<compile_context>
chip_gen: v6e
topology: v6e:2x2x1
jax: 0.10.0
libtpu: 0.0.40
codegen_flags: <defaults>
</compile_context>

<pallas_src>
import functools

import jax
import jax.numpy as jnp
from jax.experimental import pallas as pl
from jax.experimental.pallas import tpu as pltpu

EPS = 1e-5
_LANES = 128


def _round_up(v, m):
    return (v + m - 1) // m * m


def _vmem_limit_bytes():
    # Generation-dependent scoped-VMEM limit: 3/4 of physical, capped at 96MiB
    # (v5e/v6e: 96 MiB of 128 MiB; v7x: 48 MiB of 64 MiB).
    try:
        cap = int(pltpu.get_tpu_info().vmem_capacity_bytes)
    except Exception:
        cap = 128 * 1024 * 1024
    return int(min(96 * 1024 * 1024, cap * 3 // 4))


# --------------------------------------------------------------------------
# In-kernel helpers.
# --------------------------------------------------------------------------
def _fill_padded(pad_ref, x, H, W):
    """Zero only the four halo strips of the (H+2, W+2, C) scratch, then copy
    the interior."""
    Cp = x.shape[-1]
    zrow = jnp.zeros((1, W + 2, Cp), pad_ref.dtype)
    zcol = jnp.zeros((H + 2, 1, Cp), pad_ref.dtype)
    pad_ref[0:1, :, :] = zrow
    pad_ref[H + 1:H + 2, :, :] = zrow
    pad_ref[:, 0:1, :] = zcol
    pad_ref[:, W + 1:W + 2, :] = zcol
    pad_ref[1:H + 1, 1:W + 1, :] = x


def _conv3x3_kw_split(xpad, w_ref, H, W, Cp, Cop):
    """3x3 conv as 3 accumulating MXU dots (one per kw shift, K = 3*Cp each).

    Only the kw-shifted slice is materialized; the three kh taps are cheap
    leading-dim slices of it.  Weight layout is (kw, kh, cin) row-major.
    """
    acc = jnp.zeros((H * W, Cop), jnp.float32)
    for kw in range(3):
        xs = xpad[:, kw:kw + W, :]                               # (H+2, W, Cp)
        patch = jnp.concatenate([xs[kh:kh + H] for kh in range(3)], axis=-1)
        patch = patch.reshape(H * W, 3 * Cp)
        w_slab = w_ref[kw * 3 * Cp:(kw + 1) * 3 * Cp, :]
        acc = acc + jnp.dot(patch, w_slab,
                            preferred_element_type=jnp.float32)
    return acc


# --------------------------------------------------------------------------
# Stage A: conv1 (3x3) + projection BN stats, one batch element per grid step.
# --------------------------------------------------------------------------
def _conv_in_kernel(H, W, use_proj, *refs):
    if use_proj:
        x_ref, w1_ref, wp_ref, acc1_ref, stats_ref, xpad_ref = refs
    else:
        x_ref, w1_ref, acc1_ref, stats_ref, xpad_ref = refs
        wp_ref = None
    Cp = x_ref.shape[-1]
    Cop = acc1_ref.shape[-1]
    x = x_ref[0]                                                 # (H, W, Cp)

    _fill_padded(xpad_ref, x, H, W)
    xpad = xpad_ref[...]

    acc1 = _conv3x3_kw_split(xpad, w1_ref, H, W, Cp, Cop)        # f32

    # Partial BN statistics for this tile (per output channel), in f32.
    s1 = jnp.sum(acc1, axis=0, keepdims=True)
    ss1 = jnp.sum(acc1 * acc1, axis=0, keepdims=True)
    z = jnp.zeros_like(s1)
    if use_proj:
        # Projection output is NOT stored to HBM; only its BN stats are.
        accp = jnp.dot(x.reshape(H * W, Cp), wp_ref[...],
                       preferred_element_type=jnp.float32)
        sp = jnp.sum(accp, axis=0, keepdims=True)
        ssp = jnp.sum(accp * accp, axis=0, keepdims=True)
    else:
        sp, ssp = z, z
    stats_ref[0] = jnp.concatenate([s1, ss1, sp, ssp, z, z, z, z], axis=0)

    acc1_ref[0] = acc1.astype(acc1_ref.dtype)                    # bf16 store


# --------------------------------------------------------------------------
# Stage B: fused BN1+ReLU (single f32 FMA), conv2 (3x3) + partial BN2 stats.
# --------------------------------------------------------------------------
def _conv_mid_kernel(H, W, acc1_ref, scale_ref, shift_ref, w2_ref,
                     acc2_ref, stats_ref, hpad_ref):
    Cop = acc1_ref.shape[-1]

    # BN1 folded to scale/shift + ReLU in f32; bf16 only for the MXU operand.
    h1 = jnp.maximum(acc1_ref[0].astype(jnp.float32) * scale_ref[...]
                     + shift_ref[...], 0.0)
    h1 = h1.astype(jnp.bfloat16).reshape(H, W, Cop)

    _fill_padded(hpad_ref, h1, H, W)
    hpad = hpad_ref[...]

    acc2 = _conv3x3_kw_split(hpad, w2_ref, H, W, Cop, Cop)       # f32

    s2 = jnp.sum(acc2, axis=0, keepdims=True)
    ss2 = jnp.sum(acc2 * acc2, axis=0, keepdims=True)
    z = jnp.zeros_like(s2)
    stats_ref[0] = jnp.concatenate([s2, ss2, z, z, z, z, z, z], axis=0)

    acc2_ref[0] = acc2.astype(acc2_ref.dtype)                    # bf16 store


# --------------------------------------------------------------------------
# Stage C: BN2 + shortcut (recomputed projection / identity) + add + ReLU.
# --------------------------------------------------------------------------
def _finalize_proj_kernel(acc2_ref, x_ref, wp_ref, s2_ref, b2_ref,
                          sp_ref, bp_ref, out_ref):
    y2 = acc2_ref[...].astype(jnp.float32) * s2_ref[...] + b2_ref[...]
    yp = jnp.dot(x_ref[...], wp_ref[...], preferred_element_type=jnp.float32)
    out_ref[...] = jnp.maximum(y2 + yp * sp_ref[...] + bp_ref[...], 0.0)


def _finalize_id_kernel(acc2_ref, x_ref, s2_ref, b2_ref, out_ref):
    y2 = acc2_ref[...].astype(jnp.float32) * s2_ref[...] + b2_ref[...]
    out_ref[...] = jnp.maximum(y2 + x_ref[...].astype(jnp.float32), 0.0)


# --------------------------------------------------------------------------
# Parameter / layout helpers (tiny per-channel ops, fused by XLA).
# --------------------------------------------------------------------------
def _conv3x3_weight(w, cin_p, cout_p):
    # (Cout, Cin, 3, 3) -> (9*Cin_p, Cout_p), row index = (kw, kh, cin).
    cout, cin = w.shape[0], w.shape[1]
    w = jnp.transpose(w, (3, 2, 1, 0))                    # (kw, kh, Cin, Cout)
    w = jnp.pad(w, ((0, 0), (0, 0), (0, cin_p - cin), (0, cout_p - cout)))
    return w.reshape(9 * cin_p, cout_p).astype(jnp.bfloat16)


def _conv1x1_weight(w, cin_p, cout_p):
    cout, cin = w.shape[0], w.shape[1]
    w = jnp.transpose(w[:, :, 0, 0], (1, 0))              # (Cin, Cout)
    w = jnp.pad(w, ((0, cin_p - cin), (0, cout_p - cout)))
    return w.astype(jnp.bfloat16)


def _pad_vec(v, cp):
    v = v.reshape(1, -1).astype(jnp.float32)
    return jnp.pad(v, ((0, 0), (0, cp - v.shape[-1])))


def _fold_bn(s, ss, gamma, beta, count):
    mean = s / count
    var = jnp.maximum(ss / count - mean * mean, 0.0)       # biased variance
    scale = gamma * jax.lax.rsqrt(var + EPS)
    shift = beta - mean * scale
    return scale, shift


def _stage_c_rows(total):
    for cand in (2048, 1024, 512, 256, 128, 64, 32, 16, 8):
        if total % cand == 0:
            return cand
    return total


# --------------------------------------------------------------------------
# Forward wrapper (accepts / returns NCHW like the PyTorch module).
# --------------------------------------------------------------------------
def basic_block_forward(x_nchw, params, stride=1):
    assert stride == 1, "TODO(synk): stride > 1 not implemented"
    N, Cin, H, W = x_nchw.shape
    Cout = params["w1"].shape[0]
    Cin_p = _round_up(Cin, _LANES)
    Cout_p = _round_up(Cout, _LANES)
    HW = H * W
    total = N * HW
    count = float(total)
    use_proj = "wp" in params
    if not use_proj:
        assert Cin == Cout, "identity shortcut requires Cin == Cout"

    # ---- weights / affine params, padded to lane multiples ----
    w1p = _conv3x3_weight(params["w1"], Cin_p, Cout_p)
    w2p = _conv3x3_weight(params["w2"], Cout_p, Cout_p)
    g1, b1 = _pad_vec(params["g1"], Cout_p), _pad_vec(params["b1"], Cout_p)
    g2, b2 = _pad_vec(params["g2"], Cout_p), _pad_vec(params["b2"], Cout_p)

    # ---- input: NCHW -> NHWC, bf16, channel pad (one fused XLA pass) ----
    x = jnp.transpose(x_nchw, (0, 2, 3, 1)).astype(jnp.bfloat16)
    if Cin_p != Cin:
        x = jnp.pad(x, ((0, 0), (0, 0), (0, 0), (0, Cin_p - Cin)))

    vmem_limit = _vmem_limit_bytes()
    cparams_1d = pltpu.CompilerParams(
        dimension_semantics=("parallel",), vmem_limit_bytes=vmem_limit)

    # ---- stage A: conv1 + projection stats ----
    in_specs_a = [
        pl.BlockSpec((1, H, W, Cin_p), lambda n: (n, 0, 0, 0)),
        pl.BlockSpec((9 * Cin_p, Cout_p), lambda n: (0, 0)),
    ]
    args_a = [x, w1p]
    if use_proj:
        wpp = _conv1x1_weight(params["wp"], Cin_p, Cout_p)
        in_specs_a.append(pl.BlockSpec((Cin_p, Cout_p), lambda n: (0, 0)))
        args_a.append(wpp)
    flops_a = 2 * N * HW * Cout_p * (9 * Cin_p + (Cin_p if use_proj else 0))
    bytes_a = (N * HW * Cin_p * 2 + 9 * Cin_p * Cout_p * 2
               + (Cin_p * Cout_p * 2 if use_proj else 0)
               + N * HW * Cout_p * 2 + N * 8 * Cout_p * 4)
    acc1, stats_a = pl.pallas_call(
        functools.partial(_conv_in_kernel, H, W, use_proj),
        out_shape=(jax.ShapeDtypeStruct((N, HW, Cout_p), jnp.bfloat16),
                   jax.ShapeDtypeStruct((N, 8, Cout_p), jnp.float32)),
        grid=(N,),
        in_specs=in_specs_a,
        out_specs=(
            pl.BlockSpec((1, HW, Cout_p), lambda n: (n, 0, 0)),
            pl.BlockSpec((1, 8, Cout_p), lambda n: (n, 0, 0)),
        ),
        scratch_shapes=[pltpu.VMEM((H + 2, W + 2, Cin_p), jnp.bfloat16)],
        compiler_params=cparams_1d,
        cost_estimate=pl.CostEstimate(flops=flops_a, transcendentals=0,
                                      bytes_accessed=bytes_a),
    )(*args_a)

    # ---- fold BN1 / BN_proj into per-channel scale & shift ----
    tot = jnp.sum(stats_a, axis=0)                         # (8, Cout_p)
    scale1, shift1 = _fold_bn(tot[0:1], tot[1:2], g1, b1, count)
    if use_proj:
        gp, bp = _pad_vec(params["gp"], Cout_p), _pad_vec(params["bp"], Cout_p)
        scalep, shiftp = _fold_bn(tot[2:3], tot[3:4], gp, bp, count)

    # ---- stage B: BN1+ReLU fused, conv2 + partial stats ----
    flops_b = 2 * N * HW * 9 * Cout_p * Cout_p
    bytes_b = (N * HW * Cout_p * 2 + 9 * Cout_p * Cout_p * 2
               + N * HW * Cout_p * 2 + N * 8 * Cout_p * 4)
    acc2, stats_b = pl.pallas_call(
        functools.partial(_conv_mid_kernel, H, W),
        out_shape=(jax.ShapeDtypeStruct((N, HW, Cout_p), jnp.bfloat16),
                   jax.ShapeDtypeStruct((N, 8, Cout_p), jnp.float32)),
        grid=(N,),
        in_specs=[
            pl.BlockSpec((1, HW, Cout_p), lambda n: (n, 0, 0)),
            pl.BlockSpec((1, Cout_p), lambda n: (0, 0)),
            pl.BlockSpec((1, Cout_p), lambda n: (0, 0)),
            pl.BlockSpec((9 * Cout_p, Cout_p), lambda n: (0, 0)),
        ],
        out_specs=(
            pl.BlockSpec((1, HW, Cout_p), lambda n: (n, 0, 0)),
            pl.BlockSpec((1, 8, Cout_p), lambda n: (n, 0, 0)),
        ),
        scratch_shapes=[pltpu.VMEM((H + 2, W + 2, Cout_p), jnp.bfloat16)],
        compiler_params=cparams_1d,
        cost_estimate=pl.CostEstimate(flops=flops_b, transcendentals=0,
                                      bytes_accessed=bytes_b),
    )(acc1, scale1, shift1, w2p)

    totb = jnp.sum(stats_b, axis=0)
    scale2, shift2 = _fold_bn(totb[0:1], totb[1:2], g2, b2, count)

    # ---- stage C: BN2 + shortcut + add + ReLU over flattened N*HW rows ----
    RT = _stage_c_rows(total)
    acc2_flat = acc2.reshape(total, Cout_p)
    x_flat = x.reshape(total, Cin_p)
    cparams_c = pltpu.CompilerParams(
        dimension_semantics=("parallel",), vmem_limit_bytes=vmem_limit)
    bytes_c = total * (Cout_p * 2 + Cin_p * 2 + Cout_p * 4)
    if use_proj:
        out = pl.pallas_call(
            _finalize_proj_kernel,
            out_shape=jax.ShapeDtypeStruct((total, Cout_p), jnp.float32),
            grid=(total // RT,),
            in_specs=[
                pl.BlockSpec((RT, Cout_p), lambda r: (r, 0)),
                pl.BlockSpec((RT, Cin_p), lambda r: (r, 0)),
                pl.BlockSpec((Cin_p, Cout_p), lambda r: (0, 0)),
                pl.BlockSpec((1, Cout_p), lambda r: (0, 0)),
                pl.BlockSpec((1, Cout_p), lambda r: (0, 0)),
                pl.BlockSpec((1, Cout_p), lambda r: (0, 0)),
                pl.BlockSpec((1, Cout_p), lambda r: (0, 0)),
            ],
            out_specs=pl.BlockSpec((RT, Cout_p), lambda r: (r, 0)),
            compiler_params=cparams_c,
            cost_estimate=pl.CostEstimate(
                flops=2 * total * Cin_p * Cout_p, transcendentals=0,
                bytes_accessed=bytes_c),
        )(acc2_flat, x_flat, wpp, scale2, shift2, scalep, shiftp)
    else:
        out = pl.pallas_call(
            _finalize_id_kernel,
            out_shape=jax.ShapeDtypeStruct((total, Cout_p), jnp.float32),
            grid=(total // RT,),
            in_specs=[
                pl.BlockSpec((RT, Cout_p), lambda r: (r, 0)),
                pl.BlockSpec((RT, Cin_p), lambda r: (r, 0)),
                pl.BlockSpec((1, Cout_p), lambda r: (0, 0)),
                pl.BlockSpec((1, Cout_p), lambda r: (0, 0)),
            ],
            out_specs=pl.BlockSpec((RT, Cout_p), lambda r: (r, 0)),
            compiler_params=cparams_c,
            cost_estimate=pl.CostEstimate(
                flops=3 * total * Cout_p, transcendentals=0,
                bytes_accessed=bytes_c),
        )(acc2_flat, x_flat, scale2, shift2)

    # Drop padded channels, back to NCHW (fused slice + transpose).
    out = out.reshape(N, H, W, Cout_p)[..., :Cout]
    return jnp.transpose(out, (0, 3, 1, 2)).astype(jnp.float32)


def make_params(key, in_channels, channels, stride=1):
    # Deterministic synthetic init. Conv weights ~ N(0, 0.1); BN affine params
    # follow PyTorch defaults (gamma=1, beta=0). Layout matches PyTorch.
    k1, k2, k3 = jax.random.split(key, 3)
    p = dict(
        w1=jax.random.normal(k1, (channels, in_channels, 3, 3), jnp.float32) * 0.1,
        g1=jnp.ones((channels,), jnp.float32),
        b1=jnp.zeros((channels,), jnp.float32),
        w2=jax.random.normal(k2, (channels, channels, 3, 3), jnp.float32) * 0.1,
        g2=jnp.ones((channels,), jnp.float32),
        b2=jnp.zeros((channels,), jnp.float32),
    )
    if stride != 1 or in_channels != channels:
        p.update(
            wp=jax.random.normal(k3, (channels, in_channels, 1, 1),
                                 jnp.float32) * 0.1,
            gp=jnp.ones((channels,), jnp.float32),
            bp=jnp.zeros((channels,), jnp.float32),
        )
    return p


def _reference(x, params):
    # Pure-JAX f32 reference of the training-mode PyTorch BasicBlock forward.
    hi = jax.lax.Precision.HIGHEST

    def conv(x, w, pad):
        return jax.lax.conv_general_dilated(
            x, w, (1, 1), ((pad, pad), (pad, pad)),
            dimension_numbers=("NCHW", "OIHW", "NCHW"), precision=hi)

    def bn(x, g, b):
        mean = jnp.mean(x, axis=(0, 2, 3), keepdims=True)
        var = jnp.mean((x - mean) ** 2, axis=(0, 2, 3), keepdims=True)
        xn = (x - mean) * jax.lax.rsqrt(var + EPS)
        return xn * g.reshape(1, -1, 1, 1) + b.reshape(1, -1, 1, 1)

    h = jax.nn.relu(bn(conv(x, params["w1"], 1), params["g1"], params["b1"]))
    h = bn(conv(h, params["w2"], 1), params["g2"], params["b2"])
    if "wp" in params:
        p = bn(conv(x, params["wp"], 0), params["gp"], params["bp"])
    else:
        p = x
    return jax.nn.relu(h + p)


if __name__ == "__main__":
    key = jax.random.PRNGKey(0)
    fwd = jax.jit(basic_block_forward, static_argnames=("stride",))

    # Case 1: projection shortcut (Cin != Cout).
    N, Cin, Cout, H, W = 2, 4, 8, 16, 16
    kp, kx, kp2, kx2 = jax.random.split(key, 4)
    params = make_params(kp, Cin, Cout)
    x = jax.random.normal(kx, (N, Cin, H, W), jnp.float32)
    out = fwd(x, params, stride=1)
    jax.block_until_ready(out)
    assert out.shape == (N, Cout, H, W)
    assert bool(jnp.all(jnp.isfinite(out)))
    err = float(jnp.max(jnp.abs(out - _reference(x, params))))
    assert err < 0.3, f"projection-case max abs error too large: {err}"

    # Case 2: identity shortcut (Cin == Cout).
    params_id = make_params(kp2, Cout, Cout)
    x_id = jax.random.normal(kx2, (N, Cout, H, W), jnp.float32)
    out_id = fwd(x_id, params_id, stride=1)
    jax.block_until_ready(out_id)
    assert out_id.shape == (N, Cout, H, W)
    assert bool(jnp.all(jnp.isfinite(out_id)))
    err_id = float(jnp.max(jnp.abs(out_id - _reference(x_id, params_id))))
    assert err_id < 0.3, f"identity-case max abs error too large: {err_id}"

    print("KERNEL_OK")
</pallas_src>

<mosaic_0001>
module attributes {stable_mosaic.version = 11 : i64} {
  func.func @_conv_in_kernel(%arg0: i32, %arg1: memref<1x16x16x128xbf16, #tpu.memory_space<vmem>>, %arg2: memref<1152x128xbf16, #tpu.memory_space<vmem>>, %arg3: memref<128x128xbf16, #tpu.memory_space<vmem>>, %arg4: memref<1x256x128xbf16, #tpu.memory_space<vmem>>, %arg5: memref<1x8x128xf32, #tpu.memory_space<vmem>>, %arg6: memref<18x18x128xbf16, #tpu.memory_space<vmem>>) attributes {dimension_semantics = [#tpu.dimension_semantics<parallel>], iteration_bounds = array<i64: 2>, scalar_prefetch = 0 : i64, scratch_operands = 1 : i64, tpu.core_type = #tpu.core_type<tc>, window_params = [{transform_indices = @transform_0, window_bounds = array<i64: 1, 16, 16, 128>}, {pipeline_mode = #tpu.pipeline_mode<synchronous>, transform_indices = @transform_1, window_bounds = array<i64: 1152, 128>}, {pipeline_mode = #tpu.pipeline_mode<synchronous>, transform_indices = @transform_2, window_bounds = array<i64: 128, 128>}, {transform_indices = @transform_3, window_bounds = array<i64: 1, 256, 128>}, {transform_indices = @transform_4, window_bounds = array<i64: 1, 8, 128>}]} {
    %c0 = arith.constant 0 : index
    %c0_0 = arith.constant 0 : index
    %c0_1 = arith.constant 0 : index
    %c0_2 = arith.constant 0 : index
    %0 = vector.load %arg1[%c0, %c0_0, %c0_1, %c0_2] : memref<1x16x16x128xbf16, #tpu.memory_space<vmem>>, vector<1x16x16x128xbf16>
    %1 = vector.shape_cast %0 : vector<1x16x16x128xbf16> to vector<16x16x128xbf16>
    %cst = arith.constant 0.000000e+00 : bf16
    %2 = vector.broadcast %cst : bf16 to vector<1x18x128xbf16>
    %cst_3 = arith.constant 0.000000e+00 : bf16
    %3 = vector.broadcast %cst_3 : bf16 to vector<18x1x128xbf16>
    %c0_4 = arith.constant 0 : index
    %c0_5 = arith.constant 0 : index
    %c0_6 = arith.constant 0 : index
    %4 = vector.load %arg6[%c0_4, %c0_5, %c0_6] : memref<18x18x128xbf16, #tpu.memory_space<vmem>>, vector<1x18x128xbf16>
    tpu.vector_store %arg6[%c0_4, %c0_5, %c0_6], %2 {strides = array<i32>} : memref<18x18x128xbf16, #tpu.memory_space<vmem>>, vector<1x18x128xbf16>,
    %c17 = arith.constant 17 : index
    %c0_7 = arith.constant 0 : index
    %c0_8 = arith.constant 0 : index
    %5 = vector.load %arg6[%c17, %c0_7, %c0_8] : memref<18x18x128xbf16, #tpu.memory_space<vmem>>, vector<1x18x128xbf16>
    tpu.vector_store %arg6[%c17, %c0_7, %c0_8], %2 {strides = array<i32>} : memref<18x18x128xbf16, #tpu.memory_space<vmem>>, vector<1x18x128xbf16>,
    %c0_9 = arith.constant 0 : index
    %c0_10 = arith.constant 0 : index
    %c0_11 = arith.constant 0 : index
    %6 = vector.load %arg6[%c0_9, %c0_10, %c0_11] : memref<18x18x128xbf16, #tpu.memory_space<vmem>>, vector<18x1x128xbf16>
    tpu.vector_store %arg6[%c0_9, %c0_10, %c0_11], %3 {strides = array<i32>} : memref<18x18x128xbf16, #tpu.memory_space<vmem>>, vector<18x1x128xbf16>,
    %c0_12 = arith.constant 0 : index
    %c17_13 = arith.constant 17 : index
    %c0_14 = arith.constant 0 : index
    %7 = vector.load %arg6[%c0_12, %c17_13, %c0_14] : memref<18x18x128xbf16, #tpu.memory_space<vmem>>, vector<18x1x128xbf16>
    tpu.vector_store %arg6[%c0_12, %c17_13, %c0_14], %3 {strides = array<i32>} : memref<18x18x128xbf16, #tpu.memory_space<vmem>>, vector<18x1x128xbf16>,
    %c1 = arith.constant 1 : index
    %c1_15 = arith.constant 1 : index
    %c0_16 = arith.constant 0 : index
    %8 = vector.load %arg6[%c1, %c1_15, %c0_16] : memref<18x18x128xbf16, #tpu.memory_space<vmem>>, vector<16x16x128xbf16>
    tpu.vector_store %arg6[%c1, %c1_15, %c0_16], %1 {strides = array<i32>} : memref<18x18x128xbf16, #tpu.memory_space<vmem>>, vector<16x16x128xbf16>,
    %c0_17 = arith.constant 0 : index
    %c0_18 = arith.constant 0 : index
    %c0_19 = arith.constant 0 : index
    %9 = vector.load %arg6[%c0_17, %c0_18, %c0_19] : memref<18x18x128xbf16, #tpu.memory_space<vmem>>, vector<18x18x128xbf16>
    %cst_20 = arith.constant 0.000000e+00 : f32
    %10 = vector.broadcast %cst_20 : f32 to vector<256x128xf32>
    %11 = vector.extract_strided_slice %9 {offsets = [0, 0, 0], sizes = [18, 16, 128], strides = [1, 1, 1]} : vector<18x18x128xbf16> to vector<18x16x128xbf16>
    %12 = vector.extract_strided_slice %11 {offsets = [0, 0, 0], sizes = [16, 16, 128], strides = [1, 1, 1]} : vector<18x16x128xbf16> to vector<16x16x128xbf16>
    %13 = vector.extract_strided_slice %11 {offsets = [1, 0, 0], sizes = [16, 16, 128], strides = [1, 1, 1]} : vector<18x16x128xbf16> to vector<16x16x128xbf16>
    %14 = vector.extract_strided_slice %11 {offsets = [2, 0, 0], sizes = [16, 16, 128], strides = [1, 1, 1]} : vector<18x16x128xbf16> to vector<16x16x128xbf16>
    %15 = tpu.concatenate %12, %13, %14 in 2 : vector<16x16x128xbf16>, vector<16x16x128xbf16>, vector<16x16x128xbf16> -> vector<16x16x384xbf16>
    %16 = vector.shape_cast %15 : vector<16x16x384xbf16> to vector<256x384xbf16>
    %c0_21 = arith.constant 0 : index
    %c0_22 = arith.constant 0 : index
    %17 = vector.load %arg2[%c0_21, %c0_22] : memref<1152x128xbf16, #tpu.memory_space<vmem>>, vector<384x128xbf16>
    %cst_23 = arith.constant dense<0.000000e+00> : vector<256x128xf32>
    %18 = tpu.matmul %16, %17, %cst_23 {dimension_numbers = #tpu.dot_dimension_numbers<[1], [0], [0], [1], [0, 0, 1, 1], [], []>} : vector<256x384xbf16>, vector<384x128xbf16>, vector<256x128xf32> -> vector<256x128xf32>
    %19 = arith.addf %10, %18 : vector<256x128xf32>
    %20 = vector.extract_strided_slice %9 {offsets = [0, 1, 0], sizes = [18, 16, 128], strides = [1, 1, 1]} : vector<18x18x128xbf16> to vector<18x16x128xbf16>
    %21 = vector.extract_strided_slice %20 {offsets = [0, 0, 0], sizes = [16, 16, 128], strides = [1, 1, 1]} : vector<18x16x128xbf16> to vector<16x16x128xbf16>
    %22 = vector.extract_strided_slice %20 {offsets = [1, 0, 0], sizes = [16, 16, 128], strides = [1, 1, 1]} : vector<18x16x128xbf16> to vector<16x16x128xbf16>
    %23 = vector.extract_strided_slice %20 {offsets = [2, 0, 0], sizes = [16, 16, 128], strides = [1, 1, 1]} : vector<18x16x128xbf16> to vector<16x16x128xbf16>
    %24 = tpu.concatenate %21, %22, %23 in 2 : vector<16x16x128xbf16>, vector<16x16x128xbf16>, vector<16x16x128xbf16> -> vector<16x16x384xbf16>
    %25 = vector.shape_cast %24 : vector<16x16x384xbf16> to vector<256x384xbf16>
    %c384 = arith.constant 384 : index
    %c0_24 = arith.constant 0 : index
    %26 = vector.load %arg2[%c384, %c0_24] : memref<1152x128xbf16, #tpu.memory_space<vmem>>, vector<384x128xbf16>
    %cst_25 = arith.constant dense<0.000000e+00> : vector<256x128xf32>
    %27 = tpu.matmul %25, %26, %cst_25 {dimension_numbers = #tpu.dot_dimension_numbers<[1], [0], [0], [1], [0, 0, 1, 1], [], []>} : vector<256x384xbf16>, vector<384x128xbf16>, vector<256x128xf32> -> vector<256x128xf32>
    %28 = arith.addf %19, %27 : vector<256x128xf32>
    %29 = vector.extract_strided_slice %9 {offsets = [0, 2, 0], sizes = [18, 16, 128], strides = [1, 1, 1]} : vector<18x18x128xbf16> to vector<18x16x128xbf16>
    %30 = vector.extract_strided_slice %29 {offsets = [0, 0, 0], sizes = [16, 16, 128], strides = [1, 1, 1]} : vector<18x16x128xbf16> to vector<16x16x128xbf16>
    %31 = vector.extract_strided_slice %29 {offsets = [1, 0, 0], sizes = [16, 16, 128], strides = [1, 1, 1]} : vector<18x16x128xbf16> to vector<16x16x128xbf16>
    %32 = vector.extract_strided_slice %29 {offsets = [2, 0, 0], sizes = [16, 16, 128], strides = [1, 1, 1]} : vector<18x16x128xbf16> to vector<16x16x128xbf16>
    %33 = tpu.concatenate %30, %31, %32 in 2 : vector<16x16x128xbf16>, vector<16x16x128xbf16>, vector<16x16x128xbf16> -> vector<16x16x384xbf16>
    %34 = vector.shape_cast %33 : vector<16x16x384xbf16> to vector<256x384xbf16>
    %c768 = arith.constant 768 : index
    %c0_26 = arith.constant 0 : index
    %35 = vector.load %arg2[%c768, %c0_26] : memref<1152x128xbf16, #tpu.memory_space<vmem>>, vector<384x128xbf16>
    %cst_27 = arith.constant dense<0.000000e+00> : vector<256x128xf32>
    %36 = tpu.matmul %34, %35, %cst_27 {dimension_numbers = #tpu.dot_dimension_numbers<[1], [0], [0], [1], [0, 0, 1, 1], [], []>} : vector<256x384xbf16>, vector<384x128xbf16>, vector<256x128xf32> -> vector<256x128xf32>
    %37 = arith.addf %28, %36 : vector<256x128xf32>
    %cst_28 = arith.constant dense<0.000000e+00> : vector<128xf32>
    %38 = vector.multi_reduction <add>, %37, %cst_28 [0] : vector<256x128xf32> to vector<128xf32>
    %39 = vector.shape_cast %38 : vector<128xf32> to vector<1x128xf32>
    %40 = arith.mulf %37, %37 : vector<256x128xf32>
    %cst_29 = arith.constant dense<0.000000e+00> : vector<128xf32>
    %41 = vector.multi_reduction <add>, %40, %cst_29 [0] : vector<256x128xf32> to vector<128xf32>
    %42 = vector.shape_cast %41 : vector<128xf32> to vector<1x128xf32>
    %cst_30 = arith.constant 0.000000e+00 : f32
    %43 = vector.broadcast %cst_30 : f32 to vector<1x128xf32>
    %44 = vector.shape_cast %1 : vector<16x16x128xbf16> to vector<256x128xbf16>
    %c0_31 = arith.constant 0 : index
    %c0_32 = arith.constant 0 : index
    %45 = vector.load %arg3[%c0_31, %c0_32] : memref<128x128xbf16, #tpu.memory_space<vmem>>, vector<128x128xbf16>
    %cst_33 = arith.constant dense<0.000000e+00> : vector<256x128xf32>
    %46 = tpu.matmul %44, %45, %cst_33 {dimension_numbers = #tpu.dot_dimension_numbers<[1], [0], [0], [1], [0, 0, 1, 1], [], []>} : vector<256x128xbf16>, vector<128x128xbf16>, vector<256x128xf32> -> vector<256x128xf32>
    %cst_34 = arith.constant dense<0.000000e+00> : vector<128xf32>
    %47 = vector.multi_reduction <add>, %46, %cst_34 [0] : vector<256x128xf32> to vector<128xf32>
    %48 = vector.shape_cast %47 : vector<128xf32> to vector<1x128xf32>
    %49 = arith.mulf %46, %46 : vector<256x128xf32>
    %cst_35 = arith.constant dense<0.000000e+00> : vector<128xf32>
    %50 = vector.multi_reduction <add>, %49, %cst_35 [0] : vector<256x128xf32> to vector<128xf32>
    %51 = vector.shape_cast %50 : vector<128xf32> to vector<1x128xf32>
    %52 = tpu.concatenate %39, %42, %48, %51, %43, %43, %43, %43 in 0 : vector<1x128xf32>, vector<1x128xf32>, vector<1x128xf32>, vector<1x128xf32>, vector<1x128xf32>, vector<1x128xf32>, vector<1x128xf32>, vector<1x128xf32> -> vector<8x128xf32>
    %c0_36 = arith.constant 0 : index
    %c0_37 = arith.constant 0 : index
    %c0_38 = arith.constant 0 : index
    %53 = vector.load %arg5[%c0_36, %c0_37, %c0_38] : memref<1x8x128xf32, #tpu.memory_space<vmem>>, vector<1x8x128xf32>
    %54 = vector.shape_cast %53 : vector<1x8x128xf32> to vector<8x128xf32>
    %55 = vector.shape_cast %52 : vector<8x128xf32> to vector<1x8x128xf32>
    tpu.vector_store %arg5[%c0_36, %c0_37, %c0_38], %55 {strides = array<i32>} : memref<1x8x128xf32, #tpu.memory_space<vmem>>, vector<1x8x128xf32>,
    %56 = arith.truncf %37 : vector<256x128xf32> to vector<256x128xbf16>
    %c0_39 = arith.constant 0 : index
    %c0_40 = arith.constant 0 : index
    %c0_41 = arith.constant 0 : index
    %57 = vector.load %arg4[%c0_39, %c0_40, %c0_41] : memref<1x256x128xbf16, #tpu.memory_space<vmem>>, vector<1x256x128xbf16>
    %58 = vector.shape_cast %57 : vector<1x256x128xbf16> to vector<256x128xbf16>
    %59 = vector.shape_cast %56 : vector<256x128xbf16> to vector<1x256x128xbf16>
    tpu.vector_store %arg4[%c0_39, %c0_40, %c0_41], %59 {strides = array<i32>} : memref<1x256x128xbf16, #tpu.memory_space<vmem>>, vector<1x256x128xbf16>,
    return
  }
  func.func @transform_0(%arg0: i32) -> (i32, i32, i32, i32) {
    %c0_i32 = arith.constant 0 : i32
    %c0_i32_0 = arith.constant 0 : i32
    %c0_i32_1 = arith.constant 0 : i32
    %c0_i32_2 = arith.constant 0 : i32
    return %arg0, %c0_i32, %c0_i32_0, %c0_i32_1 : i32, i32, i32, i32
  }
  func.func @transform_1(%arg0: i32) -> (i32, i32) {
    %c0_i32 = arith.constant 0 : i32
    %c0_i32_0 = arith.constant 0 : i32
    %c0_i32_1 = arith.constant 0 : i32
    return %c0_i32, %c0_i32_0 : i32, i32
  }
  func.func @transform_2(%arg0: i32) -> (i32, i32) {
    %c0_i32 = arith.constant 0 : i32
    %c0_i32_0 = arith.constant 0 : i32
    %c0_i32_1 = arith.constant 0 : i32
    return %c0_i32, %c0_i32_0 : i32, i32
  }
  func.func @transform_3(%arg0: i32) -> (i32, i32, i32) {
    %c0_i32 = arith.constant 0 : i32
    %c0_i32_0 = arith.constant 0 : i32
    %c0_i32_1 = arith.constant 0 : i32
    return %arg0, %c0_i32, %c0_i32_0 : i32, i32, i32
  }
  func.func @transform_4(%arg0: i32) -> (i32, i32, i32) {
    %c0_i32 = arith.constant 0 : i32
    %c0_i32_0 = arith.constant 0 : i32
    %c0_i32_1 = arith.constant 0 : i32
    return %arg0, %c0_i32, %c0_i32_0 : i32, i32, i32
  }
}

module attributes {stable_mosaic.version = 11 : i64} {
  func.func @_finalize_proj_kernel(%arg0: i32, %arg1: memref<512x128xbf16, #tpu.memory_space<vmem>>, %arg2: memref<512x128xbf16, #tpu.memory_space<vmem>>, %arg3: memref<128x128xbf16, #tpu.memory_space<vmem>>, %arg4: memref<1x128xf32, #tpu.memory_space<vmem>>, %arg5: memref<1x128xf32, #tpu.memory_space<vmem>>, %arg6: memref<1x128xf32, #tpu.memory_space<vmem>>, %arg7: memref<1x128xf32, #tpu.memory_space<vmem>>, %arg8: memref<512x128xf32, #tpu.memory_space<vmem>>) attributes {dimension_semantics = [#tpu.dimension_semantics<parallel>], iteration_bounds = array<i64: 1>, scalar_prefetch = 0 : i64, scratch_operands = 0 : i64, tpu.core_type = #tpu.core_type<tc>, window_params = [{transform_indices = @transform_0, window_bounds = array<i64: 512, 128>}, {transform_indices = @transform_1, window_bounds = array<i64: 512, 128>}, {pipeline_mode = #tpu.pipeline_mode<synchronous>, transform_indices = @transform_2, window_bounds = array<i64: 128, 128>}, {pipeline_mode = #tpu.pipeline_mode<synchronous>, transform_indices = @transform_3, window_bounds = array<i64: 1, 128>}, {pipeline_mode = #tpu.pipeline_mode<synchronous>, transform_indices = @transform_4, window_bounds = array<i64: 1, 128>}, {pipeline_mode = #tpu.pipeline_mode<synchronous>, transform_indices = @transform_5, window_bounds = array<i64: 1, 128>}, {pipeline_mode = #tpu.pipeline_mode<synchronous>, transform_indices = @transform_6, window_bounds = array<i64: 1, 128>}, {transform_indices = @transform_7, window_bounds = array<i64: 512, 128>}]} {
    %c0 = arith.constant 0 : index
    %c0_0 = arith.constant 0 : index
    %0 = vector.load %arg1[%c0, %c0_0] : memref<512x128xbf16, #tpu.memory_space<vmem>>, vector<512x128xbf16>
    %1 = arith.extf %0 : vector<512x128xbf16> to vector<512x128xf32>
    %c0_1 = arith.constant 0 : index
    %c0_2 = arith.constant 0 : index
    %2 = vector.load %arg4[%c0_1, %c0_2] : memref<1x128xf32, #tpu.memory_space<vmem>>, vector<1x128xf32>
    %3 = vector.broadcast %2 : vector<1x128xf32> to vector<512x128xf32>
    %4 = arith.mulf %1, %3 : vector<512x128xf32>
    %c0_3 = arith.constant 0 : index
    %c0_4 = arith.constant 0 : index
    %5 = vector.load %arg5[%c0_3, %c0_4] : memref<1x128xf32, #tpu.memory_space<vmem>>, vector<1x128xf32>
    %6 = vector.broadcast %5 : vector<1x128xf32> to vector<512x128xf32>
    %7 = arith.addf %4, %6 : vector<512x128xf32>
    %c0_5 = arith.constant 0 : index
    %c0_6 = arith.constant 0 : index
    %8 = vector.load %arg2[%c0_5, %c0_6] : memref<512x128xbf16, #tpu.memory_space<vmem>>, vector<512x128xbf16>
    %c0_7 = arith.constant 0 : index
    %c0_8 = arith.constant 0 : index
    %9 = vector.load %arg3[%c0_7, %c0_8] : memref<128x128xbf16, #tpu.memory_space<vmem>>, vector<128x128xbf16>
    %cst = arith.constant dense<0.000000e+00> : vector<512x128xf32>
    %10 = tpu.matmul %8, %9, %cst {dimension_numbers = #tpu.dot_dimension_numbers<[1], [0], [0], [1], [0, 0, 1, 1], [], []>} : vector<512x128xbf16>, vector<128x128xbf16>, vector<512x128xf32> -> vector<512x128xf32>
    %c0_9 = arith.constant 0 : index
    %c0_10 = arith.constant 0 : index
    %11 = vector.load %arg6[%c0_9, %c0_10] : memref<1x128xf32, #tpu.memory_space<vmem>>, vector<1x128xf32>
    %12 = vector.broadcast %11 : vector<1x128xf32> to vector<512x128xf32>
    %13 = arith.mulf %10, %12 : vector<512x128xf32>
    %14 = arith.addf %7, %13 : vector<512x128xf32>
    %c0_11 = arith.constant 0 : index
    %c0_12 = arith.constant 0 : index
    %15 = vector.load %arg7[%c0_11, %c0_12] : memref<1x128xf32, #tpu.memory_space<vmem>>, vector<1x128xf32>
    %16 = vector.broadcast %15 : vector<1x128xf32> to vector<512x128xf32>
    %17 = arith.addf %14, %16 : vector<512x128xf32>
    %cst_13 = arith.constant 0.000000e+00 : f32
    %18 = vector.broadcast %cst_13 : f32 to vector<512x128xf32>
    %19 = arith.maximumf %17, %18 : vector<512x128xf32>
    %c0_14 = arith.constant 0 : index
    %c0_15 = arith.constant 0 : index
    %20 = vector.load %arg8[%c0_14, %c0_15] : memref<512x128xf32, #tpu.memory_space<vmem>>, vector<512x128xf32>
    tpu.vector_store %arg8[%c0_14, %c0_15], %19 {strides = array<i32>} : memref<512x128xf32, #tpu.memory_space<vmem>>, vector<512x128xf32>,
    return
  }
  func.func @transform_0(%arg0: i32) -> (i32, i32) {
    %c0_i32 = arith.constant 0 : i32
    %c0_i32_0 = arith.constant 0 : i32
    return %arg0, %c0_i32 : i32, i32
  }
  func.func @transform_1(%arg0: i32) -> (i32, i32) {
    %c0_i32 = arith.constant 0 : i32
    %c0_i32_0 = arith.constant 0 : i32
    return %arg0, %c0_i32 : i32, i32
  }
  func.func @transform_2(%arg0: i32) -> (i32, i32) {
    %c0_i32 = arith.constant 0 : i32
    %c0_i32_0 = arith.constant 0 : i32
    %c0_i32_1 = arith.constant 0 : i32
    return %c0_i32, %c0_i32_0 : i32, i32
  }
  func.func @transform_3(%arg0: i32) -> (i32, i32) {
    %c0_i32 = arith.constant 0 : i32
    %c0_i32_0 = arith.constant 0 : i32
    %c0_i32_1 = arith.constant 0 : i32
    return %c0_i32, %c0_i32_0 : i32, i32
  }
  func.func @transform_4(%arg0: i32) -> (i32, i32) {
    %c0_i32 = arith.constant 0 : i32
    %c0_i32_0 = arith.constant 0 : i32
    %c0_i32_1 = arith.constant 0 : i32
    return %c0_i32, %c0_i32_0 : i32, i32
  }
  func.func @transform_5(%arg0: i32) -> (i32, i32) {
    %c0_i32 = arith.constant 0 : i32
    %c0_i32_0 = arith.constant 0 : i32
    %c0_i32_1 = arith.constant 0 : i32
    return %c0_i32, %c0_i32_0 : i32, i32
  }
  func.func @transform_6(%arg0: i32) -> (i32, i32) {
    %c0_i32 = arith.constant 0 : i32
    %c0_i32_0 = arith.constant 0 : i32
    %c0_i32_1 = arith.constant 0 : i32
    return %c0_i32, %c0_i32_0 : i32, i32
  }
  func.func @transform_7(%arg0: i32) -> (i32, i32) {
    %c0_i32 = arith.constant 0 : i32
    %c0_i32_0 = arith.constant 0 : i32
    return %arg0, %c0_i32 : i32, i32
  }
}

module attributes {stable_mosaic.version = 11 : i64} {
  func.func @_conv_mid_kernel(%arg0: i32, %arg1: memref<1x256x128xbf16, #tpu.memory_space<vmem>>, %arg2: memref<1x128xf32, #tpu.memory_space<vmem>>, %arg3: memref<1x128xf32, #tpu.memory_space<vmem>>, %arg4: memref<1152x128xbf16, #tpu.memory_space<vmem>>, %arg5: memref<1x256x128xbf16, #tpu.memory_space<vmem>>, %arg6: memref<1x8x128xf32, #tpu.memory_space<vmem>>, %arg7: memref<18x18x128xbf16, #tpu.memory_space<vmem>>) attributes {dimension_semantics = [#tpu.dimension_semantics<parallel>], iteration_bounds = array<i64: 2>, scalar_prefetch = 0 : i64, scratch_operands = 1 : i64, tpu.core_type = #tpu.core_type<tc>, window_params = [{transform_indices = @transform_0, window_bounds = array<i64: 1, 256, 128>}, {pipeline_mode = #tpu.pipeline_mode<synchronous>, transform_indices = @transform_1, window_bounds = array<i64: 1, 128>}, {pipeline_mode = #tpu.pipeline_mode<synchronous>, transform_indices = @transform_2, window_bounds = array<i64: 1, 128>}, {pipeline_mode = #tpu.pipeline_mode<synchronous>, transform_indices = @transform_3, window_bounds = array<i64: 1152, 128>}, {transform_indices = @transform_4, window_bounds = array<i64: 1, 256, 128>}, {transform_indices = @transform_5, window_bounds = array<i64: 1, 8, 128>}]} {
    %c0 = arith.constant 0 : index
    %c0_0 = arith.constant 0 : index
    %c0_1 = arith.constant 0 : index
    %0 = vector.load %arg1[%c0, %c0_0, %c0_1] : memref<1x256x128xbf16, #tpu.memory_space<vmem>>, vector<1x256x128xbf16>
    %1 = vector.shape_cast %0 : vector<1x256x128xbf16> to vector<256x128xbf16>
    %2 = arith.extf %1 : vector<256x128xbf16> to vector<256x128xf32>
    %c0_2 = arith.constant 0 : index
    %c0_3 = arith.constant 0 : index
    %3 = vector.load %arg2[%c0_2, %c0_3] : memref<1x128xf32, #tpu.memory_space<vmem>>, vector<1x128xf32>
    %4 = vector.broadcast %3 : vector<1x128xf32> to vector<256x128xf32>
    %5 = arith.mulf %2, %4 : vector<256x128xf32>
    %c0_4 = arith.constant 0 : index
    %c0_5 = arith.constant 0 : index
    %6 = vector.load %arg3[%c0_4, %c0_5] : memref<1x128xf32, #tpu.memory_space<vmem>>, vector<1x128xf32>
    %7 = vector.broadcast %6 : vector<1x128xf32> to vector<256x128xf32>
    %8 = arith.addf %5, %7 : vector<256x128xf32>
    %cst = arith.constant 0.000000e+00 : f32
    %9 = vector.broadcast %cst : f32 to vector<256x128xf32>
    %10 = arith.maximumf %8, %9 : vector<256x128xf32>
    %11 = arith.truncf %10 : vector<256x128xf32> to vector<256x128xbf16>
    %12 = vector.shape_cast %11 : vector<256x128xbf16> to vector<16x16x128xbf16>
    %cst_6 = arith.constant 0.000000e+00 : bf16
    %13 = vector.broadcast %cst_6 : bf16 to vector<1x18x128xbf16>
    %cst_7 = arith.constant 0.000000e+00 : bf16
    %14 = vector.broadcast %cst_7 : bf16 to vector<18x1x128xbf16>
    %c0_8 = arith.constant 0 : index
    %c0_9 = arith.constant 0 : index
    %c0_10 = arith.constant 0 : index
    %15 = vector.load %arg7[%c0_8, %c0_9, %c0_10] : memref<18x18x128xbf16, #tpu.memory_space<vmem>>, vector<1x18x128xbf16>
    tpu.vector_store %arg7[%c0_8, %c0_9, %c0_10], %13 {strides = array<i32>} : memref<18x18x128xbf16, #tpu.memory_space<vmem>>, vector<1x18x128xbf16>,
    %c17 = arith.constant 17 : index
    %c0_11 = arith.constant 0 : index
    %c0_12 = arith.constant 0 : index
    %16 = vector.load %arg7[%c17, %c0_11, %c0_12] : memref<18x18x128xbf16, #tpu.memory_space<vmem>>, vector<1x18x128xbf16>
    tpu.vector_store %arg7[%c17, %c0_11, %c0_12], %13 {strides = array<i32>} : memref<18x18x128xbf16, #tpu.memory_space<vmem>>, vector<1x18x128xbf16>,
    %c0_13 = arith.constant 0 : index
    %c0_14 = arith.constant 0 : index
    %c0_15 = arith.constant 0 : index
    %17 = vector.load %arg7[%c0_13, %c0_14, %c0_15] : memref<18x18x128xbf16, #tpu.memory_space<vmem>>, vector<18x1x128xbf16>
    tpu.vector_store %arg7[%c0_13, %c0_14, %c0_15], %14 {strides = array<i32>} : memref<18x18x128xbf16, #tpu.memory_space<vmem>>, vector<18x1x128xbf16>,
    %c0_16 = arith.constant 0 : index
    %c17_17 = arith.constant 17 : index
    %c0_18 = arith.constant 0 : index
    %18 = vector.load %arg7[%c0_16, %c17_17, %c0_18] : memref<18x18x128xbf16, #tpu.memory_space<vmem>>, vector<18x1x128xbf16>
    tpu.vector_store %arg7[%c0_16, %c17_17, %c0_18], %14 {strides = array<i32>} : memref<18x18x128xbf16, #tpu.memory_space<vmem>>, vector<18x1x128xbf16>,
    %c1 = arith.constant 1 : index
    %c1_19 = arith.constant 1 : index
    %c0_20 = arith.constant 0 : index
    %19 = vector.load %arg7[%c1, %c1_19, %c0_20] : memref<18x18x128xbf16, #tpu.memory_space<vmem>>, vector<16x16x128xbf16>
    tpu.vector_store %arg7[%c1, %c1_19, %c0_20], %12 {strides = array<i32>} : memref<18x18x128xbf16, #tpu.memory_space<vmem>>, vector<16x16x128xbf16>,
    %c0_21 = arith.constant 0 : index
    %c0_22 = arith.constant 0 : index
    %c0_23 = arith.constant 0 : index
    %20 = vector.load %arg7[%c0_21, %c0_22, %c0_23] : memref<18x18x128xbf16, #tpu.memory_space<vmem>>, vector<18x18x128xbf16>
    %cst_24 = arith.constant 0.000000e+00 : f32
    %21 = vector.broadcast %cst_24 : f32 to vector<256x128xf32>
    %22 = vector.extract_strided_slice %20 {offsets = [0, 0, 0], sizes = [18, 16, 128], strides = [1, 1, 1]} : vector<18x18x128xbf16> to vector<18x16x128xbf16>
    %23 = vector.extract_strided_slice %22 {offsets = [0, 0, 0], sizes = [16, 16, 128], strides = [1, 1, 1]} : vector<18x16x128xbf16> to vector<16x16x128xbf16>
    %24 = vector.extract_strided_slice %22 {offsets = [1, 0, 0], sizes = [16, 16, 128], strides = [1, 1, 1]} : vector<18x16x128xbf16> to vector<16x16x128xbf16>
    %25 = vector.extract_strided_slice %22 {offsets = [2, 0, 0], sizes = [16, 16, 128], strides = [1, 1, 1]} : vector<18x16x128xbf16> to vector<16x16x128xbf16>
    %26 = tpu.concatenate %23, %24, %25 in 2 : vector<16x16x128xbf16>, vector<16x16x128xbf16>, vector<16x16x128xbf16> -> vector<16x16x384xbf16>
    %27 = vector.shape_cast %26 : vector<16x16x384xbf16> to vector<256x384xbf16>
    %c0_25 = arith.constant 0 : index
    %c0_26 = arith.constant 0 : index
    %28 = vector.load %arg4[%c0_25, %c0_26] : memref<1152x128xbf16, #tpu.memory_space<vmem>>, vector<384x128xbf16>
    %cst_27 = arith.constant dense<0.000000e+00> : vector<256x128xf32>
    %29 = tpu.matmul %27, %28, %cst_27 {dimension_numbers = #tpu.dot_dimension_numbers<[1], [0], [0], [1], [0, 0, 1, 1], [], []>} : vector<256x384xbf16>, vector<384x128xbf16>, vector<256x128xf32> -> vector<256x128xf32>
    %30 = arith.addf %21, %29 : vector<256x128xf32>
    %31 = vector.extract_strided_slice %20 {offsets = [0, 1, 0], sizes = [18, 16, 128], strides = [1, 1, 1]} : vector<18x18x128xbf16> to vector<18x16x128xbf16>
    %32 = vector.extract_strided_slice %31 {offsets = [0, 0, 0], sizes = [16, 16, 128], strides = [1, 1, 1]} : vector<18x16x128xbf16> to vector<16x16x128xbf16>
    %33 = vector.extract_strided_slice %31 {offsets = [1, 0, 0], sizes = [16, 16, 128], strides = [1, 1, 1]} : vector<18x16x128xbf16> to vector<16x16x128xbf16>
    %34 = vector.extract_strided_slice %31 {offsets = [2, 0, 0], sizes = [16, 16, 128], strides = [1, 1, 1]} : vector<18x16x128xbf16> to vector<16x16x128xbf16>
    %35 = tpu.concatenate %32, %33, %34 in 2 : vector<16x16x128xbf16>, vector<16x16x128xbf16>, vector<16x16x128xbf16> -> vector<16x16x384xbf16>
    %36 = vector.shape_cast %35 : vector<16x16x384xbf16> to vector<256x384xbf16>
    %c384 = arith.constant 384 : index
    %c0_28 = arith.constant 0 : index
    %37 = vector.load %arg4[%c384, %c0_28] : memref<1152x128xbf16, #tpu.memory_space<vmem>>, vector<384x128xbf16>
    %cst_29 = arith.constant dense<0.000000e+00> : vector<256x128xf32>
    %38 = tpu.matmul %36, %37, %cst_29 {dimension_numbers = #tpu.dot_dimension_numbers<[1], [0], [0], [1], [0, 0, 1, 1], [], []>} : vector<256x384xbf16>, vector<384x128xbf16>, vector<256x128xf32> -> vector<256x128xf32>
    %39 = arith.addf %30, %38 : vector<256x128xf32>
    %40 = vector.extract_strided_slice %20 {offsets = [0, 2, 0], sizes = [18, 16, 128], strides = [1, 1, 1]} : vector<18x18x128xbf16> to vector<18x16x128xbf16>
    %41 = vector.extract_strided_slice %40 {offsets = [0, 0, 0], sizes = [16, 16, 128], strides = [1, 1, 1]} : vector<18x16x128xbf16> to vector<16x16x128xbf16>
    %42 = vector.extract_strided_slice %40 {offsets = [1, 0, 0], sizes = [16, 16, 128], strides = [1, 1, 1]} : vector<18x16x128xbf16> to vector<16x16x128xbf16>
    %43 = vector.extract_strided_slice %40 {offsets = [2, 0, 0], sizes = [16, 16, 128], strides = [1, 1, 1]} : vector<18x16x128xbf16> to vector<16x16x128xbf16>
    %44 = tpu.concatenate %41, %42, %43 in 2 : vector<16x16x128xbf16>, vector<16x16x128xbf16>, vector<16x16x128xbf16> -> vector<16x16x384xbf16>
    %45 = vector.shape_cast %44 : vector<16x16x384xbf16> to vector<256x384xbf16>
    %c768 = arith.constant 768 : index
    %c0_30 = arith.constant 0 : index
    %46 = vector.load %arg4[%c768, %c0_30] : memref<1152x128xbf16, #tpu.memory_space<vmem>>, vector<384x128xbf16>
    %cst_31 = arith.constant dense<0.000000e+00> : vector<256x128xf32>
    %47 = tpu.matmul %45, %46, %cst_31 {dimension_numbers = #tpu.dot_dimension_numbers<[1], [0], [0], [1], [0, 0, 1, 1], [], []>} : vector<256x384xbf16>, vector<384x128xbf16>, vector<256x128xf32> -> vector<256x128xf32>
    %48 = arith.addf %39, %47 : vector<256x128xf32>
    %cst_32 = arith.constant dense<0.000000e+00> : vector<128xf32>
    %49 = vector.multi_reduction <add>, %48, %cst_32 [0] : vector<256x128xf32> to vector<128xf32>
    %50 = vector.shape_cast %49 : vector<128xf32> to vector<1x128xf32>
    %51 = arith.mulf %48, %48 : vector<256x128xf32>
    %cst_33 = arith.constant dense<0.000000e+00> : vector<128xf32>
    %52 = vector.multi_reduction <add>, %51, %cst_33 [0] : vector<256x128xf32> to vector<128xf32>
    %53 = vector.shape_cast %52 : vector<128xf32> to vector<1x128xf32>
    %cst_34 = arith.constant 0.000000e+00 : f32
    %54 = vector.broadcast %cst_34 : f32 to vector<1x128xf32>
    %55 = tpu.concatenate %50, %53, %54, %54, %54, %54, %54, %54 in 0 : vector<1x128xf32>, vector<1x128xf32>, vector<1x128xf32>, vector<1x128xf32>, vector<1x128xf32>, vector<1x128xf32>, vector<1x128xf32>, vector<1x128xf32> -> vector<8x128xf32>
    %c0_35 = arith.constant 0 : index
    %c0_36 = arith.constant 0 : index
    %c0_37 = arith.constant 0 : index
    %56 = vector.load %arg6[%c0_35, %c0_36, %c0_37] : memref<1x8x128xf32, #tpu.memory_space<vmem>>, vector<1x8x128xf32>
    %57 = vector.shape_cast %56 : vector<1x8x128xf32> to vector<8x128xf32>
    %58 = vector.shape_cast %55 : vector<8x128xf32> to vector<1x8x128xf32>
    tpu.vector_store %arg6[%c0_35, %c0_36, %c0_37], %58 {strides = array<i32>} : memref<1x8x128xf32, #tpu.memory_space<vmem>>, vector<1x8x128xf32>,
    %59 = arith.truncf %48 : vector<256x128xf32> to vector<256x128xbf16>
    %c0_38 = arith.constant 0 : index
    %c0_39 = arith.constant 0 : index
    %c0_40 = arith.constant 0 : index
    %60 = vector.load %arg5[%c0_38, %c0_39, %c0_40] : memref<1x256x128xbf16, #tpu.memory_space<vmem>>, vector<1x256x128xbf16>
    %61 = vector.shape_cast %60 : vector<1x256x128xbf16> to vector<256x128xbf16>
    %62 = vector.shape_cast %59 : vector<256x128xbf16> to vector<1x256x128xbf16>
    tpu.vector_store %arg5[%c0_38, %c0_39, %c0_40], %62 {strides = array<i32>} : memref<1x256x128xbf16, #tpu.memory_space<vmem>>, vector<1x256x128xbf16>,
    return
  }
  func.func @transform_0(%arg0: i32) -> (i32, i32, i32) {
    %c0_i32 = arith.constant 0 : i32
    %c0_i32_0 = arith.constant 0 : i32
    %c0_i32_1 = arith.constant 0 : i32
    return %arg0, %c0_i32, %c0_i32_0 : i32, i32, i32
  }
  func.func @transform_1(%arg0: i32) -> (i32, i32) {
    %c0_i32 = arith.constant 0 : i32
    %c0_i32_0 = arith.constant 0 : i32
    %c0_i32_1 = arith.constant 0 : i32
    return %c0_i32, %c0_i32_0 : i32, i32
  }
  func.func @transform_2(%arg0: i32) -> (i32, i32) {
    %c0_i32 = arith.constant 0 : i32
    %c0_i32_0 = arith.constant 0 : i32
    %c0_i32_1 = arith.constant 0 : i32
    return %c0_i32, %c0_i32_0 : i32, i32
  }
  func.func @transform_3(%arg0: i32) -> (i32, i32) {
    %c0_i32 = arith.constant 0 : i32
    %c0_i32_0 = arith.constant 0 : i32
    %c0_i32_1 = arith.constant 0 : i32
    return %c0_i32, %c0_i32_0 : i32, i32
  }
  func.func @transform_4(%arg0: i32) -> (i32, i32, i32) {
    %c0_i32 = arith.constant 0 : i32
    %c0_i32_0 = arith.constant 0 : i32
    %c0_i32_1 = arith.constant 0 : i32
    return %arg0, %c0_i32, %c0_i32_0 : i32, i32, i32
  }
  func.func @transform_5(%arg0: i32) -> (i32, i32, i32) {
    %c0_i32 = arith.constant 0 : i32
    %c0_i32_0 = arith.constant 0 : i32
    %c0_i32_1 = arith.constant 0 : i32
    return %arg0, %c0_i32, %c0_i32_0 : i32, i32, i32
  }
}

</mosaic_0001>

<bundles_post_ra>
// kernel: basic_block_forward.5
= control target key start
LH: loop header
LB: loop body
LE: loop exit
PB: predicated region body
PF: predicated region fallthrough
CT: control target
= control target key end

     0   :  { %s2539_s2 = inlined_call_operand.vmem [shape: bf16[128,128], index: 2, kind: input, shape index: {}]   ;;  %s2540_s1 = inlined_call_operand.vmem [shape: bf16[512,128], index: 1, kind: input, shape index: {}]   ;;  %s2541_s0 = inlined_call_operand.vmem [shape: bf16[512,128], index: 0, kind: input, shape index: {}]   ;;  %s2542_s3 = inlined_call_operand.vmem [shape: f32[1,128], index: 3, kind: input, shape index: {}]   ;;  %s2543_s4 = inlined_call_operand.vmem [shape: f32[1,128], index: 4, kind: input, shape index: {}]   ;;  %s2544_s5 = inlined_call_operand.vmem [shape: f32[1,128], index: 5, kind: input, shape index: {}]   ;;  %s2545_s6 = inlined_call_operand.vmem [shape: f32[1,128], index: 6, kind: input, shape index: {}]   ;;  %s2546_s7 = inlined_call_operand.vmem [shape: f32[512,128], index: 7, kind: output, shape index: {}]  }
   0x1   :  { %v1583_v0 = vld [vmem:[%s2539_s2 + $0x38] sm:$0xff]   ;;  %v1584_v1 = vld [vmem:[%s2539_s2 + $0x30] sm:$0xff]   ;;  %v1585_v2 = vld [vmem:[%s2539_s2 + $0x28] sm:$0xff]  }
   0x2   :  { %1487 = vmatprep.subr.bf16.mxu0 %v1583_v0  ;;  %1567 = vmatprep.subr.bf16.mxu1 %v1583_v0  ;;  %v1586_v3 = vld [vmem:[%s2539_s2 + $0x20] sm:$0xff]   ;;  %v1587_v6 = vld [vmem:[%s2539_s2 + $0x18] sm:$0xff]   ;;  %v1588_v7 = vld [vmem:[%s2539_s2 + $0x10] sm:$0xff]  }
   0x3   :  { %1488 = vmatpush3.bf16.msra.mxu0 %v1583_v0  ;;  %1575 = vmatpush3.bf16.msra.mxu1 %v1583_v0  ;;  %v1591_v4 = vld [vmem:[%s2540_s1] sm:$0xff]   ;;  %v1589_v8 = vld [vmem:[%s2539_s2 + $0x8] sm:$0xff]   ;;  %v1595_v12 = vld [vmem:[%s2540_s1 + $0x10] sm:$0xff]  }
   0x4   :  { %1489 = vmatprep.subr.bf16.mxu0 %v1584_v1  ;;  %1568 = vmatprep.subr.bf16.mxu1 %v1584_v1  ;;  %v1592_v5 = vld [vmem:[%s2540_s1 + $0x80] sm:$0xff]   ;;  %v1593_v10 = vld [vmem:[%s2540_s1 + $0x8] sm:$0xff]   ;;  %v1596_v13 = vld [vmem:[%s2540_s1 + $0x90] sm:$0xff]  }
   0x5   :  { %1503 = vmatprep.mubr.bf16.mxu0 %v1591_v4  ;;  %1535 = vmatprep.mubr.bf16.mxu1 %v1592_v5  ;;  %v1590_v9 = vld [vmem:[%s2539_s2] sm:$0xff]   ;;  %v1594_v11 = vld [vmem:[%s2540_s1 + $0x88] sm:$0xff]   ;;  %v1597_v14 = vld [vmem:[%s2540_s1 + $0x18] sm:$0xff]  }
   0x6   :  { %v1598_v15 = vld [vmem:[%s2540_s1 + $0x98] sm:$0xff]   ;;  %v1599_v16 = vld [vmem:[%s2540_s1 + $0x20] sm:$0xff]   ;;  %v1601_v18 = vld [vmem:[%s2540_s1 + $0x28] sm:$0xff]  }
   0x7   :  { %1490 = vmatpush3.bf16.msra.mxu0 %v1584_v1  ;;  %1576 = vmatpush3.bf16.msra.mxu1 %v1584_v1  ;;  %v1600_v17 = vld [vmem:[%s2540_s1 + $0xa0] sm:$0xff]   ;;  %v1602_v19 = vld [vmem:[%s2540_s1 + $0xa8] sm:$0xff]   ;;  %v1603_v20 = vld [vmem:[%s2540_s1 + $0x30] sm:$0xff]  }
   0x8   :  { %1491 = vmatprep.subr.bf16.mxu0 %v1585_v2  ;;  %1569 = vmatprep.subr.bf16.mxu1 %v1585_v2  ;;  %v1604_v21 = vld [vmem:[%s2540_s1 + $0xb0] sm:$0xff]   ;;  %v1605_v22 = vld [vmem:[%s2540_s1 + $0x38] sm:$0xff]   ;;  %v1607_v24 = vld [vmem:[%s2540_s1 + $0x40] sm:$0xff]  }
   0x9   :  { %v1606_v23 = vld [vmem:[%s2540_s1 + $0xb8] sm:$0xff]   ;;  %v1608_v25 = vld [vmem:[%s2540_s1 + $0xc0] sm:$0xff]   ;;  %v1609_v26 = vld [vmem:[%s2540_s1 + $0x48] sm:$0xff]  }
   0xa   :  { %v1610_v27 = vld [vmem:[%s2540_s1 + $0xc8] sm:$0xff]   ;;  %v1611_v28 = vld [vmem:[%s2540_s1 + $0x50] sm:$0xff]   ;;  %v1613_v30 = vld [vmem:[%s2540_s1 + $0x58] sm:$0xff]  }
   0xb   :  { %1492 = vmatpush3.bf16.msra.mxu0 %v1585_v2  ;;  %1577 = vmatpush3.bf16.msra.mxu1 %v1585_v2  ;;  %v1612_v29 = vld [vmem:[%s2540_s1 + $0xd0] sm:$0xff]   ;;  %v1614_v31 = vld [vmem:[%s2540_s1 + $0xd8] sm:$0xff]   ;;  %v1615_v32 = vld [vmem:[%s2540_s1 + $0x60] sm:$0xff]  }
   0xc   :  { %1493 = vmatprep.subr.bf16.mxu0 %v1586_v3  ;;  %1570 = vmatprep.subr.bf16.mxu1 %v1586_v3  ;;  %v1616_v33 = vld [vmem:[%s2540_s1 + $0xe0] sm:$0xff]   ;;  %v1617_v34 = vld [vmem:[%s2540_s1 + $0x68] sm:$0xff]   ;;  %v1619_v36 = vld [vmem:[%s2540_s1 + $0x70] sm:$0xff]  }
   0xd   :  { %v1618_v35 = vld [vmem:[%s2540_s1 + $0xe8] sm:$0xff]   ;;  %v1620_v37 = vld [vmem:[%s2540_s1 + $0xf0] sm:$0xff]   ;;  %v1621_v38 = vld [vmem:[%s2540_s1 + $0x78] sm:$0xff]  }
   0xe   :  { %v1622_v39 = vld [vmem:[%s2540_s1 + $0xf8] sm:$0xff]   ;;  %v1416_v40 = vld [vmem:[%s2541_s0 + $0x8] sm:$0xff]   ;;  %v1289_v42 = vld [vmem:[%s2541_s0] sm:$0xff]  }
   0xf   :  { %1494 = vmatpush3.bf16.msra.mxu0 %v1586_v3  ;;  %1578 = vmatpush3.bf16.msra.mxu1 %v1586_v3  ;;  %v1432_v41 = vld [vmem:[%s2541_s0 + $0x88] sm:$0xff]   ;;  %v1431_v43 = vld [vmem:[%s2541_s0 + $0x80] sm:$0xff]   ;;  %v1294_v44 = vunpack.c.l.bf16 %v1416_v40  ;;  %v1290_v47 = vunpack.c.l.bf16 %v1289_v42  ;;  %v1295_v49 = vunpack.c.h.bf16 %v1416_v40  ;;  %v1418_v51 = vld [vmem:[%s2541_s0 + $0x18] sm:$0xff]   ;;  %v1291_v55 = vunpack.c.h.bf16 %v1289_v42 }
  0x10   :  { %1495 = vmatprep.subr.bf16.mxu0 %v1587_v6  ;;  %1571 = vmatprep.subr.bf16.mxu1 %v1587_v6  ;;  %v1358_v45 = vunpack.c.l.bf16 %v1432_v41  ;;  %v1798_v46 = vld [vmem:[%s2542_s3] ss:$0 sm:$0xff]  ;;  %v1354_v48 = vunpack.c.l.bf16 %v1431_v43  ;;  %v1359_v50 = vunpack.c.h.bf16 %v1432_v41  ;;  %v1434_v52 = vld [vmem:[%s2541_s0 + $0x98] sm:$0xff]   ;;  %v1355_v56 = vunpack.c.h.bf16 %v1431_v43  ;;  %v1417_v57 = vld [vmem:[%s2541_s0 + $0x10] sm:$0xff]  }
  0x11   :  { %v164_v53 = vmul.f32 %v1294_v44, %v1798_v46  ;;  %v1433_v58 = vld [vmem:[%s2541_s0 + $0x90] sm:$0xff]   ;;  %v1817_v59 = vld [vmem:[%s2543_s4] ss:$0 sm:$0xff]  ;;  %v1302_v60 = vunpack.c.l.bf16 %v1418_v51  ;;  %v1366_v61 = vunpack.c.l.bf16 %v1434_v52  ;;  %v162_v62 = vmul.f32 %v1290_v47, %v1798_v46 }
  0x12   :  { %v196_v54 = vmul.f32 %v1358_v45, %v1798_v46  ;;  %v194_v63 = vmul.f32 %v1354_v48, %v1798_v46  ;;  %v165_v0 = vmul.f32 %v1295_v49, %v1798_v46  ;;  %v197_v1 = vmul.f32 %v1359_v50, %v1798_v46  ;;  %v1421_v49 = vld [vmem:[%s2541_s0 + $0x30] sm:$0xff]  }
  0x13   :  { %1496 = vmatpush3.bf16.msra.mxu0 %v1587_v6  ;;  %1579 = vmatpush3.bf16.msra.mxu1 %v1587_v6  ;;  %v1298_v2 = vunpack.c.l.bf16 %v1417_v57  ;;  %v1362_v3 = vunpack.c.l.bf16 %v1433_v58  ;;  %v1303_v4 = vunpack.c.h.bf16 %v1418_v51  ;;  %v1367_v5 = vunpack.c.h.bf16 %v1434_v52  ;;  %v1437_v50 = vld [vmem:[%s2541_s0 + $0xb0] sm:$0xff]  }
  0x14   :  { %1497 = vmatprep.subr.bf16.mxu0 %v1588_v7  ;;  %1572 = vmatprep.subr.bf16.mxu1 %v1588_v7  ;;  %v1824_v6 = vadd.f32 %v1817_v59, %v164_v53 }
  0x17   :  { %1498 = vmatpush3.bf16.msra.mxu0 %v1588_v7  ;;  %1580 = vmatpush3.bf16.msra.mxu1 %v1588_v7  ;;  %v1827_v7 = vadd.f32 %v1817_v59, %v196_v54 }
  0x18   :  { %1499 = vmatprep.subr.bf16.mxu0 %v1589_v8  ;;  %1573 = vmatprep.subr.bf16.mxu1 %v1589_v8 }
  0x1b   :  { %1500 = vmatpush3.bf16.msra.mxu0 %v1589_v8  ;;  %1581 = vmatpush3.bf16.msra.mxu1 %v1589_v8  ;;  %v163_v8 = vmul.f32 %v1291_v55, %v1798_v46 }
  0x1c   :  { %1501 = vmatprep.subr.bf16.mxu0 %v1590_v9  ;;  %1574 = vmatprep.subr.bf16.mxu1 %v1590_v9 }
  0x1f   :  { %1502 = vmatpush3.bf16.msra.mxu0 %v1590_v9  ;;  %1582 = vmatpush3.bf16.msra.mxu1 %v1590_v9  ;;  %v195_v9 = vmul.f32 %v1355_v56, %v1798_v46 }
  0x22   :  { %1504 = vmatmul.mubr.bf16.vlgmr.msra.gmra.mxu0 %v1593_v10  ;;  %1536 = vmatmul.mubr.bf16.vlgmr.msra.gmra.mxu1 %v1594_v11  ;;  %v168_v10 = vmul.f32 %v1302_v60, %v1798_v46  ;;  %v200_v11 = vmul.f32 %v1366_v61, %v1798_v46  ;;  %v1314_v60 = vunpack.c.l.bf16 %v1421_v49  ;;  %v1378_v61 = vunpack.c.l.bf16 %v1437_v50 }
  0x23   :  { %1507 = vmatprep.mubr.bf16.mxu0 %v1595_v12  ;;  %1539 = vmatprep.mubr.bf16.mxu1 %v1596_v13  ;;  %v1299_v12 = vunpack.c.h.bf16 %v1417_v57  ;;  %v1363_v13 = vunpack.c.h.bf16 %v1433_v58 }
  0x2a   :  { %1508 = vmatmul.mubr.bf16.gmra.mxu0 %v1597_v14  ;;  %1540 = vmatmul.mubr.bf16.gmra.mxu1 %v1598_v15  ;;  %v1420_v14 = vld [vmem:[%s2541_s0 + $0x28] sm:$0xff]  }
  0x2b   :  { %1511 = vmatprep.mubr.bf16.mxu0 %v1599_v16  ;;  %1543 = vmatprep.mubr.bf16.mxu1 %v1600_v17  ;;  %v1436_v15 = vld [vmem:[%s2541_s0 + $0xa8] sm:$0xff]   ;;  %v1840_v16 = vadd.f32 %v1817_v59, %v162_v62  ;;  %v1843_v17 = vadd.f32 %v1817_v59, %v194_v63 }
  0x32   :  { %1512 = vmatmul.mubr.bf16.gmra.mxu0 %v1601_v18  ;;  %1544 = vmatmul.mubr.bf16.gmra.mxu1 %v1602_v19  ;;  %v1846_v18 = vadd.f32 %v1817_v59, %v165_v0  ;;  %v1849_v19 = vadd.f32 %v1817_v59, %v197_v1 }
  0x33   :  { %1515 = vmatprep.mubr.bf16.mxu0 %v1603_v20  ;;  %1547 = vmatprep.mubr.bf16.mxu1 %v1604_v21  ;;  %v166_v20 = vmul.f32 %v1298_v2, %v1798_v46  ;;  %v198_v21 = vmul.f32 %v1362_v3, %v1798_v46 }
  0x35   :  { %v1882_v40 = vadd.f32 %v1817_v59, %v166_v20  ;;  %v1885_v41 = vadd.f32 %v1817_v59, %v198_v21  ;;  %v174_v20 = vmul.f32 %v1314_v60, %v1798_v46  ;;  %v206_v21 = vmul.f32 %v1378_v61, %v1798_v46  ;;  %v1425_v60 = vld [vmem:[%s2541_s0 + $0x50] sm:$0xff]  }
  0x36   :  { %v1441_v61 = vld [vmem:[%s2541_s0 + $0xd0] sm:$0xff]  }
  0x3a   :  { %1516 = vmatmul.mubr.bf16.gmra.mxu0 %v1605_v22  ;;  %1548 = vmatmul.mubr.bf16.gmra.mxu1 %v1606_v23  ;;  %v169_v22 = vmul.f32 %v1303_v4, %v1798_v46  ;;  %v201_v23 = vmul.f32 %v1367_v5, %v1798_v46 }
  0x3b   :  { %1519 = vmatprep.mubr.bf16.mxu0 %v1607_v24  ;;  %1551 = vmatprep.mubr.bf16.mxu1 %v1608_v25  ;;  %v1419_v24 = vld [vmem:[%s2541_s0 + $0x20] sm:$0xff]  }
  0x3c   :  { %v1435_v25 = vld [vmem:[%s2541_s0 + $0xa0] sm:$0xff]   ;;  %v1888_v42 = vadd.f32 %v1817_v59, %v169_v22  ;;  %v1891_v43 = vadd.f32 %v1817_v59, %v201_v23  ;;  %v1307_v47 = vunpack.c.h.bf16 %v1419_v24 }
  0x3d   :  { %v1371_v48 = vunpack.c.h.bf16 %v1435_v25 }
  0x3e   :  { %v171_v2 = vmul.f32 %v1307_v47, %v1798_v46  ;;  %v1426_v47 = vld [vmem:[%s2541_s0 + $0x58] sm:$0xff]  }
  0x3f   :  { %v203_v3 = vmul.f32 %v1371_v48, %v1798_v46  ;;  %v1442_v48 = vld [vmem:[%s2541_s0 + $0xd8] sm:$0xff]  }
  0x42   :  { %1520 = vmatmul.mubr.bf16.gmra.mxu0 %v1609_v26  ;;  %1552 = vmatmul.mubr.bf16.gmra.mxu1 %v1610_v27  ;;  %v1862_v26 = vadd.f32 %v1817_v59, %v163_v8  ;;  %v1865_v27 = vadd.f32 %v1817_v59, %v195_v9  ;;  %v1315_v8 = vunpack.c.h.bf16 %v1421_v49  ;;  %v1379_v9 = vunpack.c.h.bf16 %v1437_v50 }
  0x43   :  { %1523 = vmatprep.mubr.bf16.mxu0 %v1611_v28  ;;  %1555 = vmatprep.mubr.bf16.mxu1 %v1612_v29  ;;  %v1310_v28 = vunpack.c.l.bf16 %v1420_v14  ;;  %v1374_v29 = vunpack.c.l.bf16 %v1436_v15  ;;  %v1970_v49 = vadd.f32 %v1817_v59, %v174_v20  ;;  %v1973_v50 = vadd.f32 %v1817_v59, %v206_v21 }
  0x44   :  { %v1335_v20 = vunpack.c.h.bf16 %v1426_v47  ;;  %v1399_v21 = vunpack.c.h.bf16 %v1442_v48 }
  0x45   :  { %v172_v44 = vmul.f32 %v1310_v28, %v1798_v46  ;;  %v204_v45 = vmul.f32 %v1374_v29, %v1798_v46  ;;  %v1950_v28 = vadd.f32 %v1817_v59, %v171_v2  ;;  %v1953_v29 = vadd.f32 %v1817_v59, %v203_v3 }
  0x46   :  { %v1334_v2 = vunpack.c.l.bf16 %v1426_v47  ;;  %v1398_v3 = vunpack.c.l.bf16 %v1442_v48 }
  0x47   :  { %v1912_v0 = vadd.f32 %v1817_v59, %v172_v44  ;;  %v1915_v1 = vadd.f32 %v1817_v59, %v204_v45 }
  0x4a   :  { %1524 = vmatmul.mubr.bf16.gmra.mxu0 %v1613_v30  ;;  %1556 = vmatmul.mubr.bf16.gmra.mxu1 %v1614_v31  ;;  %v1868_v30 = vadd.f32 %v1817_v59, %v168_v10  ;;  %v1871_v31 = vadd.f32 %v1817_v59, %v200_v11  ;;  %v1424_v10 = vld [vmem:[%s2541_s0 + $0x48] sm:$0xff]  }
  0x4b   :  { %1527 = vmatprep.mubr.bf16.mxu0 %v1615_v32  ;;  %1559 = vmatprep.mubr.bf16.mxu1 %v1616_v33  ;;  %v167_v32 = vmul.f32 %v1299_v12, %v1798_v46  ;;  %v199_v33 = vmul.f32 %v1363_v13, %v1798_v46  ;;  %v1440_v11 = vld [vmem:[%s2541_s0 + $0xc8] sm:$0xff]   ;;  %v1327_v44 = vunpack.c.h.bf16 %v1424_v10 }
  0x4c   :  { %v1391_v45 = vunpack.c.h.bf16 %v1440_v11 }
  0x4d   :  { %v1902_v51 = vadd.f32 %v1817_v59, %v167_v32  ;;  %v1905_v52 = vadd.f32 %v1817_v59, %v199_v33  ;;  %v1326_v32 = vunpack.c.l.bf16 %v1424_v10  ;;  %v1390_v33 = vunpack.c.l.bf16 %v1440_v11 }
  0x4e   :  { %v1330_v10 = vunpack.c.l.bf16 %v1425_v60  ;;  %v1394_v11 = vunpack.c.l.bf16 %v1441_v61 }
  0x52   :  { %1528 = vmatmul.mubr.bf16.gmra.mxu0 %v1617_v34  ;;  %1560 = vmatmul.mubr.bf16.gmra.mxu1 %v1618_v35  ;;  %v1306_v34 = vunpack.c.l.bf16 %v1419_v24  ;;  %v1370_v35 = vunpack.c.l.bf16 %v1435_v25  ;;  %v1423_v24 = vld [vmem:[%s2541_s0 + $0x40] sm:$0xff]  }
  0x53   :  { %1531 = vmatprep.mubr.bf16.mxu0 %v1619_v36  ;;  %1563 = vmatprep.mubr.bf16.mxu1 %v1620_v37  ;;  %v1311_v36 = vunpack.c.h.bf16 %v1420_v14  ;;  %v1375_v37 = vunpack.c.h.bf16 %v1436_v15  ;;  %v1439_v25 = vld [vmem:[%s2541_s0 + $0xc0] sm:$0xff]  }
  0x54   :  { %v170_v55 = vmul.f32 %v1306_v34, %v1798_v46  ;;  %v202_v56 = vmul.f32 %v1370_v35, %v1798_v46 }
  0x55   :  { %v173_v57 = vmul.f32 %v1311_v36, %v1798_v46  ;;  %v205_v58 = vmul.f32 %v1375_v37, %v1798_v46  ;;  %v175_v36 = vmul.f32 %v1315_v8, %v1798_v46  ;;  %v207_v37 = vmul.f32 %v1379_v9, %v1798_v46 }
  0x56   :  { %v1928_v12 = vadd.f32 %v1817_v59, %v170_v55  ;;  %v1931_v13 = vadd.f32 %v1817_v59, %v202_v56  ;;  %v180_v55 = vmul.f32 %v1326_v32, %v1798_v46  ;;  %v212_v56 = vmul.f32 %v1390_v33, %v1798_v46 }
  0x57   :  { %v1934_v14 = vadd.f32 %v1817_v59, %v173_v57  ;;  %v1937_v15 = vadd.f32 %v1817_v59, %v205_v58  ;;  %v1323_v57 = vunpack.c.h.bf16 %v1423_v24  ;;  %v1387_v58 = vunpack.c.h.bf16 %v1439_v25 }
  0x58   :  { %v181_v8 = vmul.f32 %v1327_v44, %v1798_v46  ;;  %v213_v9 = vmul.f32 %v1391_v45, %v1798_v46  ;;  %v184_v32 = vmul.f32 %v1334_v2, %v1798_v46  ;;  %v216_v33 = vmul.f32 %v1398_v3, %v1798_v46 }
  0x5a   :  { %1532 = vmatmul.mubr.bf16.gmra.mxu0 %v1621_v38  ;;  %1564 = vmatmul.mubr.bf16.gmra.mxu1 %v1622_v39  ;;  %v1422_v38 = vld [vmem:[%s2541_s0 + $0x38] sm:$0xff]   ;;  %v2022_v47 = vadd.f32 %v1817_v59, %v181_v8  ;;  %v2025_v48 = vadd.f32 %v1817_v59, %v213_v9  ;;  %v2044_v8 = vadd.f32 %v1817_v59, %v184_v32 }
  0x5b   :  { %v1438_v39 = vld [vmem:[%s2541_s0 + $0xb8] sm:$0xff]   ;;  %v1318_v53 = vunpack.c.l.bf16 %v1422_v38  ;;  %v1319_v62 = vunpack.c.h.bf16 %v1422_v38  ;;  %v1322_v38 = vunpack.c.l.bf16 %v1423_v24  ;;  %v179_v24 = vmul.f32 %v1323_v57, %v1798_v46 }
  0x5c   :  { %v1382_v54 = vunpack.c.l.bf16 %v1438_v39  ;;  %v1383_v63 = vunpack.c.h.bf16 %v1438_v39  ;;  %v1386_v39 = vunpack.c.l.bf16 %v1439_v25  ;;  %v211_v25 = vmul.f32 %v1387_v58, %v1798_v46  ;;  %2547 = vst [vmem:[#allocation2_spill] sm:$0xff] %v2022_v47  ;;  %2548 = vst [vmem:[#allocation3_spill] sm:$0xff] %v2025_v48  ;;  %v1446_v32 = vld [vmem:[%s2541_s0 + $0xf8] sm:$0xff]  }
  0x5d   :  { %v176_v4 = vmul.f32 %v1318_v53, %v1798_v46  ;;  %v177_v22 = vmul.f32 %v1319_v62, %v1798_v46  ;;  %v1990_v62 = vadd.f32 %v1817_v59, %v175_v36  ;;  %v1331_v36 = vunpack.c.h.bf16 %v1425_v60  ;;  %v1427_v60 = vld [vmem:[%s2541_s0 + $0x60] sm:$0xff]   ;;  %2551 = vst [vmem:[#allocation6_spill] sm:$0xff] %v2044_v8 }
  0x5e   :  { %v208_v5 = vmul.f32 %v1382_v54, %v1798_v46  ;;  %v209_v23 = vmul.f32 %v1383_v63, %v1798_v46  ;;  %v1993_v63 = vadd.f32 %v1817_v59, %v207_v37  ;;  %v1395_v37 = vunpack.c.h.bf16 %v1441_v61  ;;  %v1443_v61 = vld [vmem:[%s2541_s0 + $0xe0] sm:$0xff]  }
  0x5f   :  { %v1956_v34 = vadd.f32 %v1817_v59, %v176_v4  ;;  %v1976_v53 = vadd.f32 %v1817_v59, %v177_v22  ;;  %v178_v4 = vmul.f32 %v1322_v38, %v1798_v46  ;;  %v2000_v22 = vadd.f32 %v1817_v59, %v180_v55  ;;  %v1428_v38 = vld [vmem:[%s2541_s0 + $0x68] sm:$0xff]  }
  0x60   :  { %v1959_v35 = vadd.f32 %v1817_v59, %v208_v5  ;;  %v1979_v54 = vadd.f32 %v1817_v59, %v209_v23  ;;  %v210_v5 = vmul.f32 %v1386_v39, %v1798_v46  ;;  %v2003_v23 = vadd.f32 %v1817_v59, %v212_v56  ;;  %v1444_v39 = vld [vmem:[%s2541_s0 + $0xe8] sm:$0xff]  }
  0x61   :  { %v2016_v44 = vadd.f32 %v1817_v59, %v178_v4  ;;  %v182_v55 = vmul.f32 %v1330_v10, %v1798_v46  ;;  %v214_v56 = vmul.f32 %v1394_v11, %v1798_v46  ;;  %v185_v57 = vmul.f32 %v1335_v20, %v1798_v46 }
  0x62   :  { %v2019_v45 = vadd.f32 %v1817_v59, %v210_v5  ;;  %v217_v58 = vmul.f32 %v1399_v21, %v1798_v46  ;;  %v2038_v2 = vadd.f32 %v1817_v59, %v179_v24  ;;  %v2041_v3 = vadd.f32 %v1817_v59, %v211_v25  ;;  %v1430_v25 = vld [vmem:[%s2541_s0 + $0x78] sm:$0xff]  }
  0x63   :  { %v1342_v4 = vunpack.c.l.bf16 %v1428_v38  ;;  %v1406_v5 = vunpack.c.l.bf16 %v1444_v39  ;;  %v2047_v9 = vadd.f32 %v1817_v59, %v216_v33  ;;  %v183_v10 = vmul.f32 %v1331_v36, %v1798_v46 }
  0x64   :  { %2549 = vst [vmem:[#allocation4_spill] sm:$0xff] %v2038_v2  ;;  %2550 = vst [vmem:[#allocation5_spill] sm:$0xff] %v2041_v3  ;;  %v215_v11 = vmul.f32 %v1395_v37, %v1798_v46  ;;  %v1338_v20 = vunpack.c.l.bf16 %v1427_v60  ;;  %v1402_v21 = vunpack.c.l.bf16 %v1443_v61  ;;  %v1343_v48 = vunpack.c.h.bf16 %v1428_v38 }
  0x65   :  { %2552 = vst [vmem:[#allocation7_spill] sm:$0xff] %v2047_v9  ;;  %v1407_v24 = vunpack.c.h.bf16 %v1444_v39  ;;  %v2058_v8 = vadd.f32 %v1817_v59, %v182_v55  ;;  %v2061_v33 = vadd.f32 %v1817_v59, %v214_v56  ;;  %v2064_v36 = vadd.f32 %v1817_v59, %v185_v57  ;;  %v1429_v55 = vld [vmem:[%s2541_s0 + $0x70] sm:$0xff]  }
  0x66   :  { %v2067_v37 = vadd.f32 %v1817_v59, %v217_v58  ;;  %v188_v38 = vmul.f32 %v1342_v4, %v1798_v46  ;;  %v220_v39 = vmul.f32 %v1406_v5, %v1798_v46  ;;  %v1339_v9 = vunpack.c.h.bf16 %v1427_v60  ;;  %v1445_v56 = vld [vmem:[%s2541_s0 + $0xf0] sm:$0xff]  }
  0x67   :  { %2553 = vst [vmem:[#allocation8_spill] sm:$0xff] %v2058_v8  ;;  %2554 = vst [vmem:[#allocation9_spill] sm:$0xff] %v2061_v33  ;;  %v1403_v3 = vunpack.c.h.bf16 %v1443_v61  ;;  %v2078_v57 = vadd.f32 %v1817_v59, %v183_v10  ;;  %v2081_v58 = vadd.f32 %v1817_v59, %v215_v11  ;;  %v1414_v4 = vunpack.c.l.bf16 %v1446_v32 }
  0x68   :  { %2555 = vst [vmem:[#allocation10_spill] sm:$0xff] %v2064_v36  ;;  %2556 = vst [vmem:[#allocation11_spill] sm:$0xff] %v2067_v37  ;;  %v1350_v37 = vunpack.c.l.bf16 %v1430_v25  ;;  %v186_v5 = vmul.f32 %v1338_v20, %v1798_v46  ;;  %v218_v60 = vmul.f32 %v1402_v21, %v1798_v46  ;;  %v189_v61 = vmul.f32 %v1343_v48, %v1798_v46  ;;  %v2098_v48 = vld [vmem:[%s2544_s5] ss:$0 sm:$0xff] }
  0x69   :  { %2557 = vst [vmem:[#allocation12_spill] sm:$0xff] %v2081_v58  ;;  %v221_v36 = vmul.f32 %v1407_v24, %v1798_v46  ;;  %v1346_v33 = vunpack.c.l.bf16 %v1429_v55  ;;  %v1410_v8 = vunpack.c.l.bf16 %v1445_v56  ;;  %v1351_v2 = vunpack.c.h.bf16 %v1430_v25 }
  0x6a   :  { %v1415_v47 = vunpack.c.h.bf16 %v1446_v32  ;;  %v2088_v10 = vadd.f32 %v1817_v59, %v188_v38  ;;  %v2091_v11 = vadd.f32 %v1817_v59, %v220_v39  ;;  %v187_v58 = vmul.f32 %v1339_v9, %v1798_v46 }
  0x6b   :  { %v219_v20 = vmul.f32 %v1403_v3, %v1798_v46  ;;  %v192_v21 = vmul.f32 %v1350_v37, %v1798_v46  ;;  %v224_v24 = vmul.f32 %v1414_v4, %v1798_v46  ;;  %v1347_v25 = vunpack.c.h.bf16 %v1429_v55 }
  0x6c   :  { %2558 = vst [vmem:[#allocation13_spill] sm:$0xff] %v2088_v10  ;;  %2559 = vst [vmem:[#allocation14_spill] sm:$0xff] %v2091_v11  ;;  %v1411_v32 = vunpack.c.h.bf16 %v1445_v56  ;;  %v2103_v38 = vadd.f32 %v1817_v59, %v186_v5  ;;  %v2106_v39 = vadd.f32 %v1817_v59, %v218_v60  ;;  %v2109_v9 = vadd.f32 %v1817_v59, %v189_v61 }
  0x6d   :  { %v2112_v3 = vadd.f32 %v1817_v59, %v221_v36  ;;  %v190_v37 = vmul.f32 %v1346_v33, %v1798_v46  ;;  %v222_v4 = vmul.f32 %v1410_v8, %v1798_v46  ;;  %v193_v55 = vmul.f32 %v1351_v2, %v1798_v46  ;;  %v2129_v33 = vld [vmem:[%s2545_s6] ss:$0 sm:$0xff] }
  0x6e   :  { %2560 = vst [vmem:[#allocation15_spill] sm:$0xff] %v2106_v39  ;;  %2561 = vst [vmem:[#allocation16_spill] sm:$0xff] %v2109_v9  ;;  %v225_v56 = vmul.f32 %v1415_v47, %v1798_v46  ;;  %v2121_v61 = vadd.f32 %v1817_v59, %v187_v58  ;;  %v2124_v36 = vadd.f32 %v1817_v59, %v219_v20 }
  0x6f   :  { %2562 = vst [vmem:[#allocation17_spill] sm:$0xff] %v2112_v3  ;;  %v2132_v2 = vadd.f32 %v1817_v59, %v192_v21  ;;  %v2135_v47 = vadd.f32 %v1817_v59, %v224_v24  ;;  %v223_v58 = vmul.f32 %v1411_v32, %v1798_v46  ;;  %v2144_v21 = vadd.f32 %v1817_v59, %v190_v37 }
  0x70   :  { %2563 = vst [vmem:[#allocation18_spill] sm:$0xff] %v2121_v61  ;;  %2564 = vst [vmem:[#allocation19_spill] sm:$0xff] %v2124_v36  ;;  %v2147_v24 = vadd.f32 %v1817_v59, %v222_v4 }
  0xe2   :  { %v1505_v11 = vpop.f32.mrf.mxu0  ;;  %v1537_v10 = vpop.f32.mrf.mxu1 }
  0xe3   :  { %v915_v5 = vmul.f32 %v1505_v11, %v2098_v48  ;;  %v947_v60 = vmul.f32 %v1537_v10, %v2098_v48  ;;  %v191_v10 = vmul.f32 %v1347_v25, %v1798_v46  ;;  %v2150_v25 = vadd.f32 %v1817_v59, %v193_v55 }
  0xe4   :  { %v651_v8 = vpop.f32.mrf.mxu0  ;;  %v779_v3 = vpop.f32.mrf.mxu1  ;;  %v2153_v46 = vadd.f32 %v1817_v59, %v225_v56  ;;  %v2165_v56 = vadd.f32 %v1817_v59, %v223_v58 }
  0xe5   :  { %v979_v11 = vadd.f32 %v915_v5, %v1824_v6  ;;  %v1011_v20 = vadd.f32 %v947_v60, %v1827_v7  ;;  %v913_v36 = vmul.f32 %v2098_v48, %v651_v8  ;;  %v945_v61 = vmul.f32 %v2098_v48, %v779_v3 }
  0xe6   :  { %v1506_v9 = vpop.f32.mrf.mxu0  ;;  %v1538_v39 = vpop.f32.mrf.mxu1  ;;  %v2162_v55 = vadd.f32 %v1817_v59, %v191_v10 }
  0xe7   :  { %v1050_v6 = vadd.f32 %v2129_v33, %v979_v11  ;;  %v1082_v7 = vadd.f32 %v2129_v33, %v1011_v20  ;;  %v977_v32 = vadd.f32 %v913_v36, %v1840_v16  ;;  %v1009_v3 = vadd.f32 %v945_v61, %v1843_v17 }
  0xe8   :  { %v916_v37 = vmul.f32 %v1506_v9, %v2098_v48  ;;  %v948_v5 = vmul.f32 %v1538_v39, %v2098_v48  ;;  %v654_v4 = vpop.f32.mrf.mxu0  ;;  %v782_v60 = vpop.f32.mrf.mxu1 }
  0xe9   :  { %v1114_v8 = vmax.f32 %v1050_v6, 0.0  ;;  %v1146_v11 = vmax.f32 %v1082_v7, 0.0  ;;  %v1048_v20 = vadd.f32 %v2129_v33, %v977_v32  ;;  %v1080_v16 = vadd.f32 %v2129_v33, %v1009_v3 }
  0xea   :  { %v980_v17 = vadd.f32 %v916_v37, %v1846_v18  ;;  %v1012_v9 = vadd.f32 %v948_v5, %v1849_v19  ;;  %v914_v39 = vmul.f32 %v2098_v48, %v654_v4  ;;  %v946_v61 = vmul.f32 %v2098_v48, %v782_v60  ;;  %v1509_v36 = vpop.f32.mrf.mxu0  ;;  %v1541_v10 = vpop.f32.mrf.mxu1 }
  0xeb   :  { %1178 = vst [vmem:[%s2546_s7 + $0x10] sm:$0xff] %v1114_v8  ;;  %1210 = vst [vmem:[%s2546_s7 + $0x110] sm:$0xff] %v1146_v11  ;;  %v1112_v59 = vmax.f32 %v1048_v20, 0.0  ;;  %v1144_v58 = vmax.f32 %v1080_v16, 0.0  ;;  %v919_v18 = vmul.f32 %v1509_v36, %v2098_v48  ;;  %v951_v19 = vmul.f32 %v1541_v10, %v2098_v48 }
  0xec   :  { %v1051_v6 = vadd.f32 %v2129_v33, %v980_v17  ;;  %v1083_v7 = vadd.f32 %v2129_v33, %v1012_v9  ;;  %v978_v32 = vadd.f32 %v914_v39, %v1862_v26  ;;  %v1010_v3 = vadd.f32 %v946_v61, %v1865_v27  ;;  %v667_v37 = vpop.f32.mrf.mxu0  ;;  %v795_v5 = vpop.f32.mrf.mxu1 }
  0xed   :  { %1176 = vst [vmem:[%s2546_s7] sm:$0xff] %v1112_v59  ;;  %1208 = vst [vmem:[%s2546_s7 + $0x100] sm:$0xff] %v1144_v58  ;;  %v983_v4 = vadd.f32 %v919_v18, %v1868_v30  ;;  %v1015_v60 = vadd.f32 %v951_v19, %v1871_v31  ;;  %v917_v8 = vmul.f32 %v2098_v48, %v667_v37 }
  0xee   :  { %v949_v26 = vmul.f32 %v2098_v48, %v795_v5  ;;  %v1115_v11 = vmax.f32 %v1051_v6, 0.0  ;;  %v1147_v27 = vmax.f32 %v1083_v7, 0.0  ;;  %v1049_v20 = vadd.f32 %v2129_v33, %v978_v32  ;;  %v1510_v17 = vpop.f32.mrf.mxu0  ;;  %v1542_v9 = vpop.f32.mrf.mxu1 }
  0xef   :  { %v1081_v16 = vadd.f32 %v2129_v33, %v1010_v3  ;;  %v1054_v39 = vadd.f32 %v2129_v33, %v983_v4  ;;  %v1086_v61 = vadd.f32 %v2129_v33, %v1015_v60  ;;  %v981_v30 = vadd.f32 %v917_v8, %v1882_v40 }
  0xf0   :  { %v1013_v31 = vadd.f32 %v949_v26, %v1885_v41  ;;  %1179 = vst [vmem:[%s2546_s7 + $0x18] sm:$0xff] %v1115_v11  ;;  %1211 = vst [vmem:[%s2546_s7 + $0x118] sm:$0xff] %v1147_v27  ;;  %v1113_v36 = vmax.f32 %v1049_v20, 0.0  ;;  %v920_v59 = vmul.f32 %v1510_v17, %v2098_v48  ;;  %v952_v58 = vmul.f32 %v1542_v9, %v2098_v48  ;;  %v670_v18 = vpop.f32.mrf.mxu0  ;;  %v798_v19 = vpop.f32.mrf.mxu1 }
  0xf1   :  { %v1145_v10 = vmax.f32 %v1081_v16, 0.0  ;;  %v1118_v6 = vmax.f32 %v1054_v39, 0.0  ;;  %v1150_v40 = vmax.f32 %v1086_v61, 0.0  ;;  %v1052_v41 = vadd.f32 %v2129_v33, %v981_v30 }
  0xf2   :  { %v1084_v7 = vadd.f32 %v2129_v33, %v1013_v31  ;;  %1177 = vst [vmem:[%s2546_s7 + $0x8] sm:$0xff] %v1113_v36  ;;  %v984_v32 = vadd.f32 %v920_v59, %v1888_v42  ;;  %v1016_v3 = vadd.f32 %v952_v58, %v1891_v43  ;;  %v918_v37 = vmul.f32 %v2098_v48, %v670_v18  ;;  %v1513_v4 = vpop.f32.mrf.mxu0  ;;  %v1545_v60 = vpop.f32.mrf.mxu1 }
  0xf3   :  { %1209 = vst [vmem:[%s2546_s7 + $0x108] sm:$0xff] %v1145_v10  ;;  %v950_v5 = vmul.f32 %v2098_v48, %v798_v19  ;;  %1182 = vst [vmem:[%s2546_s7 + $0x30] sm:$0xff] %v1118_v6  ;;  %v1116_v8 = vmax.f32 %v1052_v41, 0.0  ;;  %v923_v42 = vmul.f32 %v1513_v4, %v2098_v48  ;;  %v955_v43 = vmul.f32 %v1545_v60, %v2098_v48 }
  0xf4   :  { %1214 = vst [vmem:[%s2546_s7 + $0x130] sm:$0xff] %v1150_v40  ;;  %v1148_v26 = vmax.f32 %v1084_v7, 0.0  ;;  %v1055_v11 = vadd.f32 %v2129_v33, %v984_v32  ;;  %v1087_v27 = vadd.f32 %v2129_v33, %v1016_v3  ;;  %v982_v20 = vadd.f32 %v918_v37, %v1902_v51  ;;  %v683_v17 = vpop.f32.mrf.mxu0  ;;  %v811_v9 = vpop.f32.mrf.mxu1 }
  0xf5   :  { %v1014_v16 = vadd.f32 %v950_v5, %v1905_v52  ;;  %1180 = vst [vmem:[%s2546_s7 + $0x20] sm:$0xff] %v1116_v8  ;;  %v987_v39 = vadd.f32 %v923_v42, %v1912_v0  ;;  %v1019_v61 = vadd.f32 %v955_v43, %v1915_v1  ;;  %v921_v30 = vmul.f32 %v2098_v48, %v683_v17 }
  0xf6   :  { %1212 = vst [vmem:[%s2546_s7 + $0x120] sm:$0xff] %v1148_v26  ;;  %v953_v51 = vmul.f32 %v2098_v48, %v811_v9  ;;  %v1119_v31 = vmax.f32 %v1055_v11, 0.0  ;;  %v1151_v52 = vmax.f32 %v1087_v27, 0.0  ;;  %v1053_v36 = vadd.f32 %v2129_v33, %v982_v20  ;;  %v1514_v59 = vpop.f32.mrf.mxu0  ;;  %v1546_v58 = vpop.f32.mrf.mxu1 }
  0xf7   :  { %v1085_v10 = vadd.f32 %v2129_v33, %v1014_v16  ;;  %v1058_v18 = vadd.f32 %v2129_v33, %v987_v39  ;;  %v1090_v19 = vadd.f32 %v2129_v33, %v1019_v61  ;;  %v985_v0 = vadd.f32 %v921_v30, %v1928_v12 }
  0xf8   :  { %v1017_v1 = vadd.f32 %v953_v51, %v1931_v13  ;;  %1183 = vst [vmem:[%s2546_s7 + $0x38] sm:$0xff] %v1119_v31  ;;  %1215 = vst [vmem:[%s2546_s7 + $0x138] sm:$0xff] %v1151_v52  ;;  %v1117_v6 = vmax.f32 %v1053_v36, 0.0  ;;  %v924_v41 = vmul.f32 %v1514_v59, %v2098_v48  ;;  %v956_v7 = vmul.f32 %v1546_v58, %v2098_v48  ;;  %v686_v32 = vpop.f32.mrf.mxu0  ;;  %v814_v3 = vpop.f32.mrf.mxu1 }
  0xf9   :  { %v1149_v40 = vmax.f32 %v1085_v10, 0.0  ;;  %v1122_v37 = vmax.f32 %v1058_v18, 0.0  ;;  %v1154_v12 = vmax.f32 %v1090_v19, 0.0  ;;  %v1056_v13 = vadd.f32 %v2129_v33, %v985_v0 }
  0xfa   :  { %v1088_v5 = vadd.f32 %v2129_v33, %v1017_v1  ;;  %1181 = vst [vmem:[%s2546_s7 + $0x28] sm:$0xff] %v1117_v6  ;;  %v988_v4 = vadd.f32 %v924_v41, %v1934_v14  ;;  %v1020_v60 = vadd.f32 %v956_v7, %v1937_v15  ;;  %v922_v8 = vmul.f32 %v2098_v48, %v686_v32  ;;  %v1517_v42 = vpop.f32.mrf.mxu0  ;;  %v1549_v43 = vpop.f32.mrf.mxu1 }
  0xfb   :  { %1213 = vst [vmem:[%s2546_s7 + $0x128] sm:$0xff] %v1149_v40  ;;  %v954_v26 = vmul.f32 %v2098_v48, %v814_v3  ;;  %1186 = vst [vmem:[%s2546_s7 + $0x50] sm:$0xff] %v1122_v37  ;;  %v1120_v11 = vmax.f32 %v1056_v13, 0.0  ;;  %v927_v14 = vmul.f32 %v1517_v42, %v2098_v48  ;;  %v959_v15 = vmul.f32 %v1549_v43, %v2098_v48 }
  0xfc   :  { %1218 = vst [vmem:[%s2546_s7 + $0x150] sm:$0xff] %v1154_v12  ;;  %v1152_v27 = vmax.f32 %v1088_v5, 0.0  ;;  %v1059_v20 = vadd.f32 %v2129_v33, %v988_v4  ;;  %v1091_v16 = vadd.f32 %v2129_v33, %v1020_v60  ;;  %v986_v17 = vadd.f32 %v922_v8, %v1950_v28  ;;  %v699_v39 = vpop.f32.mrf.mxu0  ;;  %v827_v61 = vpop.f32.mrf.mxu1 }
  0xfd   :  { %v1018_v9 = vadd.f32 %v954_v26, %v1953_v29  ;;  %1184 = vst [vmem:[%s2546_s7 + $0x40] sm:$0xff] %v1120_v11  ;;  %v991_v30 = vadd.f32 %v927_v14, %v1956_v34  ;;  %v1023_v51 = vadd.f32 %v959_v15, %v1959_v35  ;;  %v925_v31 = vmul.f32 %v2098_v48, %v699_v39 }
  0xfe   :  { %1216 = vst [vmem:[%s2546_s7 + $0x140] sm:$0xff] %v1152_v27  ;;  %v957_v28 = vmul.f32 %v2098_v48, %v827_v61  ;;  %v1123_v52 = vmax.f32 %v1059_v20, 0.0  ;;  %v1155_v29 = vmax.f32 %v1091_v16, 0.0  ;;  %v1057_v36 = vadd.f32 %v2129_v33, %v986_v17  ;;  %v1518_v59 = vpop.f32.mrf.mxu0  ;;  %v1550_v58 = vpop.f32.mrf.mxu1 }
  0xff   :  { %v1089_v10 = vadd.f32 %v2129_v33, %v1018_v9  ;;  %v1062_v18 = vadd.f32 %v2129_v33, %v991_v30  ;;  %v1094_v19 = vadd.f32 %v2129_v33, %v1023_v51  ;;  %v989_v34 = vadd.f32 %v925_v31, %v1970_v49 }
 0x100   :  { %v1021_v35 = vadd.f32 %v957_v28, %v1973_v50  ;;  %1187 = vst [vmem:[%s2546_s7 + $0x58] sm:$0xff] %v1123_v52  ;;  %1219 = vst [vmem:[%s2546_s7 + $0x158] sm:$0xff] %v1155_v29  ;;  %v1121_v0 = vmax.f32 %v1057_v36, 0.0  ;;  %v928_v6 = vmul.f32 %v1518_v59, %v2098_v48  ;;  %v960_v40 = vmul.f32 %v1550_v58, %v2098_v48  ;;  %v702_v41 = vpop.f32.mrf.mxu0  ;;  %v830_v7 = vpop.f32.mrf.mxu1 }
 0x101   :  { %v1153_v1 = vmax.f32 %v1089_v10, 0.0  ;;  %v1126_v32 = vmax.f32 %v1062_v18, 0.0  ;;  %v1158_v49 = vmax.f32 %v1094_v19, 0.0  ;;  %v1060_v50 = vadd.f32 %v2129_v33, %v989_v34  ;;  %v2565_v34 = vld [vmem:[#allocation2_spill] sm:$0xff] }
 0x102   :  { %v1092_v3 = vadd.f32 %v2129_v33, %v1021_v35  ;;  %1185 = vst [vmem:[%s2546_s7 + $0x48] sm:$0xff] %v1121_v0  ;;  %v992_v37 = vadd.f32 %v928_v6, %v1976_v53  ;;  %v1024_v12 = vadd.f32 %v960_v40, %v1979_v54  ;;  %v926_v13 = vmul.f32 %v2098_v48, %v702_v41  ;;  %v1521_v4 = vpop.f32.mrf.mxu0  ;;  %v1553_v60 = vpop.f32.mrf.mxu1  ;;  %v2566_v0 = vld [vmem:[#allocation3_spill] sm:$0xff] }
 0x103   :  { %1217 = vst [vmem:[%s2546_s7 + $0x148] sm:$0xff] %v1153_v1  ;;  %v958_v5 = vmul.f32 %v2098_v48, %v830_v7  ;;  %1190 = vst [vmem:[%s2546_s7 + $0x70] sm:$0xff] %v1126_v32  ;;  %v1124_v8 = vmax.f32 %v1060_v50, 0.0  ;;  %v931_v53 = vmul.f32 %v1521_v4, %v2098_v48  ;;  %v963_v54 = vmul.f32 %v1553_v60, %v2098_v48  ;;  %v2568_v4 = vld [vmem:[#allocation5_spill] sm:$0xff] }
 0x104   :  { %1222 = vst [vmem:[%s2546_s7 + $0x170] sm:$0xff] %v1158_v49  ;;  %v1156_v26 = vmax.f32 %v1092_v3, 0.0  ;;  %v1063_v42 = vadd.f32 %v2129_v33, %v992_v37  ;;  %v1095_v43 = vadd.f32 %v2129_v33, %v1024_v12  ;;  %v990_v11 = vadd.f32 %v926_v13, %v1990_v62  ;;  %v715_v14 = vpop.f32.mrf.mxu0  ;;  %v843_v15 = vpop.f32.mrf.mxu1  ;;  %v2567_v13 = vld [vmem:[#allocation4_spill] sm:$0xff] }
 0x105   :  { %v1022_v27 = vadd.f32 %v958_v5, %v1993_v63  ;;  %1188 = vst [vmem:[%s2546_s7 + $0x60] sm:$0xff] %v1124_v8  ;;  %v995_v20 = vadd.f32 %v931_v53, %v2000_v22  ;;  %v1027_v16 = vadd.f32 %v963_v54, %v2003_v23  ;;  %v929_v17 = vmul.f32 %v2098_v48, %v715_v14  ;;  %v2569_v53 = vld [vmem:[#allocation6_spill] sm:$0xff] }
 0x106   :  { %1220 = vst [vmem:[%s2546_s7 + $0x160] sm:$0xff] %v1156_v26  ;;  %v961_v62 = vmul.f32 %v2098_v48, %v843_v15  ;;  %v1127_v9 = vmax.f32 %v1063_v42, 0.0  ;;  %v1159_v63 = vmax.f32 %v1095_v43, 0.0  ;;  %v1061_v39 = vadd.f32 %v2129_v33, %v990_v11  ;;  %v1522_v30 = vpop.f32.mrf.mxu0  ;;  %v1554_v51 = vpop.f32.mrf.mxu1  ;;  %v2570_v42 = vld [vmem:[#allocation7_spill] sm:$0xff] }
 0x107   :  { %v1093_v61 = vadd.f32 %v2129_v33, %v1022_v27  ;;  %v1066_v31 = vadd.f32 %v2129_v33, %v995_v20  ;;  %v1098_v28 = vadd.f32 %v2129_v33, %v1027_v16  ;;  %v993_v22 = vadd.f32 %v929_v17, %v2016_v44 }
 0x108   :  { %v1025_v23 = vadd.f32 %v961_v62, %v2019_v45  ;;  %1191 = vst [vmem:[%s2546_s7 + $0x78] sm:$0xff] %v1127_v9  ;;  %1223 = vst [vmem:[%s2546_s7 + $0x178] sm:$0xff] %v1159_v63  ;;  %v1125_v52 = vmax.f32 %v1061_v39, 0.0  ;;  %v932_v36 = vmul.f32 %v1522_v30, %v2098_v48  ;;  %v964_v10 = vmul.f32 %v1554_v51, %v2098_v48  ;;  %v718_v59 = vpop.f32.mrf.mxu0  ;;  %v846_v58 = vpop.f32.mrf.mxu1  ;;  %v2571_v39 = vld [vmem:[#allocation8_spill] sm:$0xff]  ;;  %v2572_v30 = vld [vmem:[#allocation9_spill] sm:$0xff] }
 0x109   :  { %v1157_v29 = vmax.f32 %v1093_v61, 0.0  ;;  %v1130_v18 = vmax.f32 %v1066_v31, 0.0  ;;  %v1162_v44 = vmax.f32 %v1098_v28, 0.0  ;;  %v1064_v45 = vadd.f32 %v2129_v33, %v993_v22 }
 0x10a   :  { %v1096_v19 = vadd.f32 %v2129_v33, %v1025_v23  ;;  %1189 = vst [vmem:[%s2546_s7 + $0x68] sm:$0xff] %v1125_v52  ;;  %v996_v35 = vadd.f32 %v932_v36, %v2565_v34  ;;  %v1028_v1 = vadd.f32 %v964_v10, %v2566_v0  ;;  %v930_v6 = vmul.f32 %v2098_v48, %v718_v59  ;;  %v1525_v41 = vpop.f32.mrf.mxu0  ;;  %v1557_v7 = vpop.f32.mrf.mxu1 }
 0x10b   :  { %1221 = vst [vmem:[%s2546_s7 + $0x168] sm:$0xff] %v1157_v29  ;;  %v962_v40 = vmul.f32 %v2098_v48, %v846_v58  ;;  %1194 = vst [vmem:[%s2546_s7 + $0x90] sm:$0xff] %v1130_v18  ;;  %v1128_v32 = vmax.f32 %v1064_v45, 0.0  ;;  %v935_v50 = vmul.f32 %v1525_v41, %v2098_v48  ;;  %v967_v3 = vmul.f32 %v1557_v7, %v2098_v48  ;;  %v2573_v18 = vld [vmem:[#allocation10_spill] sm:$0xff]  ;;  %v2574_v45 = vld [vmem:[#allocation11_spill] sm:$0xff] }
 0x10c   :  { %1226 = vst [vmem:[%s2546_s7 + $0x190] sm:$0xff] %v1162_v44  ;;  %v1160_v49 = vmax.f32 %v1096_v19, 0.0  ;;  %v1067_v37 = vadd.f32 %v2129_v33, %v996_v35  ;;  %v1099_v12 = vadd.f32 %v2129_v33, %v1028_v1  ;;  %v994_v5 = vadd.f32 %v930_v6, %v2567_v13  ;;  %v731_v8 = vpop.f32.mrf.mxu0  ;;  %v859_v26 = vpop.f32.mrf.mxu1 }
 0x10d   :  { %v1026_v60 = vadd.f32 %v962_v40, %v2568_v4  ;;  %1192 = vst [vmem:[%s2546_s7 + $0x80] sm:$0xff] %v1128_v32  ;;  %v999_v54 = vadd.f32 %v935_v50, %v2569_v53  ;;  %v1031_v43 = vadd.f32 %v967_v3, %v2570_v42  ;;  %v933_v11 = vmul.f32 %v2098_v48, %v731_v8  ;;  %v2575_v3 = vld [vmem:[#allocation12_spill] sm:$0xff] }
 0x10e   :  { %1224 = vst [vmem:[%s2546_s7 + $0x180] sm:$0xff] %v1160_v49  ;;  %v965_v27 = vmul.f32 %v2098_v48, %v859_v26  ;;  %v1131_v14 = vmax.f32 %v1067_v37, 0.0  ;;  %v1163_v15 = vmax.f32 %v1099_v12, 0.0  ;;  %v1065_v20 = vadd.f32 %v2129_v33, %v994_v5  ;;  %v1526_v17 = vpop.f32.mrf.mxu0  ;;  %v1558_v62 = vpop.f32.mrf.mxu1  ;;  %v2576_v5 = vld [vmem:[#allocation13_spill] sm:$0xff] }
 0x10f   :  { %v1097_v16 = vadd.f32 %v2129_v33, %v1026_v60  ;;  %v1070_v9 = vadd.f32 %v2129_v33, %v999_v54  ;;  %v1102_v63 = vadd.f32 %v2129_v33, %v1031_v43  ;;  %v997_v61 = vadd.f32 %v933_v11, %v2571_v39  ;;  %v2577_v60 = vld [vmem:[#allocation14_spill] sm:$0xff] }
 0x110   :  { %v1029_v51 = vadd.f32 %v965_v27, %v2572_v30  ;;  %1195 = vst [vmem:[%s2546_s7 + $0x98] sm:$0xff] %v1131_v14  ;;  %1227 = vst [vmem:[%s2546_s7 + $0x198] sm:$0xff] %v1163_v15  ;;  %v1129_v31 = vmax.f32 %v1065_v20, 0.0  ;;  %v936_v22 = vmul.f32 %v1526_v17, %v2098_v48  ;;  %v968_v23 = vmul.f32 %v1558_v62, %v2098_v48  ;;  %v734_v52 = vpop.f32.mrf.mxu0  ;;  %v862_v29 = vpop.f32.mrf.mxu1 }
 0x111   :  { %v1161_v28 = vmax.f32 %v1097_v16, 0.0  ;;  %v1134_v36 = vmax.f32 %v1070_v9, 0.0  ;;  %v1166_v10 = vmax.f32 %v1102_v63, 0.0  ;;  %v1068_v59 = vadd.f32 %v2129_v33, %v997_v61  ;;  %v2578_v16 = vld [vmem:[#allocation15_spill] sm:$0xff] }
 0x112   :  { %v1100_v58 = vadd.f32 %v2129_v33, %v1029_v51  ;;  %1193 = vst [vmem:[%s2546_s7 + $0x88] sm:$0xff] %v1129_v31  ;;  %v1000_v44 = vadd.f32 %v936_v22, %v2573_v18  ;;  %v1032_v19 = vadd.f32 %v968_v23, %v2574_v45  ;;  %v934_v34 = vmul.f32 %v2098_v48, %v734_v52  ;;  %v1529_v0 = vpop.f32.mrf.mxu0  ;;  %v1561_v1 = vpop.f32.mrf.mxu1  ;;  %v2579_v22 = vld [vmem:[#allocation16_spill] sm:$0xff]  ;;  %v2580_v52 = vld [vmem:[#allocation17_spill] sm:$0xff] }
 0x113   :  { %1225 = vst [vmem:[%s2546_s7 + $0x188] sm:$0xff] %v1161_v28  ;;  %v966_v35 = vmul.f32 %v2098_v48, %v862_v29  ;;  %1198 = vst [vmem:[%s2546_s7 + $0xb0] sm:$0xff] %v1134_v36  ;;  %v1132_v6 = vmax.f32 %v1068_v59, 0.0  ;;  %v939_v41 = vmul.f32 %v1529_v0, %v2098_v48  ;;  %v971_v7 = vmul.f32 %v1561_v1, %v2098_v48  ;;  %v2581_v0 = vld [vmem:[#allocation18_spill] sm:$0xff] }
 0x114   :  { %1230 = vst [vmem:[%s2546_s7 + $0x1b0] sm:$0xff] %v1166_v10  ;;  %v1164_v40 = vmax.f32 %v1100_v58, 0.0  ;;  %v1071_v32 = vadd.f32 %v2129_v33, %v1000_v44  ;;  %v1103_v49 = vadd.f32 %v2129_v33, %v1032_v19  ;;  %v998_v50 = vadd.f32 %v934_v34, %v2078_v57  ;;  %v747_v12 = vpop.f32.mrf.mxu0  ;;  %v875_v13 = vpop.f32.mrf.mxu1 }
 0x115   :  { %v1030_v37 = vadd.f32 %v966_v35, %v2575_v3  ;;  %1196 = vst [vmem:[%s2546_s7 + $0xa0] sm:$0xff] %v1132_v6  ;;  %v1003_v4 = vadd.f32 %v939_v41, %v2576_v5  ;;  %v1035_v8 = vadd.f32 %v971_v7, %v2577_v60  ;;  %v937_v26 = vmul.f32 %v2098_v48, %v747_v12  ;;  %v2582_v6 = vld [vmem:[#allocation19_spill] sm:$0xff] }
 0x116   :  { %1228 = vst [vmem:[%s2546_s7 + $0x1a0] sm:$0xff] %v1164_v40  ;;  %v969_v57 = vmul.f32 %v2098_v48, %v875_v13  ;;  %v1135_v53 = vmax.f32 %v1071_v32, 0.0  ;;  %v1167_v54 = vmax.f32 %v1103_v49, 0.0  ;;  %v1069_v42 = vadd.f32 %v2129_v33, %v998_v50  ;;  %v1530_v11 = vpop.f32.mrf.mxu0  ;;  %v1562_v27 = vpop.f32.mrf.mxu1 }
 0x117   :  { %v1101_v43 = vadd.f32 %v2129_v33, %v1030_v37  ;;  %v1074_v14 = vadd.f32 %v2129_v33, %v1003_v4  ;;  %v1106_v15 = vadd.f32 %v2129_v33, %v1035_v8  ;;  %v1001_v20 = vadd.f32 %v937_v26, %v2103_v38 }
 0x118   :  { %v1033_v17 = vadd.f32 %v969_v57, %v2578_v16  ;;  %1199 = vst [vmem:[%s2546_s7 + $0xb8] sm:$0xff] %v1135_v53  ;;  %1231 = vst [vmem:[%s2546_s7 + $0x1b8] sm:$0xff] %v1167_v54  ;;  %v1133_v62 = vmax.f32 %v1069_v42, 0.0  ;;  %v940_v63 = vmul.f32 %v1530_v11, %v2098_v48  ;;  %v972_v39 = vmul.f32 %v1562_v27, %v2098_v48  ;;  %v750_v61 = vpop.f32.mrf.mxu0  ;;  %v878_v30 = vpop.f32.mrf.mxu1 }
 0x119   :  { %v1165_v9 = vmax.f32 %v1101_v43, 0.0  ;;  %v1138_v51 = vmax.f32 %v1074_v14, 0.0  ;;  %v1170_v38 = vmax.f32 %v1106_v15, 0.0  ;;  %v1072_v31 = vadd.f32 %v2129_v33, %v1001_v20 }
 0x11a   :  { %v1104_v28 = vadd.f32 %v2129_v33, %v1033_v17  ;;  %1197 = vst [vmem:[%s2546_s7 + $0xa8] sm:$0xff] %v1133_v62  ;;  %v1004_v23 = vadd.f32 %v940_v63, %v2579_v22  ;;  %v1036_v29 = vadd.f32 %v972_v39, %v2580_v52  ;;  %v938_v36 = vmul.f32 %v2098_v48, %v750_v61  ;;  %v1533_v59 = vpop.f32.mrf.mxu0  ;;  %v1565_v58 = vpop.f32.mrf.mxu1 }
 0x11b   :  { %1229 = vst [vmem:[%s2546_s7 + $0x1a8] sm:$0xff] %v1165_v9  ;;  %v970_v10 = vmul.f32 %v2098_v48, %v878_v30  ;;  %1202 = vst [vmem:[%s2546_s7 + $0xd0] sm:$0xff] %v1138_v51  ;;  %v1136_v18 = vmax.f32 %v1072_v31, 0.0  ;;  %v943_v45 = vmul.f32 %v1533_v59, %v2098_v48  ;;  %v975_v19 = vmul.f32 %v1565_v58, %v2098_v48 }
 0x11c   :  { %1234 = vst [vmem:[%s2546_s7 + $0x1d0] sm:$0xff] %v1170_v38  ;;  %v1168_v44 = vmax.f32 %v1104_v28, 0.0  ;;  %v1075_v34 = vadd.f32 %v2129_v33, %v1004_v23  ;;  %v1107_v35 = vadd.f32 %v2129_v33, %v1036_v29  ;;  %v1002_v1 = vadd.f32 %v938_v36, %v2581_v0  ;;  %v763_v41 = vpop.f32.mrf.mxu0  ;;  %v891_v7 = vpop.f32.mrf.mxu1 }
 0x11d   :  { %v1034_v40 = vadd.f32 %v970_v10, %v2582_v6  ;;  %1200 = vst [vmem:[%s2546_s7 + $0xc0] sm:$0xff] %v1136_v18  ;;  %v1007_v32 = vadd.f32 %v943_v45, %v2132_v2  ;;  %v1039_v49 = vadd.f32 %v975_v19, %v2135_v47  ;;  %v941_v50 = vmul.f32 %v2098_v48, %v763_v41 }
 0x11e   :  { %1232 = vst [vmem:[%s2546_s7 + $0x1c0] sm:$0xff] %v1168_v44  ;;  %v973_v3 = vmul.f32 %v2098_v48, %v891_v7  ;;  %v1139_v37 = vmax.f32 %v1075_v34, 0.0  ;;  %v1171_v12 = vmax.f32 %v1107_v35, 0.0  ;;  %v1073_v13 = vadd.f32 %v2129_v33, %v1002_v1  ;;  %v1534_v4 = vpop.f32.mrf.mxu0  ;;  %v1566_v60 = vpop.f32.mrf.mxu1 }
 0x11f   :  { %v1105_v5 = vadd.f32 %v2129_v33, %v1034_v40  ;;  %v1078_v8 = vadd.f32 %v2129_v33, %v1007_v32  ;;  %v1110_v26 = vadd.f32 %v2129_v33, %v1039_v49  ;;  %v1005_v2 = vadd.f32 %v941_v50, %v2144_v21 }
 0x120   :  { %v1037_v47 = vadd.f32 %v973_v3, %v2147_v24  ;;  %1203 = vst [vmem:[%s2546_s7 + $0xd8] sm:$0xff] %v1139_v37  ;;  %1235 = vst [vmem:[%s2546_s7 + $0x1d8] sm:$0xff] %v1171_v12  ;;  %v1137_v57 = vmax.f32 %v1073_v13, 0.0  ;;  %v944_v54 = vmul.f32 %v1534_v4, %v2098_v48  ;;  %v976_v42 = vmul.f32 %v1566_v60, %v2098_v48  ;;  %v766_v43 = vpop.f32.mrf.mxu0  ;;  %v894_v11 = vpop.f32.mrf.mxu1 }
 0x121   :  { %v1169_v53 = vmax.f32 %v1105_v5, 0.0  ;;  %v1142_v27 = vmax.f32 %v1078_v8, 0.0  ;;  %v1174_v21 = vmax.f32 %v1110_v26, 0.0  ;;  %v1076_v24 = vadd.f32 %v2129_v33, %v1005_v2 }
 0x122   :  { %v1108_v14 = vadd.f32 %v2129_v33, %v1037_v47  ;;  %1201 = vst [vmem:[%s2546_s7 + $0xc8] sm:$0xff] %v1137_v57  ;;  %v1008_v15 = vadd.f32 %v944_v54, %v2150_v25  ;;  %v1040_v20 = vadd.f32 %v976_v42, %v2153_v46  ;;  %v942_v16 = vmul.f32 %v2098_v48, %v766_v43 }
 0x123   :  { %1233 = vst [vmem:[%s2546_s7 + $0x1c8] sm:$0xff] %v1169_v53  ;;  %v974_v17 = vmul.f32 %v2098_v48, %v894_v11  ;;  %1206 = vst [vmem:[%s2546_s7 + $0xf0] sm:$0xff] %v1142_v27  ;;  %v1140_v62 = vmax.f32 %v1076_v24, 0.0 }
 0x124   :  { %1238 = vst [vmem:[%s2546_s7 + $0x1f0] sm:$0xff] %v1174_v21  ;;  %v1172_v9 = vmax.f32 %v1108_v14, 0.0  ;;  %v1079_v63 = vadd.f32 %v2129_v33, %v1008_v15  ;;  %v1111_v25 = vadd.f32 %v2129_v33, %v1040_v20  ;;  %v1006_v46 = vadd.f32 %v942_v16, %v2162_v55 }
 0x125   :  { %v1038_v39 = vadd.f32 %v974_v17, %v2165_v56  ;;  %1204 = vst [vmem:[%s2546_s7 + $0xe0] sm:$0xff] %v1140_v62 }
 0x126   :  { %1236 = vst [vmem:[%s2546_s7 + $0x1e0] sm:$0xff] %v1172_v9  ;;  %v1143_v48 = vmax.f32 %v1079_v63, 0.0  ;;  %v1175_v61 = vmax.f32 %v1111_v25, 0.0  ;;  %v1077_v30 = vadd.f32 %v2129_v33, %v1006_v46 }
 0x127   :  { %v1109_v51 = vadd.f32 %v2129_v33, %v1038_v39 }
 0x128   :  { %1207 = vst [vmem:[%s2546_s7 + $0xf8] sm:$0xff] %v1143_v48  ;;  %1239 = vst [vmem:[%s2546_s7 + $0x1f8] sm:$0xff] %v1175_v61  ;;  %v1141_v55 = vmax.f32 %v1077_v30, 0.0 }
 0x129   :  { %v1173_v56 = vmax.f32 %v1109_v51, 0.0 }
 0x12a   :  { %1205 = vst [vmem:[%s2546_s7 + $0xe8] sm:$0xff] %v1141_v55 }
 0x12b   :  { %1237 = vst [vmem:[%s2546_s7 + $0x1e8] sm:$0xff] %v1173_v56 }

// kernel: basic_block_forward.3
= control target key start
LH: loop header
LB: loop body
LE: loop exit
PB: predicated region body
PF: predicated region fallthrough
CT: control target
= control target key end

     0   :  { %s4853_s15 = smov 0   ;;  %s6033_s0 = inlined_call_operand.vmem [shape: bf16[2,16,16,128], index: 0, kind: input, shape index: {}]   ;;  %s6034_s1 = inlined_call_operand.vmem [shape: bf16[1152,128], index: 1, kind: input, shape index: {}]   ;;  %s6035_s2 = inlined_call_operand.vmem [shape: bf16[128,128], index: 2, kind: input, shape index: {}]   ;;  %s6036_s3 = inlined_call_operand.vmem [shape: bf16[2,256,128], index: 3, kind: output, shape index: {0}]   ;;  %s6037_s4 = inlined_call_operand.vmem [shape: f32[2,8,128], index: 4, kind: output, shape index: {1}]  }
   0x1 LB: > { %s3691_s16 = sadd.s32 4294967295, %s4825_s15   ;;  %p3695_p0 = scmp.ge.s32.totalorder %s4825_s15, 1  ;;  %s4825_s15 = sphi %s4853_s15, %s15_s15  }
   0x2   : > { %p165_p1 = scmp.lt.s32.totalorder %s4825_s15, 3 }
   0x4   : > { %p166_p2 = pnand %p3695_p0, %p165_p1 }
   0x6   : > { %169 = sbr.rel (%p166_p2) target bundleno = 638 (0x27e), region = 32 }
   0xb   : > { %v4629_v0 = vld [vmem:[%s6034_s1 + $0x138] sm:$0xff]   ;;  %v4632_v3 = vld [vmem:[%s6034_s1 + $0x130] sm:$0xff]   ;;  %v4635_v6 = vld [vmem:[%s6034_s1 + $0x128] sm:$0xff]   ;;  %v4827_v7 = vmov 0   ;;  %p195_p3 = scmp.lt.s32.totalorder %s3691_s16, 1  ;;  %vm249_vm0 = vcmask 1040384  }
   0xc   : > { %v4630_v1 = vld [vmem:[%s6034_s1 + $0x178] sm:$0xff]   ;;  %3996 = vmatprep.subr.bf16.mxu0 %v4629_v0  ;;  %v4633_v4 = vld [vmem:[%s6034_s1 + $0x170] sm:$0xff]   ;;  %242 = vst [vmem:[#allocation2] sm:$0xf] %v4827_v7  ;;  %243 = vst [vmem:[#allocation2 + $0x4] sm:$0xf] %v4827_v7 }
   0xd   : > { %v4631_v2 = vld [vmem:[%s6034_s1 + $0xf8] sm:$0xff]   ;;  %4428 = vmatprep.subr.bf16.mxu1 %v4630_v1  ;;  %v4634_v5 = vld [vmem:[%s6034_s1 + $0xf0] sm:$0xff]   ;;  %244 = vst [vmem:[#allocation2 + $0x8] sm:$0x1] %v4827_v7  ;;  %246 = vst [vmem:[#allocation2 + $0xcc] sm:$0xf] %v4827_v7 }
   0xe   : > { %3997 = vmatpush3.bf16.msra.mxu0 %v4631_v2  ;;  %4429 = vmatpush3.bf16.msra.mxu1 %v4630_v1  ;;  %247 = vst [vmem:[#allocation2 + $0xd0] sm:$0xf] %v4827_v7  ;;  %248 = vst [vmem:[#allocation2 + $0xd4] sm:$0x1] %v4827_v7  ;;  %v4636_v8 = vld [vmem:[%s6034_s1 + $0x168] sm:$0xff]   ;;  %v4638_v10 = vld [vmem:[%s6034_s1 + $0x120] sm:$0xff]  }
   0xf   : > { %3998 = vmatprep.subr.bf16.mxu0 %v4632_v3  ;;  %4430 = vmatprep.subr.bf16.mxu1 %v4633_v4  ;;  %v4637_v9 = vld [vmem:[%s6034_s1 + $0xe8] sm:$0xff]   ;;  %v4639_v11 = vld [vmem:[%s6034_s1 + $0x160] sm:$0xff]   ;;  %v4641_v13 = vld [vmem:[%s6034_s1 + $0x118] sm:$0xff]   ;;  %s6065_s16 = smov (!%p195_p3, %s3691_s16), 1  ;;  %vm250_vm1 = vsmask.f32 256 }
  0x10   : > { %v4640_v12 = vld [vmem:[%s6034_s1 + $0xe0] sm:$0xff]   ;;  %v4642_v14 = vld [vmem:[%s6034_s1 + $0x158] sm:$0xff]   ;;  %v4644_v16 = vld [vmem:[%s6034_s1 + $0x110] sm:$0xff]   ;;  %s3867_s27 = sshll.u32 %s6065_s16, 7  ;;  %vm306_vm3 = vsmask.f32 7938 }
  0x11   : > { %v4643_v15 = vld [vmem:[%s6034_s1 + $0xd8] sm:$0xff]   ;;  %v4645_v17 = vld [vmem:[%s6034_s1 + $0x150] sm:$0xff]   ;;  %v4647_v19 = vld [vmem:[%s6034_s1 + $0x108] sm:$0xff]   ;;  %s4933_s10 = scalar_lea.vmem %s6033_s0, %s3867_s27  ;;  %vm685_vm5 = vcmask 1043456   ;;  %vm362_vm6 = vsmask.f32 4368  ;;  %s5944_s24 = scalar_lea.vmem %s6036_s3, %s3867_s27 }
  0x12   : > { %3999 = vmatpush3.bf16.msra.mxu0 %v4634_v5  ;;  %4431 = vmatpush3.bf16.msra.mxu1 %v4633_v4  ;;  %v4646_v18 = vld [vmem:[%s6034_s1 + $0xd0] sm:$0xff]   ;;  %v4648_v20 = vld [vmem:[%s6034_s1 + $0x148] sm:$0xff]   ;;  %v4650_v22 = vld [vmem:[%s6034_s1 + $0x100] sm:$0xff]   ;;  %vm1063_vm9 = vsmask.f32 7424  ;;  %vm2278_vm10 = vcmask 1046528  }
  0x13   : > { %4000 = vmatprep.subr.bf16.mxu0 %v4635_v6  ;;  %4432 = vmatprep.subr.bf16.mxu1 %v4636_v8  ;;  %v4649_v21 = vld [vmem:[%s6034_s1 + $0xc8] sm:$0xff]   ;;  %v4651_v23 = vld [vmem:[%s6034_s1 + $0x140] sm:$0xff]   ;;  %vm4948_vm2 = vmand %vm249_vm0, %vm250_vm1  ;;  %vm3432_vm11 = vcmask 1041408   ;;  %vm3434_vm12 = vcmask 1042432   ;;  %s3700_s27 = sshll.u32 %s6065_s16, 3  ;;  %vm3438_vm13 = vcmask 1044480  }
  0x14   : > { %v210_v24 = vld [vmem:[%s4933_s10] sm:$0xf]  ;;  %v211_v25 = vld [vmem:[%s4933_s10 + $0x4] sm:$0xf]  ;;  %v255_v27 = vld [vmem:[#allocation2 + $0xc] sm:$0x1]  ;;  %s208_s28 = scalar_lea.vmem %s6037_s4, %s3700_s27 }
  0x15   : > { %v311_v28 = vld [vmem:[#allocation2 + $0x14] sm:$0x1]  ;;  %v4652_v29 = vld [vmem:[%s6034_s1 + $0xc0] sm:$0xff]   ;;  %v256_v30 = vsel %vm4948_vm2, 0, %v255_v27  ;;  %vm4959_vm4 = vmand %vm249_vm0, %vm306_vm3  ;;  %v365_v32 = vshrl.u32 %v210_v24, 16  ;;  %v368_v33 = vshll.u32 %v210_v24, 16 }
  0x16   : > { %4001 = vmatpush3.bf16.msra.mxu0 %v4637_v9  ;;  %4433 = vmatpush3.bf16.msra.mxu1 %v4636_v8  ;;  %257 = vst [vmem:[#allocation2 + $0xc] sm:$0x1] %v256_v30  ;;  %v312_v34 = vsel %vm4959_vm4, 0, %v311_v28  ;;  %v373_v35 = vshrl.u32 %v211_v25, 16  ;;  %v376_v36 = vshll.u32 %v211_v25, 16  ;;  %v4968_v37 = vld [vmem:[%s6034_s1 + $0xb8] sm:$0xff]   ;;  %vm4977_vm7 = vmor %vm250_vm1, %vm362_vm6 }
  0x17   : > { %4002 = vmatprep.subr.bf16.mxu0 %v4638_v10  ;;  %4434 = vmatprep.subr.bf16.mxu1 %v4639_v11  ;;  %313 = vst [vmem:[#allocation2 + $0x14] sm:$0x1] %v312_v34  ;;  %v367_v38 = vrot.slane %v365_v32, 7  ;;  %v212_v39 = vld [vmem:[%s4933_s10 + $0x8] sm:$0xf]  ;;  %v4662_v41 = vld [vmem:[%s6034_s1 + $0x78] sm:$0xff]   ;;  %vm4987_vm8 = vmand %vm685_vm5, %vm306_vm3 }
  0x18   : > { %v213_v40 = vld [vmem:[%s4933_s10 + $0xc] sm:$0xf]  ;;  %v375_v42 = vrot.slane %v373_v35, 7  ;;  %v258_v43 = vld [vmem:[#allocation2 + $0x18] sm:$0x1]  ;;  %v382_v45 = vshrl.u32 %v212_v39, 16 }
  0x19   : > { %v314_v44 = vld [vmem:[#allocation2 + $0x20] sm:$0x1]  ;;  %v370_v47 = vor.u32 %v368_v33, %v367_v38  ;;  %v371_v48 = vrot.slane %v367_v38, 4  ;;  %v259_v49 = vsel %vm4948_vm2, 0, %v258_v43  ;;  %v385_v55 = vshll.u32 %v212_v39, 16 }
  0x1a   : > { %4003 = vmatpush3.bf16.msra.mxu0 %v4640_v12  ;;  %4435 = vmatpush3.bf16.msra.mxu1 %v4639_v11  ;;  %v315_v50 = vsel %vm4959_vm4, 0, %v314_v44  ;;  %v252_v51 = vld [vmem:[#allocation2] sm:$0x1]  ;;  %v378_v52 = vor.u32 %v376_v36, %v375_v42  ;;  %v380_v53 = vrot.slane %v375_v42, 4  ;;  %260 = vst [vmem:[#allocation2 + $0x18] sm:$0x1] %v259_v49 }
  0x1b   : > { %4004 = vmatprep.subr.bf16.mxu0 %v4641_v13  ;;  %4436 = vmatprep.subr.bf16.mxu1 %v4642_v14  ;;  %316 = vst [vmem:[#allocation2 + $0x20] sm:$0x1] %v315_v50  ;;  %v384_v54 = vrot.slane %v382_v45, 7  ;;  %v308_v56 = vld [vmem:[#allocation2 + $0x8] sm:$0x1]  ;;  %v390_v58 = vshrl.u32 %v213_v40, 16 }
  0x1c   : > { %v393_v59 = vshll.u32 %v213_v40, 16  ;;  %v253_v60 = vsel %vm4948_vm2, 0, %v252_v51  ;;  %v309_v61 = vsel %vm4959_vm4, 0, %v308_v56  ;;  %v379_v62 = vsel %vm4977_vm7, %v371_v48, %v378_v52  ;;  %v214_v0 = vld [vmem:[%s4933_s10 + $0x10] sm:$0xf] }
  0x1d   : > { %v388_v63 = vrot.slane %v384_v54, 4  ;;  %254 = vst [vmem:[#allocation2] sm:$0x1] %v253_v60  ;;  %310 = vst [vmem:[#allocation2 + $0x8] sm:$0x1] %v309_v61  ;;  %v392_v3 = vrot.slane %v390_v58, 7  ;;  %v387_v8 = vor.u32 %v385_v55, %v384_v54 }
  0x1e   : > { %4005 = vmatpush3.bf16.msra.mxu0 %v4643_v15  ;;  %4437 = vmatpush3.bf16.msra.mxu1 %v4642_v14  ;;  %v215_v1 = vld [vmem:[%s4933_s10 + $0x14] sm:$0xf]  ;;  %v687_v2 = vld [vmem:[#allocation2 + $0xc] sm:$0xf]  ;;  %690 = vst [vmem:[#allocation2 + $0x10] sm:$0xf] %v379_v62 }
  0x1f   : > { %4006 = vmatprep.subr.bf16.mxu0 %v4644_v16  ;;  %4438 = vmatprep.subr.bf16.mxu1 %v4645_v17  ;;  %v261_v4 = vld [vmem:[#allocation2 + $0x24] sm:$0x1]  ;;  %v399_v5 = vshrl.u32 %v214_v0, 16  ;;  %v688_v6 = vsel %vm4987_vm8, %v370_v47, %v687_v2  ;;  %v691_v7 = vld [vmem:[#allocation2 + $0x14] sm:$0x1]  ;;  %v402_v11 = vshll.u32 %v214_v0, 16  ;;  %v395_v13 = vor.u32 %v393_v59, %v392_v3 }
  0x20   : > { %v262_v9 = vsel %vm4948_vm2, 0, %v261_v4  ;;  %v317_v10 = vld [vmem:[#allocation2 + $0x2c] sm:$0x1]  ;;  %689 = vst [vmem:[#allocation2 + $0xc] sm:$0xf] %v688_v6  ;;  %v692_v12 = vsel %vm4948_vm2, %v380_v53, %v691_v7  ;;  %v397_v14 = vrot.slane %v392_v3, 4 }
  0x21   : > { %263 = vst [vmem:[#allocation2 + $0x24] sm:$0x1] %v262_v9  ;;  %v318_v15 = vsel %vm4959_vm4, 0, %v317_v10  ;;  %693 = vst [vmem:[#allocation2 + $0x14] sm:$0x1] %v692_v12  ;;  %v401_v16 = vrot.slane %v399_v5, 7 }
  0x22   : > { %4007 = vmatpush3.bf16.msra.mxu0 %v4646_v18  ;;  %4439 = vmatpush3.bf16.msra.mxu1 %v4645_v17  ;;  %319 = vst [vmem:[#allocation2 + $0x2c] sm:$0x1] %v318_v15  ;;  %v407_v17 = vshrl.u32 %v215_v1, 16  ;;  %v410_v18 = vshll.u32 %v215_v1, 16  ;;  %v216_v35 = vld [vmem:[%s4933_s10 + $0x18] sm:$0xf] }
  0x23   : > { %4008 = vmatprep.subr.bf16.mxu0 %v4647_v19  ;;  %4440 = vmatprep.subr.bf16.mxu1 %v4648_v20  ;;  %v396_v19 = vsel %vm4977_vm7, %v388_v63, %v395_v13  ;;  %v405_v24 = vrot.slane %v401_v16, 4  ;;  %v404_v27 = vor.u32 %v402_v11, %v401_v16  ;;  %v416_v49 = vshrl.u32 %v216_v35, 16  ;;  %v217_v53 = vld [vmem:[%s4933_s10 + $0x1c] sm:$0xf]  ;;  %v264_v61 = vld [vmem:[#allocation2 + $0x30] sm:$0x1] }
  0x24   : > { %697 = vst [vmem:[#allocation2 + $0x1c] sm:$0xf] %v396_v19  ;;  %v4657_v25 = vld [vmem:[#allocation2] sm:$0xff]   ;;  %v409_v28 = vrot.slane %v407_v17, 7  ;;  %v419_v54 = vshll.u32 %v216_v35, 16  ;;  %v265_v1 = vsel %vm4948_vm2, 0, %v264_v61 }
  0x25   : > { %v1065_v30 = vshrl.u32 %v4657_v25, 16  ;;  %v1067_v32 = vshll.u32 %v4657_v25, 16  ;;  %v320_v2 = vld [vmem:[#allocation2 + $0x38] sm:$0x1]  ;;  %266 = vst [vmem:[#allocation2 + $0x30] sm:$0x1] %v265_v1 }
  0x26   : > { %4009 = vmatpush3.bf16.msra.mxu0 %v4649_v21  ;;  %4441 = vmatpush3.bf16.msra.mxu1 %v4648_v20  ;;  %v694_v20 = vld [vmem:[#allocation2 + $0x18] sm:$0xf]  ;;  %v698_v21 = vld [vmem:[#allocation2 + $0x20] sm:$0x1]  ;;  %v412_v33 = vor.u32 %v410_v18, %v409_v28  ;;  %v414_v34 = vrot.slane %v409_v28, 4  ;;  %v321_v4 = vsel %vm4959_vm4, 0, %v320_v2 }
  0x27   : > { %4010 = vmatprep.subr.bf16.mxu0 %v4650_v22  ;;  %4442 = vmatprep.subr.bf16.mxu1 %v4651_v23  ;;  %v695_v22 = vsel %vm4987_vm8, %v387_v8, %v694_v20  ;;  %v4653_v36 = vld [vmem:[#allocation2 + $0xc] sm:$0xff]   ;;  %v418_v5 = vrot.slane %v416_v49, 7  ;;  %v424_v6 = vshrl.u32 %v217_v53, 16  ;;  %322 = vst [vmem:[#allocation2 + $0x38] sm:$0x1] %v321_v4  ;;  %v427_v10 = vshll.u32 %v217_v53, 16 }
  0x28   : > { %696 = vst [vmem:[#allocation2 + $0x18] sm:$0xf] %v695_v22  ;;  %v701_v39 = vld [vmem:[#allocation2 + $0x24] sm:$0xf]  ;;  %v413_v42 = vsel %vm4977_vm7, %v405_v24, %v412_v33  ;;  %v1077_v44 = vshrl.u32 %v4653_v36, 16  ;;  %v1079_v45 = vshll.u32 %v4653_v36, 16 }
  0x29   : > { %v4654_v40 = vld [vmem:[#allocation2 + $0x14] ss:$0 sps:$4 sm:$0x11]   ;;  %v702_v43 = vsel %vm4987_vm8, %v404_v27, %v701_v39  ;;  %704 = vst [vmem:[#allocation2 + $0x28] sm:$0xf] %v413_v42  ;;  %v422_v17 = vrot.slane %v418_v5, 4  ;;  %v421_v24 = vor.u32 %v419_v54, %v418_v5 }
  0x2a   : > { %4011 = vmatpush3.bf16.msra.mxu0 %v4652_v29  ;;  %4443 = vmatpush3.bf16.msra.mxu1 %v4651_v23  ;;  %v699_v23 = vsel %vm4948_vm2, %v397_v14, %v698_v21  ;;  %v4658_v29 = vld [vmem:[#allocation2 + $0x8] ss:$0 sps:$4 sm:$0x11]   ;;  %703 = vst [vmem:[#allocation2 + $0x24] sm:$0xf] %v702_v43  ;;  %v1084_v50 = vshll.u32 %v4654_v40, 16 }
  0x2b   : > { %4476 = vmatprep.subr.bf16.mxu0 %v4968_v37  ;;  %4132 = vmatprep.subr.bf16.mxu1 %v4662_v41  ;;  %700 = vst [vmem:[#allocation2 + $0x20] sm:$0x1] %v699_v23  ;;  %v1072_v38 = vshll.u32 %v4658_v29, 16  ;;  %v1069_v41 = vrot.slane %v1067_v32, 1  ;;  %v705_v48 = vld [vmem:[#allocation2 + $0x2c] sm:$0x1] }
  0x2c   : > { %v706_v52 = vsel %vm4948_vm2, %v414_v34, %v705_v48  ;;  %v1081_v55 = vrot.slane %v1079_v45, 1  ;;  %v1086_v58 = vrot.slane %v1084_v50, 1  ;;  %v4674_v7 = vld [vmem:[%s6034_s1 + $0xb0] sm:$0xff]   ;;  %v218_v11 = vld [vmem:[%s4933_s10 + $0x20] sm:$0xf]  ;;  %v426_v18 = vrot.slane %v424_v6, 7 }
  0x2d   : > { %v1074_v47 = vrot.slane %v1072_v38, 1  ;;  %v1070_v51 = vor.u32 %v1069_v41, %v1065_v30  ;;  %707 = vst [vmem:[#allocation2 + $0x2c] sm:$0x1] %v706_v52  ;;  %v267_v12 = vld [vmem:[#allocation2 + $0x3c] sm:$0x1]  ;;  %v5038_v21 = vld [vmem:[%s6034_s1 + $0xa8] sm:$0xff]  }
  0x2e   : > { %v1082_v62 = vor.u32 %v1081_v55, %v1077_v44  ;;  %v219_v15 = vld [vmem:[%s4933_s10 + $0x24] sm:$0xf]  ;;  %v268_v19 = vsel %vm4948_vm2, 0, %v267_v12  ;;  %v429_v28 = vor.u32 %v427_v10, %v426_v18  ;;  %v431_v29 = vrot.slane %v426_v18, 4  ;;  %v4663_v35 = vld [vmem:[%s6034_s1 + $0x38] sm:$0xff]   ;;  %v4668_v49 = vld [vmem:[%s6034_s1 + $0x70] sm:$0xff]  }
  0x2f   : > { %v4655_v56 = vld [vmem:[#allocation2 + $0x18] sm:$0xff]   ;;  %v1075_v60 = vsel %vm1063_vm9, %v1070_v51, %v1074_v47  ;;  %v323_v20 = vld [vmem:[#allocation2 + $0x44] sm:$0x1]  ;;  %269 = vst [vmem:[#allocation2 + $0x3c] sm:$0x1] %v268_v19  ;;  %v433_v33 = vshrl.u32 %v218_v11, 16 }
  0x30   : > { %v1089_v63 = vshrl.u32 %v4655_v56, 16  ;;  %v1091_v0 = vshll.u32 %v4655_v56, 16  ;;  %v1087_v8 = vsel %vm1063_vm9, %v1082_v62, %v1086_v58  ;;  %v324_v32 = vsel %vm4959_vm4, 0, %v323_v20  ;;  %v708_v38 = vld [vmem:[#allocation2 + $0x30] sm:$0xf]  ;;  %v4676_v19 = vld [vmem:[%s6034_s1 + $0x28] sm:$0xff]  }
  0x31   : > { %1522 = vmatprep.mubr.bf16.mxu0 %v1087_v8  ;;  %v4659_v14 = vld [vmem:[#allocation2 + $0x24] sm:$0xff]   ;;  %v436_v34 = vshll.u32 %v218_v11, 16  ;;  %v430_v36 = vsel %vm4977_vm7, %v422_v17, %v429_v28  ;;  %325 = vst [vmem:[#allocation2 + $0x44] sm:$0x1] %v324_v32  ;;  %v441_v39 = vshrl.u32 %v219_v15, 16  ;;  %v444_v40 = vshll.u32 %v219_v15, 16 }
  0x32   : > { %v4656_v59 = vld [vmem:[#allocation2 + $0x20] ss:$0 sps:$4 sm:$0x11]   ;;  %v1093_v9 = vrot.slane %v1091_v0, 1  ;;  %1523 = vmatmul.mubr.bf16.vlgmr.msra.gmra.mxu0 %v1075_v60  ;;  %v1101_v23 = vshrl.u32 %v4659_v14, 16  ;;  %v1103_v27 = vshll.u32 %v4659_v14, 16  ;;  %v709_v42 = vsel %vm4987_vm8, %v421_v24, %v708_v38 }
  0x33   : > { %v1096_v3 = vshll.u32 %v4656_v59, 16  ;;  %4477 = vmatpush3.bf16.msra.mxu0 %v4968_v37  ;;  %711 = vst [vmem:[#allocation2 + $0x34] sm:$0xf] %v430_v36  ;;  %v712_v43 = vld [vmem:[#allocation2 + $0x38] sm:$0x1]  ;;  %v435_v44 = vrot.slane %v433_v33, 7 }
  0x34   : > { %v1094_v16 = vor.u32 %v1093_v9, %v1089_v63  ;;  %v4660_v22 = vld [vmem:[#allocation2 + $0x2c] ss:$0 sps:$4 sm:$0x11]   ;;  %4478 = vmatprep.subr.bf16.mxu0 %v4674_v7  ;;  %v1105_v37 = vrot.slane %v1103_v27, 1  ;;  %710 = vst [vmem:[#allocation2 + $0x30] sm:$0xf] %v709_v42  ;;  %v713_v47 = vsel %vm4948_vm2, %v431_v29, %v712_v43 }
  0x35   : > { %v1098_v13 = vrot.slane %v1096_v3, 1  ;;  %v1108_v30 = vshll.u32 %v4660_v22, 16  ;;  %v443_v48 = vrot.slane %v441_v39, 7  ;;  %v220_v50 = vld [vmem:[%s4933_s10 + $0x28] sm:$0xf]  ;;  %v438_v52 = vor.u32 %v436_v34, %v435_v44  ;;  %v4669_v1 = vld [vmem:[%s6034_s1 + $0x30] sm:$0xff]  }
  0x36   : > { %v1106_v45 = vor.u32 %v1105_v37, %v1101_v23  ;;  %v221_v51 = vld [vmem:[%s4933_s10 + $0x2c] sm:$0xf]  ;;  %714 = vst [vmem:[#allocation2 + $0x38] sm:$0x1] %v713_v47  ;;  %v439_v53 = vrot.slane %v435_v44, 4  ;;  %v450_v56 = vshrl.u32 %v220_v50, 16 }
  0x37   : > { %v5042_v25 = vsel %vm1063_vm9, %v1094_v16, %v1098_v13  ;;  %v1110_v41 = vrot.slane %v1108_v30, 1  ;;  %4479 = vmatpush3.bf16.msra.mxu0 %v4674_v7  ;;  %v270_v54 = vld [vmem:[#allocation2 + $0x48] sm:$0x1]  ;;  %v326_v55 = vld [vmem:[#allocation2 + $0x50] sm:$0x1]  ;;  %v446_v59 = vor.u32 %v444_v40, %v443_v48  ;;  %v448_v60 = vrot.slane %v443_v48, 4 }
  0x38   : > { %4444 = vmatprep.mubr.bf16.mxu1 %v5042_v25  ;;  %1530 = vmatprep.mubr.bf16.mxu0 %v5042_v25  ;;  %v715_v61 = vld [vmem:[#allocation2 + $0x3c] sm:$0xf]  ;;  %v271_v62 = vsel %vm4948_vm2, 0, %v270_v54  ;;  %v222_v63 = vld [vmem:[%s4933_s10 + $0x30] sm:$0xf]  ;;  %v327_v2 = vsel %vm4959_vm4, 0, %v326_v55 }
  0x39   : > { %4480 = vmatprep.subr.bf16.mxu0 %v5038_v21  ;;  %v5064_v58 = vsel %vm1063_vm9, %v1106_v45, %v1110_v41  ;;  %v716_v0 = vsel %vm4987_vm8, %v438_v52, %v715_v61  ;;  %272 = vst [vmem:[#allocation2 + $0x48] sm:$0x1] %v271_v62  ;;  %v452_v3 = vrot.slane %v450_v56, 7  ;;  %v453_v4 = vshll.u32 %v220_v50, 16  ;;  %v223_v5 = vld [vmem:[%s4933_s10 + $0x34] sm:$0xf] }
  0x3a   : > { %1531 = vmatmul.mubr.bf16.gmra.mxu0 %v1087_v8  ;;  %4445 = vmatmul.mubr.bf16.vlgmr.msra.gmra.mxu1 %v5064_v58  ;;  %v447_v6 = vsel %vm4977_vm7, %v439_v53, %v446_v59  ;;  %717 = vst [vmem:[#allocation2 + $0x3c] sm:$0xf] %v716_v0  ;;  %328 = vst [vmem:[#allocation2 + $0x50] sm:$0x1] %v327_v2  ;;  %v458_v7 = vshrl.u32 %v221_v51, 16  ;;  %v461_v8 = vshll.u32 %v221_v51, 16 }
  0x3b   : > { %1538 = vmatprep.mubr.bf16.mxu0 %v5064_v58  ;;  %4133 = vmatpush3.bf16.msra.mxu1 %v4663_v35  ;;  %v273_v9 = vld [vmem:[#allocation2 + $0x54] sm:$0x1]  ;;  %v329_v10 = vld [vmem:[#allocation2 + $0x5c] sm:$0x1]  ;;  %718 = vst [vmem:[#allocation2 + $0x40] sm:$0xf] %v447_v6  ;;  %v455_v22 = vor.u32 %v453_v4, %v452_v3 }
  0x3c   : > { %4481 = vmatpush3.bf16.msra.mxu0 %v5038_v21  ;;  %v719_v11 = vld [vmem:[#allocation2 + $0x44] sm:$0x1]  ;;  %4134 = vmatprep.subr.bf16.mxu1 %v4668_v49  ;;  %v274_v12 = vsel %vm4948_vm2, 0, %v273_v9  ;;  %v330_v13 = vsel %vm4959_vm4, 0, %v329_v10  ;;  %v4675_v14 = vld [vmem:[%s6034_s1 + $0x68] sm:$0xff]   ;;  %v456_v16 = vrot.slane %v452_v3, 4 }
  0x3d   : > { %v720_v15 = vsel %vm4948_vm2, %v448_v60, %v719_v11  ;;  %v460_v17 = vrot.slane %v458_v7, 7  ;;  %275 = vst [vmem:[#allocation2 + $0x54] sm:$0x1] %v274_v12  ;;  %331 = vst [vmem:[#allocation2 + $0x5c] sm:$0x1] %v330_v13  ;;  %v467_v18 = vshrl.u32 %v222_v63, 16 }
  0x3e   : > { %v4700_v20 = vld [vmem:[%s6034_s1 + $0xa0] sm:$0xff]   ;;  %v4664_v21 = vld [vmem:[#allocation2 + $0x30] sm:$0xff]   ;;  %721 = vst [vmem:[#allocation2 + $0x44] sm:$0x1] %v720_v15  ;;  %v470_v23 = vshll.u32 %v222_v63, 16  ;;  %v475_v24 = vshrl.u32 %v223_v5, 16 }
  0x3f   : > { %v478_v27 = vshll.u32 %v223_v5, 16  ;;  %v4681_v28 = vld [vmem:[%s6034_s1 + $0x60] sm:$0xff]   ;;  %v4665_v29 = vld [vmem:[#allocation2 + $0x38] ss:$0 sps:$4 sm:$0x11]   ;;  %4135 = vmatpush3.bf16.msra.mxu1 %v4669_v1  ;;  %v463_v30 = vor.u32 %v461_v8, %v460_v17  ;;  %v465_v32 = vrot.slane %v460_v17, 4  ;;  %4482 = vmatprep.subr.bf16.mxu0 %v4700_v20 }
  0x40   : > { %v1113_v33 = vshrl.u32 %v4664_v21, 16  ;;  %v1115_v34 = vshll.u32 %v4664_v21, 16  ;;  %v469_v37 = vrot.slane %v467_v18, 7  ;;  %v477_v35 = vrot.slane %v475_v24, 7  ;;  %4136 = vmatprep.subr.bf16.mxu1 %v4675_v14  ;;  %4483 = vmatpush3.bf16.msra.mxu0 %v4700_v20  ;;  %v722_v39 = vld [vmem:[#allocation2 + $0x48] sm:$0xf] }
  0x41   : > { %v1120_v36 = vshll.u32 %v4665_v29, 16  ;;  %v464_v38 = vsel %vm4977_vm7, %v456_v16, %v463_v30  ;;  %v723_v41 = vsel %vm4987_vm8, %v455_v22, %v722_v39  ;;  %v726_v42 = vld [vmem:[#allocation2 + $0x50] sm:$0x1]  ;;  %v4688_v60 = vld [vmem:[%s6034_s1 + $0x58] sm:$0xff]   ;;  %v276_v6 = vld [vmem:[#allocation2 + $0x60] sm:$0x1] }
  0x42   : > { %1539 = vmatmul.mubr.bf16.gmra.mxu0 %v5042_v25  ;;  %v1117_v40 = vrot.slane %v1115_v34, 1  ;;  %725 = vst [vmem:[#allocation2 + $0x4c] sm:$0xf] %v464_v38  ;;  %v472_v43 = vor.u32 %v470_v23, %v469_v37  ;;  %v473_v44 = vrot.slane %v469_v37, 4  ;;  %v4666_v47 = vld [vmem:[#allocation2 + $0x3c] sm:$0xff]   ;;  %v727_v48 = vsel %vm4948_vm2, %v465_v32, %v726_v42  ;;  %v4694_v8 = vld [vmem:[%s6034_s1 + $0x50] sm:$0xff]  }
  0x43   : > { %v1122_v45 = vrot.slane %v1120_v36, 1  ;;  %724 = vst [vmem:[#allocation2 + $0x48] sm:$0xf] %v723_v41  ;;  %v480_v49 = vor.u32 %v478_v27, %v477_v35  ;;  %v482_v50 = vrot.slane %v477_v35, 4  ;;  %4137 = vmatpush3.bf16.msra.mxu1 %v4676_v19  ;;  %v4682_v25 = vld [vmem:[%s6034_s1 + $0x20] sm:$0xff]   ;;  %v1125_v62 = vshrl.u32 %v4666_v47, 16 }
  0x44   : > { %v1118_v51 = vor.u32 %v1117_v40, %v1113_v33  ;;  %728 = vst [vmem:[#allocation2 + $0x50] sm:$0x1] %v727_v48  ;;  %v729_v52 = vld [vmem:[#allocation2 + $0x54] sm:$0xf]  ;;  %v733_v53 = vld [vmem:[#allocation2 + $0x5c] sm:$0x1]  ;;  %4138 = vmatprep.subr.bf16.mxu1 %v4681_v28 }
  0x45   : > { %v4667_v54 = vld [vmem:[#allocation2 + $0x44] ss:$0 sps:$4 sm:$0x11]   ;;  %v481_v55 = vsel %vm4977_vm7, %v473_v44, %v480_v49  ;;  %v730_v56 = vsel %vm4987_vm8, %v472_v43, %v729_v52  ;;  %v734_v59 = vsel %vm4948_vm2, %v482_v50, %v733_v53  ;;  %v1127_v63 = vshll.u32 %v4666_v47, 16  ;;  %v4689_v0 = vld [vmem:[%s6034_s1 + $0x18] sm:$0xff]   ;;  %v4695_v18 = vld [vmem:[%s6034_s1 + $0x10] sm:$0xff]  }
  0x46   : > { %v5120_v61 = vsel %vm1063_vm9, %v1118_v51, %v1122_v45  ;;  %731 = vst [vmem:[#allocation2 + $0x54] sm:$0xf] %v730_v56  ;;  %732 = vst [vmem:[#allocation2 + $0x58] sm:$0xf] %v481_v55  ;;  %v1132_v1 = vshll.u32 %v4667_v54, 16  ;;  %v4709_v3 = vld [vmem:[%s6034_s1 + $0x98] sm:$0xff]  }
  0x47   : > { %735 = vst [vmem:[#allocation2 + $0x5c] sm:$0x1] %v734_v59  ;;  %4448 = vmatprep.mubr.bf16.mxu1 %v5120_v61  ;;  %1546 = vmatprep.mubr.bf16.mxu0 %v5120_v61  ;;  %v224_v2 = vld [vmem:[%s4933_s10 + $0x38] sm:$0xf]  ;;  %v1129_v4 = vrot.slane %v1127_v63, 1  ;;  %v277_v10 = vsel %vm4948_vm2, 0, %v276_v6 }
  0x48   : > { %v225_v5 = vld [vmem:[%s4933_s10 + $0x3c] sm:$0xf]  ;;  %v484_v7 = vshrl.u32 %v224_v2, 16  ;;  %4139 = vmatpush3.bf16.msra.mxu1 %v4682_v25  ;;  %v1134_v9 = vrot.slane %v1132_v1, 1  ;;  %v332_v11 = vld [vmem:[#allocation2 + $0x68] sm:$0x1]  ;;  %4484 = vmatprep.subr.bf16.mxu0 %v4709_v3 }
  0x49   : > { %4140 = vmatprep.subr.bf16.mxu1 %v4688_v60  ;;  %v1130_v12 = vor.u32 %v1129_v4, %v1125_v62  ;;  %278 = vst [vmem:[#allocation2 + $0x60] sm:$0x1] %v277_v10  ;;  %v333_v14 = vsel %vm4959_vm4, 0, %v332_v11  ;;  %v487_v16 = vshll.u32 %v224_v2, 16  ;;  %4485 = vmatpush3.bf16.msra.mxu0 %v4709_v3  ;;  %v492_v21 = vshrl.u32 %v225_v5, 16  ;;  %v4701_v23 = vld [vmem:[%s6034_s1 + $0x48] sm:$0xff]  }
  0x4a   : > { %1547 = vmatmul.mubr.bf16.gmra.mxu0 %v5064_v58  ;;  %v4670_v13 = vld [vmem:[#allocation2 + $0x48] sm:$0xff]   ;;  %v486_v15 = vrot.slane %v484_v7, 7  ;;  %334 = vst [vmem:[#allocation2 + $0x68] sm:$0x1] %v333_v14  ;;  %v226_v22 = vld [vmem:[%s4933_s10 + $0x40] sm:$0xf] }
  0x4b   : > { %v4671_v17 = vld [vmem:[#allocation2 + $0x50] ss:$0 sps:$4 sm:$0x11]   ;;  %v5144_v58 = vsel %vm1063_vm9, %v1130_v12, %v1134_v9  ;;  %v1137_v19 = vshrl.u32 %v4670_v13, 16  ;;  %v1139_v20 = vshll.u32 %v4670_v13, 16  ;;  %v4702_v32 = vld [vmem:[%s6034_s1 + $0x8] sm:$0xff]  }
  0x4c   : > { %4141 = vmatpush3.bf16.msra.mxu1 %v4689_v0  ;;  %v1144_v24 = vshll.u32 %v4671_v17, 16  ;;  %1554 = vmatprep.mubr.bf16.mxu0 %v5144_v58  ;;  %v489_v30 = vor.u32 %v487_v16, %v486_v15  ;;  %v490_v35 = vrot.slane %v486_v15, 4  ;;  %v227_v36 = vld [vmem:[%s4933_s10 + $0x44] sm:$0xf]  ;;  %v279_v38 = vld [vmem:[#allocation2 + $0x6c] sm:$0x1] }
  0x4d   : > { %4449 = vmatmul.mubr.bf16.gmra.mxu1 %v5144_v58  ;;  %v4672_v27 = vld [vmem:[#allocation2 + $0x54] sm:$0xff]   ;;  %v1141_v28 = vrot.slane %v1139_v20, 1  ;;  %4142 = vmatprep.subr.bf16.mxu1 %v4694_v8  ;;  %v494_v41 = vrot.slane %v492_v21, 7  ;;  %v495_v42 = vshll.u32 %v225_v5, 16  ;;  %v4707_v44 = vld [vmem:[%s6034_s1 + $0x40] sm:$0xff]   ;;  %v280_v48 = vsel %vm4948_vm2, 0, %v279_v38 }
  0x4e   : > { %v4673_v29 = vld [vmem:[#allocation2 + $0x5c] ss:$0 sps:$4 sm:$0x11]   ;;  %v1146_v33 = vrot.slane %v1144_v24, 1  ;;  %v1149_v34 = vshrl.u32 %v4672_v27, 16  ;;  %v1151_v37 = vshll.u32 %v4672_v27, 16 }
  0x4f   : > { %v1142_v39 = vor.u32 %v1141_v28, %v1137_v19  ;;  %v1156_v40 = vshll.u32 %v4673_v29, 16  ;;  %v335_v43 = vld [vmem:[#allocation2 + $0x74] sm:$0x1]  ;;  %v501_v50 = vshrl.u32 %v226_v22, 16  ;;  %v497_v52 = vor.u32 %v495_v42, %v494_v41  ;;  %281 = vst [vmem:[#allocation2 + $0x6c] sm:$0x1] %v280_v48 }
  0x50   : > { %4143 = vmatpush3.bf16.msra.mxu1 %v4695_v18  ;;  %v1153_v45 = vrot.slane %v1151_v37, 1  ;;  %v736_v47 = vld [vmem:[#allocation2 + $0x60] sm:$0xf]  ;;  %v336_v49 = vsel %vm4959_vm4, 0, %v335_v43  ;;  %v499_v53 = vrot.slane %v494_v41, 4  ;;  %v5177_v62 = vld [vmem:[%s6034_s1 + $0x238] sm:$0xff]  }
  0x51   : > { %4144 = vmatprep.subr.bf16.mxu1 %v4701_v23  ;;  %v5165_v25 = vsel %vm1063_vm9, %v1142_v39, %v1146_v33  ;;  %v1158_v51 = vrot.slane %v1156_v40, 1  ;;  %v740_v54 = vld [vmem:[#allocation2 + $0x68] sm:$0x1]  ;;  %337 = vst [vmem:[#allocation2 + $0x74] sm:$0x1] %v336_v49  ;;  %v4708_v55 = vld [vmem:[%s6034_s1] sm:$0xff]   ;;  %v737_v59 = vsel %vm4987_vm8, %v489_v30, %v736_v47  ;;  %v498_v63 = vsel %vm4977_vm7, %v490_v35, %v497_v52 }
  0x52   : > { %1555 = vmatmul.mubr.bf16.gmra.mxu0 %v5120_v61  ;;  %4452 = vmatprep.mubr.bf16.mxu1 %v5165_v25  ;;  %v1154_v56 = vor.u32 %v1153_v45, %v1149_v34  ;;  %v503_v60 = vrot.slane %v501_v50, 7  ;;  %v504_v61 = vshll.u32 %v226_v22, 16  ;;  %738 = vst [vmem:[#allocation2 + $0x60] sm:$0xf] %v737_v59  ;;  %v741_v0 = vsel %vm4948_vm2, %v499_v53, %v740_v54  ;;  %v228_v3 = vld [vmem:[%s4933_s10 + $0x48] sm:$0xf] }
  0x53   : > { %1562 = vmatprep.mubr.bf16.mxu0 %v5165_v25  ;;  %v509_v1 = vshrl.u32 %v227_v36, 16  ;;  %v512_v2 = vshll.u32 %v227_v36, 16  ;;  %739 = vst [vmem:[#allocation2 + $0x64] sm:$0xf] %v498_v63  ;;  %742 = vst [vmem:[#allocation2 + $0x68] sm:$0x1] %v741_v0 }
  0x54   : > { %4145 = vmatpush3.bf16.msra.mxu1 %v4702_v32  ;;  %v5185_v4 = vsel %vm1063_vm9, %v1154_v56, %v1158_v51  ;;  %v506_v5 = vor.u32 %v504_v61, %v503_v60  ;;  %v507_v6 = vrot.slane %v503_v60, 4  ;;  %v229_v7 = vld [vmem:[%s4933_s10 + $0x4c] sm:$0xf]  ;;  %v282_v8 = vld [vmem:[#allocation2 + $0x78] sm:$0x1]  ;;  %v518_v9 = vshrl.u32 %v228_v3, 16 }
  0x55   : > { %4146 = vmatprep.subr.bf16.mxu1 %v4707_v44  ;;  %4453 = vmatmul.mubr.bf16.gmra.mxu1 %v5185_v4  ;;  %v511_v10 = vrot.slane %v509_v1, 7  ;;  %v283_v11 = vsel %vm4948_vm2, 0, %v282_v8  ;;  %v338_v12 = vld [vmem:[#allocation2 + $0x80] sm:$0x1]  ;;  %v521_v13 = vshll.u32 %v228_v3, 16  ;;  %v526_v14 = vshrl.u32 %v229_v7, 16 }
  0x56   : > { %284 = vst [vmem:[#allocation2 + $0x78] sm:$0x1] %v283_v11  ;;  %v339_v15 = vsel %vm4959_vm4, 0, %v338_v12  ;;  %v520_v16 = vrot.slane %v518_v9, 7  ;;  %v529_v17 = vshll.u32 %v229_v7, 16  ;;  %v4711_v19 = vld [vmem:[%s6034_s1 + $0x90] sm:$0xff]  }
  0x57   : > { %v230_v18 = vld [vmem:[%s4933_s10 + $0x50] sm:$0xf]  ;;  %v514_v20 = vor.u32 %v512_v2, %v511_v10  ;;  %v516_v21 = vrot.slane %v511_v10, 4  ;;  %340 = vst [vmem:[#allocation2 + $0x80] sm:$0x1] %v339_v15  ;;  %v528_v22 = vrot.slane %v526_v14, 7  ;;  %4486 = vmatprep.subr.bf16.mxu0 %v4711_v19 }
  0x58   : > { %v231_v23 = vld [vmem:[%s4933_s10 + $0x54] sm:$0xf]  ;;  %v285_v24 = vld [vmem:[#allocation2 + $0x84] sm:$0x1]  ;;  %4147 = vmatpush3.bf16.msra.mxu1 %v4708_v55  ;;  %v743_v27 = vld [vmem:[#allocation2 + $0x6c] sm:$0xf]  ;;  %v523_v29 = vor.u32 %v521_v13, %v520_v16  ;;  %4487 = vmatpush3.bf16.msra.mxu0 %v4711_v19 }
  0x59   : > { %v747_v28 = vld [vmem:[#allocation2 + $0x74] sm:$0x1]  ;;  %v524_v30 = vrot.slane %v520_v16, 4  ;;  %v286_v32 = vsel %vm4948_vm2, 0, %v285_v24  ;;  %4524 = vmatprep.subr.bf16.mxu1 %v5177_v62  ;;  %v515_v33 = vsel %vm4977_vm7, %v507_v6, %v514_v20  ;;  %v744_v34 = vsel %vm4987_vm8, %v506_v5, %v743_v27  ;;  %v341_v36 = vld [vmem:[#allocation2 + $0x8c] sm:$0x1] }
  0x5a   : > { %1563 = vmatmul.mubr.bf16.gmra.mxu0 %v5144_v58  ;;  %v748_v37 = vsel %vm4948_vm2, %v516_v21, %v747_v28  ;;  %v531_v35 = vor.u32 %v529_v17, %v528_v22  ;;  %287 = vst [vmem:[#allocation2 + $0x84] sm:$0x1] %v286_v32  ;;  %745 = vst [vmem:[#allocation2 + $0x6c] sm:$0xf] %v744_v34  ;;  %v533_v58 = vrot.slane %v528_v22, 4  ;;  %v342_v38 = vsel %vm4959_vm4, 0, %v341_v36 }
  0x5b   : > { %1570 = vmatprep.mubr.bf16.mxu0 %v5185_v4  ;;  %746 = vst [vmem:[#allocation2 + $0x70] sm:$0xf] %v515_v33  ;;  %749 = vst [vmem:[#allocation2 + $0x74] sm:$0x1] %v748_v37  ;;  %v535_v39 = vshrl.u32 %v230_v18, 16  ;;  %v538_v40 = vshll.u32 %v230_v18, 16 }
  0x5c   : > { %v5211_v41 = vld [vmem:[#allocation2 + $0x60] sm:$0xff]   ;;  %v532_v42 = vsel %vm4977_vm7, %v524_v30, %v531_v35  ;;  %343 = vst [vmem:[#allocation2 + $0x8c] sm:$0x1] %v342_v38  ;;  %v543_v43 = vshrl.u32 %v231_v23, 16  ;;  %v546_v47 = vshll.u32 %v231_v23, 16  ;;  %v4713_v52 = vld [vmem:[%s6034_s1 + $0x88] sm:$0xff]  }
  0x5d   : > { %v4678_v44 = vld [vmem:[#allocation2 + $0x68] ss:$0 sps:$4 sm:$0x11]   ;;  %753 = vst [vmem:[#allocation2 + $0x7c] sm:$0xf] %v532_v42  ;;  %v537_v45 = vrot.slane %v535_v39, 7  ;;  %4488 = vmatprep.subr.bf16.mxu0 %v4713_v52 }
  0x5e   : > { %v1161_v48 = vshrl.u32 %v5211_v41, 16  ;;  %v1163_v49 = vshll.u32 %v5211_v41, 16  ;;  %v750_v50 = vld [vmem:[#allocation2 + $0x78] sm:$0xf]  ;;  %v545_v51 = vrot.slane %v543_v43, 7  ;;  %v1168_v53 = vshll.u32 %v4678_v44, 16  ;;  %4489 = vmatpush3.bf16.msra.mxu0 %v4713_v52 }
  0x5f   : > { %v751_v54 = vsel %vm4987_vm8, %v523_v29, %v750_v50  ;;  %v754_v55 = vld [vmem:[#allocation2 + $0x80] sm:$0x1]  ;;  %v540_v56 = vor.u32 %v538_v40, %v537_v45  ;;  %v541_v59 = vrot.slane %v537_v45, 4  ;;  %v232_v11 = vld [vmem:[%s4933_s10 + $0x58] sm:$0xf]  ;;  %vm3440_vm14 = vcmask 1045504  }
  0x60   : > { %v1165_v60 = vrot.slane %v1163_v49, 1  ;;  %752 = vst [vmem:[#allocation2 + $0x78] sm:$0xf] %v751_v54  ;;  %v755_v61 = vsel %vm4948_vm2, %v533_v58, %v754_v55  ;;  %v548_v63 = vor.u32 %v546_v47, %v545_v51  ;;  %v550_v0 = vrot.slane %v545_v51, 4  ;;  %v233_v12 = vld [vmem:[%s4933_s10 + $0x5c] sm:$0xf] }
  0x61   : > { %v1170_v1 = vrot.slane %v1168_v53, 1  ;;  %756 = vst [vmem:[#allocation2 + $0x80] sm:$0x1] %v755_v61  ;;  %v757_v2 = vld [vmem:[#allocation2 + $0x84] sm:$0xf]  ;;  %v552_v17 = vshrl.u32 %v232_v11, 16 }
  0x62   : > { %1571 = vmatmul.mubr.bf16.gmra.mxu0 %v5165_v25  ;;  %v1166_v3 = vor.u32 %v1165_v60, %v1161_v48  ;;  %v549_v5 = vsel %vm4977_vm7, %v541_v59, %v548_v63  ;;  %v758_v6 = vsel %vm4987_vm8, %v540_v56, %v757_v2  ;;  %v5229_v7 = vld [vmem:[#allocation2 + $0x6c] sm:$0xff]   ;;  %v4680_v8 = vld [vmem:[#allocation2 + $0x74] ss:$0 sps:$4 sm:$0x11]   ;;  %v344_v19 = vld [vmem:[#allocation2 + $0x98] sm:$0x1] }
  0x63   : > { %759 = vst [vmem:[#allocation2 + $0x84] sm:$0xf] %v758_v6  ;;  %760 = vst [vmem:[#allocation2 + $0x88] sm:$0xf] %v549_v5  ;;  %v761_v9 = vld [vmem:[#allocation2 + $0x8c] sm:$0x1] }
  0x64   : > { %v5232_v10 = vsel %vm1063_vm9, %v1166_v3, %v1170_v1  ;;  %v762_v25 = vsel %vm4948_vm2, %v550_v0, %v761_v9  ;;  %v1173_v13 = vshrl.u32 %v5229_v7, 16  ;;  %v1175_v14 = vshll.u32 %v5229_v7, 16  ;;  %v288_v16 = vld [vmem:[#allocation2 + $0x90] sm:$0x1]  ;;  %v4715_v35 = vld [vmem:[%s6034_s1 + $0x80] sm:$0xff]  }
  0x65   : > { %4456 = vmatprep.mubr.bf16.mxu1 %v5232_v10  ;;  %v1180_v15 = vshll.u32 %v4680_v8, 16  ;;  %763 = vst [vmem:[#allocation2 + $0x8c] sm:$0x1] %v762_v25  ;;  %1578 = vmatprep.mubr.bf16.mxu0 %v5232_v10  ;;  %v289_v18 = vsel %vm4948_vm2, 0, %v288_v16  ;;  %v555_v20 = vshll.u32 %v232_v11, 16  ;;  %v560_v21 = vshrl.u32 %v233_v12, 16 }
  0x66   : > { %v563_v22 = vshll.u32 %v233_v12, 16  ;;  %v1177_v23 = vrot.slane %v1175_v14, 1  ;;  %290 = vst [vmem:[#allocation2 + $0x90] sm:$0x1] %v289_v18  ;;  %v345_v28 = vsel %vm4959_vm4, 0, %v344_v19  ;;  %v554_v30 = vrot.slane %v552_v17, 7  ;;  %4490 = vmatprep.subr.bf16.mxu0 %v4715_v35 }
  0x67   : > { %v1182_v24 = vrot.slane %v1180_v15, 1  ;;  %v5244_v27 = vld [vmem:[#allocation2 + $0x78] sm:$0xff]   ;;  %346 = vst [vmem:[#allocation2 + $0x98] sm:$0x1] %v345_v28  ;;  %v562_v37 = vrot.slane %v560_v21, 7  ;;  %4491 = vmatpush3.bf16.msra.mxu0 %v4715_v35 }
  0x68   : > { %v4684_v29 = vld [vmem:[#allocation2 + $0x80] ss:$0 sps:$4 sm:$0x11]   ;;  %v1178_v32 = vor.u32 %v1177_v23, %v1173_v13  ;;  %v1185_v33 = vshrl.u32 %v5244_v27, 16  ;;  %v1187_v34 = vshll.u32 %v5244_v27, 16  ;;  %v557_v38 = vor.u32 %v555_v20, %v554_v30 }
  0x69   : > { %v1192_v36 = vshll.u32 %v4684_v29, 16  ;;  %v234_v39 = vld [vmem:[%s4933_s10 + $0x60] sm:$0xf]  ;;  %v558_v43 = vrot.slane %v554_v30, 4  ;;  %v565_v44 = vor.u32 %v563_v22, %v562_v37  ;;  %v235_v45 = vld [vmem:[%s4933_s10 + $0x64] sm:$0xf] }
  0x6a   : > { %1579 = vmatmul.mubr.bf16.gmra.mxu0 %v5185_v4  ;;  %v5254_v58 = vld [vmem:[#allocation2 + $0x84] sm:$0xff]   ;;  %v5258_v40 = vsel %vm1063_vm9, %v1178_v32, %v1182_v24  ;;  %v1189_v42 = vrot.slane %v1187_v34, 1  ;;  %v291_v47 = vld [vmem:[#allocation2 + $0x9c] sm:$0x1]  ;;  %v567_v55 = vrot.slane %v562_v37, 4  ;;  %v569_v2 = vshrl.u32 %v234_v39, 16 }
  0x6b   : > { %4457 = vmatmul.mubr.bf16.gmra.mxu1 %v5258_v40  ;;  %v1194_v4 = vrot.slane %v1192_v36, 1  ;;  %1586 = vmatprep.mubr.bf16.mxu0 %v5258_v40  ;;  %v1197_v50 = vshrl.u32 %v5254_v58, 16  ;;  %v1199_v51 = vshll.u32 %v5254_v58, 16  ;;  %v566_v52 = vsel %vm4977_vm7, %v558_v43, %v565_v44  ;;  %v347_v53 = vld [vmem:[#allocation2 + $0xa4] sm:$0x1]  ;;  %v4717_v29 = vld [vmem:[%s6034_s1 + $0x1f8] sm:$0xff]  }
  0x6c   : > { %v4686_v48 = vld [vmem:[#allocation2 + $0x8c] ss:$0 sps:$4 sm:$0x11]   ;;  %v1190_v49 = vor.u32 %v1189_v42, %v1185_v33  ;;  %767 = vst [vmem:[#allocation2 + $0x94] sm:$0xf] %v566_v52  ;;  %v292_v59 = vsel %vm4948_vm2, 0, %v291_v47  ;;  %4268 = vmatprep.subr.bf16.mxu0 %v4717_v29 }
  0x6d   : > { %v1204_v54 = vshll.u32 %v4686_v48, 16  ;;  %v764_v56 = vld [vmem:[#allocation2 + $0x90] sm:$0xf]  ;;  %v348_v60 = vsel %vm4959_vm4, 0, %v347_v53  ;;  %v1201_v63 = vrot.slane %v1199_v51, 1  ;;  %v572_v6 = vshll.u32 %v234_v39, 16 }
  0x6e   : > { %v5272_v61 = vsel %vm1063_vm9, %v1190_v49, %v1194_v4  ;;  %v765_v0 = vsel %vm4987_vm8, %v557_v38, %v764_v56  ;;  %v768_v1 = vld [vmem:[#allocation2 + $0x98] sm:$0x1]  ;;  %293 = vst [vmem:[#allocation2 + $0x9c] sm:$0x1] %v292_v59  ;;  %349 = vst [vmem:[#allocation2 + $0xa4] sm:$0x1] %v348_v60 }
  0x6f   : > { %4460 = vmatprep.mubr.bf16.mxu1 %v5272_v61  ;;  %v1206_v3 = vrot.slane %v1204_v54, 1  ;;  %766 = vst [vmem:[#allocation2 + $0x90] sm:$0xf] %v765_v0  ;;  %v769_v5 = vsel %vm4948_vm2, %v567_v55, %v768_v1  ;;  %v577_v8 = vshrl.u32 %v235_v45, 16  ;;  %v1202_v9 = vor.u32 %v1201_v63, %v1197_v50  ;;  %v236_v12 = vld [vmem:[%s4933_s10 + $0x68] sm:$0xf] }
  0x70   : > { %770 = vst [vmem:[#allocation2 + $0x98] sm:$0x1] %v769_v5  ;;  %v571_v25 = vrot.slane %v569_v2, 7  ;;  %v580_v11 = vshll.u32 %v235_v45, 16  ;;  %v237_v14 = vld [vmem:[%s4933_s10 + $0x6c] sm:$0xf] }
  0x71   : > { %v579_v13 = vrot.slane %v577_v8, 7  ;;  %v294_v15 = vld [vmem:[#allocation2 + $0xa8] sm:$0x1]  ;;  %v586_v16 = vshrl.u32 %v236_v12, 16  ;;  %v5284_v17 = vsel %vm1063_vm9, %v1202_v9, %v1206_v3  ;;  %v350_v21 = vld [vmem:[#allocation2 + $0xb0] sm:$0x1] }
  0x72   : > { %1587 = vmatmul.mubr.bf16.gmra.mxu0 %v5232_v10  ;;  %v574_v18 = vor.u32 %v572_v6, %v571_v25  ;;  %v575_v19 = vrot.slane %v571_v25, 4  ;;  %v295_v20 = vsel %vm4948_vm2, 0, %v294_v15  ;;  %v238_v22 = vld [vmem:[%s4933_s10 + $0x70] sm:$0xf]  ;;  %v351_v24 = vsel %vm4959_vm4, 0, %v350_v21 }
  0x73   : > { %1594 = vmatprep.mubr.bf16.mxu0 %v5272_v61  ;;  %4461 = vmatmul.mubr.bf16.gmra.mxu1 %v5284_v17  ;;  %v582_v10 = vor.u32 %v580_v11, %v579_v13  ;;  %v584_v23 = vrot.slane %v579_v13, 4  ;;  %296 = vst [vmem:[#allocation2 + $0xa8] sm:$0x1] %v295_v20  ;;  %v588_v28 = vrot.slane %v586_v16, 7  ;;  %352 = vst [vmem:[#allocation2 + $0xb0] sm:$0x1] %v351_v24 }
  0x74   : > { %v589_v30 = vshll.u32 %v236_v12, 16  ;;  %v594_v32 = vshrl.u32 %v237_v14, 16  ;;  %v597_v33 = vshll.u32 %v237_v14, 16  ;;  %v239_v34 = vld [vmem:[%s4933_s10 + $0x74] sm:$0xf]  ;;  %v603_v37 = vshrl.u32 %v238_v22, 16 }
  0x75   : > { %v583_v35 = vsel %vm4977_vm7, %v575_v19, %v582_v10  ;;  %v771_v36 = vld [vmem:[#allocation2 + $0x9c] sm:$0xf]  ;;  %v775_v38 = vld [vmem:[#allocation2 + $0xa4] sm:$0x1]  ;;  %v592_v39 = vrot.slane %v588_v28, 4  ;;  %v606_v42 = vshll.u32 %v238_v22, 16 }
  0x76   : > { %v5298_v43 = vld [vmem:[#allocation2 + $0x90] sm:$0xff]   ;;  %v772_v44 = vsel %vm4987_vm8, %v574_v18, %v771_v36  ;;  %774 = vst [vmem:[#allocation2 + $0xa0] sm:$0xf] %v583_v35  ;;  %v776_v45 = vsel %vm4948_vm2, %v584_v23, %v775_v38  ;;  %v596_v47 = vrot.slane %v594_v32, 7  ;;  %v591_v49 = vor.u32 %v589_v30, %v588_v28  ;;  %v353_v55 = vld [vmem:[#allocation2 + $0xbc] sm:$0x1] }
  0x77   : > { %v297_v4 = vld [vmem:[#allocation2 + $0xb4] sm:$0x1]  ;;  %v4691_v48 = vld [vmem:[#allocation2 + $0x98] ss:$0 sps:$4 sm:$0x11]   ;;  %v1209_v51 = vshrl.u32 %v5298_v43, 16 }
  0x78   : > { %773 = vst [vmem:[#allocation2 + $0x9c] sm:$0xf] %v772_v44  ;;  %777 = vst [vmem:[#allocation2 + $0xa4] sm:$0x1] %v776_v45  ;;  %v298_v50 = vsel %vm4948_vm2, 0, %v297_v4  ;;  %v1211_v52 = vshll.u32 %v5298_v43, 16  ;;  %v599_v53 = vor.u32 %v597_v33, %v596_v47 }
  0x79   : > { %v601_v54 = vrot.slane %v596_v47, 4  ;;  %299 = vst [vmem:[#allocation2 + $0xb4] sm:$0x1] %v298_v50  ;;  %v1216_v56 = vshll.u32 %v4691_v48, 16  ;;  %v354_v59 = vsel %vm4959_vm4, 0, %v353_v55  ;;  %v605_v60 = vrot.slane %v603_v37, 7 }
  0x7a   : > { %1595 = vmatmul.mubr.bf16.gmra.mxu0 %v5258_v40  ;;  %v611_v63 = vshrl.u32 %v239_v34, 16  ;;  %v1213_v0 = vrot.slane %v1211_v52, 1  ;;  %v600_v1 = vsel %vm4977_vm7, %v592_v39, %v599_v53  ;;  %v778_v2 = vld [vmem:[#allocation2 + $0xa8] sm:$0xf]  ;;  %355 = vst [vmem:[#allocation2 + $0xbc] sm:$0x1] %v354_v59 }
  0x7b   : > { %1602 = vmatprep.mubr.bf16.mxu0 %v5284_v17  ;;  %v614_v3 = vshll.u32 %v239_v34, 16  ;;  %v1218_v5 = vrot.slane %v1216_v56, 1  ;;  %v779_v40 = vsel %vm4987_vm8, %v591_v49, %v778_v2  ;;  %781 = vst [vmem:[#allocation2 + $0xac] sm:$0xf] %v600_v1  ;;  %v782_v6 = vld [vmem:[#allocation2 + $0xb0] sm:$0x1]  ;;  %v608_v8 = vor.u32 %v606_v42, %v605_v60 }
  0x7c   : > { %v1214_v9 = vor.u32 %v1213_v0, %v1209_v51  ;;  %780 = vst [vmem:[#allocation2 + $0xa8] sm:$0xf] %v779_v40  ;;  %v783_v25 = vsel %vm4948_vm2, %v601_v54, %v782_v6  ;;  %v609_v11 = vrot.slane %v605_v60, 4  ;;  %v613_v12 = vrot.slane %v611_v63, 7  ;;  %v240_v13 = vld [vmem:[%s4933_s10 + $0x78] sm:$0xf] }
  0x7d   : > { %784 = vst [vmem:[#allocation2 + $0xb0] sm:$0x1] %v783_v25  ;;  %v620_v21 = vshrl.u32 %v240_v13, 16  ;;  %v241_v28 = vld [vmem:[%s4933_s10 + $0x7c] sm:$0xf]  ;;  %v623_v42 = vshll.u32 %v240_v13, 16 }
  0x7e   : > { %v5320_v14 = vsel %vm1063_vm9, %v1214_v9, %v1218_v5  ;;  %v616_v16 = vor.u32 %v614_v3, %v613_v12  ;;  %v618_v18 = vrot.slane %v613_v12, 4  ;;  %v300_v29 = vld [vmem:[#allocation2 + $0xc0] sm:$0x1]  ;;  %v356_v34 = vld [vmem:[#allocation2 + $0xc8] sm:$0x1]  ;;  %v628_v44 = vshrl.u32 %v241_v28, 16 }
  0x7f   : > { %v5322_v15 = vld [vmem:[#allocation2 + $0x9c] sm:$0xff]   ;;  %4464 = vmatprep.mubr.bf16.mxu1 %v5320_v14  ;;  %v5325_v19 = vld [vmem:[#allocation2 + $0xa4] ss:$0 sps:$4 sm:$0x11]   ;;  %v301_v33 = vsel %vm4948_vm2, 0, %v300_v29  ;;  %v357_v36 = vsel %vm4959_vm4, 0, %v356_v34 }
  0x80   : > { %v785_v20 = vld [vmem:[#allocation2 + $0xb4] sm:$0xf]  ;;  %v1221_v22 = vshrl.u32 %v5322_v15, 16  ;;  %v1223_v10 = vshll.u32 %v5322_v15, 16  ;;  %v617_v23 = vsel %vm4977_vm7, %v609_v11, %v616_v16  ;;  %v1228_v30 = vshll.u32 %v5325_v19, 16 }
  0x81   : > { %v786_v24 = vsel %vm4987_vm8, %v608_v8, %v785_v20  ;;  %788 = vst [vmem:[#allocation2 + $0xb8] sm:$0xf] %v617_v23  ;;  %v789_v32 = vld [vmem:[#allocation2 + $0xbc] sm:$0x1]  ;;  %302 = vst [vmem:[#allocation2 + $0xc0] sm:$0x1] %v301_v33 }
  0x82   : > { %1603 = vmatmul.mubr.bf16.gmra.mxu0 %v5272_v61  ;;  %787 = vst [vmem:[#allocation2 + $0xb4] sm:$0xf] %v786_v24  ;;  %v1225_v37 = vrot.slane %v1223_v10, 1  ;;  %v790_v35 = vsel %vm4948_vm2, %v618_v18, %v789_v32  ;;  %v622_v61 = vrot.slane %v620_v21, 7  ;;  %v1230_v38 = vrot.slane %v1228_v30, 1 }
  0x83   : > { %1610 = vmatprep.mubr.bf16.mxu0 %v5320_v14  ;;  %v5343_v39 = vld [vmem:[#allocation2 + $0xa8] sm:$0xff]   ;;  %791 = vst [vmem:[#allocation2 + $0xbc] sm:$0x1] %v790_v35  ;;  %358 = vst [vmem:[#allocation2 + $0xc8] sm:$0x1] %v357_v36  ;;  %v630_v51 = vrot.slane %v628_v44, 7 }
  0x84   : > { %v1226_v45 = vor.u32 %v1225_v37, %v1221_v22  ;;  %v5345_v47 = vld [vmem:[#allocation2 + $0xb0] ss:$0 sps:$4 sm:$0x11]   ;;  %v626_v4 = vrot.slane %v622_v61, 4  ;;  %v1233_v48 = vshrl.u32 %v5343_v39, 16  ;;  %v1235_v49 = vshll.u32 %v5343_v39, 16 }
  0x85   : > { %v625_v50 = vor.u32 %v623_v42, %v622_v61  ;;  %v303_v52 = vld [vmem:[#allocation2 + $0xcc] sm:$0x1]  ;;  %v1240_v54 = vshll.u32 %v5345_v47, 16  ;;  %v631_v55 = vshll.u32 %v241_v28, 16  ;;  %v359_v59 = vld [vmem:[#allocation2 + $0xd4] sm:$0x1] }
  0x86   : > { %v1231_v53 = vsel %vm1063_vm9, %v1226_v45, %v1230_v38  ;;  %v304_v56 = vsel %vm4948_vm2, 0, %v303_v52  ;;  %v1237_v60 = vrot.slane %v1235_v49, 1  ;;  %v635_v63 = vrot.slane %v630_v51, 4  ;;  %v5388_v38 = vld [vmem:[#allocation2 + $0xc] sm:$0xff]   ;;  %v5394_v44 = vld [vmem:[#allocation2] sm:$0xff]   ;;  %v5398_v45 = vld [vmem:[#allocation2 + $0x18] sm:$0xff]  }
  0x87   : > { %4465 = vmatmul.mubr.bf16.gmra.mxu1 %v1231_v53  ;;  %305 = vst [vmem:[#allocation2 + $0xcc] sm:$0x1] %v304_v56  ;;  %v360_v0 = vsel %vm4959_vm4, 0, %v359_v59  ;;  %v1242_v1 = vrot.slane %v1240_v54, 1  ;;  %v633_v3 = vor.u32 %v631_v55, %v630_v51  ;;  %v4712_v42 = vld [vmem:[%s6034_s1 + $0x230] sm:$0xff]   ;;  %v5412_v49 = vld [vmem:[#allocation2 + $0x24] sm:$0xff]  }
  0x88   : > { %361 = vst [vmem:[#allocation2 + $0xd4] sm:$0x1] %v360_v0  ;;  %v1238_v5 = vor.u32 %v1237_v60, %v1233_v48  ;;  %v792_v40 = vld [vmem:[#allocation2 + $0xc0] sm:$0xf]  ;;  %v4719_v51 = vld [vmem:[%s6034_s1 + $0x218] sm:$0xff]   ;;  %v5422_v52 = vld [vmem:[#allocation2 + $0x30] sm:$0xff]  }
  0x89   : > { %v5355_v2 = vld [vmem:[#allocation2 + $0xb4] sm:$0xff]   ;;  %v634_v8 = vsel %vm4977_vm7, %v626_v4, %v633_v3  ;;  %v793_v9 = vsel %vm4987_vm8, %v625_v50, %v792_v40  ;;  %v4714_v4 = vld [vmem:[%s6034_s1 + $0x228] sm:$0xff]   ;;  %v4716_v48 = vld [vmem:[%s6034_s1 + $0x220] sm:$0xff]  }
  0x8a   : > { %1611 = vmatmul.mubr.bf16.gmra.mxu0 %v5284_v17  ;;  %v5358_v6 = vld [vmem:[#allocation2 + $0xbc] ss:$0 sps:$4 sm:$0x11]   ;;  %v1243_v31 = vsel %vm1063_vm9, %v1238_v5, %v1242_v1  ;;  %v1245_v25 = vshrl.u32 %v5355_v2, 16  ;;  %v1247_v11 = vshll.u32 %v5355_v2, 16  ;;  %v4720_v50 = vld [vmem:[%s6034_s1 + $0x1f0] sm:$0xff]  }
  0x8b   : > { %1618 = vmatprep.mubr.bf16.mxu0 %v1231_v53  ;;  %794 = vst [vmem:[#allocation2 + $0xc0] sm:$0xf] %v793_v9  ;;  %795 = vst [vmem:[#allocation2 + $0xc4] sm:$0xf] %v634_v8  ;;  %v796_v17 = vld [vmem:[#allocation2 + $0xc8] sm:$0x1]  ;;  %4468 = vmatprep.mubr.bf16.mxu1 %v1243_v31 }
  0x8c   : > { %v1252_v12 = vshll.u32 %v5358_v6, 16  ;;  %v797_v13 = vsel %vm4948_vm2, %v635_v63, %v796_v17  ;;  %v1249_v46 = vrot.slane %v1247_v11, 1  ;;  %v4722_v54 = vld [vmem:[%s6034_s1 + $0x1e8] sm:$0xff]   ;;  %v4724_v55 = vld [vmem:[%s6034_s1 + $0x210] sm:$0xff]   ;;  %v4725_v59 = vld [vmem:[%s6034_s1 + $0x1e0] sm:$0xff]  }
  0x8d   : > { %798 = vst [vmem:[#allocation2 + $0xc8] sm:$0x1] %v797_v13  ;;  %v4723_v56 = vld [vmem:[%s6034_s1 + $0x1a8] sm:$0xff]   ;;  %v5445_v63 = vld [vmem:[#allocation2 + $0x3c] sm:$0xff]   ;;  %v4730_v8 = vld [vmem:[%s6034_s1 + $0x1d0] sm:$0xff]  }
  0x8e   : > { %v1254_v16 = vrot.slane %v1252_v12, 1  ;;  %v5370_v57 = vld [vmem:[#allocation2 + $0xcc] sm:$0xff]   ;;  %v1250_v18 = vor.u32 %v1249_v46, %v1245_v25  ;;  %v4726_v1 = vld [vmem:[%s6034_s1 + $0x1a0] sm:$0xff]   ;;  %v4727_v3 = vld [vmem:[%s6034_s1 + $0x1d8] sm:$0xff]   ;;  %v2282_v46 = vrot.slane %v5388_v38, 1 }
  0x8f   : > { %v5372_v20 = vld [vmem:[#allocation2 + $0xd4] ss:$0 sps:$4 sm:$0x11]   ;;  %v1271_v21 = vshll.u32 %v5370_v57, 16  ;;  %v1269_v10 = vshrl.u32 %v5370_v57, 16  ;;  %v4729_v60 = vld [vmem:[%s6034_s1 + $0x208] sm:$0xff]  }
  0x90   : > { %v1255_v22 = vsel %vm1063_vm9, %v1250_v18, %v1254_v16  ;;  %v1276_v23 = vshll.u32 %v5372_v20, 16  ;;  %v5448_v0 = vld [vmem:[#allocation2 + $0x48] sm:$0xff]   ;;  %v4734_v5 = vld [vmem:[%s6034_s1 + $0x200] sm:$0xff]   ;;  %v4728_v40 = vld [vmem:[%s6034_s1 + $0x198] sm:$0xff]  }
  0x91   : > { %4469 = vmatmul.mubr.bf16.gmra.mxu1 %v1255_v22  ;;  %v1273_v24 = vrot.slane %v1271_v21, 1  ;;  %v5468_v9 = vld [vmem:[#allocation2 + $0x54] sm:$0xff]   ;;  %v4732_v11 = vld [vmem:[%s6034_s1 + $0x1c8] sm:$0xff]   ;;  %v4735_v12 = vld [vmem:[%s6034_s1 + $0x1c0] sm:$0xff]  }
  0x92   : > { %1619 = vmatmul.mubr.bf16.gmra.mxu0 %v5320_v14  ;;  %v5379_v26 = vld [vmem:[#allocation2 + $0xc0] sm:$0xff]   ;;  %v1278_v33 = vrot.slane %v1276_v23, 1  ;;  %v4731_v25 = vld [vmem:[%s6034_s1 + $0x190] sm:$0xff]   ;;  %v4733_v17 = vld [vmem:[%s6034_s1 + $0x188] sm:$0xff]  }
  0x93   : > { %1626 = vmatprep.mubr.bf16.mxu0 %v1243_v31  ;;  %v1257_v29 = vshrl.u32 %v5379_v26, 16  ;;  %v1259_v30 = vshll.u32 %v5379_v26, 16  ;;  %v1274_v14 = vor.u32 %v1273_v24, %v1269_v10  ;;  %v4736_v13 = vld [vmem:[%s6034_s1 + $0x180] sm:$0xff]   ;;  %v4769_v16 = vld [vmem:[#allocation2 + $0x14] ss:$0 sps:$4 sm:$0x11]  }
  0x94   : > { %v5381_v28 = vld [vmem:[#allocation2 + $0xc8] ss:$0 sps:$4 sm:$0x11]   ;;  %v2283_v18 = vrot.slane %v4769_v16, 1  ;;  %v2285_v24 = vrot.slane %v5398_v45, 1 }
  0x95   : > { %v1264_v32 = vshll.u32 %v5381_v28, 16  ;;  %v1261_v34 = vrot.slane %v1259_v30, 1  ;;  %v1279_v36 = vsel %vm1063_vm9, %v1274_v14, %v1278_v33  ;;  %v4770_v10 = vld [vmem:[#allocation2 + $0x8] ss:$0 sps:$4 sm:$0x11]  }
  0x96   : > { %v2284_v21 = vsel %vm2278_vm10, %v2282_v46, %v2283_v18  ;;  %v2280_v23 = vrot.slane %v4770_v10, 1 }
  0x97   : > { %v1266_v37 = vrot.slane %v1264_v32, 1  ;;  %v1262_v35 = vor.u32 %v1261_v34, %v1257_v29  ;;  %v4771_v29 = vld [vmem:[#allocation2 + $0x20] ss:$0 sps:$4 sm:$0x11]  }
  0x98   : > { %v2286_v30 = vrot.slane %v4771_v29, 1 }
  0x99   : > { %v1267_v61 = vsel %vm1063_vm9, %v1262_v35, %v1266_v37  ;;  %v2288_v37 = vrot.slane %v5412_v49, 1  ;;  %v4772_v35 = vld [vmem:[#allocation2 + $0x2c] ss:$0 sps:$4 sm:$0x11]  }
  0x9a   : > { %1627 = vmatmul.mubr.bf16.gmra.mxu0 %v1231_v53  ;;  %4472 = vmatprep.mubr.bf16.mxu1 %v1267_v61  ;;  %v4721_v53 = vld [vmem:[%s6034_s1 + $0x1b0] sm:$0xff]  }
  0x9b   : > { %1634 = vmatprep.mubr.bf16.mxu0 %v1255_v22  ;;  %4473 = vmatmul.mubr.bf16.gmra.mxu1 %v1279_v36  ;;  %v2289_v36 = vrot.slane %v4772_v35, 1 }
  0x9c   : > { %1988 = vmatprep.mubr.bf16.mxu1 %v5388_v38 }
  0xa2   : > { %1635 = vmatmul.mubr.bf16.gmra.mxu0 %v1243_v31  ;;  %v5474_v31 = vld [vmem:[%s6035_s2 + $0x38] sm:$0xff]  }
  0xa3   : > { %1642 = vmatprep.mubr.bf16.mxu0 %v1267_v61  ;;  %1989 = vmatmul.mubr.bf16.vlgmr.msra.gmra.mxu1 %v5394_v44 }
  0xa4   : > { %4525 = vmatpush3.bf16.msra.mxu1 %v5177_v62  ;;  %1996 = vmatprep.mubr.bf16.mxu1 %v5398_v45  ;;  %v4718_v62 = vld [vmem:[%s6034_s1 + $0x1b8] sm:$0xff]  }
  0xa5   : > { %4526 = vmatprep.subr.bf16.mxu1 %v4712_v42 }
  0xa8   : > { %4527 = vmatpush3.bf16.msra.mxu1 %v4712_v42  ;;  %v5529_v42 = vsel %vm2278_vm10, %v2288_v37, %v2289_v36 }
  0xa9   : > { %4528 = vmatprep.subr.bf16.mxu1 %v4714_v4 }
  0xaa   : > { %1643 = vmatmul.mubr.bf16.gmra.mxu0 %v1255_v22  ;;  %v2279_v22 = vrot.slane %v5394_v44, 1 }
  0xab   : > { %4492 = vmatprep.mubr.bf16.mxu0 %v5398_v45  ;;  %1997 = vmatmul.mubr.bf16.gmra.mxu1 %v5388_v38 }
  0xac   : > { %2004 = vmatprep.mubr.bf16.mxu1 %v5412_v49  ;;  %4529 = vmatpush3.bf16.msra.mxu1 %v4714_v4  ;;  %v2281_v32 = vsel %vm2278_vm10, %v2279_v22, %v2280_v23 }
  0xad   : > { %4530 = vmatprep.subr.bf16.mxu1 %v4716_v48 }
  0xb0   : > { %4531 = vmatpush3.bf16.msra.mxu1 %v4716_v48 }
  0xb1   : > { %4532 = vmatprep.subr.bf16.mxu1 %v4719_v51 }
  0xb2   : > { %4493 = vmatmul.mubr.bf16.vlgmr.msra.gmra.mxu0 %v5412_v49 }
  0xb3   : > { %4269 = vmatpush3.bf16.msra.mxu0 %v4718_v62  ;;  %4496 = vmatprep.mubr.bf16.mxu0 %v5422_v52 }
  0xb4   : > { %4270 = vmatprep.subr.bf16.mxu0 %v4720_v50  ;;  %2005 = vmatmul.mubr.bf16.gmra.mxu1 %v5398_v45  ;;  %v4773_v50 = vld [vmem:[#allocation2 + $0x38] ss:$0 sps:$4 sm:$0x11]  }
  0xb5   : > { %2012 = vmatprep.mubr.bf16.mxu1 %v5422_v52  ;;  %4533 = vmatpush3.bf16.msra.mxu1 %v4719_v51  ;;  %v2292_v51 = vrot.slane %v4773_v50, 1 }
  0xb6   : > { %4534 = vmatprep.subr.bf16.mxu1 %v4724_v55 }
  0xb7   : > { %4271 = vmatpush3.bf16.msra.mxu0 %v4721_v53 }
  0xb8   : > { %4272 = vmatprep.subr.bf16.mxu0 %v4722_v54 }
  0xb9   : > { %4535 = vmatpush3.bf16.msra.mxu1 %v4724_v55 }
  0xba   : > { %4497 = vmatmul.mubr.bf16.gmra.mxu0 %v5445_v63  ;;  %4536 = vmatprep.subr.bf16.mxu1 %v4729_v60 }
  0xbb   : > { %4500 = vmatprep.mubr.bf16.mxu0 %v5448_v0  ;;  %4273 = vmatpush3.bf16.msra.mxu0 %v4723_v56 }
  0xbc   : > { %4274 = vmatprep.subr.bf16.mxu0 %v4725_v59  ;;  %2013 = vmatmul.mubr.bf16.gmra.mxu1 %v5412_v49 }
  0xbd   : > { %2020 = vmatprep.mubr.bf16.mxu1 %v5445_v63  ;;  %4537 = vmatpush3.bf16.msra.mxu1 %v4729_v60 }
  0xbe   : > { %4538 = vmatprep.subr.bf16.mxu1 %v4734_v5 }
  0xbf   : > { %4275 = vmatpush3.bf16.msra.mxu0 %v4726_v1 }
  0xc0   : > { %4276 = vmatprep.subr.bf16.mxu0 %v4727_v3 }
  0xc1   : > { %4539 = vmatpush3.bf16.msra.mxu1 %v4734_v5 }
  0xc2   : > { %4501 = vmatmul.mubr.bf16.gmra.mxu0 %v5468_v9  ;;  %4572 = vmatprep.subr.bf16.mxu1 %v5474_v31 }
  0xc3   : > { %4504 = vmatprep.mubr.bf16.mxu0 %v5211_v41  ;;  %4277 = vmatpush3.bf16.msra.mxu0 %v4728_v40  ;;  %v4774_v40 = vld [vmem:[#allocation2 + $0x44] ss:$0 sps:$4 sm:$0x11]  }
  0xc4   : > { %4278 = vmatprep.subr.bf16.mxu0 %v4730_v8  ;;  %2021 = vmatmul.mubr.bf16.gmra.mxu1 %v5422_v52  ;;  %v2295_v8 = vrot.slane %v4774_v40, 1 }
  0xc5   : > { %2028 = vmatprep.mubr.bf16.mxu1 %v5448_v0 }
  0xc7   : > { %4279 = vmatpush3.bf16.msra.mxu0 %v4731_v25 }
  0xc8   : > { %4280 = vmatprep.subr.bf16.mxu0 %v4732_v11 }
  0xca   : > { %4505 = vmatmul.mubr.bf16.gmra.mxu0 %v5229_v7 }
  0xcb   : > { %4508 = vmatprep.mubr.bf16.mxu0 %v5244_v27  ;;  %4281 = vmatpush3.bf16.msra.mxu0 %v4733_v17 }
  0xcc   : > { %4282 = vmatprep.subr.bf16.mxu0 %v4735_v12  ;;  %2029 = vmatmul.mubr.bf16.gmra.mxu1 %v5445_v63 }
  0xcd   : > { %2036 = vmatprep.mubr.bf16.mxu1 %v5468_v9 }
  0xcf   : > { %4283 = vmatpush3.bf16.msra.mxu0 %v4736_v13 }
  0xd2   : > { %4509 = vmatmul.mubr.bf16.gmra.mxu0 %v5254_v58 }
  0xd3   : > { %4512 = vmatprep.mubr.bf16.mxu0 %v5298_v43 }
  0xd4   : > { %2037 = vmatmul.mubr.bf16.gmra.mxu1 %v5448_v0 }
  0xd5   : > { %2044 = vmatprep.mubr.bf16.mxu1 %v5211_v41 }
  0xda   : > { %4513 = vmatmul.mubr.bf16.gmra.mxu0 %v5322_v15 }
  0xdb   : > { %4516 = vmatprep.mubr.bf16.mxu0 %v5343_v39 }
  0xdc   : > { %2045 = vmatmul.mubr.bf16.gmra.mxu1 %v5468_v9 }
  0xdd   : > { %2052 = vmatprep.mubr.bf16.mxu1 %v5229_v7 }
  0xe2   : > { %4517 = vmatmul.mubr.bf16.gmra.mxu0 %v5355_v2 }
  0xe3   : > { %4520 = vmatprep.mubr.bf16.mxu0 %v5379_v26 }
  0xe4   : > { %2053 = vmatmul.mubr.bf16.gmra.mxu1 %v5211_v41  ;;  %v5520_v41 = vsel %vm2278_vm10, %v2285_v24, %v2286_v30 }
  0xe5   : > { %2060 = vmatprep.mubr.bf16.mxu1 %v5244_v27 }
  0xea   : > { %4521 = vmatmul.mubr.bf16.gmra.mxu0 %v5370_v57 }
  0xeb   : > { %2575 = vmatprep.mubr.bf16.mxu0 %v2284_v21 }
  0xec   : > { %2061 = vmatmul.mubr.bf16.gmra.mxu1 %v5229_v7 }
  0xed   : > { %2068 = vmatprep.mubr.bf16.mxu1 %v5254_v58 }
  0xf2   : > { %v4012_v14 = vpop.f32.mrf.mxu0  ;;  %2576 = vmatmul.mubr.bf16.vlgmr.msra.gmra.mxu0 %v2281_v32 }
  0xf3   : > { %2583 = vmatprep.mubr.bf16.mxu0 %v5520_v41 }
  0xf4   : > { %v4013_v33 = vpop.f32.mrf.mxu0  ;;  %2069 = vmatmul.mubr.bf16.gmra.mxu1 %v5244_v27  ;;  %v2291_v27 = vrot.slane %v5422_v52, 1 }
  0xf5   : > { %v4014_v34 = vadd.f32 %v4013_v33, %v4012_v14  ;;  %2076 = vmatprep.mubr.bf16.mxu1 %v5298_v43 }
  0xf6   : > { %v4015_v61 = vpop.f32.mrf.mxu0  ;;  %v5540_v60 = vsel %vm2278_vm10, %v2291_v27, %v2292_v51 }
  0xf8   : > { %v4016_v7 = vpop.f32.mrf.mxu0 }
  0xf9   : > { %v5526_v38 = vadd.f32 %v4016_v7, %v4015_v61  ;;  %v2300_v7 = vrot.slane %v5468_v9, 1 }
  0xfa   : > { %v4018_v44 = vpop.f32.mrf.mxu0  ;;  %2584 = vmatmul.mubr.bf16.gmra.mxu0 %v2284_v21  ;;  %v4446_v45 = vpop.f32.mrf.mxu1  ;;  %v2297_v21 = vrot.slane %v5448_v0, 1 }
  0xfb   : > { %2591 = vmatprep.mubr.bf16.mxu0 %v5529_v42 }
  0xfc   : > { %v4019_v4 = vpop.f32.mrf.mxu0  ;;  %v1685_v48 = vpop.f32.mrf.mxu1  ;;  %2077 = vmatmul.mubr.bf16.gmra.mxu1 %v5254_v58  ;;  %v2294_v58 = vrot.slane %v5445_v63, 1 }
  0xfd   : > { %v4020_v62 = vadd.f32 %v4019_v4, %v4018_v44  ;;  %v5532_v49 = vadd.f32 %v4014_v34, %v1685_v48  ;;  %2084 = vmatprep.mubr.bf16.mxu1 %v5322_v15  ;;  %v4776_v44 = vld [vmem:[#allocation2 + $0x5c] ss:$0 sps:$4 sm:$0x11]  }
  0xfe   : > { %v4021_v53 = vpop.f32.mrf.mxu0  ;;  %v4447_v59 = vpop.f32.mrf.mxu1  ;;  %v5552_v13 = vsel %vm2278_vm10, %v2294_v58, %v2295_v8  ;;  %v4778_v58 = vld [vmem:[#allocation2 + $0x68] ss:$0 sps:$4 sm:$0x11]  }
  0xff   : > { %v5536_v54 = vadd.f32 %v4446_v45, %v4020_v62  ;;  %v2301_v45 = vrot.slane %v4776_v44, 1  ;;  %v2304_v40 = vrot.slane %v4778_v58, 1  ;;  %v4781_v44 = vld [vmem:[#allocation2 + $0x78] sm:$0xff]  }
 0x100   : > { %v4022_v55 = vpop.f32.mrf.mxu0  ;;  %v5549_v12 = vpop.f32.mrf.mxu1 }
 0x101   : > { %v4023_v56 = vadd.f32 %v4022_v55, %v4021_v53  ;;  %v5576_v51 = vsel %vm2278_vm10, %v2300_v7, %v2301_v45  ;;  %v2309_v45 = vrot.slane %v4781_v44, 1 }
 0x102   : > { %v4024_v1 = vpop.f32.mrf.mxu0  ;;  %2592 = vmatmul.mubr.bf16.gmra.mxu0 %v5520_v41 }
 0x103   : > { %v5543_v3 = vadd.f32 %v4447_v59, %v4023_v56  ;;  %2599 = vmatprep.mubr.bf16.mxu0 %v5540_v60 }
 0x104   : > { %v4025_v52 = vpop.f32.mrf.mxu0  ;;  %2085 = vmatmul.mubr.bf16.gmra.mxu1 %v5298_v43  ;;  %v4775_v43 = vld [vmem:[#allocation2 + $0x50] ss:$0 sps:$4 sm:$0x11]  }
 0x105   : > { %v4026_v5 = vadd.f32 %v4025_v52, %v4024_v1  ;;  %2092 = vmatprep.mubr.bf16.mxu1 %v5343_v39  ;;  %v2298_v22 = vrot.slane %v4775_v43, 1  ;;  %v4777_v52 = vld [vmem:[#allocation2 + $0x60] sm:$0xff]   ;;  %v4738_v43 = vld [vmem:[%s6035_s2 + $0x30] sm:$0xff]  }
 0x106   : > { %v4027_v25 = vpop.f32.mrf.mxu0 }
 0x107   : > { %v5564_v33 = vsel %vm2278_vm10, %v2297_v21, %v2298_v22 }
 0x108   : > { %v4028_v11 = vpop.f32.mrf.mxu0 }
 0x109   : > { %v4029_v17 = vadd.f32 %v4028_v11, %v4027_v25 }
 0x10a   : > { %v4030_v46 = vpop.f32.mrf.mxu0  ;;  %2600 = vmatmul.mubr.bf16.gmra.mxu0 %v5529_v42 }
 0x10b   : > { %2607 = vmatprep.mubr.bf16.mxu0 %v5552_v13 }
 0x10c   : > { %v4031_v63 = vpop.f32.mrf.mxu0  ;;  %2093 = vmatmul.mubr.bf16.gmra.mxu1 %v5322_v15 }
 0x10d   : > { %v4032_v16 = vadd.f32 %v4031_v63, %v4030_v46  ;;  %v4450_v18 = vpop.f32.mrf.mxu1  ;;  %2100 = vmatprep.mubr.bf16.mxu1 %v5355_v2 }
 0x10e   : > { %v4033_v10 = vpop.f32.mrf.mxu0 }
 0x10f   : > { %v5558_v23 = vadd.f32 %v4450_v18, %v4032_v16  ;;  %v1701_v24 = vpop.f32.mrf.mxu1 }
 0x110   : > { %v4034_v29 = vpop.f32.mrf.mxu0  ;;  %v5561_v30 = vadd.f32 %v4026_v5, %v1701_v24  ;;  %v2303_v5 = vrot.slane %v4777_v52, 1  ;;  %v4780_v24 = vld [vmem:[#allocation2 + $0x74] ss:$0 sps:$4 sm:$0x11]  }
 0x111   : > { %v4035_v32 = vadd.f32 %v4034_v29, %v4033_v10  ;;  %v4451_v14 = vpop.f32.mrf.mxu1  ;;  %v4779_v10 = vld [vmem:[#allocation2 + $0x6c] sm:$0xff]   ;;  %v2307_v29 = vrot.slane %v4780_v24, 1 }
 0x112   : > { %v4036_v34 = vpop.f32.mrf.mxu0  ;;  %2608 = vmatmul.mubr.bf16.gmra.mxu0 %v5540_v60  ;;  %v5589_v63 = vsel %vm2278_vm10, %v2303_v5, %v2304_v40 }
 0x113   : > { %v5567_v0 = vadd.f32 %v4451_v14, %v4035_v32  ;;  %2615 = vmatprep.mubr.bf16.mxu0 %v5564_v33  ;;  %v1704_v37 = vpop.f32.mrf.mxu1 }
 0x114   : > { %v4037_v35 = vpop.f32.mrf.mxu0  ;;  %v5570_v36 = vadd.f32 %v4029_v17, %v1704_v37  ;;  %2101 = vmatmul.mubr.bf16.gmra.mxu1 %v5343_v39 }
 0x115   : > { %v4038_v61 = vadd.f32 %v4037_v35, %v4036_v34  ;;  %v4454_v48 = vpop.f32.mrf.mxu1  ;;  %2108 = vmatprep.mubr.bf16.mxu1 %v5379_v26  ;;  %v4739_v34 = vld [vmem:[%s6035_s2 + $0x28] sm:$0xff]  }
 0x116   : > { %v4039_v4 = vpop.f32.mrf.mxu0 }
 0x117   : > { %v1717_v27 = vpop.f32.mrf.mxu1 }
 0x118   : > { %v4040_v62 = vpop.f32.mrf.mxu0  ;;  %v5578_v53 = vadd.f32 %v4038_v61, %v1717_v27 }
 0x119   : > { %v4041_v50 = vadd.f32 %v4040_v62, %v4039_v4  ;;  %v4455_v9 = vpop.f32.mrf.mxu1  ;;  %v4782_v4 = vld [vmem:[#allocation2 + $0x80] ss:$0 sps:$4 sm:$0x11]  }
 0x11a   : > { %v4042_v55 = vpop.f32.mrf.mxu0  ;;  %2616 = vmatmul.mubr.bf16.gmra.mxu0 %v5552_v13 }
 0x11b   : > { %2623 = vmatprep.mubr.bf16.mxu0 %v5576_v51  ;;  %v1720_v59 = vpop.f32.mrf.mxu1 }
 0x11c   : > { %v4043_v56 = vpop.f32.mrf.mxu0  ;;  %v5582_v8 = vadd.f32 %v4041_v50, %v1720_v59  ;;  %2109 = vmatmul.mubr.bf16.gmra.mxu1 %v5355_v2  ;;  %v4741_v59 = vld [vmem:[%s6035_s2 + $0x18] sm:$0xff]  }
 0x11d   : > { %v4044_v1 = vadd.f32 %v4043_v56, %v4042_v55  ;;  %4540 = vmatprep.mubr.bf16.mxu1 %v5520_v41  ;;  %v2306_v41 = vrot.slane %v4779_v10, 1 }
 0x11e   : > { %v4045_v25 = vpop.f32.mrf.mxu0 }
 0x11f   : > { %v5585_v11 = vadd.f32 %v4454_v48, %v4044_v1  ;;  %v5605_v35 = vsel %vm2278_vm10, %v2306_v41, %v2307_v29  ;;  %v2310_v48 = vrot.slane %v4782_v4, 1 }
 0x120   : > { %v4046_v17 = vpop.f32.mrf.mxu0 }
 0x121   : > { %v4047_v46 = vadd.f32 %v4046_v17, %v4045_v25  ;;  %v2311_v52 = vsel %vm2278_vm10, %v2309_v45, %v2310_v48  ;;  %v4742_v17 = vld [vmem:[%s6035_s2 + $0x10] sm:$0xff]   ;;  %v4786_v45 = vld [vmem:[#allocation2 + $0x98] ss:$0 sps:$4 sm:$0x11]  }
 0x122   : > { %v4048_v16 = vpop.f32.mrf.mxu0  ;;  %2624 = vmatmul.mubr.bf16.gmra.mxu0 %v5564_v33  ;;  %v2316_v4 = vrot.slane %v4786_v45, 1 }
 0x123   : > { %v5592_v18 = vadd.f32 %v4455_v9, %v4047_v46  ;;  %2631 = vmatprep.mubr.bf16.mxu0 %v5589_v63 }
 0x124   : > { %v4049_v21 = vpop.f32.mrf.mxu0  ;;  %4541 = vmatmul.mubr.bf16.vlgmr.msra.gmra.mxu1 %v5529_v42 }
 0x125   : > { %v4050_v22 = vadd.f32 %v4049_v21, %v4048_v16  ;;  %4573 = vmatpush3.bf16.msra.mxu1 %v5474_v31  ;;  %4544 = vmatprep.mubr.bf16.mxu1 %v5540_v60  ;;  %v4740_v60 = vld [vmem:[%s6035_s2 + $0x20] sm:$0xff]  }
 0x126   : > { %v4051_v32 = vpop.f32.mrf.mxu0  ;;  %4574 = vmatprep.subr.bf16.mxu1 %v4738_v43  ;;  %v4783_v16 = vld [vmem:[#allocation2 + $0x84] sm:$0xff]  }
 0x127   : > { %v2312_v21 = vrot.slane %v4783_v16, 1  ;;  %v2321_v16 = vrot.slane %v5343_v39, 1 }
 0x128   : > { %v4052_v14 = vpop.f32.mrf.mxu0 }
 0x129   : > { %v4053_v37 = vadd.f32 %v4052_v14, %v4051_v32  ;;  %4575 = vmatpush3.bf16.msra.mxu1 %v4738_v43  ;;  %v4784_v43 = vld [vmem:[#allocation2 + $0x8c] ss:$0 sps:$4 sm:$0x11]  }
 0x12a   : > { %v4054_v61 = vpop.f32.mrf.mxu0  ;;  %2632 = vmatmul.mubr.bf16.gmra.mxu0 %v5576_v51  ;;  %4576 = vmatprep.subr.bf16.mxu1 %v4739_v34  ;;  %v4743_v14 = vld [vmem:[%s6035_s2 + $0x8] sm:$0xff]  }
 0x12b   : > { %2639 = vmatprep.mubr.bf16.mxu0 %v5605_v35  ;;  %v4458_v31 = vpop.f32.mrf.mxu1 }
 0x12c   : > { %v4055_v42 = vpop.f32.mrf.mxu0  ;;  %4545 = vmatmul.mubr.bf16.gmra.mxu1 %v5552_v13 }
 0x12d   : > { %v4056_v7 = vadd.f32 %v4055_v42, %v4054_v61  ;;  %v1733_v27 = vpop.f32.mrf.mxu1  ;;  %4548 = vmatprep.mubr.bf16.mxu1 %v5564_v33  ;;  %4577 = vmatpush3.bf16.msra.mxu1 %v4739_v34 }
 0x12e   : > { %v4057_v62 = vpop.f32.mrf.mxu0  ;;  %v5616_v55 = vadd.f32 %v4050_v22, %v1733_v27  ;;  %4578 = vmatprep.subr.bf16.mxu1 %v4740_v60  ;;  %v2313_v22 = vrot.slane %v4784_v43, 1 }
 0x12f   : > { %v5613_v50 = vadd.f32 %v4458_v31, %v4056_v7  ;;  %v4459_v56 = vpop.f32.mrf.mxu1  ;;  %v4744_v31 = vld [vmem:[%s6035_s2] sm:$0xff]   ;;  %v4785_v7 = vld [vmem:[#allocation2 + $0x90] sm:$0xff]  }
 0x130   : > { %v4058_v9 = vpop.f32.mrf.mxu0  ;;  %v2315_v44 = vrot.slane %v4785_v7, 1 }
 0x131   : > { %v4059_v1 = vadd.f32 %v4058_v9, %v4057_v62  ;;  %v1736_v13 = vpop.f32.mrf.mxu1  ;;  %4579 = vmatpush3.bf16.msra.mxu1 %v4740_v60 }
 0x132   : > { %v4060_v5 = vpop.f32.mrf.mxu0  ;;  %2640 = vmatmul.mubr.bf16.gmra.mxu0 %v5589_v63  ;;  %v5625_v33 = vadd.f32 %v4053_v37, %v1736_v13  ;;  %4580 = vmatprep.subr.bf16.mxu1 %v4741_v59  ;;  %v2314_v37 = vsel %vm2278_vm10, %v2312_v21, %v2313_v22  ;;  %v2322_v21 = vrot.slane %v5345_v47, 1  ;;  %v2324_v47 = vrot.slane %v5355_v2, 1 }
 0x133   : > { %v5623_v58 = vadd.f32 %v4459_v56, %v4059_v1  ;;  %2647 = vmatprep.mubr.bf16.mxu0 %v2311_v52  ;;  %v4462_v25 = vpop.f32.mrf.mxu1  ;;  %v2317_v56 = vsel %vm2278_vm10, %v2315_v44, %v2316_v4 }
 0x134   : > { %v4061_v40 = vpop.f32.mrf.mxu0  ;;  %4549 = vmatmul.mubr.bf16.gmra.mxu1 %v5576_v51 }
 0x135   : > { %v4062_v46 = vadd.f32 %v4061_v40, %v4060_v5  ;;  %v1749_v41 = vpop.f32.mrf.mxu1  ;;  %4552 = vmatprep.mubr.bf16.mxu1 %v5589_v63  ;;  %4581 = vmatpush3.bf16.msra.mxu1 %v4741_v59  ;;  %v2318_v40 = vrot.slane %v5322_v15, 1 }
 0x136   : > { %v4063_v10 = vpop.f32.mrf.mxu0  ;;  %4582 = vmatprep.subr.bf16.mxu1 %v4742_v17 }
 0x137   : > { %v5632_v24 = vadd.f32 %v4062_v46, %v1749_v41  ;;  %v4463_v32 = vpop.f32.mrf.mxu1 }
 0x138   : > { %v4064_v29 = vpop.f32.mrf.mxu0 }
 0x139   : > { %v4065_v34 = vadd.f32 %v4064_v29, %v4063_v10  ;;  %v1752_v51 = vpop.f32.mrf.mxu1  ;;  %4583 = vmatpush3.bf16.msra.mxu1 %v4742_v17  ;;  %v2323_v29 = vsel %vm2278_vm10, %v2321_v16, %v2322_v21  ;;  %v4788_v16 = vld [vmem:[%s4933_s10 + $0x4] sm:$0xf] }
 0x13a   : > { %v4066_v61 = vpop.f32.mrf.mxu0  ;;  %2648 = vmatmul.mubr.bf16.gmra.mxu0 %v5605_v35  ;;  %4584 = vmatprep.subr.bf16.mxu1 %v4743_v14 }
 0x13b   : > { %2655 = vmatprep.mubr.bf16.mxu0 %v2314_v37  ;;  %v5639_v63 = vadd.f32 %v4065_v34, %v1752_v51 }
 0x13c   : > { %v4067_v42 = vpop.f32.mrf.mxu0  ;;  %4553 = vmatmul.mubr.bf16.gmra.mxu1 %v5605_v35  ;;  %v2319_v35 = vrot.slane %v5325_v19, 1 }
 0x13d   : > { %v4068_v60 = vadd.f32 %v4067_v42, %v4066_v61  ;;  %4556 = vmatprep.mubr.bf16.mxu1 %v2311_v52  ;;  %4585 = vmatpush3.bf16.msra.mxu1 %v4743_v14  ;;  %v2325_v61 = vrot.slane %v5358_v6, 1  ;;  %v2327_v42 = vrot.slane %v5379_v26, 1 }
 0x13e   : > { %v4069_v48 = vpop.f32.mrf.mxu0  ;;  %4586 = vmatprep.subr.bf16.mxu1 %v4744_v31  ;;  %v2320_v43 = vsel %vm2278_vm10, %v2318_v40, %v2319_v35 }
 0x13f   : > { %v5645_v62 = vadd.f32 %v4462_v25, %v4068_v60  ;;  %v2326_v4 = vsel %vm2278_vm10, %v2324_v47, %v2325_v61  ;;  %v4790_v47 = vld [vmem:[%s4933_s10 + $0xc] sm:$0xf] }
 0x140   : > { %v4070_v27 = vpop.f32.mrf.mxu0 }
 0x141   : > { %v4071_v9 = vadd.f32 %v4070_v27, %v4069_v48  ;;  %4587 = vmatpush3.bf16.msra.mxu1 %v4744_v31  ;;  %v2328_v31 = vrot.slane %v5381_v28, 1 }
 0x142   : > { %v4072_v59 = vpop.f32.mrf.mxu0  ;;  %2656 = vmatmul.mubr.bf16.gmra.mxu0 %v2311_v52 }
 0x143   : > { %v5648_v1 = vadd.f32 %v4463_v32, %v4071_v9  ;;  %2663 = vmatprep.mubr.bf16.mxu0 %v2317_v56  ;;  %v2329_v2 = vsel %vm2278_vm10, %v2327_v42, %v2328_v31  ;;  %v4791_v42 = vld [vmem:[%s4933_s10 + $0x10] sm:$0xf]  ;;  %v4792_v31 = vld [vmem:[%s4933_s10 + $0x14] sm:$0xf] }
 0x144   : > { %v4073_v5 = vpop.f32.mrf.mxu0  ;;  %4557 = vmatmul.mubr.bf16.gmra.mxu1 %v2314_v37 }
 0x145   : > { %v4074_v13 = vadd.f32 %v4073_v5, %v4072_v59  ;;  %4560 = vmatprep.mubr.bf16.mxu1 %v2317_v56  ;;  %v2331_v59 = vrot.slane %v5372_v20, 1 }
 0x146   : > { %v4075_v25 = vpop.f32.mrf.mxu0 }
 0x147   : > { %v4466_v46 = vpop.f32.mrf.mxu1 }
 0x148   : > { %v4076_v17 = vpop.f32.mrf.mxu0 }
 0x149   : > { %v4077_v52 = vadd.f32 %v4076_v17, %v4075_v25  ;;  %v1765_v10 = vpop.f32.mrf.mxu1 }
 0x14a   : > { %v4078_v22 = vpop.f32.mrf.mxu0  ;;  %2664 = vmatmul.mubr.bf16.gmra.mxu0 %v2314_v37  ;;  %v5655_v41 = vadd.f32 %v4074_v13, %v1765_v10 }
 0x14b   : > { %2671 = vmatprep.mubr.bf16.mxu0 %v2320_v43  ;;  %v4467_v19 = vpop.f32.mrf.mxu1 }
 0x14c   : > { %v4079_v15 = vpop.f32.mrf.mxu0  ;;  %4561 = vmatmul.mubr.bf16.gmra.mxu1 %v2320_v43 }
 0x14d   : > { %v4080_v32 = vadd.f32 %v4079_v15, %v4078_v22  ;;  %v1768_v34 = vpop.f32.mrf.mxu1  ;;  %4564 = vmatprep.mubr.bf16.mxu1 %v2323_v29 }
 0x14e   : > { %v4081_v14 = vpop.f32.mrf.mxu0  ;;  %v5662_v37 = vadd.f32 %v4077_v52, %v1768_v34  ;;  %v4789_v34 = vld [vmem:[%s4933_s10 + $0x8] sm:$0xf] }
 0x14f   : > { %v5658_v39 = vadd.f32 %v4466_v46, %v4080_v32  ;;  %v4787_v46 = vld [vmem:[%s4933_s10] sm:$0xf]  ;;  %v3810_v61 = vcombine.low %v4789_v34, %v4790_v47 }
 0x150   : > { %v4082_v51 = vpop.f32.mrf.mxu0  ;;  %v3809_v21 = vcombine.low %v4787_v46, %v4788_v16  ;;  %v4795_v46 = vld [vmem:[%s4933_s10 + $0x20] sm:$0xf]  ;;  %v4796_v16 = vld [vmem:[%s4933_s10 + $0x24] sm:$0xf] }
 0x151   : > { %v4083_v60 = vadd.f32 %v4082_v51, %v4081_v14  ;;  %v4470_v45 = vpop.f32.mrf.mxu1 }
 0x152   : > { %v4084_v7 = vpop.f32.mrf.mxu0  ;;  %2672 = vmatmul.mubr.bf16.gmra.mxu0 %v2317_v56  ;;  %v2330_v56 = vrot.slane %v5370_v57, 1 }
 0x153   : > { %v5666_v44 = vadd.f32 %v4467_v19, %v4083_v60  ;;  %2679 = vmatprep.mubr.bf16.mxu0 %v2323_v29  ;;  %v1781_v27 = vpop.f32.mrf.mxu1  ;;  %v3811_v60 = vcombine.low %v4791_v42, %v4792_v31 }
 0x154   : > { %v4085_v48 = vpop.f32.mrf.mxu0  ;;  %4565 = vmatmul.mubr.bf16.gmra.mxu1 %v2326_v4  ;;  %v2332_v17 = vsel %vm2278_vm10, %v2330_v56, %v2331_v59 }
 0x155   : > { %v4086_v6 = vadd.f32 %v4085_v48, %v4084_v7  ;;  %v4471_v28 = vpop.f32.mrf.mxu1  ;;  %4568 = vmatprep.mubr.bf16.mxu1 %v2329_v2 }
 0x156   : > { %v4087_v9 = vpop.f32.mrf.mxu0 }
 0x157   : > { %v5670_v26 = vadd.f32 %v4086_v6, %v1781_v27  ;;  %v1784_v40 = vpop.f32.mrf.mxu1 }
 0x158   : > { %v4088_v5 = vpop.f32.mrf.mxu0 }
 0x159   : > { %v4089_v13 = vadd.f32 %v4088_v5, %v4087_v9 }
 0x15a   : > { %v4090_v35 = vpop.f32.mrf.mxu0  ;;  %2680 = vmatmul.mubr.bf16.gmra.mxu0 %v2320_v43 }
 0x15b   : > { %v5674_v25 = vadd.f32 %v4089_v13, %v1784_v40  ;;  %2687 = vmatprep.mubr.bf16.mxu0 %v2326_v4  ;;  %v4474_v20 = vpop.f32.mrf.mxu1  ;;  %v4793_v13 = vld [vmem:[%s4933_s10 + $0x18] sm:$0xf]  ;;  %v4794_v40 = vld [vmem:[%s4933_s10 + $0x1c] sm:$0xf] }
 0x15c   : > { %v4091_v52 = vpop.f32.mrf.mxu0  ;;  %4569 = vmatmul.mubr.bf16.gmra.mxu1 %v2332_v17 }
 0x15d   : > { %v4092_v22 = vadd.f32 %v4091_v52, %v4090_v35  ;;  %4588 = vmatprep.mubr.bf16.mxu1 %v3809_v21  ;;  %v1797_v15 = vpop.f32.mrf.mxu1  ;;  %v3812_v35 = vcombine.low %v4793_v13, %v4794_v40  ;;  %v3813_v21 = vcombine.low %v4795_v46, %v4796_v16 }
 0x15e   : > { %v4093_v57 = vpop.f32.mrf.mxu0 }
 0x15f   : > { %v5679_v10 = vadd.f32 %v4470_v45, %v4092_v22  ;;  %v4475_v14 = vpop.f32.mrf.mxu1 }
 0x160   : > { %v4094_v43 = vpop.f32.mrf.mxu0 }
 0x161   : > { %v4095_v19 = vadd.f32 %v4094_v43, %v4093_v57  ;;  %v1800_v45 = vpop.f32.mrf.mxu1 }
 0x162   : > { %v4096_v32 = vpop.f32.mrf.mxu0  ;;  %2688 = vmatmul.mubr.bf16.gmra.mxu0 %v2323_v29 }
 0x163   : > { %v5683_v51 = vadd.f32 %v4471_v28, %v4095_v19  ;;  %2695 = vmatprep.mubr.bf16.mxu0 %v2329_v2  ;;  %v4148_v27 = vpop.f32.mrf.mxu1 }
 0x164   : > { %v4097_v7 = vpop.f32.mrf.mxu0  ;;  %4589 = vmatmul.mubr.bf16.vlgmr.msra.gmra.mxu1 %v3810_v61 }
 0x165   : > { %v4098_v48 = vadd.f32 %v4097_v7, %v4096_v32  ;;  %4592 = vmatprep.mubr.bf16.mxu1 %v3811_v60  ;;  %v4149_v28 = vpop.f32.mrf.mxu1 }
 0x166   : > { %v4099_v6 = vpop.f32.mrf.mxu0  ;;  %v4150_v2 = vadd.f32 %v4149_v28, %v4148_v27  ;;  %v4800_v27 = vld [vmem:[%s4933_s10 + $0x34] sm:$0xf] }
 0x167   : > { %v5687_v29 = vadd.f32 %v4098_v48, %v1797_v15  ;;  %v4151_v5 = vpop.f32.mrf.mxu1  ;;  %v1689_v15 = vadd.f32 %v5526_v38, %v5549_v12  ;;  %v4798_v48 = vld [vmem:[%s4933_s10 + $0x2c] sm:$0xf]  ;;  %v4799_v12 = vld [vmem:[%s4933_s10 + $0x30] sm:$0xf] }
 0x168   : > { %v4100_v9 = vpop.f32.mrf.mxu0  ;;  %v1991_v22 = vadd.f32 %v4150_v2, %v5532_v49 }
 0x169   : > { %v4101_v56 = vadd.f32 %v4100_v9, %v4099_v6  ;;  %v4152_v57 = vpop.f32.mrf.mxu1  ;;  %v3815_v9 = vcombine.low %v4799_v12, %v4800_v27 }
 0x16a   : > { %v4102_v59 = vpop.f32.mrf.mxu0  ;;  %2696 = vmatmul.mubr.bf16.gmra.mxu0 %v2326_v4  ;;  %v4153_v4 = vadd.f32 %v4152_v57, %v4151_v5  ;;  %v4801_v57 = vld [vmem:[%s4933_s10 + $0x38] sm:$0xf] }
 0x16b   : > { %v5691_v17 = vadd.f32 %v4101_v56, %v1800_v45  ;;  %v4154_v32 = vpop.f32.mrf.mxu1  ;;  %v4797_v45 = vld [vmem:[%s4933_s10 + $0x28] sm:$0xf] }
 0x16c   : > { %v4103_v52 = vpop.f32.mrf.mxu0  ;;  %4593 = vmatmul.mubr.bf16.gmra.mxu1 %v3812_v35  ;;  %v1994_v61 = vadd.f32 %v4153_v4, %v1689_v15  ;;  %v3814_v6 = vcombine.low %v4797_v45, %v4798_v48  ;;  %v4803_v4 = vld [vmem:[%s4933_s10 + $0x40] sm:$0xf] }
 0x16d   : > { %v4104_v43 = vadd.f32 %v4103_v52, %v4102_v59  ;;  %4596 = vmatprep.mubr.bf16.mxu1 %v3813_v21  ;;  %v4155_v42 = vpop.f32.mrf.mxu1 }
 0x16e   : > { %v4105_v19 = vpop.f32.mrf.mxu0  ;;  %v4156_v31 = vadd.f32 %v4155_v42, %v4154_v32 }
 0x16f   : > { %v5698_v34 = vadd.f32 %v4474_v20, %v4104_v43  ;;  %v4157_v7 = vpop.f32.mrf.mxu1  ;;  %v4802_v43 = vld [vmem:[%s4933_s10 + $0x3c] sm:$0xf] }
 0x170   : > { %v4106_v47 = vpop.f32.mrf.mxu0  ;;  %v1999_v28 = vadd.f32 %v4156_v31, %v5536_v54  ;;  %v3816_v15 = vcombine.low %v4801_v57, %v4802_v43 }
 0x171   : > { %v4107_v49 = vadd.f32 %v4106_v47, %v4105_v19  ;;  %v4158_v56 = vpop.f32.mrf.mxu1  ;;  %v4804_v19 = vld [vmem:[%s4933_s10 + $0x44] sm:$0xf] }
 0x172   : > { %v4494_v60 = vpop.f32.mrf.mxu0  ;;  %v4159_v59 = vadd.f32 %v4158_v56, %v4157_v7  ;;  %v3817_v32 = vcombine.low %v4803_v4, %v4804_v19  ;;  %v4807_v56 = vld [vmem:[%s4933_s10 + $0x50] sm:$0xf] }
 0x173   : > { %v5702_v38 = vadd.f32 %v4475_v14, %v4107_v49  ;;  %v5709_v5 = vadd.f32 %v4494_v60, %v1999_v28  ;;  %v4806_v28 = vld [vmem:[%s4933_s10 + $0x4c] sm:$0xf] }
 0x174   : > { %v2151_v20 = vpop.f32.mrf.mxu0  ;;  %v4160_v40 = vpop.f32.mrf.mxu1  ;;  %4597 = vmatmul.mubr.bf16.gmra.mxu1 %v3814_v6  ;;  %v2002_v14 = vadd.f32 %v4159_v59, %v5543_v3  ;;  %v4808_v59 = vld [vmem:[%s4933_s10 + $0x54] sm:$0xf] }
 0x175   : > { %v5707_v2 = vadd.f32 %v2151_v20, %v1991_v22  ;;  %4600 = vmatprep.mubr.bf16.mxu1 %v3815_v9  ;;  %v4805_v9 = vld [vmem:[%s4933_s10 + $0x48] sm:$0xf] }
 0x176   : > { %v4495_v13 = vpop.f32.mrf.mxu0  ;;  %v4161_v46 = vpop.f32.mrf.mxu1  ;;  %v3818_v20 = vcombine.low %v4805_v9, %v4806_v28 }
 0x177   : > { %v4162_v16 = vadd.f32 %v4161_v46, %v4160_v40  ;;  %v5714_v21 = vadd.f32 %v4495_v13, %v2002_v14  ;;  %v3819_v13 = vcombine.low %v4807_v56, %v4808_v59 }
 0x178   : > { %v2154_v35 = vpop.f32.mrf.mxu0  ;;  %v4163_v22 = vpop.f32.mrf.mxu1 }
 0x179   : > { %v5712_v54 = vadd.f32 %v2154_v35, %v1994_v61  ;;  %v2007_v47 = vadd.f32 %v4162_v16, %v5561_v30 }
 0x17a   : > { %v4498_v52 = vpop.f32.mrf.mxu0  ;;  %v4164_v3 = vpop.f32.mrf.mxu1 }
 0x17b   : > { %v4165_v49 = vadd.f32 %v4164_v3, %v4163_v22 }
 0x17c   : > { %v2167_v42 = vpop.f32.mrf.mxu0  ;;  %v4166_v60 = vpop.f32.mrf.mxu1  ;;  %4601 = vmatmul.mubr.bf16.gmra.mxu1 %v3816_v15 }
 0x17d   : > { %v5721_v61 = vadd.f32 %v2167_v42, %v2007_v47  ;;  %4604 = vmatprep.mubr.bf16.mxu1 %v3817_v32  ;;  %v2010_v7 = vadd.f32 %v4165_v49, %v5570_v36  ;;  %v4809_v47 = vld [vmem:[%s4933_s10 + $0x58] sm:$0xf]  ;;  %v4810_v42 = vld [vmem:[%s4933_s10 + $0x5c] sm:$0xf]  ;;  %v4812_v49 = vld [vmem:[%s4933_s10 + $0x64] sm:$0xf] }
 0x17e   : > { %v4499_v31 = vpop.f32.mrf.mxu0  ;;  %v4167_v48 = vpop.f32.mrf.mxu1  ;;  %v3820_v3 = vcombine.low %v4809_v47, %v4810_v42 }
 0x17f   : > { %v4168_v6 = vadd.f32 %v4167_v48, %v4166_v60 }
 0x180   : > { %v2170_v45 = vpop.f32.mrf.mxu0  ;;  %v4169_v27 = vpop.f32.mrf.mxu1 }
 0x181   : > { %v5724_v12 = vadd.f32 %v2170_v45, %v2010_v7  ;;  %v2015_v40 = vadd.f32 %v4168_v6, %v5558_v23 }
 0x182   : > { %v4502_v30 = vpop.f32.mrf.mxu0  ;;  %v4170_v35 = vpop.f32.mrf.mxu1 }
 0x183   : > { %v4171_v36 = vadd.f32 %v4170_v35, %v4169_v27  ;;  %v5731_v46 = vadd.f32 %v4498_v52, %v2015_v40  ;;  %v4811_v52 = vld [vmem:[%s4933_s10 + $0x60] sm:$0xf]  ;;  %v4813_v40 = vld [vmem:[%s4933_s10 + $0x68] sm:$0xf]  ;;  %v4814_v35 = vld [vmem:[%s4933_s10 + $0x6c] sm:$0xf] }
 0x184   : > { %v2183_v14 = vpop.f32.mrf.mxu0  ;;  %v4172_v22 = vpop.f32.mrf.mxu1  ;;  %4605 = vmatmul.mubr.bf16.gmra.mxu1 %v3818_v20  ;;  %v3821_v60 = vcombine.low %v4811_v52, %v4812_v49 }
 0x185   : > { %4608 = vmatprep.mubr.bf16.mxu1 %v3819_v13  ;;  %v2018_v57 = vadd.f32 %v4171_v36, %v5567_v0  ;;  %v3822_v36 = vcombine.low %v4813_v40, %v4814_v35 }
 0x186   : > { %v4503_v16 = vpop.f32.mrf.mxu0  ;;  %v4173_v15 = vpop.f32.mrf.mxu1 }
 0x187   : > { %v4174_v4 = vadd.f32 %v4173_v15, %v4172_v22  ;;  %v5734_v19 = vadd.f32 %v4499_v31, %v2018_v57  ;;  %v4816_v22 = vld [vmem:[%s4933_s10 + $0x74] sm:$0xf] }
 0x188   : > { %v2186_v43 = vpop.f32.mrf.mxu0  ;;  %v4175_v32 = vpop.f32.mrf.mxu1 }
 0x189   : > { %v2023_v7 = vadd.f32 %v4174_v4, %v5578_v53 }
 0x18a   : > { %v5736_v23 = vpop.f32.mrf.mxu0  ;;  %v4176_v0 = vpop.f32.mrf.mxu1 }
 0x18b   : > { %v4177_v48 = vadd.f32 %v4176_v0, %v4175_v32  ;;  %v5743_v6 = vadd.f32 %v2183_v14, %v2023_v7  ;;  %v4815_v14 = vld [vmem:[%s4933_s10 + $0x70] sm:$0xf] }
 0x18c   : > { %v2199_v45 = vpop.f32.mrf.mxu0  ;;  %v4178_v27 = vpop.f32.mrf.mxu1  ;;  %4609 = vmatmul.mubr.bf16.gmra.mxu1 %v3820_v3  ;;  %v3823_v57 = vcombine.low %v4815_v14, %v4816_v22 }
 0x18d   : > { %4612 = vmatprep.mubr.bf16.mxu1 %v3821_v60  ;;  %v2026_v9 = vadd.f32 %v4177_v48, %v5582_v8  ;;  %v4817_v48 = vld [vmem:[%s4933_s10 + $0x78] sm:$0xf] }
 0x18e   : > { %v4507_v31 = vpop.f32.mrf.mxu0  ;;  %v4179_v20 = vpop.f32.mrf.mxu1 }
 0x18f   : > { %v4180_v56 = vadd.f32 %v4179_v20, %v4178_v27  ;;  %v5746_v59 = vadd.f32 %v2186_v43, %v2026_v9  ;;  %v4818_v27 = vld [vmem:[%s4933_s10 + $0x7c] sm:$0xf] }
 0x190   : > { %v2202_v28 = vpop.f32.mrf.mxu0  ;;  %v4181_v13 = vpop.f32.mrf.mxu1  ;;  %v3824_v9 = vcombine.low %v4817_v48, %v4818_v27 }
 0x191   : > { %v2031_v15 = vadd.f32 %v4180_v56, %v5585_v11 }
 0x192   : > { %v5748_v53 = vpop.f32.mrf.mxu0  ;;  %v4182_v8 = vpop.f32.mrf.mxu1 }
 0x193   : > { %v4183_v32 = vadd.f32 %v4182_v8, %v4181_v13  ;;  %v5755_v47 = vadd.f32 %v4502_v30, %v2031_v15 }
 0x194   : > { %v2215_v4 = vpop.f32.mrf.mxu0  ;;  %v4184_v42 = vpop.f32.mrf.mxu1  ;;  %4613 = vmatmul.mubr.bf16.gmra.mxu1 %v3822_v36 }
 0x195   : > { %4616 = vmatprep.mubr.bf16.mxu1 %v3823_v57  ;;  %v2034_v3 = vadd.f32 %v4183_v32, %v5592_v18 }
 0x196   : > { %v5757_v43 = vpop.f32.mrf.mxu0  ;;  %v4185_v49 = vpop.f32.mrf.mxu1 }
 0x197   : > { %v4186_v60 = vadd.f32 %v4185_v49, %v4184_v42  ;;  %v5760_v7 = vadd.f32 %v4503_v16, %v2034_v3 }
 0x198   : > { %v2218_v52 = vpop.f32.mrf.mxu0  ;;  %v4187_v0 = vpop.f32.mrf.mxu1 }
 0x199   : > { %v2039_v30 = vadd.f32 %v4186_v60, %v5616_v55 }
 0x19a   : > { %v5762_v11 = vpop.f32.mrf.mxu0  ;;  %v4188_v56 = vpop.f32.mrf.mxu1 }
 0x19b   : > { %v4189_v13 = vadd.f32 %v4188_v56, %v4187_v0  ;;  %v5767_v40 = vadd.f32 %v2199_v45, %v2039_v30 }
 0x19c   : > { %v2231_v20 = vpop.f32.mrf.mxu0  ;;  %v4190_v18 = vpop.f32.mrf.mxu1  ;;  %4617 = vmatmul.mubr.bf16.gmra.mxu1 %v3824_v9 }
 0x19d   : > { %v2042_v16 = vadd.f32 %v4189_v13, %v5625_v33 }
 0x19e   : > { %v5769_v35 = vpop.f32.mrf.mxu0  ;;  %v4191_v14 = vpop.f32.mrf.mxu1 }
 0x19f   : > { %v4192_v22 = vadd.f32 %v4191_v14, %v4190_v18  ;;  %v5772_v57 = vadd.f32 %v2202_v28, %v2042_v16 }
 0x1a0   : > { %v2234_v36 = vpop.f32.mrf.mxu0  ;;  %v4193_v8 = vpop.f32.mrf.mxu1 }
 0x1a1   : > { %v2047_v55 = vadd.f32 %v4192_v22, %v5613_v50 }
 0x1a2   : > { %v5774_v15 = vpop.f32.mrf.mxu0  ;;  %v4194_v45 = vpop.f32.mrf.mxu1 }
 0x1a3   : > { %v4195_v42 = vadd.f32 %v4194_v45, %v4193_v8  ;;  %v5780_v3 = vadd.f32 %v5736_v23, %v2047_v55 }
 0x1a4   : > { %v5777_v32 = vpop.f32.mrf.mxu0  ;;  %v4196_v33 = vpop.f32.mrf.mxu1 }
 0x1a5   : > { %v2050_v60 = vadd.f32 %v4195_v42, %v5623_v58 }
 0x1a6   : > { %v5782_v49 = vpop.f32.mrf.mxu0  ;;  %v4197_v28 = vpop.f32.mrf.mxu1 }
 0x1a7   : > { %v4198_v48 = vadd.f32 %v4197_v28, %v4196_v33  ;;  %v5787_v27 = vadd.f32 %v4507_v31, %v2050_v60 }
 0x1a8   : > { %v5785_v0 = vpop.f32.mrf.mxu0  ;;  %v4199_v50 = vpop.f32.mrf.mxu1 }
 0x1a9   : > { %v2055_v30 = vadd.f32 %v4198_v48, %v5632_v24 }
 0x1aa   : > { %v5789_v9 = vpop.f32.mrf.mxu0  ;;  %v4200_v23 = vpop.f32.mrf.mxu1 }
 0x1ab   : > { %v4201_v13 = vadd.f32 %v4200_v23, %v4199_v50  ;;  %v5794_v18 = vadd.f32 %v2215_v4, %v2055_v30 }
 0x1ac   : > { %v5792_v56 = vpop.f32.mrf.mxu0  ;;  %v4202_v58 = vpop.f32.mrf.mxu1 }
 0x1ad   : > { %v2058_v14 = vadd.f32 %v4201_v13, %v5639_v63 }
 0x1ae   : > { %v5796_v16 = vpop.f32.mrf.mxu0  ;;  %v4203_v31 = vpop.f32.mrf.mxu1 }
 0x1af   : > { %v4204_v8 = vadd.f32 %v4203_v31, %v4202_v58  ;;  %v5801_v55 = vadd.f32 %v2218_v52, %v2058_v14 }
 0x1b0   : > { %v5799_v22 = vpop.f32.mrf.mxu0  ;;  %v4205_v24 = vpop.f32.mrf.mxu1 }
 0x1b1   : > { %6046 = vst [vmem:[#allocation3_spill] sm:$0xff] %v5801_v55  ;;  %v2063_v42 = vadd.f32 %v4204_v8, %v5645_v62 }
 0x1b2   : > { %v5803_v45 = vpop.f32.mrf.mxu0  ;;  %v4206_v4 = vpop.f32.mrf.mxu1 }
 0x1b3   : > { %v4207_v60 = vadd.f32 %v4206_v4, %v4205_v24  ;;  %v5809_v28 = vadd.f32 %v5748_v53, %v2063_v42 }
 0x1b4   : > { %v5806_v33 = vpop.f32.mrf.mxu0  ;;  %v4208_v63 = vpop.f32.mrf.mxu1 }
 0x1b5   : > { %v2066_v50 = vadd.f32 %v4207_v60, %v5648_v1 }
 0x1b6   : > { %v5811_v48 = vpop.f32.mrf.mxu0  ;;  %v4209_v52 = vpop.f32.mrf.mxu1 }
 0x1b7   : > { %v4210_v23 = vadd.f32 %v4209_v52, %v4208_v63  ;;  %v5817_v13 = vadd.f32 %v5757_v43, %v2066_v50 }
 0x1b8   : > { %v5814_v30 = vpop.f32.mrf.mxu0  ;;  %v4211_v58 = vpop.f32.mrf.mxu1 }
 0x1b9   : > { %v2071_v14 = vadd.f32 %v4210_v23, %v5655_v41 }
 0x1ba   : > { %v5819_v62 = vpop.f32.mrf.mxu0  ;;  %v4212_v53 = vpop.f32.mrf.mxu1 }
 0x1bb   : > { %v4213_v8 = vadd.f32 %v4212_v53, %v4211_v58  ;;  %v5824_v24 = vadd.f32 %v2231_v20, %v2071_v14 }
 0x1bc   : > { %v5822_v31 = vpop.f32.mrf.mxu0  ;;  %v4214_v1 = vpop.f32.mrf.mxu1 }
 0x1bd   : > { %v2074_v4 = vadd.f32 %v4213_v8, %v5662_v37 }
 0x1be   : > { %v5826_v42 = vpop.f32.mrf.mxu0  ;;  %v4215_v43 = vpop.f32.mrf.mxu1 }
 0x1bf   : > { %v4216_v63 = vadd.f32 %v4215_v43, %v4214_v1  ;;  %v5831_v50 = vadd.f32 %v2234_v36, %v2074_v4 }
 0x1c0   : > { %v5829_v60 = vpop.f32.mrf.mxu0  ;;  %v4217_v41 = vpop.f32.mrf.mxu1 }
 0x1c1   : > { %6047 = vst [vmem:[#allocation4_spill] sm:$0xff] %v5831_v50  ;;  %v2079_v23 = vadd.f32 %v4216_v63, %v5658_v39 }
 0x1c2   : > { %v5833_v52 = vpop.f32.mrf.mxu0  ;;  %v4218_v20 = vpop.f32.mrf.mxu1 }
 0x1c3   : > { %v4219_v58 = vadd.f32 %v4218_v20, %v4217_v41  ;;  %v5839_v14 = vadd.f32 %v5762_v11, %v2079_v23 }
 0x1c4   : > { %v5836_v55 = vpop.f32.mrf.mxu0  ;;  %v4220_v37 = vpop.f32.mrf.mxu1 }
 0x1c5   : > { %v2082_v8 = vadd.f32 %v4219_v58, %v5666_v44 }
 0x1c6   : > { %v5841_v53 = vpop.f32.mrf.mxu0  ;;  %v4221_v36 = vpop.f32.mrf.mxu1 }
 0x1c7   : > { %v4222_v4 = vadd.f32 %v4221_v36, %v4220_v37  ;;  %v5847_v43 = vadd.f32 %v5769_v35, %v2082_v8 }
 0x1c8   : > { %v5844_v1 = vpop.f32.mrf.mxu0  ;;  %v4223_v63 = vpop.f32.mrf.mxu1 }
 0x1c9   : > { %6048 = vst [vmem:[#allocation5_spill] sm:$0xff] %v5847_v43  ;;  %v2087_v41 = vadd.f32 %v4222_v4, %v5670_v26 }
 0x1ca   : > { %v5849_v39 = vpop.f32.mrf.mxu0  ;;  %v4224_v11 = vpop.f32.mrf.mxu1 }
 0x1cb   : > { %v4225_v23 = vadd.f32 %v4224_v11, %v4223_v63  ;;  %v5855_v50 = vadd.f32 %v5777_v32, %v2087_v41 }
 0x1cc   : > { %v5852_v20 = vpop.f32.mrf.mxu0  ;;  %v4226_v58 = vpop.f32.mrf.mxu1 }
 0x1cd   : > { %6049 = vst [vmem:[#allocation6_spill] sm:$0xff] %v5855_v50  ;;  %v2090_v37 = vadd.f32 %v4225_v23, %v5674_v25 }
 0x1ce   : > { %v5857_v44 = vpop.f32.mrf.mxu0  ;;  %v4227_v35 = vpop.f32.mrf.mxu1 }
 0x1cf   : > { %v4228_v8 = vadd.f32 %v4227_v35, %v4226_v58  ;;  %v5863_v43 = vadd.f32 %v5785_v0, %v2090_v37 }
 0x1d0   : > { %v5860_v36 = vpop.f32.mrf.mxu0  ;;  %v4229_v4 = vpop.f32.mrf.mxu1 }
 0x1d1   : > { %6050 = vst [vmem:[#allocation7_spill] sm:$0xff] %v5863_v43  ;;  %v2095_v63 = vadd.f32 %v4228_v8, %v5679_v10 }
 0x1d2   : > { %v5865_v26 = vpop.f32.mrf.mxu0  ;;  %v4230_v32 = vpop.f32.mrf.mxu1 }
 0x1d3   : > { %v4231_v41 = vadd.f32 %v4230_v32, %v4229_v4  ;;  %v5871_v50 = vadd.f32 %v5774_v15, %v2095_v63 }
 0x1d4   : > { %v5868_v11 = vpop.f32.mrf.mxu0  ;;  %v4232_v23 = vpop.f32.mrf.mxu1 }
 0x1d5   : > { %6051 = vst [vmem:[#allocation8_spill] sm:$0xff] %v5871_v50  ;;  %v2098_v58 = vadd.f32 %v4231_v41, %v5683_v51 }
 0x1d6   : > { %v5873_v25 = vpop.f32.mrf.mxu0  ;;  %v4233_v0 = vpop.f32.mrf.mxu1 }
 0x1d7   : > { %v4234_v37 = vadd.f32 %v4233_v0, %v4232_v23  ;;  %v5879_v43 = vadd.f32 %v5782_v49, %v2098_v58 }
 0x1d8   : > { %v5876_v35 = vpop.f32.mrf.mxu0  ;;  %v4235_v8 = vpop.f32.mrf.mxu1 }
 0x1d9   : > { %6052 = vst [vmem:[#allocation9_spill] sm:$0xff] %v5879_v43  ;;  %v2103_v4 = vadd.f32 %v4234_v37, %v5687_v29 }
 0x1da   : > { %v5881_v10 = vpop.f32.mrf.mxu0  ;;  %v4236_v15 = vpop.f32.mrf.mxu1 }
 0x1db   : > { %v4237_v63 = vadd.f32 %v4236_v15, %v4235_v8  ;;  %v5887_v50 = vadd.f32 %v5792_v56, %v2103_v4  ;;  %v4292_v4 = vadd.f32 %v5822_v31, %v5819_v62  ;;  %v4289_v31 = vadd.f32 %v5814_v30, %v5811_v48 }
 0x1dc   : > { %v5884_v32 = vpop.f32.mrf.mxu0  ;;  %v4238_v41 = vpop.f32.mrf.mxu1  ;;  %v4298_v48 = vadd.f32 %v5836_v55, %v5833_v52 }
 0x1dd   : > { %6053 = vst [vmem:[#allocation10_spill] sm:$0xff] %v5887_v50  ;;  %v2106_v23 = vadd.f32 %v4237_v63, %v5691_v17 }
 0x1de   : > { %v5889_v51 = vpop.f32.mrf.mxu0  ;;  %v4239_v49 = vpop.f32.mrf.mxu1 }
 0x1df   : > { %v4240_v58 = vadd.f32 %v4239_v49, %v4238_v41  ;;  %v5895_v43 = vadd.f32 %v5799_v22, %v2106_v23  ;;  %v4286_v41 = vadd.f32 %v5806_v33, %v5803_v45 }
 0x1e0   : > { %v5892_v0 = vpop.f32.mrf.mxu0  ;;  %v4241_v37 = vpop.f32.mrf.mxu1 }
 0x1e1   : > { %6054 = vst [vmem:[#allocation11_spill] sm:$0xff] %v5895_v43  ;;  %v2111_v8 = vadd.f32 %v4240_v58, %v5698_v34  ;;  %v4295_v34 = vadd.f32 %v5829_v60, %v5826_v42 }
 0x1e2   : > { %v5897_v29 = vpop.f32.mrf.mxu0  ;;  %v4242_v56 = vpop.f32.mrf.mxu1 }
 0x1e3   : > { %v5905_v17 = vadd.f32 %v5789_v9, %v2111_v8  ;;  %v4243_v63 = vadd.f32 %v4242_v56, %v4241_v37 }
 0x1e4   : > { %v5900_v15 = vpop.f32.mrf.mxu0  ;;  %v4542_v23 = vpop.f32.mrf.mxu1 }
 0x1e5   : > { %v2114_v49 = vadd.f32 %v4243_v63, %v5702_v38  ;;  %v2747_v50 = vadd.f32 %v4542_v23, %v4292_v4 }
 0x1e6   : > { %v5909_v22 = vpop.f32.mrf.mxu0  ;;  %v2738_v43 = vpop.f32.mrf.mxu1 }
 0x1e7   : > { %v5917_v62 = vadd.f32 %v5796_v16, %v2114_v49  ;;  %v2739_v9 = vadd.f32 %v4286_v41, %v2738_v43  ;;  %v2867_v8 = vadd.f32 %v2747_v50, %v5709_v5  ;;  %v4304_v16 = vadd.f32 %v5852_v20, %v5849_v39 }
 0x1e8   : > { %v5914_v58 = vpop.f32.mrf.mxu0  ;;  %v4543_v33 = vpop.f32.mrf.mxu1 }
 0x1e9   : > { %v2750_v37 = vadd.f32 %v4543_v33, %v4295_v34  ;;  %v2865_v42 = vadd.f32 %v2739_v9, %v5707_v2  ;;  %v4307_v2 = vadd.f32 %v5860_v36, %v5857_v44 }
 0x1ea   : > { %v5921_v45 = vpop.f32.mrf.mxu0  ;;  %v2741_v60 = vpop.f32.mrf.mxu1 }
 0x1eb   : > { %v2742_v56 = vadd.f32 %v4289_v31, %v2741_v60  ;;  %v2868_v43 = vadd.f32 %v2750_v37, %v5714_v21  ;;  %v2934_v5 = vmul.f32 %v2865_v42, %v2865_v42  ;;  %v2936_v21 = vmul.f32 %v2867_v8, %v2867_v8 }
 0x1ec   : > { %v5923_v38 = vpop.f32.mrf.mxu0  ;;  %v4546_v4 = vpop.f32.mrf.mxu1 }
 0x1ed   : > { %v2866_v63 = vadd.f32 %v2742_v56, %v5712_v54  ;;  %v3909_v41 = vpack.c.bf16 %v2868_v43, %v2867_v8  ;;  %v4301_v54 = vadd.f32 %v5844_v1, %v5841_v53  ;;  %v2763_v50 = vadd.f32 %v4546_v4, %v4304_v16 }
 0x1ee   : > { %v5932_v30 = vpop.f32.mrf.mxu0  ;;  %v2754_v55 = vpop.f32.mrf.mxu1  ;;  %v2937_v34 = vmul.f32 %v2868_v43, %v2868_v43  ;;  %v4316_v1 = vadd.f32 %v5884_v32, %v5881_v10  ;;  %v4319_v10 = vadd.f32 %v5892_v0, %v5889_v51 }
 0x1ef   : > { %v2897_v52 = vadd.f32 %v2866_v63, %v2865_v42  ;;  %v2935_v39 = vmul.f32 %v2866_v63, %v2866_v63  ;;  %v3904_v20 = vpack.c.bf16 %v2866_v63, %v2865_v42  ;;  %3981 = vst [vmem:[%s5944_s24 + $0x8] sm:$0xff] %v3909_v41   ;;  %v2755_v44 = vadd.f32 %v4298_v48, %v2754_v55 }
 0x1f0   : > { %v5937_v23 = vpop.f32.mrf.mxu0  ;;  %v4547_v49 = vpop.f32.mrf.mxu1  ;;  %v2871_v53 = vadd.f32 %v2763_v50, %v5731_v46 }
 0x1f1   : > { %v2966_v9 = vadd.f32 %v2935_v39, %v2934_v5  ;;  %3905 = vst [vmem:[%s5944_s24] sm:$0xff] %v3904_v20   ;;  %v2898_v31 = vadd.f32 %v2897_v52, %v2867_v8  ;;  %v2869_v33 = vadd.f32 %v2755_v44, %v5721_v61  ;;  %v2766_v37 = vadd.f32 %v4547_v49, %v4307_v2 }
 0x1f2   : > { %v5949_v36 = vpop.f32.mrf.mxu0  ;;  %v2757_v56 = vpop.f32.mrf.mxu1  ;;  %v4310_v61 = vadd.f32 %v5868_v11, %v5865_v26 }
 0x1f3   : > { %v2967_v42 = vadd.f32 %v2966_v9, %v2936_v21  ;;  %v2899_v16 = vadd.f32 %v2898_v31, %v2868_v43  ;;  %v2938_v48 = vmul.f32 %v2869_v33, %v2869_v33  ;;  %v2758_v4 = vadd.f32 %v4301_v54, %v2757_v56 }
 0x1f4   : > { %v5953_v60 = vpop.f32.mrf.mxu0  ;;  %v4550_v41 = vpop.f32.mrf.mxu1  ;;  %v2872_v8 = vadd.f32 %v2766_v37, %v5734_v19  ;;  %v2940_v21 = vmul.f32 %v2871_v53, %v2871_v53  ;;  %v4313_v19 = vadd.f32 %v5876_v35, %v5873_v25  ;;  %v4328_v35 = vadd.f32 %v5923_v38, %v5921_v45 }
 0x1f5   : > { %v2968_v2 = vadd.f32 %v2967_v42, %v2937_v34  ;;  %v2900_v5 = vadd.f32 %v2899_v16, %v2869_v33  ;;  %v2870_v46 = vadd.f32 %v2758_v4, %v5724_v12  ;;  %v2779_v54 = vadd.f32 %v4550_v41, %v4316_v1 }
 0x1f6   : > { %v5958_v63 = vpop.f32.mrf.mxu0  ;;  %v2770_v43 = vpop.f32.mrf.mxu1  ;;  %v3919_v55 = vpack.c.bf16 %v2872_v8, %v2871_v53  ;;  %v2941_v0 = vmul.f32 %v2872_v8, %v2872_v8 }
 0x1f7   : > { %v2969_v50 = vadd.f32 %v2968_v2, %v2938_v48  ;;  %v2901_v26 = vadd.f32 %v2900_v5, %v2870_v46  ;;  %v2939_v11 = vmul.f32 %v2870_v46, %v2870_v46  ;;  %v3914_v52 = vpack.c.bf16 %v2870_v46, %v2869_v33 }
 0x1f8   : > { %v5966_v32 = vpop.f32.mrf.mxu0  ;;  %v4551_v20 = vpop.f32.mrf.mxu1  ;;  %3983 = vst [vmem:[%s5944_s24 + $0x18] sm:$0xff] %v3919_v55   ;;  %v2771_v12 = vadd.f32 %v4310_v61, %v2770_v43  ;;  %v2875_v25 = vadd.f32 %v2779_v54, %v5755_v47  ;;  %v4331_v47 = vadd.f32 %v5937_v23, %v5932_v30 }
 0x1f9   : > { %v2970_v44 = vadd.f32 %v2969_v50, %v2939_v11  ;;  %3982 = vst [vmem:[%s5944_s24 + $0x10] sm:$0xff] %v3914_v52   ;;  %v2902_v51 = vadd.f32 %v2901_v26, %v2871_v53  ;;  %v2782_v49 = vadd.f32 %v4551_v20, %v4319_v10  ;;  %v4322_v53 = vadd.f32 %v5900_v15, %v5897_v29 }
 0x1fa   : > { %v4338_v39 = vpop.f32.mrf.mxu0  ;;  %v2773_v9 = vpop.f32.mrf.mxu1  ;;  %v2873_v31 = vadd.f32 %v2771_v12, %v5743_v6 }
 0x1fb   : > { %v2971_v37 = vadd.f32 %v2970_v44, %v2940_v21  ;;  %v2903_v33 = vadd.f32 %v2902_v51, %v2872_v8  ;;  %v2774_v56 = vadd.f32 %v4313_v19, %v2773_v9  ;;  %v2876_v1 = vadd.f32 %v2782_v49, %v5760_v7 }
 0x1fc   : > { %v4339_v34 = vpop.f32.mrf.mxu0  ;;  %v4554_v16 = vpop.f32.mrf.mxu1  ;;  %v2942_v48 = vmul.f32 %v2873_v31, %v2873_v31  ;;  %v2944_v8 = vmul.f32 %v2875_v25, %v2875_v25  ;;  %v4325_v7 = vadd.f32 %v5914_v58, %v5909_v22 }
 0x1fd   : > { %v2972_v4 = vadd.f32 %v2971_v37, %v2941_v0  ;;  %v2904_v41 = vadd.f32 %v2903_v33, %v2873_v31  ;;  %v2874_v6 = vadd.f32 %v2774_v56, %v5746_v59  ;;  %v3929_v61 = vpack.c.bf16 %v2876_v1, %v2875_v25 }
 0x1fe   : > { %v4341_v42 = vpop.f32.mrf.mxu0  ;;  %v2786_v38 = vpop.f32.mrf.mxu1  ;;  %v2795_v2 = vadd.f32 %v4554_v16, %v4328_v35  ;;  %v2945_v23 = vmul.f32 %v2876_v1, %v2876_v1  ;;  %v4340_v58 = vadd.f32 %v4339_v34, %v4338_v39  ;;  %v4334_v0 = vadd.f32 %v5953_v60, %v5949_v36 }
 0x1ff   : > { %v2973_v5 = vadd.f32 %v2972_v4, %v2942_v48  ;;  %v2905_v46 = vadd.f32 %v2904_v41, %v2874_v6  ;;  %v2943_v29 = vmul.f32 %v2874_v6, %v2874_v6  ;;  %v3924_v15 = vpack.c.bf16 %v2874_v6, %v2873_v31  ;;  %3985 = vst [vmem:[%s5944_s24 + $0x28] sm:$0xff] %v3929_v61  }
 0x200   : > { %v4342_v45 = vpop.f32.mrf.mxu0  ;;  %v4555_v43 = vpop.f32.mrf.mxu1  ;;  %v2787_v59 = vadd.f32 %v4322_v53, %v2786_v38  ;;  %v2879_v22 = vadd.f32 %v2795_v2, %v5780_v3 }
 0x201   : > { %v2974_v21 = vadd.f32 %v2973_v5, %v2943_v29  ;;  %3984 = vst [vmem:[%s5944_s24 + $0x20] sm:$0xff] %v3924_v15   ;;  %v2906_v30 = vadd.f32 %v2905_v46, %v2875_v25  ;;  %v2798_v55 = vadd.f32 %v4555_v43, %v4331_v47  ;;  %v6055_v15 = vld [vmem:[#allocation3_spill] sm:$0xff] }
 0x202   : > { %v4344_v10 = vpop.f32.mrf.mxu0  ;;  %v2789_v54 = vpop.f32.mrf.mxu1  ;;  %v2877_v50 = vadd.f32 %v2787_v59, %v5767_v40  ;;  %v4343_v40 = vadd.f32 %v4342_v45, %v4341_v42  ;;  %v2948_v34 = vmul.f32 %v2879_v22, %v2879_v22 }
 0x203   : > { %v2975_v26 = vadd.f32 %v2974_v21, %v2944_v8  ;;  %v2907_v11 = vadd.f32 %v2906_v30, %v2876_v1  ;;  %v2790_v52 = vadd.f32 %v4325_v7, %v2789_v54  ;;  %v2880_v20 = vadd.f32 %v2798_v55, %v5787_v27 }
 0x204   : > { %v4345_v19 = vpop.f32.mrf.mxu0  ;;  %v4558_v44 = vpop.f32.mrf.mxu1  ;;  %v2946_v51 = vmul.f32 %v2877_v50, %v2877_v50  ;;  %v4337_v27 = vadd.f32 %v5966_v32, %v5958_v63 }
 0x205   : > { %v2976_v49 = vadd.f32 %v2975_v26, %v2945_v23  ;;  %v2908_v9 = vadd.f32 %v2907_v11, %v2877_v50  ;;  %v2878_v31 = vadd.f32 %v2790_v52, %v5772_v57  ;;  %v3939_v25 = vpack.c.bf16 %v2880_v20, %v2879_v22 }
 0x206   : > { %v4347_v12 = vpop.f32.mrf.mxu0  ;;  %v2802_v39 = vpop.f32.mrf.mxu1  ;;  %v2811_v35 = vadd.f32 %v4558_v44, %v4340_v58  ;;  %v2949_v42 = vmul.f32 %v2880_v20, %v2880_v20  ;;  %v4346_v5 = vadd.f32 %v4345_v19, %v4344_v10 }
 0x207   : > { %v2977_v37 = vadd.f32 %v2976_v49, %v2946_v51  ;;  %v2909_v33 = vadd.f32 %v2908_v9, %v2878_v31  ;;  %v2947_v56 = vmul.f32 %v2878_v31, %v2878_v31  ;;  %v3934_v1 = vpack.c.bf16 %v2878_v31, %v2877_v50  ;;  %3987 = vst [vmem:[%s5944_s24 + $0x38] sm:$0xff] %v3939_v25  }
 0x208   : > { %v4348_v3 = vpop.f32.mrf.mxu0  ;;  %v4559_v60 = vpop.f32.mrf.mxu1  ;;  %v2803_v16 = vadd.f32 %v4334_v0, %v2802_v39  ;;  %v2883_v63 = vadd.f32 %v2811_v35, %v5809_v28 }
 0x209   : > { %v2978_v48 = vadd.f32 %v2977_v37, %v2947_v56  ;;  %3986 = vst [vmem:[%s5944_s24 + $0x30] sm:$0xff] %v3934_v1   ;;  %v2910_v57 = vadd.f32 %v2909_v33, %v2879_v22  ;;  %v2814_v53 = vadd.f32 %v4559_v60, %v4343_v40  ;;  %v4349_v59 = vadd.f32 %v4348_v3, %v4347_v12  ;;  %v6056_v40 = vld [vmem:[#allocation5_spill] sm:$0xff]  ;;  %v6057_v33 = vld [vmem:[#allocation4_spill] sm:$0xff] }
 0x20a   : > { %v4350_v36 = vpop.f32.mrf.mxu0  ;;  %v2805_v41 = vpop.f32.mrf.mxu1  ;;  %v2881_v6 = vadd.f32 %v2803_v16, %v5794_v18  ;;  %v2952_v28 = vmul.f32 %v2883_v63, %v2883_v63 }
 0x20b   : > { %v2979_v47 = vadd.f32 %v2978_v48, %v2948_v34  ;;  %v2911_v45 = vadd.f32 %v2910_v57, %v2880_v20  ;;  %v2806_v38 = vadd.f32 %v4337_v27, %v2805_v41  ;;  %v2884_v8 = vadd.f32 %v2814_v53, %v5817_v13 }
 0x20c   : > { %v4351_v4 = vpop.f32.mrf.mxu0  ;;  %v4562_v7 = vpop.f32.mrf.mxu1  ;;  %v2950_v2 = vmul.f32 %v2881_v6, %v2881_v6 }
 0x20d   : > { %v4352_v32 = vadd.f32 %v4351_v4, %v4350_v36  ;;  %v2980_v46 = vadd.f32 %v2979_v47, %v2949_v42  ;;  %v2912_v29 = vadd.f32 %v2911_v45, %v2881_v6  ;;  %v2882_v43 = vadd.f32 %v2806_v38, %v6055_v15  ;;  %v6058_v38 = vld [vmem:[#allocation6_spill] sm:$0xff] }
 0x20e   : > { %v4353_v61 = vpop.f32.mrf.mxu0  ;;  %v2818_v21 = vpop.f32.mrf.mxu1  ;;  %v3949_v30 = vpack.c.bf16 %v2884_v8, %v2883_v63  ;;  %v2953_v52 = vmul.f32 %v2884_v8, %v2884_v8 }
 0x20f   : > { %v2827_v23 = vadd.f32 %v4562_v7, %v4352_v32  ;;  %v2981_v54 = vadd.f32 %v2980_v46, %v2950_v2  ;;  %v2913_v50 = vadd.f32 %v2912_v29, %v2882_v43  ;;  %v2951_v13 = vmul.f32 %v2882_v43, %v2882_v43 }
 0x210   : > { %v4354_v18 = vpop.f32.mrf.mxu0  ;;  %v3944_v22 = vpack.c.bf16 %v2882_v43, %v2881_v6  ;;  %v4563_v26 = vpop.f32.mrf.mxu1  ;;  %3989 = vst [vmem:[%s5944_s24 + $0x48] sm:$0xff] %v3949_v30   ;;  %v2819_v10 = vadd.f32 %v4346_v5, %v2818_v21  ;;  %v6059_v21 = vld [vmem:[#allocation7_spill] sm:$0xff] }
 0x211   : > { %v4355_v55 = vadd.f32 %v4354_v18, %v4353_v61  ;;  %v2982_v19 = vadd.f32 %v2981_v54, %v2951_v13  ;;  %v2914_v11 = vadd.f32 %v2913_v50, %v2883_v63  ;;  %v2887_v0 = vadd.f32 %v2827_v23, %v5839_v14 }
 0x212   : > { %v4356_v58 = vpop.f32.mrf.mxu0  ;;  %3988 = vst [vmem:[%s5944_s24 + $0x40] sm:$0xff] %v3944_v22   ;;  %v2821_v44 = vpop.f32.mrf.mxu1  ;;  %v2885_v51 = vadd.f32 %v2819_v10, %v5824_v24 }
 0x213   : > { %v2830_v20 = vadd.f32 %v4563_v26, %v4355_v55  ;;  %v2983_v49 = vadd.f32 %v2982_v19, %v2952_v28  ;;  %v2915_v9 = vadd.f32 %v2914_v11, %v2884_v8  ;;  %v2822_v31 = vadd.f32 %v4349_v59, %v2821_v44  ;;  %v6060_v55 = vld [vmem:[#allocation8_spill] sm:$0xff] }
 0x214   : > { %v4357_v12 = vpop.f32.mrf.mxu0  ;;  %v4566_v34 = vpop.f32.mrf.mxu1  ;;  %v2954_v25 = vmul.f32 %v2885_v51, %v2885_v51  ;;  %v2956_v24 = vmul.f32 %v2887_v0, %v2887_v0 }
 0x215   : > { %v2888_v3 = vadd.f32 %v2830_v20, %v6056_v40  ;;  %v4358_v27 = vadd.f32 %v4357_v12, %v4356_v58  ;;  %v2984_v35 = vadd.f32 %v2983_v49, %v2953_v52  ;;  %v2916_v37 = vadd.f32 %v2915_v9, %v2885_v51 }
 0x216   : > { %v4359_v39 = vpop.f32.mrf.mxu0  ;;  %v2886_v56 = vadd.f32 %v2822_v31, %v6057_v33  ;;  %v2834_v36 = vpop.f32.mrf.mxu1 }
 0x217   : > { %v3959_v60 = vpack.c.bf16 %v2888_v3, %v2887_v0  ;;  %v2985_v16 = vadd.f32 %v2984_v35, %v2954_v25  ;;  %v2835_v41 = vadd.f32 %v4358_v27, %v2834_v36  ;;  %v2957_v32 = vmul.f32 %v2888_v3, %v2888_v3 }
 0x218   : > { %v4360_v1 = vpop.f32.mrf.mxu0  ;;  %v2917_v48 = vadd.f32 %v2916_v37, %v2886_v56  ;;  %v2955_v57 = vmul.f32 %v2886_v56, %v2886_v56  ;;  %v3954_v42 = vpack.c.bf16 %v2886_v56, %v2885_v51  ;;  %v4567_v4 = vpop.f32.mrf.mxu1  ;;  %v6062_v56 = vld [vmem:[#allocation10_spill] sm:$0xff] }
 0x219   : > { %v4361_v14 = vadd.f32 %v4360_v1, %v4359_v39  ;;  %3991 = vst [vmem:[%s5944_s24 + $0x58] sm:$0xff] %v3959_v60   ;;  %v2889_v8 = vadd.f32 %v2835_v41, %v6058_v38 }
 0x21a   : > { %v4362_v53 = vpop.f32.mrf.mxu0  ;;  %v2986_v6 = vadd.f32 %v2985_v16, %v2955_v57  ;;  %3990 = vst [vmem:[%s5944_s24 + $0x50] sm:$0xff] %v3954_v42   ;;  %v2918_v63 = vadd.f32 %v2917_v48, %v2887_v0  ;;  %v2837_v45 = vpop.f32.mrf.mxu1  ;;  %v6061_v0 = vld [vmem:[#allocation9_spill] sm:$0xff] }
 0x21b   : > { %v2838_v5 = vadd.f32 %v4361_v14, %v2837_v45  ;;  %v2958_v15 = vmul.f32 %v2889_v8, %v2889_v8 }
 0x21c   : > { %v4363_v47 = vpop.f32.mrf.mxu0  ;;  %v2987_v7 = vadd.f32 %v2986_v6, %v2956_v24  ;;  %v2919_v2 = vadd.f32 %v2918_v63, %v2888_v3  ;;  %v4570_v29 = vpop.f32.mrf.mxu1 }
 0x21d   : > { %v4364_v61 = vadd.f32 %v4363_v47, %v4362_v53  ;;  %v2890_v28 = vadd.f32 %v2838_v5, %v6059_v21 }
 0x21e   : > { %v4365_v46 = vpop.f32.mrf.mxu0  ;;  %v2988_v59 = vadd.f32 %v2987_v7, %v2957_v32  ;;  %v2920_v18 = vadd.f32 %v2919_v2, %v2889_v8  ;;  %v2850_v23 = vpop.f32.mrf.mxu1 }
 0x21f   : > { %v2843_v43 = vadd.f32 %v4566_v34, %v4364_v61  ;;  %v2959_v58 = vmul.f32 %v2890_v28, %v2890_v28  ;;  %v3964_v26 = vpack.c.bf16 %v2890_v28, %v2889_v8 }
 0x220   : > { %v4366_v30 = vpop.f32.mrf.mxu0  ;;  %v2989_v13 = vadd.f32 %v2988_v59, %v2958_v15  ;;  %v2921_v22 = vadd.f32 %v2920_v18, %v2890_v28  ;;  %v4571_v19 = vpop.f32.mrf.mxu1 }
 0x221   : > { %v2891_v54 = vadd.f32 %v2843_v43, %v6060_v55  ;;  %v4367_v50 = vadd.f32 %v4366_v30, %v4365_v46  ;;  %3992 = vst [vmem:[%s5944_s24 + $0x60] sm:$0xff] %v3964_v26  }
 0x222   : > { %v4368_v10 = vpop.f32.mrf.mxu0  ;;  %v2990_v20 = vadd.f32 %v2989_v13, %v2959_v58  ;;  %v2853_v51 = vpop.f32.mrf.mxu1 }
 0x223   : > { %v2960_v11 = vmul.f32 %v2891_v54, %v2891_v54  ;;  %v2846_v52 = vadd.f32 %v4567_v4, %v4367_v50  ;;  %v2922_v12 = vadd.f32 %v2921_v22, %v2891_v54  ;;  %v6063_v4 = vld [vmem:[#allocation11_spill] sm:$0xff] }
 0x224   : > { %v4369_v44 = vpop.f32.mrf.mxu0  ;;  %v4590_v3 = vpop.f32.mrf.mxu1 }
 0x225   : > { %v2892_v49 = vadd.f32 %v2846_v52, %v6061_v0  ;;  %v4370_v9 = vadd.f32 %v4369_v44, %v4368_v10  ;;  %v2991_v31 = vadd.f32 %v2990_v20, %v2960_v11  ;;  %v3363_v5 = vmul.f32 %v4590_v3, %v4590_v3 }
 0x226   : > { %v4371_v40 = vpop.f32.mrf.mxu0  ;;  %v3197_v37 = vpop.f32.mrf.mxu1 }
 0x227   : > { %v2923_v39 = vadd.f32 %v2922_v12, %v2892_v49  ;;  %v2961_v34 = vmul.f32 %v2892_v49, %v2892_v49  ;;  %v3969_v25 = vpack.c.bf16 %v2892_v49, %v2891_v54  ;;  %v2851_v27 = vadd.f32 %v4370_v9, %v2850_v23 }
 0x228   : > { %v4372_v35 = vpop.f32.mrf.mxu0  ;;  %v4591_v60 = vpop.f32.mrf.mxu1  ;;  %v3361_v63 = vmul.f32 %v3197_v37, %v3197_v37 }
 0x229   : > { %v2992_v33 = vadd.f32 %v2991_v31, %v2961_v34  ;;  %3993 = vst [vmem:[%s5944_s24 + $0x68] sm:$0xff] %v3969_v25   ;;  %v2893_v1 = vadd.f32 %v2851_v27, %v6062_v56  ;;  %v4373_v36 = vadd.f32 %v4372_v35, %v4371_v40  ;;  %v3364_v30 = vmul.f32 %v4591_v60, %v4591_v60 }
 0x22a   : > { %v4374_v24 = vpop.f32.mrf.mxu0  ;;  %v3200_v42 = vpop.f32.mrf.mxu1 }
 0x22b   : > { %v2924_v14 = vadd.f32 %v2923_v39, %v2893_v1  ;;  %v2962_v16 = vmul.f32 %v2893_v1, %v2893_v1  ;;  %v2854_v48 = vadd.f32 %v4373_v36, %v2853_v51  ;;  %v3324_v32 = vadd.f32 %v3200_v42, %v3197_v37 }
 0x22c   : > { %v4375_v57 = vpop.f32.mrf.mxu0  ;;  %v3362_v47 = vmul.f32 %v3200_v42, %v3200_v42  ;;  %v4594_v38 = vpop.f32.mrf.mxu1 }
 0x22d   : > { %v2993_v53 = vadd.f32 %v2992_v33, %v2962_v16  ;;  %v2894_v41 = vadd.f32 %v2854_v48, %v6063_v4  ;;  %v4376_v6 = vadd.f32 %v4375_v57, %v4374_v24  ;;  %v3325_v46 = vadd.f32 %v4590_v3, %v3324_v32 }
 0x22e   : > { %v4377_v45 = vpop.f32.mrf.mxu0  ;;  %v3393_v15 = vadd.f32 %v3362_v47, %v3361_v63  ;;  %v3213_v59 = vpop.f32.mrf.mxu1  ;;  %v3367_v9 = vmul.f32 %v4594_v38, %v4594_v38 }
 0x22f   : > { %v2925_v8 = vadd.f32 %v2924_v14, %v2894_v41  ;;  %v2963_v61 = vmul.f32 %v2894_v41, %v2894_v41  ;;  %v3974_v7 = vpack.c.bf16 %v2894_v41, %v2893_v1  ;;  %v2859_v2 = vadd.f32 %v4570_v29, %v4376_v6 }
 0x230   : > { %v4378_v43 = vpop.f32.mrf.mxu0  ;;  %v3394_v23 = vadd.f32 %v3393_v15, %v3363_v5  ;;  %v3326_v55 = vadd.f32 %v4591_v60, %v3325_v46  ;;  %v3365_v54 = vmul.f32 %v3213_v59, %v3213_v59  ;;  %v4595_v50 = vpop.f32.mrf.mxu1 }
 0x231   : > { %v2994_v18 = vadd.f32 %v2993_v53, %v2963_v61  ;;  %3994 = vst [vmem:[%s5944_s24 + $0x70] sm:$0xff] %v3974_v7   ;;  %v2895_v21 = vadd.f32 %v2859_v2, %v5905_v17  ;;  %v4379_v28 = vadd.f32 %v4378_v43, %v4377_v45  ;;  %v3368_v34 = vmul.f32 %v4595_v50, %v4595_v50 }
 0x232   : > { %v3327_v26 = vadd.f32 %v3326_v55, %v3213_v59  ;;  %v3395_v29 = vadd.f32 %v3394_v23, %v3364_v30  ;;  %v3216_v10 = vpop.f32.mrf.mxu1 }
 0x233   : > { %v2926_v13 = vadd.f32 %v2925_v8, %v2895_v21  ;;  %v2964_v22 = vmul.f32 %v2895_v21, %v2895_v21  ;;  %v2862_v58 = vadd.f32 %v4571_v19, %v4379_v28  ;;  %v3366_v44 = vmul.f32 %v3216_v10, %v3216_v10 }
 0x234   : > { %v3396_v20 = vadd.f32 %v3395_v29, %v3365_v54  ;;  %v3328_v12 = vadd.f32 %v3327_v26, %v3216_v10  ;;  %v4598_v17 = vpop.f32.mrf.mxu1 }
 0x235   : > { %v2995_v11 = vadd.f32 %v2994_v18, %v2964_v22  ;;  %v2896_v52 = vadd.f32 %v2862_v58, %v5917_v62  ;;  %v3371_v4 = vmul.f32 %v4598_v17, %v4598_v17 }
 0x236   : > { %v3329_v31 = vadd.f32 %v4594_v38, %v3328_v12  ;;  %v3397_v40 = vadd.f32 %v3396_v20, %v3366_v44  ;;  %v3229_v3 = vpop.f32.mrf.mxu1 }
 0x237   : > { %v2927_v51 = vadd.f32 %v2926_v13, %v2896_v52  ;;  %v2965_v0 = vmul.f32 %v2896_v52, %v2896_v52  ;;  %v3979_v49 = vpack.c.bf16 %v2896_v52, %v2895_v21  ;;  %v3369_v35 = vmul.f32 %v3229_v3, %v3229_v3 }
 0x238   : > { %v3398_v25 = vadd.f32 %v3397_v40, %v3367_v9  ;;  %v3330_v27 = vadd.f32 %v4595_v50, %v3329_v31  ;;  %v4599_v37 = vpop.f32.mrf.mxu1 }
 0x239   : > { %v2928_v39 = vrot.slane %v2927_v51, 4  ;;  %v2996_v19 = vadd.f32 %v2995_v11, %v2965_v0  ;;  %3995 = vst [vmem:[%s5944_s24 + $0x78] sm:$0xff] %v3979_v49   ;;  %v3372_v45 = vmul.f32 %v4599_v37, %v4599_v37 }
 0x23a   : > { %v3331_v56 = vadd.f32 %v3330_v27, %v3229_v3  ;;  %v3399_v1 = vadd.f32 %v3398_v25, %v3368_v34  ;;  %v3232_v36 = vpop.f32.mrf.mxu1 }
 0x23b   : > { %v2929_v62 = vadd.f32 %v2928_v39, %v2927_v51  ;;  %v2997_v33 = vrot.slane %v2996_v19, 4  ;;  %v3370_v48 = vmul.f32 %v3232_v36, %v3232_v36 }
 0x23c   : > { %v3400_v14 = vadd.f32 %v3399_v1, %v3369_v35  ;;  %v3332_v16 = vadd.f32 %v3331_v56, %v3232_v36  ;;  %v4602_v57 = vpop.f32.mrf.mxu1 }
 0x23d   : > { %v2930_v24 = vrot.slane %v2929_v62, 2  ;;  %v2998_v60 = vadd.f32 %v2997_v33, %v2996_v19  ;;  %v3375_v55 = vmul.f32 %v4602_v57, %v4602_v57 }
 0x23e   : > { %v3333_v41 = vadd.f32 %v4598_v17, %v3332_v16  ;;  %v3401_v6 = vadd.f32 %v3400_v14, %v3370_v48  ;;  %v3245_v63 = vpop.f32.mrf.mxu1 }
 0x23f   : > { %v2931_v42 = vadd.f32 %v2930_v24, %v2929_v62  ;;  %v2999_v53 = vrot.slane %v2998_v60, 2  ;;  %v3373_v61 = vmul.f32 %v3245_v63, %v3245_v63 }
 0x240   : > { %v3402_v38 = vadd.f32 %v3401_v6, %v3371_v4  ;;  %v3334_v8 = vadd.f32 %v4599_v37, %v3333_v41  ;;  %v4603_v7 = vpop.f32.mrf.mxu1 }
 0x241   : > { %v2932_v32 = vrot.slane %v2931_v42, 1  ;;  %v3000_v47 = vadd.f32 %v2999_v53, %v2998_v60  ;;  %v3376_v22 = vmul.f32 %v4603_v7, %v4603_v7 }
 0x242   : > { %v3335_v5 = vadd.f32 %v3334_v8, %v3245_v63  ;;  %v3403_v46 = vadd.f32 %v3402_v38, %v3372_v45  ;;  %v3248_v15 = vpop.f32.mrf.mxu1 }
 0x243   : > { %v3001_v2 = vrot.slane %v3000_v47, 1  ;;  %v2933_v43 = vadd.f32 %v2932_v32, %v2931_v42  ;;  %v3374_v28 = vmul.f32 %v3248_v15, %v3248_v15 }
 0x244   : > { %v3404_v18 = vadd.f32 %v3403_v46, %v3373_v61  ;;  %v3336_v21 = vadd.f32 %v3335_v5, %v3248_v15  ;;  %v4606_v30 = vpop.f32.mrf.mxu1 }
 0x245   : > { %v3002_v59 = vadd.f32 %v3001_v2, %v3000_v47  ;;  %v3379_v0 = vmul.f32 %v4606_v30, %v4606_v30 }
 0x246   : > { %v3337_v54 = vadd.f32 %v4602_v57, %v3336_v21  ;;  %v3405_v50 = vadd.f32 %v3404_v18, %v3374_v28  ;;  %v3261_v13 = vpop.f32.mrf.mxu1 }
 0x247   : > { %v6021_v23 = vsel %vm249_vm0, %v2933_v43, %v3002_v59  ;;  %v3377_v29 = vmul.f32 %v3261_v13, %v3261_v13 }
 0x248   : > { %v3406_v58 = vadd.f32 %v3405_v50, %v3375_v55  ;;  %v3338_v26 = vadd.f32 %v4603_v7, %v3337_v54  ;;  %v4607_v10 = vpop.f32.mrf.mxu1 }
 0x249   : > { %v3380_v40 = vmul.f32 %v4607_v10, %v4607_v10 }
 0x24a   : > { %v3339_v11 = vadd.f32 %v3338_v26, %v3261_v13  ;;  %v3407_v52 = vadd.f32 %v3406_v58, %v3376_v22  ;;  %v3264_v20 = vpop.f32.mrf.mxu1 }
 0x24b   : > { %v3378_v17 = vmul.f32 %v3264_v20, %v3264_v20 }
 0x24c   : > { %v3408_v12 = vadd.f32 %v3407_v52, %v3377_v29  ;;  %v3340_v44 = vadd.f32 %v3339_v11, %v3264_v20  ;;  %v4610_v51 = vpop.f32.mrf.mxu1 }
 0x24d   : > { %v3383_v1 = vmul.f32 %v4610_v51, %v4610_v51 }
 0x24e   : > { %v3341_v49 = vadd.f32 %v4606_v30, %v3340_v44  ;;  %v3409_v9 = vadd.f32 %v3408_v12, %v3378_v17  ;;  %v3277_v31 = vpop.f32.mrf.mxu1 }
 0x24f   : > { %v3381_v19 = vmul.f32 %v3277_v31, %v3277_v31 }
 0x250   : > { %v3410_v3 = vadd.f32 %v3409_v9, %v3379_v0  ;;  %v3342_v39 = vadd.f32 %v4607_v10, %v3341_v49  ;;  %v4611_v34 = vpop.f32.mrf.mxu1 }
 0x251   : > { %v3384_v14 = vmul.f32 %v4611_v34, %v4611_v34 }
 0x252   : > { %v3343_v25 = vadd.f32 %v3342_v39, %v3277_v31  ;;  %v3411_v27 = vadd.f32 %v3410_v3, %v3380_v40  ;;  %v3280_v35 = vpop.f32.mrf.mxu1 }
 0x253   : > { %v3382_v33 = vmul.f32 %v3280_v35, %v3280_v35 }
 0x254   : > { %v3412_v37 = vadd.f32 %v3411_v27, %v3381_v19  ;;  %v3344_v62 = vadd.f32 %v3343_v25, %v3280_v35  ;;  %v4614_v56 = vpop.f32.mrf.mxu1 }
 0x255   : > { %v3387_v45 = vmul.f32 %v4614_v56, %v4614_v56 }
 0x256   : > { %v3345_v36 = vadd.f32 %v4610_v51, %v3344_v62  ;;  %v3413_v24 = vadd.f32 %v3412_v37, %v3382_v33  ;;  %v3293_v60 = vpop.f32.mrf.mxu1 }
 0x257   : > { %v3385_v57 = vmul.f32 %v3293_v60, %v3293_v60 }
 0x258   : > { %v3414_v16 = vadd.f32 %v3413_v24, %v3383_v1  ;;  %v3346_v48 = vadd.f32 %v4611_v34, %v3345_v36  ;;  %v4615_v42 = vpop.f32.mrf.mxu1 }
 0x259   : > { %v3388_v7 = vmul.f32 %v4615_v42, %v4615_v42 }
 0x25a   : > { %v3347_v53 = vadd.f32 %v3346_v48, %v3293_v60  ;;  %v3415_v4 = vadd.f32 %v3414_v16, %v3384_v14  ;;  %v3296_v41 = vpop.f32.mrf.mxu1 }
 0x25b   : > { %v3386_v32 = vmul.f32 %v3296_v41, %v3296_v41 }
 0x25c   : > { %v3416_v6 = vadd.f32 %v3415_v4, %v3385_v57  ;;  %v3348_v63 = vadd.f32 %v3347_v53, %v3296_v41  ;;  %v4618_v47 = vpop.f32.mrf.mxu1 }
 0x25d   : > { %v3391_v55 = vmul.f32 %v4618_v47, %v4618_v47 }
 0x25e   : > { %v3349_v38 = vadd.f32 %v4614_v56, %v3348_v63  ;;  %v3417_v8 = vadd.f32 %v3416_v6, %v3386_v32  ;;  %v3309_v61 = vpop.f32.mrf.mxu1 }
 0x25f   : > { %v3389_v46 = vmul.f32 %v3309_v61, %v3309_v61 }
 0x260   : > { %v3418_v2 = vadd.f32 %v3417_v8, %v3387_v45  ;;  %v3350_v5 = vadd.f32 %v4615_v42, %v3349_v38  ;;  %v4619_v15 = vpop.f32.mrf.mxu1 }
 0x261   : > { %v3392_v13 = vmul.f32 %v4619_v15, %v4619_v15 }
 0x262   : > { %v3351_v43 = vadd.f32 %v3350_v5, %v3309_v61  ;;  %v3419_v59 = vadd.f32 %v3418_v2, %v3388_v7  ;;  %v3312_v18 = vpop.f32.mrf.mxu1 }
 0x263   : > { %v3390_v30 = vmul.f32 %v3312_v18, %v3312_v18 }
 0x264   : > { %v3420_v21 = vadd.f32 %v3419_v59, %v3389_v46  ;;  %v3352_v28 = vadd.f32 %v3351_v43, %v3312_v18 }
 0x266   : > { %v3353_v54 = vadd.f32 %v4618_v47, %v3352_v28  ;;  %v3421_v50 = vadd.f32 %v3420_v21, %v3390_v30 }
 0x268   : > { %v3354_v22 = vadd.f32 %v4619_v15, %v3353_v54  ;;  %v3422_v58 = vadd.f32 %v3421_v50, %v3391_v55 }
 0x26a   : > { %v3355_v26 = vrot.slane %v3354_v22, 4  ;;  %v3423_v29 = vadd.f32 %v3422_v58, %v3392_v13 }
 0x26c   : > { %v3356_v10 = vadd.f32 %v3355_v26, %v3354_v22  ;;  %v3424_v11 = vrot.slane %v3423_v29, 4 }
 0x26e   : > { %v3357_v52 = vrot.slane %v3356_v10, 2  ;;  %v3425_v20 = vadd.f32 %v3424_v11, %v3423_v29 }
 0x270   : > { %v3358_v12 = vadd.f32 %v3357_v52, %v3356_v10  ;;  %v3426_v44 = vrot.slane %v3425_v20, 2 }
 0x272   : > { %v3359_v17 = vrot.slane %v3358_v12, 1  ;;  %v3427_v51 = vadd.f32 %v3426_v44, %v3425_v20 }
 0x274   : > { %v3360_v0 = vadd.f32 %v3359_v17, %v3358_v12  ;;  %v3428_v49 = vrot.slane %v3427_v51, 1 }
 0x276   : > { %v3429_v9 = vadd.f32 %v3428_v49, %v3427_v51  ;;  %v3433_v31 = vsel %vm3432_vm11, %v6021_v23, %v3360_v0 }
 0x278   : > { %v3435_v40 = vsel %vm3434_vm12, %v3433_v31, %v3429_v9 }
 0x279   : > { %v3437_v3 = vsel %vm685_vm5, %v3435_v40, 0.0 }
 0x27a   : > { %v3439_v39 = vsel %vm3438_vm13, %v3437_v3, 0.0 }
 0x27b   : > { %v3441_v19 = vsel %vm3440_vm14, %v3439_v39, 0.0 }
 0x27c   : > { %v3443_v34 = vsel %vm2278_vm10, %v3441_v19, 0.0 }
 0x27d   : > { %3444 = vst [vmem:[%s208_s28] sm:$0xff] %v3443_v34 }
 0x27e PF: > { %s15_s15 = sadd.s32 1, %s4825_s15  }
 0x27f   : > { %p12_p4 = scmp.ge.s32.totalorder %s15_s15, 4  }
 0x281   :  { %14 = sbr.rel (!%p12_p4) target bundleno = 1 (0x1), region = 76 }

// kernel: basic_block_forward.4
= control target key start
LH: loop header
LB: loop body
LE: loop exit
PB: predicated region body
PF: predicated region fallthrough
CT: control target
= control target key end

     0   :  { %s4703_s18 = smov 0   ;;  %s6084_s0 = inlined_call_operand.vmem [shape: bf16[2,256,128], index: 0, kind: input, shape index: {}]   ;;  %s6085_s1 = inlined_call_operand.vmem [shape: f32[1,128], index: 1, kind: input, shape index: {}]   ;;  %s6086_s2 = inlined_call_operand.vmem [shape: f32[1,128], index: 2, kind: input, shape index: {}]   ;;  %s6087_s3 = inlined_call_operand.vmem [shape: bf16[1152,128], index: 3, kind: input, shape index: {}]   ;;  %s6088_s4 = inlined_call_operand.vmem [shape: bf16[2,256,128], index: 4, kind: output, shape index: {0}]   ;;  %s6089_s5 = inlined_call_operand.vmem [shape: f32[2,8,128], index: 5, kind: output, shape index: {1}]  }
   0x1 LB: > { %s3529_s19 = sadd.s32 4294967295, %s4670_s18   ;;  %p3533_p0 = scmp.ge.s32.totalorder %s4670_s18, 1  ;;  %s4670_s18 = sphi %s4703_s18, %s16_s18  }
   0x2   : > { %p190_p1 = scmp.lt.s32.totalorder %s4670_s18, 3 }
   0x4   : > { %p191_p2 = pnand %p3533_p0, %p190_p1 }
   0x6   : > { %194 = sbr.rel (%p191_p2) target bundleno = 613 (0x265), region = 36 }
   0xb   : > { %v4532_v0 = vld [vmem:[%s6087_s3 + $0x138] sm:$0xff]   ;;  %v4534_v2 = vld [vmem:[%s6087_s3 + $0x130] sm:$0xff]   ;;  %p222_p3 = scmp.lt.s32.totalorder %s3529_s19, 1  ;;  %v4536_v4 = vld [vmem:[%s6087_s3 + $0x128] sm:$0xff]   ;;  %v4672_v5 = vmov 0   ;;  %vm434_vm0 = vcmask 1040384  }
   0xc   : > { %v4533_v1 = vld [vmem:[%s6087_s3 + $0xf8] sm:$0xff]   ;;  %4507 = vmatprep.subr.bf16.mxu1 %v4532_v0  ;;  %3955 = vmatprep.subr.bf16.mxu0 %v4532_v0  ;;  %v4535_v3 = vld [vmem:[%s6087_s3 + $0xf0] sm:$0xff]   ;;  %427 = vst [vmem:[#allocation2] sm:$0xf] %v4672_v5  ;;  %428 = vst [vmem:[#allocation2 + $0x4] sm:$0xf] %v4672_v5 }
   0xd   : > { %4515 = vmatpush3.bf16.msra.mxu1 %v4533_v1  ;;  %3956 = vmatpush3.bf16.msra.mxu0 %v4533_v1  ;;  %s6159_s19 = smov (!%p222_p3, %s3529_s19), 1  ;;  %429 = vst [vmem:[#allocation2 + $0x8] sm:$0x1] %v4672_v5  ;;  %431 = vst [vmem:[#allocation2 + $0xcc] sm:$0xf] %v4672_v5  ;;  %v4537_v6 = vld [vmem:[%s6087_s3 + $0xe8] sm:$0xff]  }
   0xe   : > { %4508 = vmatprep.subr.bf16.mxu1 %v4534_v2  ;;  %3957 = vmatprep.subr.bf16.mxu0 %v4534_v2  ;;  %432 = vst [vmem:[#allocation2 + $0xd0] sm:$0xf] %v4672_v5  ;;  %433 = vst [vmem:[#allocation2 + $0xd4] sm:$0x1] %v4672_v5  ;;  %v4538_v7 = vld [vmem:[%s6087_s3 + $0x120] sm:$0xff]   ;;  %s3715_s9 = sshll.u32 %s6159_s19, 7 }
   0xf   : > { %v4539_v8 = vld [vmem:[%s6087_s3 + $0xe0] sm:$0xff]   ;;  %v4540_v9 = vld [vmem:[%s6087_s3 + $0x118] sm:$0xff]   ;;  %s4746_s16 = scalar_lea.vmem %s6084_s0, %s3715_s9  ;;  %v4542_v11 = vld [vmem:[%s6087_s3 + $0x110] sm:$0xff]   ;;  %vm435_vm1 = vsmask.f32 256  ;;  %vm950_vm5 = vcmask 1043456  }
  0x10   : > { %v4541_v10 = vld [vmem:[%s6087_s3 + $0xd8] sm:$0xff]   ;;  %v3782_v12 = vld [vmem:[%s4746_s16] sm:$0xff]   ;;  %v4543_v14 = vld [vmem:[%s6087_s3 + $0xd0] sm:$0xff]   ;;  %vm491_vm2 = vsmask.f32 7938  ;;  %vm2543_vm10 = vcmask 1046528  }
  0x11   : > { %4516 = vmatpush3.bf16.msra.mxu1 %v4535_v3  ;;  %3958 = vmatpush3.bf16.msra.mxu0 %v4535_v3  ;;  %v4758_v13 = vld [vmem:[%s6085_s1] ss:$0 sm:$0xff]  ;;  %v3783_v15 = vunpack.c.l.bf16 %v3782_v12  ;;  %v3784_v16 = vunpack.c.h.bf16 %v3782_v12  ;;  %v440_v17 = vld [vmem:[#allocation2 + $0xc] sm:$0x1]  ;;  %vm4773_vm3 = vmand %vm434_vm0, %vm435_vm1  ;;  %vm627_vm6 = vsmask.f32 4368 }
  0x12   : > { %4509 = vmatprep.subr.bf16.mxu1 %v4536_v4  ;;  %3959 = vmatprep.subr.bf16.mxu0 %v4536_v4  ;;  %v4544_v18 = vld [vmem:[%s6087_s3 + $0x108] sm:$0xff]   ;;  %v4769_v19 = vld [vmem:[%s6086_s2] ss:$0 sm:$0xff]  ;;  %v496_v21 = vld [vmem:[#allocation2 + $0x14] sm:$0x1]  ;;  %v441_v24 = vsel %vm4773_vm3, 0, %v440_v17 }
  0x13   : > { %v308_v22 = vmul.f32 %v3783_v15, %v4758_v13  ;;  %v309_v23 = vmul.f32 %v3784_v16, %v4758_v13  ;;  %vm4783_vm4 = vmand %vm434_vm0, %vm491_vm2  ;;  %v3936_v26 = vld [vmem:[%s4746_s16 + $0x60] sm:$0xff]   ;;  %v476_v27 = vld [vmem:[#allocation2 + $0x9c] sm:$0x1]  ;;  %442 = vst [vmem:[#allocation2 + $0xc] sm:$0x1] %v441_v24  ;;  %vm3270_vm11 = vcmask 1041408  }
  0x14   : > { %v497_v28 = vsel %vm4783_vm4, 0, %v496_v21  ;;  %v3831_v29 = vunpack.c.l.bf16 %v3936_v26  ;;  %v3832_v30 = vunpack.c.h.bf16 %v3936_v26  ;;  %v477_v31 = vsel %vm4773_vm3, 0, %v476_v27  ;;  %v532_v32 = vld [vmem:[#allocation2 + $0xa4] sm:$0x1]  ;;  %v4545_v33 = vld [vmem:[%s6087_s3 + $0xc8] sm:$0xff]   ;;  %v3935_v46 = vld [vmem:[%s4746_s16 + $0x58] sm:$0xff]  }
  0x15   : > { %4517 = vmatpush3.bf16.msra.mxu1 %v4537_v6  ;;  %3960 = vmatpush3.bf16.msra.mxu0 %v4537_v6  ;;  %v347_v34 = vadd.f32 %v4769_v19, %v308_v22  ;;  %v348_v35 = vadd.f32 %v4769_v19, %v309_v23  ;;  %498 = vst [vmem:[#allocation2 + $0x14] sm:$0x1] %v497_v28  ;;  %478 = vst [vmem:[#allocation2 + $0x9c] sm:$0x1] %v477_v31  ;;  %v533_v36 = vsel %vm4783_vm4, 0, %v532_v32  ;;  %v4546_v41 = vld [vmem:[%s6087_s3 + $0x100] sm:$0xff]  }
  0x16   : > { %4510 = vmatprep.subr.bf16.mxu1 %v4538_v7  ;;  %3961 = vmatprep.subr.bf16.mxu0 %v4538_v7  ;;  %v332_v37 = vmul.f32 %v3831_v29, %v4758_v13  ;;  %v333_v38 = vmul.f32 %v3832_v30, %v4758_v13  ;;  %534 = vst [vmem:[#allocation2 + $0xa4] sm:$0x1] %v533_v36  ;;  %v437_v39 = vld [vmem:[#allocation2] sm:$0x1]  ;;  %v493_v40 = vld [vmem:[#allocation2 + $0x8] sm:$0x1]  ;;  %v3827_v49 = vunpack.c.l.bf16 %v3935_v46  ;;  %v3828_v50 = vunpack.c.h.bf16 %v3935_v46  ;;  %vm4834_vm7 = vmor %vm435_vm1, %vm627_vm6 }
  0x17   : > { %v379_v42 = vmax.f32 %v347_v34, 0.0  ;;  %v380_v43 = vmax.f32 %v348_v35, 0.0  ;;  %v438_v44 = vsel %vm4773_vm3, 0, %v437_v39  ;;  %v494_v45 = vsel %vm4783_vm4, 0, %v493_v40  ;;  %v473_v51 = vld [vmem:[#allocation2 + $0x90] sm:$0x1]  ;;  %vm4841_vm8 = vmand %vm950_vm5, %vm491_vm2 }
  0x18   : > { %v371_v47 = vadd.f32 %v4769_v19, %v332_v37  ;;  %v372_v48 = vadd.f32 %v4769_v19, %v333_v38  ;;  %439 = vst [vmem:[#allocation2] sm:$0x1] %v438_v44  ;;  %495 = vst [vmem:[#allocation2 + $0x8] sm:$0x1] %v494_v45  ;;  %v529_v52 = vld [vmem:[#allocation2 + $0x98] sm:$0x1]  ;;  %v330_v59 = vmul.f32 %v3827_v49, %v4758_v13 }
  0x19   : > { %4518 = vmatpush3.bf16.msra.mxu1 %v4539_v8  ;;  %3962 = vmatpush3.bf16.msra.mxu0 %v4539_v8  ;;  %v3717_v53 = vpack.c.bf16 %v379_v42, %v379_v42  ;;  %v3718_v54 = vpack.c.bf16 %v380_v43, %v380_v43  ;;  %v474_v55 = vsel %vm4773_vm3, 0, %v473_v51  ;;  %v530_v56 = vsel %vm4783_vm4, 0, %v529_v52  ;;  %v3925_v61 = vld [vmem:[%s4746_s16 + $0x8] sm:$0xff]   ;;  %v4547_v62 = vld [vmem:[%s6087_s3 + $0xc0] sm:$0xff]   ;;  %v4824_v5 = vld [vmem:[%s6087_s3 + $0x178] sm:$0xff]  }
  0x1a   : > { %4511 = vmatprep.subr.bf16.mxu1 %v4540_v9  ;;  %3963 = vmatprep.subr.bf16.mxu0 %v4540_v9  ;;  %v403_v57 = vmax.f32 %v371_v47, 0.0  ;;  %v404_v58 = vmax.f32 %v372_v48, 0.0  ;;  %v331_v60 = vmul.f32 %v3828_v50, %v4758_v13  ;;  %475 = vst [vmem:[#allocation2 + $0x90] sm:$0x1] %v474_v55  ;;  %531 = vst [vmem:[#allocation2 + $0x98] sm:$0x1] %v530_v56  ;;  %v3787_v8 = vunpack.c.l.bf16 %v3925_v61 }
  0x1b   : > { %v630_v63 = vshrl.u32 %v3717_v53, 16  ;;  %v633_v0 = vshll.u32 %v3717_v53, 16  ;;  %v638_v1 = vshrl.u32 %v3718_v54, 16  ;;  %v641_v2 = vshll.u32 %v3718_v54, 16  ;;  %v4830_v7 = vld [vmem:[%s6087_s3 + $0xb8] sm:$0xff]   ;;  %v3937_v51 = vld [vmem:[%s4746_s16 + $0x68] sm:$0xff]  }
  0x1c   : > { %v3741_v3 = vpack.c.bf16 %v403_v57, %v403_v57  ;;  %v3742_v4 = vpack.c.bf16 %v404_v58, %v404_v58  ;;  %v369_v6 = vadd.f32 %v4769_v19, %v330_v59  ;;  %v952_v12 = vld [vmem:[#allocation2 + $0xc] sm:$0xf]  ;;  %v3788_v15 = vunpack.c.h.bf16 %v3925_v61  ;;  %v956_v17 = vld [vmem:[#allocation2 + $0x14] sm:$0x1]  ;;  %v1036_v38 = vld [vmem:[#allocation2 + $0x9c] sm:$0xf] }
  0x1d   : > { %4519 = vmatpush3.bf16.msra.mxu1 %v4541_v10  ;;  %3964 = vmatpush3.bf16.msra.mxu0 %v4541_v10  ;;  %v632_v10 = vrot.slane %v630_v63, 7  ;;  %vm1328_vm9 = vsmask.f32 7424  ;;  %v1040_v39 = vld [vmem:[#allocation2 + $0xa4] sm:$0x1]  ;;  %vm3272_vm12 = vcmask 1042432  }
  0x1e   : > { %4512 = vmatprep.subr.bf16.mxu1 %v4542_v11  ;;  %3965 = vmatprep.subr.bf16.mxu0 %v4542_v11  ;;  %v640_v11 = vrot.slane %v638_v1, 7  ;;  %v837_v21 = vshll.u32 %v3741_v3, 16  ;;  %v842_v22 = vshrl.u32 %v3742_v4, 16  ;;  %v845_v23 = vshll.u32 %v3742_v4, 16  ;;  %v443_v45 = vld [vmem:[#allocation2 + $0x18] sm:$0x1] }
  0x1f   : > { %v635_v24 = vor.u32 %v633_v0, %v632_v10  ;;  %v636_v26 = vrot.slane %v632_v10, 4  ;;  %v4553_v31 = vld [vmem:[#allocation2] sm:$0xff]   ;;  %v4554_v32 = vld [vmem:[#allocation2 + $0x8] ss:$0 sps:$4 sm:$0x11]   ;;  %v311_v34 = vmul.f32 %v3788_v15, %v4758_v13  ;;  %v401_v40 = vmax.f32 %v369_v6, 0.0 }
  0x20   : > { %v643_v27 = vor.u32 %v641_v2, %v640_v11  ;;  %v645_v28 = vrot.slane %v640_v11, 4  ;;  %v844_v30 = vrot.slane %v842_v22, 7  ;;  %v1330_v46 = vshrl.u32 %v4553_v31, 16  ;;  %v499_v50 = vld [vmem:[#allocation2 + $0x20] sm:$0x1]  ;;  %v4867_v0 = vld [vmem:[%s4746_s16 + $0x10] sm:$0xff]  }
  0x21   : > { %4520 = vmatpush3.bf16.msra.mxu1 %v4543_v14  ;;  %3966 = vmatpush3.bf16.msra.mxu0 %v4543_v14  ;;  %v370_v14 = vadd.f32 %v4769_v19, %v331_v60  ;;  %v953_v36 = vsel %vm4841_vm8, %v635_v24, %v952_v12  ;;  %v1332_v47 = vshll.u32 %v4553_v31, 16  ;;  %v1337_v48 = vshll.u32 %v4554_v32, 16 }
  0x22   : > { %4513 = vmatprep.subr.bf16.mxu1 %v4544_v18  ;;  %3967 = vmatprep.subr.bf16.mxu0 %v4544_v18  ;;  %v834_v18 = vshrl.u32 %v3741_v3, 16  ;;  %v644_v35 = vsel %vm4834_vm7, %v636_v26, %v643_v27  ;;  %v957_v37 = vsel %vm4773_vm3, %v645_v28, %v956_v17  ;;  %954 = vst [vmem:[#allocation2 + $0xc] sm:$0xf] %v953_v36  ;;  %v849_v44 = vrot.slane %v844_v30, 4  ;;  %v1033_v28 = vld [vmem:[#allocation2 + $0x98] sm:$0x1] }
  0x23   : > { %955 = vst [vmem:[#allocation2 + $0x10] sm:$0xf] %v644_v35  ;;  %958 = vst [vmem:[#allocation2 + $0x14] sm:$0x1] %v957_v37  ;;  %v847_v43 = vor.u32 %v845_v23, %v844_v30  ;;  %v402_v49 = vmax.f32 %v370_v14, 0.0  ;;  %v3739_v55 = vpack.c.bf16 %v401_v40, %v401_v40  ;;  %v1334_v56 = vrot.slane %v1332_v47, 1 }
  0x24   : > { %v836_v29 = vrot.slane %v834_v18, 7  ;;  %v1041_v54 = vsel %vm4773_vm3, %v849_v44, %v1040_v39  ;;  %v1339_v57 = vrot.slane %v1337_v48, 1  ;;  %v444_v63 = vsel %vm4773_vm3, 0, %v443_v45 }
  0x25   : > { %4521 = vmatpush3.bf16.msra.mxu1 %v4545_v33  ;;  %3968 = vmatpush3.bf16.msra.mxu0 %v4545_v33  ;;  %v310_v33 = vmul.f32 %v3787_v8, %v4758_v13  ;;  %1042 = vst [vmem:[#allocation2 + $0xa4] sm:$0x1] %v1041_v54  ;;  %v3740_v58 = vpack.c.bf16 %v402_v49, %v402_v49  ;;  %v817_v60 = vshrl.u32 %v3739_v55, 16  ;;  %v820_v61 = vshll.u32 %v3739_v55, 16  ;;  %v1029_v8 = vld [vmem:[#allocation2 + $0x90] sm:$0xf] }
  0x26   : > { %4514 = vmatprep.subr.bf16.mxu1 %v4546_v41  ;;  %3969 = vmatprep.subr.bf16.mxu0 %v4546_v41  ;;  %v839_v41 = vor.u32 %v837_v21, %v836_v29  ;;  %v840_v42 = vrot.slane %v836_v29, 4  ;;  %v1335_v1 = vor.u32 %v1334_v56, %v1330_v46  ;;  %445 = vst [vmem:[#allocation2 + $0x18] sm:$0x1] %v444_v63  ;;  %v500_v11 = vsel %vm4783_vm4, 0, %v499_v50 }
  0x27   : > { %v349_v59 = vadd.f32 %v4769_v19, %v310_v33  ;;  %v825_v2 = vshrl.u32 %v3740_v58, 16  ;;  %v828_v3 = vshll.u32 %v3740_v58, 16  ;;  %v819_v6 = vrot.slane %v817_v60, 7  ;;  %501 = vst [vmem:[#allocation2 + $0x20] sm:$0x1] %v500_v11 }
  0x28   : > { %v848_v52 = vsel %vm4834_vm7, %v840_v42, %v847_v43  ;;  %v1037_v53 = vsel %vm4841_vm8, %v839_v41, %v1036_v38  ;;  %v3835_v12 = vunpack.c.l.bf16 %v3937_v51  ;;  %v1340_v14 = vsel %vm1328_vm9, %v1335_v1, %v1339_v57  ;;  %v479_v42 = vld [vmem:[#allocation2 + $0xa8] sm:$0x1]  ;;  %v535_v57 = vld [vmem:[#allocation2 + $0xb0] sm:$0x1] }
  0x29   : > { %4522 = vmatpush3.bf16.msra.mxu1 %v4547_v62  ;;  %3970 = vmatpush3.bf16.msra.mxu0 %v4547_v62  ;;  %1038 = vst [vmem:[#allocation2 + $0x9c] sm:$0xf] %v1037_v53  ;;  %1039 = vst [vmem:[#allocation2 + $0xa0] sm:$0xf] %v848_v52  ;;  %v350_v62 = vadd.f32 %v4769_v19, %v311_v34  ;;  %v381_v4 = vmax.f32 %v349_v59, 0.0  ;;  %v3836_v17 = vunpack.c.h.bf16 %v3937_v51  ;;  %v3791_v18 = vunpack.c.l.bf16 %v4867_v0 }
  0x2a   : > { %4363 = vmatprep.subr.bf16.mxu1 %v4824_v5  ;;  %4411 = vmatprep.subr.bf16.mxu0 %v4830_v7  ;;  %v4548_v21 = vld [vmem:[#allocation2 + $0xc] sm:$0xff]   ;;  %v4549_v22 = vld [vmem:[#allocation2 + $0x14] ss:$0 sps:$4 sm:$0x11]   ;;  %v822_v23 = vor.u32 %v820_v61, %v819_v6  ;;  %v823_v24 = vrot.slane %v819_v6, 4  ;;  %v827_v26 = vrot.slane %v825_v2, 7  ;;  %v334_v31 = vmul.f32 %v3835_v12, %v4758_v13 }
  0x2b   : > { %v382_v10 = vmax.f32 %v350_v62, 0.0  ;;  %v3719_v15 = vpack.c.bf16 %v381_v4, %v381_v4  ;;  %v335_v32 = vmul.f32 %v3836_v17, %v4758_v13  ;;  %v1342_v33 = vshrl.u32 %v4548_v21, 16  ;;  %v446_v12 = vld [vmem:[#allocation2 + $0x24] sm:$0x1] }
  0x2c   : > { %v1344_v34 = vshll.u32 %v4548_v21, 16  ;;  %v1349_v35 = vshll.u32 %v4549_v22, 16  ;;  %v830_v37 = vor.u32 %v828_v3, %v827_v26  ;;  %v832_v38 = vrot.slane %v827_v26, 4  ;;  %v4551_v45 = vld [vmem:[#allocation2 + $0xa4] ss:$0 sps:$4 sm:$0x11]  }
  0x2d   : > { %v3720_v27 = vpack.c.bf16 %v382_v10, %v382_v10  ;;  %v647_v29 = vshrl.u32 %v3719_v15, 16  ;;  %v650_v30 = vshll.u32 %v3719_v15, 16  ;;  %v1030_v39 = vsel %vm4841_vm8, %v822_v23, %v1029_v8  ;;  %v959_v52 = vld [vmem:[#allocation2 + $0x18] sm:$0xf]  ;;  %v4565_v3 = vld [vmem:[%s6087_s3 + $0xb0] sm:$0xff]  }
  0x2e   : > { %v373_v41 = vadd.f32 %v4769_v19, %v334_v31  ;;  %v1346_v43 = vrot.slane %v1344_v34, 1  ;;  %v1351_v44 = vrot.slane %v1349_v35, 1  ;;  %v831_v47 = vsel %vm4834_vm7, %v823_v24, %v830_v37  ;;  %1031 = vst [vmem:[#allocation2 + $0x90] sm:$0xf] %v1030_v39  ;;  %v963_v6 = vld [vmem:[#allocation2 + $0x20] sm:$0x1] }
  0x2f   : > { %v649_v40 = vrot.slane %v647_v29, 7  ;;  %1032 = vst [vmem:[#allocation2 + $0x94] sm:$0xf] %v831_v47  ;;  %v1034_v49 = vsel %vm4773_vm3, %v832_v38, %v1033_v28  ;;  %v1493_v54 = vshll.u32 %v4551_v45, 16  ;;  %v655_v55 = vshrl.u32 %v3720_v27, 16  ;;  %v3938_v23 = vld [vmem:[%s4746_s16 + $0x70] sm:$0xff]  }
  0x30   : > { %v4550_v36 = vld [vmem:[#allocation2 + $0x9c] sm:$0xff]   ;;  %v1347_v53 = vor.u32 %v1346_v43, %v1342_v33  ;;  %1035 = vst [vmem:[#allocation2 + $0x98] sm:$0x1] %v1034_v49  ;;  %v658_v56 = vshll.u32 %v3720_v27, 16  ;;  %v374_v60 = vadd.f32 %v4769_v19, %v335_v32  ;;  %v405_v61 = vmax.f32 %v373_v41, 0.0 }
  0x31   : > { %v1486_v46 = vshrl.u32 %v4550_v36, 16  ;;  %v1488_v48 = vshll.u32 %v4550_v36, 16  ;;  %v652_v50 = vor.u32 %v650_v30, %v649_v40  ;;  %v653_v51 = vrot.slane %v649_v40, 4  ;;  %v502_v29 = vld [vmem:[#allocation2 + $0x2c] sm:$0x1] }
  0x32   : > { %v4886_v62 = vsel %vm1328_vm9, %v1347_v53, %v1351_v44  ;;  %v1495_v63 = vrot.slane %v1493_v54, 1  ;;  %v657_v1 = vrot.slane %v655_v55, 7  ;;  %v480_v2 = vsel %vm4773_vm3, 0, %v479_v42  ;;  %v482_v40 = vld [vmem:[#allocation2 + $0xb4] sm:$0x1]  ;;  %v4577_v55 = vld [vmem:[%s6087_s3 + $0xa8] sm:$0xff]  }
  0x33   : > { %v1490_v58 = vrot.slane %v1488_v48, 1  ;;  %v960_v59 = vsel %vm4841_vm8, %v652_v50, %v959_v52  ;;  %1787 = vmatprep.mubr.bf16.mxu0 %v4886_v62  ;;  %v406_v8 = vmax.f32 %v374_v60, 0.0  ;;  %481 = vst [vmem:[#allocation2 + $0xa8] sm:$0x1] %v480_v2  ;;  %v536_v10 = vsel %vm4783_vm4, 0, %v535_v57  ;;  %v4558_v60 = vld [vmem:[%s6087_s3 + $0x170] sm:$0xff]  }
  0x34   : > { %961 = vst [vmem:[#allocation2 + $0x18] sm:$0xf] %v960_v59  ;;  %v3743_v11 = vpack.c.bf16 %v405_v61, %v405_v61  ;;  %1788 = vmatmul.mubr.bf16.vlgmr.msra.gmra.mxu0 %v1340_v14  ;;  %v660_v15 = vor.u32 %v658_v56, %v657_v1  ;;  %v662_v17 = vrot.slane %v657_v1, 4  ;;  %537 = vst [vmem:[#allocation2 + $0xb0] sm:$0x1] %v536_v10  ;;  %v3792_v21 = vunpack.c.h.bf16 %v4867_v0 }
  0x35   : > { %v1491_v4 = vor.u32 %v1490_v58, %v1486_v46  ;;  %v312_v22 = vmul.f32 %v3791_v18, %v4758_v13  ;;  %4412 = vmatpush3.bf16.msra.mxu0 %v4830_v7  ;;  %v3744_v26 = vpack.c.bf16 %v406_v8, %v406_v8  ;;  %v447_v31 = vsel %vm4773_vm3, 0, %v446_v12 }
  0x36   : > { %v851_v27 = vshrl.u32 %v3743_v11, 16  ;;  %v854_v28 = vshll.u32 %v3743_v11, 16  ;;  %v4555_v14 = vld [vmem:[#allocation2 + $0x90] sm:$0xff]   ;;  %v661_v30 = vsel %vm4834_vm7, %v653_v51, %v660_v15  ;;  %v964_v0 = vsel %vm4773_vm3, %v662_v17, %v963_v6  ;;  %4413 = vmatprep.subr.bf16.mxu0 %v4565_v3  ;;  %448 = vst [vmem:[#allocation2 + $0x24] sm:$0x1] %v447_v31  ;;  %v4563_v15 = vld [vmem:[%s6087_s3 + $0x168] sm:$0xff]  }
  0x37   : > { %v4902_v24 = vsel %vm1328_vm9, %v1491_v4, %v1495_v63  ;;  %v313_v18 = vmul.f32 %v3792_v21, %v4758_v13  ;;  %v4556_v7 = vld [vmem:[#allocation2 + $0x98] ss:$0 sps:$4 sm:$0x11]   ;;  %962 = vst [vmem:[#allocation2 + $0x1c] sm:$0xf] %v661_v30  ;;  %v351_v33 = vadd.f32 %v4769_v19, %v312_v22  ;;  %v3839_v34 = vunpack.c.l.bf16 %v3938_v23 }
  0x38   : > { %1883 = vmatprep.mubr.bf16.mxu1 %v4902_v24  ;;  %965 = vst [vmem:[#allocation2 + $0x20] sm:$0x1] %v964_v0  ;;  %v853_v32 = vrot.slane %v851_v27, 7  ;;  %v3840_v35 = vunpack.c.h.bf16 %v3938_v23  ;;  %v1474_v36 = vshrl.u32 %v4555_v14, 16  ;;  %v1476_v37 = vshll.u32 %v4555_v14, 16 }
  0x39   : > { %v859_v38 = vshrl.u32 %v3744_v26, 16  ;;  %v862_v39 = vshll.u32 %v3744_v26, 16  ;;  %v1481_v41 = vshll.u32 %v4556_v7, 16  ;;  %4414 = vmatpush3.bf16.msra.mxu0 %v4565_v3  ;;  %v352_v44 = vadd.f32 %v4769_v19, %v313_v18  ;;  %v538_v3 = vld [vmem:[#allocation2 + $0xbc] sm:$0x1] }
  0x3a   : > { %v856_v42 = vor.u32 %v854_v28, %v853_v32  ;;  %v857_v43 = vrot.slane %v853_v32, 4  ;;  %v1478_v45 = vrot.slane %v1476_v37, 1  ;;  %v1043_v47 = vld [vmem:[#allocation2 + $0xa8] sm:$0xf]  ;;  %v383_v48 = vmax.f32 %v351_v33, 0.0  ;;  %4415 = vmatprep.subr.bf16.mxu0 %v4577_v55  ;;  %v3927_v7 = vld [vmem:[%s4746_s16 + $0x18] sm:$0xff]  }
  0x3b   : > { %v861_v46 = vrot.slane %v859_v38, 7  ;;  %v503_v49 = vsel %vm4783_vm4, 0, %v502_v29  ;;  %v1483_v50 = vrot.slane %v1481_v41, 1  ;;  %v1047_v52 = vld [vmem:[#allocation2 + $0xb0] sm:$0x1]  ;;  %v384_v53 = vmax.f32 %v352_v44, 0.0 }
  0x3c   : > { %v1044_v51 = vsel %vm4841_vm8, %v856_v42, %v1043_v47  ;;  %504 = vst [vmem:[#allocation2 + $0x2c] sm:$0x1] %v503_v49  ;;  %v336_v54 = vmul.f32 %v3839_v34, %v4758_v13  ;;  %v1479_v56 = vor.u32 %v1478_v45, %v1474_v36  ;;  %v3721_v59 = vpack.c.bf16 %v383_v48, %v383_v48  ;;  %v449_v36 = vld [vmem:[#allocation2 + $0x30] sm:$0x1]  ;;  %v505_v37 = vld [vmem:[#allocation2 + $0x38] sm:$0x1] }
  0x3d   : > { %v864_v57 = vor.u32 %v862_v39, %v861_v46  ;;  %v866_v58 = vrot.slane %v861_v46, 4  ;;  %1045 = vst [vmem:[#allocation2 + $0xa8] sm:$0xf] %v1044_v51  ;;  %v3722_v61 = vpack.c.bf16 %v384_v53, %v384_v53  ;;  %v337_v63 = vmul.f32 %v3840_v35, %v4758_v13  ;;  %4416 = vmatpush3.bf16.msra.mxu0 %v4577_v55  ;;  %v966_v29 = vld [vmem:[#allocation2 + $0x24] sm:$0xf]  ;;  %v3939_v47 = vld [vmem:[%s4746_s16 + $0x78] sm:$0xff]  }
  0x3e   : > { %v375_v1 = vadd.f32 %v4769_v19, %v336_v54  ;;  %v483_v2 = vsel %vm4773_vm3, 0, %v482_v40  ;;  %v4931_v4 = vsel %vm1328_vm9, %v1479_v56, %v1483_v50  ;;  %v4559_v6 = vld [vmem:[#allocation2 + $0x18] sm:$0xff]   ;;  %v664_v11 = vshrl.u32 %v3721_v59, 16  ;;  %v4564_v39 = vld [vmem:[%s6087_s3 + $0x160] sm:$0xff]  }
  0x3f   : > { %v865_v8 = vsel %vm4834_vm7, %v857_v43, %v864_v57  ;;  %v1048_v10 = vsel %vm4773_vm3, %v866_v58, %v1047_v52  ;;  %484 = vst [vmem:[#allocation2 + $0xb4] sm:$0x1] %v483_v2  ;;  %1884 = vmatmul.mubr.bf16.vlgmr.msra.gmra.mxu1 %v4931_v4  ;;  %v4560_v12 = vld [vmem:[#allocation2 + $0x20] ss:$0 sps:$4 sm:$0x11]   ;;  %v667_v17 = vshll.u32 %v3721_v59, 16  ;;  %v376_v23 = vadd.f32 %v4769_v19, %v337_v63 }
  0x40   : > { %1046 = vst [vmem:[#allocation2 + $0xac] sm:$0xf] %v865_v8  ;;  %1049 = vst [vmem:[#allocation2 + $0xb0] sm:$0x1] %v1048_v10  ;;  %v672_v21 = vshrl.u32 %v3722_v61, 16  ;;  %v675_v22 = vshll.u32 %v3722_v61, 16  ;;  %4364 = vmatpush3.bf16.msra.mxu1 %v4824_v5  ;;  %v3795_v57 = vunpack.c.l.bf16 %v3927_v7  ;;  %v3796_v58 = vunpack.c.h.bf16 %v3927_v7 }
  0x41   : > { %v1354_v26 = vshrl.u32 %v4559_v6, 16  ;;  %v1356_v27 = vshll.u32 %v4559_v6, 16  ;;  %v666_v28 = vrot.slane %v664_v11, 7  ;;  %v407_v14 = vmax.f32 %v375_v1, 0.0  ;;  %4365 = vmatprep.subr.bf16.mxu1 %v4558_v60  ;;  %v4583_v48 = vld [vmem:[%s6087_s3 + $0xa0] sm:$0xff]  }
  0x42   : > { %v1361_v30 = vshll.u32 %v4560_v12, 16  ;;  %v674_v0 = vrot.slane %v672_v21, 7  ;;  %v408_v18 = vmax.f32 %v376_v23, 0.0  ;;  %v539_v31 = vsel %vm4783_vm4, 0, %v538_v3  ;;  %4417 = vmatprep.subr.bf16.mxu0 %v4583_v48  ;;  %v4570_v21 = vld [vmem:[%s6087_s3 + $0x158] sm:$0xff]  }
  0x43   : > { %v1358_v32 = vrot.slane %v1356_v27, 1  ;;  %v669_v33 = vor.u32 %v667_v17, %v666_v28  ;;  %v670_v34 = vrot.slane %v666_v28, 4  ;;  %v970_v35 = vld [vmem:[#allocation2 + $0x2c] sm:$0x1]  ;;  %540 = vst [vmem:[#allocation2 + $0xbc] sm:$0x1] %v539_v31  ;;  %v3745_v5 = vpack.c.bf16 %v407_v14, %v407_v14  ;;  %4418 = vmatpush3.bf16.msra.mxu0 %v4583_v48 }
  0x44   : > { %v1363_v38 = vrot.slane %v1361_v30, 1  ;;  %v677_v40 = vor.u32 %v675_v22, %v674_v0  ;;  %v679_v41 = vrot.slane %v674_v0, 4  ;;  %v3746_v42 = vpack.c.bf16 %v408_v18, %v408_v18  ;;  %4366 = vmatpush3.bf16.msra.mxu1 %v4558_v60  ;;  %v4976_v27 = vld [vmem:[%s4746_s16 + $0x20] sm:$0xff]   ;;  %v4979_v28 = vld [vmem:[%s4746_s16 + $0x28] sm:$0xff]   ;;  %v4571_v31 = vld [vmem:[%s6087_s3 + $0x150] sm:$0xff]  }
  0x45   : > { %v1359_v43 = vor.u32 %v1358_v32, %v1354_v26  ;;  %v967_v44 = vsel %vm4841_vm8, %v669_v33, %v966_v29  ;;  %v868_v45 = vshrl.u32 %v3745_v5, 16  ;;  %v871_v46 = vshll.u32 %v3745_v5, 16  ;;  %4367 = vmatprep.subr.bf16.mxu1 %v4563_v15 }
  0x46   : > { %v678_v49 = vsel %vm4834_vm7, %v670_v34, %v677_v40  ;;  %968 = vst [vmem:[#allocation2 + $0x24] sm:$0xf] %v967_v44  ;;  %v971_v50 = vsel %vm4773_vm3, %v679_v41, %v970_v35  ;;  %v876_v51 = vshrl.u32 %v3746_v42, 16  ;;  %v879_v52 = vshll.u32 %v3746_v42, 16  ;;  %v1050_v53 = vld [vmem:[#allocation2 + $0xb4] sm:$0xf] }
  0x47   : > { %v4960_v54 = vsel %vm1328_vm9, %v1359_v43, %v1363_v38  ;;  %v4561_v55 = vld [vmem:[#allocation2 + $0xa8] sm:$0xff]   ;;  %969 = vst [vmem:[#allocation2 + $0x28] sm:$0xf] %v678_v49  ;;  %972 = vst [vmem:[#allocation2 + $0x2c] sm:$0x1] %v971_v50  ;;  %v870_v56 = vrot.slane %v868_v45, 7  ;;  %v3843_v1 = vunpack.c.l.bf16 %v3939_v47  ;;  %v314_v22 = vmul.f32 %v3795_v57, %v4758_v13 }
  0x48   : > { %1795 = vmatprep.mubr.bf16.mxu0 %v4960_v54  ;;  %v4562_v59 = vld [vmem:[#allocation2 + $0xb0] ss:$0 sps:$4 sm:$0x11]   ;;  %v878_v60 = vrot.slane %v876_v51, 7  ;;  %v450_v61 = vsel %vm4773_vm3, 0, %v449_v36  ;;  %v506_v63 = vsel %vm4783_vm4, 0, %v505_v37  ;;  %4368 = vmatpush3.bf16.msra.mxu1 %v4563_v15  ;;  %v315_v15 = vmul.f32 %v3796_v58, %v4758_v13 }
  0x49   : > { %v1498_v2 = vshrl.u32 %v4561_v55, 16  ;;  %v1500_v3 = vshll.u32 %v4561_v55, 16  ;;  %1796 = vmatmul.mubr.bf16.gmra.mxu0 %v4886_v62  ;;  %v873_v6 = vor.u32 %v871_v46, %v870_v56  ;;  %v874_v8 = vrot.slane %v870_v56, 4  ;;  %451 = vst [vmem:[#allocation2 + $0x30] sm:$0x1] %v450_v61  ;;  %4369 = vmatprep.subr.bf16.mxu1 %v4564_v39 }
  0x4a   : > { %507 = vst [vmem:[#allocation2 + $0x38] sm:$0x1] %v506_v63  ;;  %v1505_v10 = vshll.u32 %v4562_v59, 16  ;;  %v881_v11 = vor.u32 %v879_v52, %v878_v60  ;;  %v883_v12 = vrot.slane %v878_v60, 4  ;;  %v1054_v17 = vld [vmem:[#allocation2 + $0xbc] sm:$0x1]  ;;  %v3844_v26 = vunpack.c.h.bf16 %v3939_v47 }
  0x4b   : > { %v1502_v23 = vrot.slane %v1500_v3, 1  ;;  %v1051_v62 = vsel %vm4841_vm8, %v873_v6, %v1050_v53  ;;  %v353_v0 = vadd.f32 %v4769_v19, %v314_v22  ;;  %v354_v7 = vadd.f32 %v4769_v19, %v315_v15  ;;  %v485_v43 = vld [vmem:[#allocation2 + $0xc0] sm:$0x1]  ;;  %v541_v47 = vld [vmem:[#allocation2 + $0xc8] sm:$0x1] }
  0x4c   : > { %v1507_v29 = vrot.slane %v1505_v10, 1  ;;  %v882_v14 = vsel %vm4834_vm7, %v874_v8, %v881_v11  ;;  %1052 = vst [vmem:[#allocation2 + $0xb4] sm:$0xf] %v1051_v62  ;;  %v1055_v30 = vsel %vm4773_vm3, %v883_v12, %v1054_v17  ;;  %4370 = vmatpush3.bf16.msra.mxu1 %v4564_v39  ;;  %v338_v32 = vmul.f32 %v3843_v1, %v4758_v13  ;;  %v4576_v53 = vld [vmem:[%s6087_s3 + $0x148] sm:$0xff]   ;;  %v452_v55 = vld [vmem:[#allocation2 + $0x3c] sm:$0x1] }
  0x4d   : > { %v1503_v18 = vor.u32 %v1502_v23, %v1498_v2  ;;  %1053 = vst [vmem:[#allocation2 + $0xb8] sm:$0xf] %v882_v14  ;;  %1056 = vst [vmem:[#allocation2 + $0xbc] sm:$0x1] %v1055_v30  ;;  %v339_v33 = vmul.f32 %v3844_v26, %v4758_v13  ;;  %4371 = vmatprep.subr.bf16.mxu1 %v4570_v21  ;;  %v385_v35 = vmax.f32 %v353_v0, 0.0  ;;  %v3799_v5 = vunpack.c.l.bf16 %v4976_v27  ;;  %v5013_v22 = vld [vmem:[%s6087_s3 + $0x140] sm:$0xff]  }
  0x4e   : > { %v4566_v34 = vld [vmem:[#allocation2 + $0x24] sm:$0xff]   ;;  %v3800_v36 = vunpack.c.h.bf16 %v4976_v27  ;;  %v3803_v37 = vunpack.c.l.bf16 %v4979_v28  ;;  %v4567_v39 = vld [vmem:[#allocation2 + $0x2c] ss:$0 sps:$4 sm:$0x11]   ;;  %v386_v40 = vmax.f32 %v354_v7, 0.0  ;;  %v377_v41 = vadd.f32 %v4769_v19, %v338_v32 }
  0x4f   : > { %v4996_v38 = vsel %vm1328_vm9, %v1503_v18, %v1507_v29  ;;  %v378_v42 = vadd.f32 %v4769_v19, %v339_v33  ;;  %v1366_v44 = vshrl.u32 %v4566_v34, 16  ;;  %v1368_v45 = vshll.u32 %v4566_v34, 16  ;;  %v508_v30 = vld [vmem:[#allocation2 + $0x44] sm:$0x1] }
  0x50   : > { %1891 = vmatprep.mubr.bf16.mxu1 %v4996_v38  ;;  %v3723_v46 = vpack.c.bf16 %v385_v35, %v385_v35  ;;  %v316_v48 = vmul.f32 %v3799_v5, %v4758_v13  ;;  %v1373_v49 = vshll.u32 %v4567_v39, 16  ;;  %v3724_v50 = vpack.c.bf16 %v386_v40, %v386_v40  ;;  %4372 = vmatpush3.bf16.msra.mxu1 %v4570_v21  ;;  %v973_v1 = vld [vmem:[#allocation2 + $0x30] sm:$0xf] }
  0x51   : > { %1892 = vmatmul.mubr.bf16.gmra.mxu1 %v4902_v24  ;;  %v409_v51 = vmax.f32 %v377_v41, 0.0  ;;  %v410_v52 = vmax.f32 %v378_v42, 0.0  ;;  %v1370_v56 = vrot.slane %v1368_v45, 1  ;;  %v486_v59 = vsel %vm4773_vm3, 0, %v485_v43  ;;  %4373 = vmatprep.subr.bf16.mxu1 %v4571_v31  ;;  %v977_v10 = vld [vmem:[#allocation2 + $0x38] sm:$0x1] }
  0x52   : > { %v681_v57 = vshrl.u32 %v3723_v46, 16  ;;  %v684_v58 = vshll.u32 %v3723_v46, 16  ;;  %v1375_v60 = vrot.slane %v1373_v49, 1  ;;  %v689_v61 = vshrl.u32 %v3724_v50, 16  ;;  %487 = vst [vmem:[#allocation2 + $0xc0] sm:$0x1] %v486_v59 }
  0x53   : > { %v692_v63 = vshll.u32 %v3724_v50, 16  ;;  %v542_v2 = vsel %vm4783_vm4, 0, %v541_v47  ;;  %v1371_v3 = vor.u32 %v1370_v56, %v1366_v44  ;;  %v3747_v11 = vpack.c.bf16 %v409_v51, %v409_v51  ;;  %v5036_v44 = vld [vmem:[%s6086_s2] ss:$0 sm:$0xff]  ;;  %v455_v46 = vld [vmem:[#allocation2 + $0x48] sm:$0x1] }
  0x54   : > { %v4568_v6 = vld [vmem:[#allocation2 + $0xb4] sm:$0xff]   ;;  %v683_v8 = vrot.slane %v681_v57, 7  ;;  %543 = vst [vmem:[#allocation2 + $0xc8] sm:$0x1] %v542_v2  ;;  %v3748_v12 = vpack.c.bf16 %v410_v52, %v410_v52  ;;  %v691_v21 = vrot.slane %v689_v61, 7  ;;  %v317_v23 = vmul.f32 %v3800_v36, %v4758_v13  ;;  %4374 = vmatpush3.bf16.msra.mxu1 %v4571_v31 }
  0x55   : > { %v4569_v17 = vld [vmem:[#allocation2 + $0xbc] ss:$0 sps:$4 sm:$0x11]   ;;  %v355_v62 = vadd.f32 %v4769_v19, %v316_v48  ;;  %v453_v15 = vsel %vm4773_vm3, 0, %v452_v55  ;;  %v5020_v26 = vsel %vm1328_vm9, %v1371_v3, %v1375_v60  ;;  %v1510_v27 = vshrl.u32 %v4568_v6, 16  ;;  %4375 = vmatprep.subr.bf16.mxu1 %v4576_v53 }
  0x56   : > { %v1512_v29 = vshll.u32 %v4568_v6, 16  ;;  %v686_v14 = vor.u32 %v684_v58, %v683_v8  ;;  %454 = vst [vmem:[#allocation2 + $0x3c] sm:$0x1] %v453_v15  ;;  %1803 = vmatprep.mubr.bf16.mxu0 %v5020_v26  ;;  %v1517_v0 = vshll.u32 %v4569_v17, 16  ;;  %v687_v18 = vrot.slane %v683_v8, 4  ;;  %v4592_v19 = vld [vmem:[%s6087_s3 + $0x98] sm:$0xff]  }
  0x57   : > { %v694_v7 = vor.u32 %v692_v63, %v691_v21  ;;  %v696_v13 = vrot.slane %v691_v21, 4  ;;  %1804 = vmatmul.mubr.bf16.gmra.mxu0 %v4960_v54  ;;  %v885_v33 = vshrl.u32 %v3747_v11, 16  ;;  %v888_v34 = vshll.u32 %v3747_v11, 16  ;;  %4419 = vmatprep.subr.bf16.mxu0 %v4592_v19  ;;  %v4581_v51 = vld [vmem:[%s6087_s3 + $0x78] sm:$0xff]   ;;  %v5053_v61 = vld [vmem:[%s6085_s1] ss:$0 sm:$0xff] }
  0x58   : > { %v1514_v32 = vrot.slane %v1512_v29, 1  ;;  %v974_v31 = vsel %vm4841_vm8, %v686_v14, %v973_v1  ;;  %v1519_v35 = vrot.slane %v1517_v0, 1  ;;  %v893_v39 = vshrl.u32 %v3748_v12, 16  ;;  %4376 = vmatpush3.bf16.msra.mxu1 %v4576_v53  ;;  %4420 = vmatpush3.bf16.msra.mxu0 %v4592_v19  ;;  %v3930_v8 = vld [vmem:[%s4746_s16 + $0x30] sm:$0xff]  }
  0x59   : > { %v695_v5 = vsel %vm4834_vm7, %v687_v18, %v694_v7  ;;  %975 = vst [vmem:[#allocation2 + $0x30] sm:$0xf] %v974_v31  ;;  %v978_v36 = vsel %vm4773_vm3, %v696_v13, %v977_v10  ;;  %v887_v41 = vrot.slane %v885_v33, 7  ;;  %v896_v42 = vshll.u32 %v3748_v12, 16  ;;  %v1057_v43 = vld [vmem:[#allocation2 + $0xc0] sm:$0xf]  ;;  %4377 = vmatprep.subr.bf16.mxu1 %v5013_v22 }
  0x5a   : > { %v1515_v40 = vor.u32 %v1514_v32, %v1510_v27  ;;  %976 = vst [vmem:[#allocation2 + $0x34] sm:$0xf] %v695_v5  ;;  %979 = vst [vmem:[#allocation2 + $0x38] sm:$0x1] %v978_v36  ;;  %v356_v45 = vadd.f32 %v5036_v44, %v317_v23  ;;  %v895_v47 = vrot.slane %v893_v39, 7  ;;  %v387_v49 = vmax.f32 %v355_v62, 0.0 }
  0x5b   : > { %v1061_v48 = vld [vmem:[#allocation2 + $0xc8] sm:$0x1]  ;;  %v509_v50 = vsel %vm4783_vm4, 0, %v508_v30  ;;  %v3804_v52 = vunpack.c.h.bf16 %v4979_v28  ;;  %v890_v55 = vor.u32 %v888_v34, %v887_v41  ;;  %v891_v56 = vrot.slane %v887_v41, 4  ;;  %v5066_v10 = vld [vmem:[%s4746_s16 + $0x38] sm:$0xff]   ;;  %v4599_v36 = vld [vmem:[%s6087_s3 + $0x90] sm:$0xff]  }
  0x5c   : > { %v5047_v53 = vsel %vm1328_vm9, %v1515_v40, %v1519_v35  ;;  %v388_v57 = vmax.f32 %v356_v45, 0.0  ;;  %510 = vst [vmem:[#allocation2 + $0x44] sm:$0x1] %v509_v50  ;;  %v898_v58 = vor.u32 %v896_v42, %v895_v47  ;;  %v900_v59 = vrot.slane %v895_v47, 4  ;;  %4378 = vmatpush3.bf16.msra.mxu1 %v5013_v22  ;;  %v511_v17 = vld [vmem:[#allocation2 + $0x50] sm:$0x1]  ;;  %4421 = vmatprep.subr.bf16.mxu0 %v4599_v36 }
  0x5d   : > { %1899 = vmatprep.mubr.bf16.mxu1 %v5047_v53  ;;  %v3725_v60 = vpack.c.bf16 %v387_v49, %v387_v49  ;;  %v318_v63 = vmul.f32 %v5053_v61, %v3803_v37  ;;  %v1058_v1 = vsel %vm4841_vm8, %v890_v55, %v1057_v43  ;;  %v319_v3 = vmul.f32 %v5053_v61, %v3804_v52  ;;  %v980_v62 = vld [vmem:[#allocation2 + $0x3c] sm:$0xf]  ;;  %v458_v52 = vld [vmem:[#allocation2 + $0x54] sm:$0x1] }
  0x5e   : > { %1900 = vmatmul.mubr.bf16.gmra.mxu1 %v4996_v38  ;;  %v3726_v2 = vpack.c.bf16 %v388_v57, %v388_v57  ;;  %v456_v6 = vsel %vm4773_vm3, 0, %v455_v46  ;;  %v899_v11 = vsel %vm4834_vm7, %v891_v56, %v898_v58  ;;  %1059 = vst [vmem:[#allocation2 + $0xc0] sm:$0xf] %v1058_v1  ;;  %v1062_v28 = vsel %vm4773_vm3, %v900_v59, %v1061_v48 }
  0x5f   : > { %v698_v37 = vshrl.u32 %v3725_v60, 16  ;;  %v701_v12 = vshll.u32 %v3725_v60, 16  ;;  %457 = vst [vmem:[#allocation2 + $0x48] sm:$0x1] %v456_v6  ;;  %1060 = vst [vmem:[#allocation2 + $0xc4] sm:$0xf] %v899_v11  ;;  %4091 = vmatprep.subr.bf16.mxu1 %v4581_v51  ;;  %v357_v15 = vadd.f32 %v5036_v44, %v318_v63  ;;  %v358_v27 = vadd.f32 %v5036_v44, %v319_v3 }
  0x60   : > { %1063 = vst [vmem:[#allocation2 + $0xc8] sm:$0x1] %v1062_v28  ;;  %v706_v21 = vshrl.u32 %v3726_v2, 16  ;;  %v709_v23 = vshll.u32 %v3726_v2, 16  ;;  %v3807_v30 = vunpack.c.l.bf16 %v3930_v8  ;;  %v3808_v0 = vunpack.c.h.bf16 %v3930_v8  ;;  %4422 = vmatpush3.bf16.msra.mxu0 %v4599_v36  ;;  %v514_v6 = vld [vmem:[#allocation2 + $0x5c] sm:$0x1] }
  0x61   : > { %v5075_v29 = vld [vmem:[#allocation2 + $0x30] sm:$0xff]   ;;  %v700_v14 = vrot.slane %v698_v37, 7  ;;  %v3811_v22 = vunpack.c.l.bf16 %v5066_v10  ;;  %v4573_v18 = vld [vmem:[#allocation2 + $0x38] ss:$0 sps:$4 sm:$0x11]   ;;  %v389_v13 = vmax.f32 %v357_v15, 0.0  ;;  %v3812_v32 = vunpack.c.h.bf16 %v5066_v10 }
  0x62   : > { %v708_v7 = vrot.slane %v706_v21, 7  ;;  %v390_v19 = vmax.f32 %v358_v27, 0.0  ;;  %v1378_v31 = vshrl.u32 %v5075_v29, 16  ;;  %v1380_v33 = vshll.u32 %v5075_v29, 16  ;;  %v517_v36 = vld [vmem:[#allocation2 + $0x68] sm:$0x1] }
  0x63   : > { %v703_v34 = vor.u32 %v701_v12, %v700_v14  ;;  %v704_v35 = vrot.slane %v700_v14, 4  ;;  %v984_v5 = vld [vmem:[#allocation2 + $0x44] sm:$0x1]  ;;  %v1385_v39 = vshll.u32 %v4573_v18, 16  ;;  %v512_v42 = vsel %vm4783_vm4, 0, %v511_v17 }
  0x64   : > { %v711_v40 = vor.u32 %v709_v23, %v708_v7  ;;  %v713_v41 = vrot.slane %v708_v7, 4  ;;  %v1382_v43 = vrot.slane %v1380_v33, 1  ;;  %513 = vst [vmem:[#allocation2 + $0x50] sm:$0x1] %v512_v42  ;;  %v3727_v46 = vpack.c.bf16 %v389_v13, %v389_v13 }
  0x65   : > { %v981_v45 = vsel %vm4841_vm8, %v703_v34, %v980_v62  ;;  %v3728_v47 = vpack.c.bf16 %v390_v19, %v390_v19  ;;  %v1387_v48 = vrot.slane %v1385_v39, 1  ;;  %v320_v51 = vmul.f32 %v5053_v61, %v3807_v30  ;;  %v4608_v19 = vld [vmem:[%s6087_s3 + $0x88] sm:$0xff]  }
  0x66   : > { %v712_v49 = vsel %vm4834_vm7, %v704_v35, %v711_v40  ;;  %982 = vst [vmem:[#allocation2 + $0x3c] sm:$0xf] %v981_v45  ;;  %v985_v50 = vsel %vm4773_vm3, %v713_v41, %v984_v5  ;;  %v1383_v55 = vor.u32 %v1382_v43, %v1378_v31  ;;  %v4574_v56 = vld [vmem:[#allocation2 + $0xc0] sm:$0xff]   ;;  %v715_v57 = vshrl.u32 %v3727_v46, 16  ;;  %v987_v21 = vld [vmem:[#allocation2 + $0x48] sm:$0xf]  ;;  %4423 = vmatprep.subr.bf16.mxu0 %v4608_v19 }
  0x67   : > { %983 = vst [vmem:[#allocation2 + $0x40] sm:$0xf] %v712_v49  ;;  %986 = vst [vmem:[#allocation2 + $0x44] sm:$0x1] %v985_v50  ;;  %v321_v58 = vmul.f32 %v5053_v61, %v3808_v0  ;;  %v322_v59 = vmul.f32 %v5053_v61, %v3811_v22  ;;  %v718_v63 = vshll.u32 %v3727_v46, 16  ;;  %v723_v1 = vshrl.u32 %v3728_v47, 16  ;;  %4424 = vmatpush3.bf16.msra.mxu0 %v4608_v19 }
  0x68   : > { %v4575_v60 = vld [vmem:[#allocation2 + $0xc8] ss:$0 sps:$4 sm:$0x11]   ;;  %v726_v2 = vshll.u32 %v3728_v47, 16  ;;  %v359_v3 = vadd.f32 %v5036_v44, %v320_v51  ;;  %v5097_v8 = vsel %vm1328_vm9, %v1383_v55, %v1387_v48  ;;  %v1522_v11 = vshrl.u32 %v4574_v56, 16 }
  0x69   : > { %v1524_v28 = vshll.u32 %v4574_v56, 16  ;;  %v717_v37 = vrot.slane %v715_v57, 7  ;;  %1811 = vmatprep.mubr.bf16.mxu0 %v5097_v8  ;;  %v1529_v12 = vshll.u32 %v4575_v60, 16  ;;  %v725_v17 = vrot.slane %v723_v1, 7  ;;  %v461_v5 = vld [vmem:[#allocation2 + $0x60] sm:$0x1] }
  0x6a   : > { %v360_v23 = vadd.f32 %v5036_v44, %v321_v58  ;;  %v391_v62 = vmax.f32 %v359_v3, 0.0  ;;  %1812 = vmatmul.mubr.bf16.gmra.mxu0 %v5020_v26  ;;  %v459_v30 = vsel %vm4773_vm3, 0, %v458_v52  ;;  %v515_v34 = vsel %vm4783_vm4, 0, %v514_v6  ;;  %v3932_v52 = vld [vmem:[%s4746_s16 + $0x40] sm:$0xff]  }
  0x6b   : > { %v1526_v15 = vrot.slane %v1524_v28, 1  ;;  %v720_v27 = vor.u32 %v718_v63, %v717_v37  ;;  %v721_v14 = vrot.slane %v717_v37, 4  ;;  %v1531_v0 = vrot.slane %v1529_v12, 1  ;;  %v991_v7 = vld [vmem:[#allocation2 + $0x50] sm:$0x1] }
  0x6c   : > { %v728_v22 = vor.u32 %v726_v2, %v725_v17  ;;  %v730_v18 = vrot.slane %v725_v17, 4  ;;  %v392_v13 = vmax.f32 %v360_v23, 0.0  ;;  %460 = vst [vmem:[#allocation2 + $0x54] sm:$0x1] %v459_v30  ;;  %v3729_v35 = vpack.c.bf16 %v391_v62, %v391_v62  ;;  %516 = vst [vmem:[#allocation2 + $0x5c] sm:$0x1] %v515_v34 }
  0x6d   : > { %v1527_v31 = vor.u32 %v1526_v15, %v1522_v11  ;;  %v988_v33 = vsel %vm4841_vm8, %v720_v27, %v987_v21  ;;  %v323_v43 = vmul.f32 %v5053_v61, %v3812_v32  ;;  %v361_v49 = vadd.f32 %v5036_v44, %v322_v59  ;;  %v4611_v59 = vld [vmem:[%s6087_s3 + $0x80] sm:$0xff]   ;;  %v464_v62 = vld [vmem:[#allocation2 + $0x6c] sm:$0x1]  ;;  %v4586_v15 = vld [vmem:[%s6087_s3 + $0x70] sm:$0xff]  }
  0x6e   : > { %v5111_v39 = vld [vmem:[#allocation2 + $0x3c] sm:$0xff]   ;;  %v729_v40 = vsel %vm4834_vm7, %v721_v14, %v728_v22  ;;  %989 = vst [vmem:[#allocation2 + $0x48] sm:$0xf] %v988_v33  ;;  %v992_v41 = vsel %vm4773_vm3, %v730_v18, %v991_v7  ;;  %v3730_v42 = vpack.c.bf16 %v392_v13, %v392_v13  ;;  %v4580_v46 = vld [vmem:[#allocation2 + $0x44] ss:$0 sps:$4 sm:$0x11]   ;;  %4425 = vmatprep.subr.bf16.mxu0 %v4611_v59  ;;  %v3816_v22 = vunpack.c.h.bf16 %v3932_v52 }
  0x6f   : > { %v5121_v45 = vsel %vm1328_vm9, %v1527_v31, %v1531_v0  ;;  %990 = vst [vmem:[#allocation2 + $0x4c] sm:$0xf] %v729_v40  ;;  %993 = vst [vmem:[#allocation2 + $0x50] sm:$0x1] %v992_v41  ;;  %v732_v47 = vshrl.u32 %v3729_v35, 16  ;;  %v735_v48 = vshll.u32 %v3729_v35, 16  ;;  %v362_v57 = vadd.f32 %v5036_v44, %v323_v43  ;;  %4426 = vmatpush3.bf16.msra.mxu0 %v4611_v59 }
  0x70   : > { %1907 = vmatprep.mubr.bf16.mxu1 %v5121_v45  ;;  %v1390_v50 = vshrl.u32 %v5111_v39, 16  ;;  %v1392_v10 = vshll.u32 %v5111_v39, 16  ;;  %v740_v51 = vshrl.u32 %v3730_v42, 16  ;;  %v743_v32 = vshll.u32 %v3730_v42, 16  ;;  %v520_v40 = vld [vmem:[#allocation2 + $0x74] sm:$0x1] }
  0x71   : > { %1908 = vmatmul.mubr.bf16.gmra.mxu1 %v5047_v53  ;;  %v1397_v55 = vshll.u32 %v4580_v46, 16  ;;  %v734_v56 = vrot.slane %v732_v47, 7  ;;  %v393_v58 = vmax.f32 %v361_v49, 0.0  ;;  %v462_v1 = vsel %vm4773_vm3, 0, %v461_v5  ;;  %v4587_v43 = vld [vmem:[%s6087_s3 + $0x30] sm:$0xff]  }
  0x72   : > { %v1394_v60 = vrot.slane %v1392_v10, 1  ;;  %4379 = vmatprep.mubr.bf16.mxu1 %v4960_v54  ;;  %v742_v63 = vrot.slane %v740_v51, 7  ;;  %v518_v2 = vsel %vm4783_vm4, 0, %v517_v36  ;;  %v394_v37 = vmax.f32 %v362_v57, 0.0  ;;  %463 = vst [vmem:[#allocation2 + $0x60] sm:$0x1] %v462_v1 }
  0x73   : > { %v1399_v3 = vrot.slane %v1397_v55, 1  ;;  %v737_v6 = vor.u32 %v735_v48, %v734_v56  ;;  %v738_v11 = vrot.slane %v734_v56, 4  ;;  %v994_v28 = vld [vmem:[#allocation2 + $0x54] sm:$0xf]  ;;  %519 = vst [vmem:[#allocation2 + $0x68] sm:$0x1] %v518_v2  ;;  %v3731_v23 = vpack.c.bf16 %v393_v58, %v393_v58 }
  0x74   : > { %v1395_v12 = vor.u32 %v1394_v60, %v1390_v50  ;;  %v4582_v54 = vld [vmem:[%s6087_s3 + $0x38] sm:$0xff]   ;;  %v745_v17 = vor.u32 %v743_v32, %v742_v63  ;;  %v747_v21 = vrot.slane %v742_v63, 4  ;;  %v3732_v30 = vpack.c.bf16 %v394_v37, %v394_v37  ;;  %v5167_v48 = vld [vmem:[%s4746_s16 + $0x48] sm:$0xff]   ;;  %v523_v60 = vld [vmem:[#allocation2 + $0x80] sm:$0x1] }
  0x75   : > { %v995_v27 = vsel %vm4841_vm8, %v737_v6, %v994_v28  ;;  %v998_v14 = vld [vmem:[#allocation2 + $0x5c] sm:$0x1]  ;;  %v3815_v0 = vunpack.c.l.bf16 %v3932_v52  ;;  %v749_v31 = vshrl.u32 %v3731_v23, 16  ;;  %v752_v34 = vshll.u32 %v3731_v23, 16  ;;  %v467_v32 = vld [vmem:[#allocation2 + $0x78] sm:$0x1] }
  0x76   : > { %v5147_v18 = vsel %vm1328_vm9, %v1395_v12, %v1399_v3  ;;  %v5149_v7 = vld [vmem:[#allocation2 + $0x48] sm:$0xff]   ;;  %v746_v13 = vsel %vm4834_vm7, %v738_v11, %v745_v17  ;;  %996 = vst [vmem:[#allocation2 + $0x54] sm:$0xf] %v995_v27  ;;  %v999_v19 = vsel %vm4773_vm3, %v747_v21, %v998_v14  ;;  %v5156_v33 = vld [vmem:[#allocation2 + $0x50] ss:$0 sps:$4 sm:$0x11]   ;;  %v325_v47 = vmul.f32 %v5053_v61, %v3816_v22 }
  0x77   : > { %1819 = vmatprep.mubr.bf16.mxu0 %v5147_v18  ;;  %997 = vst [vmem:[#allocation2 + $0x58] sm:$0xf] %v746_v13  ;;  %1000 = vst [vmem:[#allocation2 + $0x5c] sm:$0x1] %v999_v19  ;;  %v757_v35 = vshrl.u32 %v3732_v30, 16  ;;  %v760_v5 = vshll.u32 %v3732_v30, 16  ;;  %v324_v36 = vmul.f32 %v5053_v61, %v3815_v0  ;;  %v3820_v0 = vunpack.c.h.bf16 %v5167_v48 }
  0x78   : > { %1820 = vmatmul.mubr.bf16.gmra.mxu0 %v5097_v8  ;;  %v1402_v41 = vshrl.u32 %v5149_v7, 16  ;;  %v1404_v42 = vshll.u32 %v5149_v7, 16  ;;  %v751_v46 = vrot.slane %v749_v31, 7  ;;  %v1409_v49 = vshll.u32 %v5156_v33, 16  ;;  %v4617_v52 = vld [vmem:[%s6087_s3 + $0x1f8] sm:$0xff]   ;;  %v4590_v1 = vld [vmem:[%s6087_s3 + $0x68] sm:$0xff]  }
  0x79   : > { %4380 = vmatmul.mubr.bf16.vlgmr.msra.gmra.mxu1 %v5020_v26  ;;  %v759_v50 = vrot.slane %v757_v35, 7  ;;  %v363_v10 = vadd.f32 %v5036_v44, %v324_v36  ;;  %v465_v51 = vsel %vm4773_vm3, 0, %v464_v62  ;;  %v1001_v26 = vld [vmem:[#allocation2 + $0x60] sm:$0xf]  ;;  %v364_v59 = vadd.f32 %v5036_v44, %v325_v47  ;;  %4227 = vmatprep.subr.bf16.mxu0 %v4617_v52  ;;  %v4591_v11 = vld [vmem:[%s6087_s3 + $0x28] sm:$0xff]  }
  0x7a   : > { %4092 = vmatpush3.bf16.msra.mxu1 %v4582_v54  ;;  %v1406_v55 = vrot.slane %v1404_v42, 1  ;;  %4383 = vmatprep.mubr.bf16.mxu1 %v5097_v8  ;;  %v754_v56 = vor.u32 %v752_v34, %v751_v46  ;;  %v755_v57 = vrot.slane %v751_v46, 4  ;;  %v1005_v58 = vld [vmem:[#allocation2 + $0x68] sm:$0x1]  ;;  %466 = vst [vmem:[#allocation2 + $0x6c] sm:$0x1] %v465_v51  ;;  %v3819_v62 = vunpack.c.l.bf16 %v5167_v48 }
  0x7b   : > { %v1411_v63 = vrot.slane %v1409_v49, 1  ;;  %4093 = vmatprep.subr.bf16.mxu1 %v4586_v15  ;;  %v762_v2 = vor.u32 %v760_v5, %v759_v50  ;;  %v764_v3 = vrot.slane %v759_v50, 4  ;;  %v395_v6 = vmax.f32 %v363_v10, 0.0  ;;  %v4595_v21 = vld [vmem:[%s6087_s3 + $0x60] sm:$0xff]   ;;  %v3934_v15 = vld [vmem:[%s4746_s16 + $0x50] sm:$0xff]   ;;  %s5933_s16 = scalar_lea.vmem %s6088_s4, %s3715_s9  ;;  %s3538_s9 = sshll.u32 %s6159_s19, 3 }
  0x7c   : > { %v1407_v8 = vor.u32 %v1406_v55, %v1402_v41  ;;  %v1002_v28 = vsel %vm4841_vm8, %v754_v56, %v1001_v26  ;;  %v396_v37 = vmax.f32 %v364_v59, 0.0  ;;  %v521_v12 = vsel %vm4783_vm4, 0, %v520_v40  ;;  %v4598_v10 = vld [vmem:[%s6087_s3 + $0x20] sm:$0xff]   ;;  %s235_s28 = scalar_lea.vmem %s6089_s5, %s3538_s9 }
  0x7d   : > { %v763_v54 = vsel %vm4834_vm7, %v755_v57, %v762_v2  ;;  %1003 = vst [vmem:[#allocation2 + $0x60] sm:$0xf] %v1002_v28  ;;  %v1006_v17 = vsel %vm4773_vm3, %v764_v3, %v1005_v58  ;;  %522 = vst [vmem:[#allocation2 + $0x74] sm:$0x1] %v521_v12  ;;  %v3733_v23 = vpack.c.bf16 %v395_v6, %v395_v6  ;;  %v468_v22 = vsel %vm4773_vm3, 0, %v467_v32 }
  0x7e   : > { %v5199_v27 = vsel %vm1328_vm9, %v1407_v8, %v1411_v63  ;;  %4094 = vmatpush3.bf16.msra.mxu1 %v4587_v43  ;;  %v5201_v14 = vld [vmem:[#allocation2 + $0x54] sm:$0xff]   ;;  %1004 = vst [vmem:[#allocation2 + $0x64] sm:$0xf] %v763_v54  ;;  %1007 = vst [vmem:[#allocation2 + $0x68] sm:$0x1] %v1006_v17  ;;  %v3734_v30 = vpack.c.bf16 %v396_v37, %v396_v37  ;;  %v326_v34 = vmul.f32 %v5053_v61, %v3819_v62  ;;  %vm3276_vm13 = vcmask 1044480  }
  0x7f   : > { %1827 = vmatprep.mubr.bf16.mxu0 %v5199_v27  ;;  %v5207_v13 = vld [vmem:[#allocation2 + $0x5c] ss:$0 sps:$4 sm:$0x11]   ;;  %4095 = vmatprep.subr.bf16.mxu1 %v4590_v1  ;;  %v766_v19 = vshrl.u32 %v3733_v23, 16  ;;  %v769_v31 = vshll.u32 %v3733_v23, 16  ;;  %v524_v35 = vsel %vm4783_vm4, 0, %v523_v60  ;;  %v327_v46 = vmul.f32 %v5053_v61, %v3820_v0 }
  0x80   : > { %469 = vst [vmem:[#allocation2 + $0x78] sm:$0x1] %v468_v22  ;;  %1828 = vmatmul.mubr.bf16.gmra.mxu0 %v5147_v18  ;;  %v1414_v5 = vshrl.u32 %v5201_v14, 16  ;;  %v1416_v36 = vshll.u32 %v5201_v14, 16  ;;  %v774_v40 = vshrl.u32 %v3734_v30, 16  ;;  %v777_v41 = vshll.u32 %v3734_v30, 16 }
  0x81   : > { %525 = vst [vmem:[#allocation2 + $0x80] sm:$0x1] %v524_v35  ;;  %4384 = vmatmul.mubr.bf16.gmra.mxu1 %v5147_v18  ;;  %v1421_v42 = vshll.u32 %v5207_v13, 16  ;;  %v768_v43 = vrot.slane %v766_v19, 7  ;;  %v365_v47 = vadd.f32 %v5036_v44, %v326_v34  ;;  %v1008_v50 = vld [vmem:[#allocation2 + $0x6c] sm:$0xf]  ;;  %v3823_v51 = vunpack.c.l.bf16 %v3934_v15 }
  0x82   : > { %v1418_v48 = vrot.slane %v1416_v36, 1  ;;  %4387 = vmatprep.mubr.bf16.mxu1 %v5199_v27  ;;  %4096 = vmatpush3.bf16.msra.mxu1 %v4591_v11  ;;  %v776_v49 = vrot.slane %v774_v40, 7  ;;  %v4602_v18 = vld [vmem:[%s6087_s3 + $0x58] sm:$0xff]   ;;  %v3824_v32 = vunpack.c.h.bf16 %v3934_v15  ;;  %v366_v57 = vadd.f32 %v5036_v44, %v327_v46  ;;  %v470_v28 = vld [vmem:[#allocation2 + $0x84] sm:$0x1] }
  0x83   : > { %v1423_v52 = vrot.slane %v1421_v42, 1  ;;  %4097 = vmatprep.subr.bf16.mxu1 %v4595_v21  ;;  %v771_v55 = vor.u32 %v769_v31, %v768_v43  ;;  %v772_v56 = vrot.slane %v768_v43, 4  ;;  %v397_v63 = vmax.f32 %v365_v47, 0.0  ;;  %v4605_v1 = vld [vmem:[%s6087_s3 + $0x18] sm:$0xff]   ;;  %v526_v23 = vld [vmem:[#allocation2 + $0x8c] sm:$0x1] }
  0x84   : > { %v1419_v26 = vor.u32 %v1418_v48, %v1414_v5  ;;  %v779_v58 = vor.u32 %v777_v41, %v776_v49  ;;  %v781_v59 = vrot.slane %v776_v49, 4  ;;  %v1012_v60 = vld [vmem:[#allocation2 + $0x74] sm:$0x1]  ;;  %v398_v6 = vmax.f32 %v366_v57, 0.0  ;;  %v488_v22 = vld [vmem:[#allocation2 + $0xcc] sm:$0x1] }
  0x85   : > { %v5230_v2 = vld [vmem:[#allocation2 + $0x60] sm:$0xff]   ;;  %v1009_v3 = vsel %vm4841_vm8, %v771_v55, %v1008_v50  ;;  %v328_v8 = vmul.f32 %v5053_v61, %v3823_v51  ;;  %v329_v11 = vmul.f32 %v5053_v61, %v3824_v32  ;;  %v5239_v12 = vld [vmem:[#allocation2 + $0x68] ss:$0 sps:$4 sm:$0x11]   ;;  %v3735_v21 = vpack.c.bf16 %v397_v63, %v397_v63  ;;  %v4606_v61 = vld [vmem:[%s6087_s3 + $0x50] sm:$0xff]  }
  0x86   : > { %v5237_v37 = vsel %vm1328_vm9, %v1419_v26, %v1423_v52  ;;  %v780_v54 = vsel %vm4834_vm7, %v772_v56, %v779_v58  ;;  %1010 = vst [vmem:[#allocation2 + $0x6c] sm:$0xf] %v1009_v3  ;;  %v1013_v17 = vsel %vm4773_vm3, %v781_v59, %v1012_v60  ;;  %4098 = vmatpush3.bf16.msra.mxu1 %v4598_v10  ;;  %v1426_v62 = vshrl.u32 %v5230_v2, 16  ;;  %v4607_v43 = vld [vmem:[%s6087_s3 + $0x10] sm:$0xff]   ;;  %v4610_v63 = vld [vmem:[%s6087_s3 + $0x8] sm:$0xff]  }
  0x87   : > { %1835 = vmatprep.mubr.bf16.mxu0 %v5237_v37  ;;  %v1428_v15 = vshll.u32 %v5230_v2, 16  ;;  %1011 = vst [vmem:[#allocation2 + $0x70] sm:$0xf] %v780_v54  ;;  %1014 = vst [vmem:[#allocation2 + $0x74] sm:$0x1] %v1013_v17  ;;  %v3736_v30 = vpack.c.bf16 %v398_v6, %v398_v6  ;;  %4099 = vmatprep.subr.bf16.mxu1 %v4602_v18  ;;  %v367_v0 = vadd.f32 %v5036_v44, %v328_v8  ;;  %vm3278_vm14 = vcmask 1045504  }
  0x88   : > { %1836 = vmatmul.mubr.bf16.gmra.mxu0 %v5199_v27  ;;  %v1433_v19 = vshll.u32 %v5239_v12, 16  ;;  %v783_v31 = vshrl.u32 %v3735_v21, 16  ;;  %v786_v34 = vshll.u32 %v3735_v21, 16  ;;  %v368_v35 = vadd.f32 %v5036_v44, %v329_v11  ;;  %v1015_v41 = vld [vmem:[#allocation2 + $0x78] sm:$0xf]  ;;  %v4609_v44 = vld [vmem:[%s6087_s3 + $0x48] sm:$0xff]  }
  0x89   : > { %4388 = vmatmul.mubr.bf16.gmra.mxu1 %v5237_v37  ;;  %v1430_v5 = vrot.slane %v1428_v15, 1  ;;  %v791_v36 = vshrl.u32 %v3736_v30, 16  ;;  %v794_v40 = vshll.u32 %v3736_v30, 16  ;;  %v399_v42 = vmax.f32 %v367_v0, 0.0  ;;  %v1019_v27 = vld [vmem:[#allocation2 + $0x80] sm:$0x1] }
  0x8a   : > { %v1435_v46 = vrot.slane %v1433_v19, 1  ;;  %v785_v47 = vrot.slane %v783_v31, 7  ;;  %v400_v48 = vmax.f32 %v368_v35, 0.0  ;;  %v471_v49 = vsel %vm4773_vm3, 0, %v470_v28  ;;  %4100 = vmatpush3.bf16.msra.mxu1 %v4605_v1  ;;  %v544_v32 = vld [vmem:[#allocation2 + $0xd4] sm:$0x1] }
  0x8b   : > { %v1431_v50 = vor.u32 %v1430_v5, %v1426_v62  ;;  %v793_v10 = vrot.slane %v791_v36, 7  ;;  %472 = vst [vmem:[#allocation2 + $0x84] sm:$0x1] %v471_v49  ;;  %v527_v18 = vsel %vm4783_vm4, 0, %v526_v23  ;;  %v3737_v51 = vpack.c.bf16 %v399_v42, %v399_v42  ;;  %4101 = vmatprep.subr.bf16.mxu1 %v4606_v61  ;;  %v4612_v21 = vld [vmem:[%s6087_s3 + $0x40] sm:$0xff]   ;;  %v5299_v42 = vld [vmem:[%s6087_s3 + $0x238] sm:$0xff]  }
  0x8c   : > { %v788_v52 = vor.u32 %v786_v34, %v785_v47  ;;  %v789_v55 = vrot.slane %v785_v47, 4  ;;  %528 = vst [vmem:[#allocation2 + $0x8c] sm:$0x1] %v527_v18  ;;  %v3738_v56 = vpack.c.bf16 %v400_v48, %v400_v48  ;;  %v489_v57 = vsel %vm4773_vm3, 0, %v488_v22 }
  0x8d   : > { %v1436_v26 = vsel %vm1328_vm9, %v1431_v50, %v1435_v46  ;;  %v796_v58 = vor.u32 %v794_v40, %v793_v10  ;;  %v798_v59 = vrot.slane %v793_v10, 4  ;;  %v800_v60 = vshrl.u32 %v3737_v51, 16  ;;  %490 = vst [vmem:[#allocation2 + $0xcc] sm:$0x1] %v489_v57 }
  0x8e   : > { %1843 = vmatprep.mubr.bf16.mxu0 %v1436_v26  ;;  %4391 = vmatprep.mubr.bf16.mxu1 %v1436_v26  ;;  %v5272_v1 = vld [vmem:[#allocation2 + $0x6c] sm:$0xff]   ;;  %v1016_v3 = vsel %vm4841_vm8, %v788_v52, %v1015_v41  ;;  %v803_v6 = vshll.u32 %v3737_v51, 16  ;;  %v5276_v8 = vld [vmem:[#allocation2 + $0x74] ss:$0 sps:$4 sm:$0x11]   ;;  %v808_v17 = vshrl.u32 %v3738_v56, 16 }
  0x8f   : > { %v797_v11 = vsel %vm4834_vm7, %v789_v55, %v796_v58  ;;  %1017 = vst [vmem:[#allocation2 + $0x78] sm:$0xf] %v1016_v3  ;;  %v1020_v28 = vsel %vm4773_vm3, %v798_v59, %v1019_v27  ;;  %v802_v54 = vrot.slane %v800_v60, 7  ;;  %4102 = vmatpush3.bf16.msra.mxu1 %v4607_v43  ;;  %v1438_v23 = vshrl.u32 %v5272_v1, 16  ;;  %v5332_v3 = vld [vmem:[#allocation2 + $0x18] sm:$0xff]  }
  0x90   : > { %1844 = vmatmul.mubr.bf16.gmra.mxu0 %v5237_v37  ;;  %v1440_v61 = vshll.u32 %v5272_v1, 16  ;;  %1018 = vst [vmem:[#allocation2 + $0x7c] sm:$0xf] %v797_v11  ;;  %1021 = vst [vmem:[#allocation2 + $0x80] sm:$0x1] %v1020_v28  ;;  %v811_v62 = vshll.u32 %v3738_v56, 16  ;;  %4103 = vmatprep.subr.bf16.mxu1 %v4609_v44 }
  0x91   : > { %v545_v15 = vsel %vm4783_vm4, 0, %v544_v32  ;;  %v1445_v30 = vshll.u32 %v5276_v8, 16  ;;  %v805_v0 = vor.u32 %v803_v6, %v802_v54  ;;  %v806_v22 = vrot.slane %v802_v54, 4  ;;  %v4615_v37 = vld [vmem:[%s6087_s3] sm:$0xff]   ;;  %v4619_v54 = vld [vmem:[%s6087_s3 + $0x1f0] sm:$0xff]  }
  0x92   : > { %v810_v19 = vrot.slane %v808_v17, 7  ;;  %546 = vst [vmem:[#allocation2 + $0xd4] sm:$0x1] %v545_v15  ;;  %v1442_v31 = vrot.slane %v1440_v61, 1  ;;  %v1022_v34 = vld [vmem:[#allocation2 + $0x84] sm:$0xf] }
  0x93   : > { %v1447_v35 = vrot.slane %v1445_v30, 1  ;;  %v1023_v40 = vsel %vm4841_vm8, %v805_v0, %v1022_v34  ;;  %v1026_v25 = vld [vmem:[#allocation2 + $0x8c] sm:$0x1]  ;;  %4104 = vmatpush3.bf16.msra.mxu1 %v4610_v63  ;;  %v5345_v17 = vld [vmem:[#allocation2 + $0x24] sm:$0xff]   ;;  %v4621_v15 = vld [vmem:[%s6087_s3 + $0x230] sm:$0xff]  }
  0x94   : > { %v813_v5 = vor.u32 %v811_v62, %v810_v19  ;;  %v815_v36 = vrot.slane %v810_v19, 4  ;;  %v1443_v41 = vor.u32 %v1442_v31, %v1438_v23  ;;  %1024 = vst [vmem:[#allocation2 + $0x84] sm:$0xf] %v1023_v40  ;;  %4105 = vmatprep.subr.bf16.mxu1 %v4612_v21  ;;  %v5325_v59 = vld [vmem:[#allocation2 + $0xcc] sm:$0xff]   ;;  %v4625_v62 = vld [vmem:[%s6087_s3 + $0x1a0] sm:$0xff]   ;;  %v4627_v30 = vld [vmem:[%s6087_s3 + $0x1d8] sm:$0xff]  }
  0x95   : > { %v1536_v63 = vshll.u32 %v5325_v59, 16  ;;  %v1534_v6 = vshrl.u32 %v5325_v59, 16  ;;  %v4623_v23 = vld [vmem:[%s6087_s3 + $0x1a8] sm:$0xff]   ;;  %v5376_v0 = vld [vmem:[#allocation2] sm:$0xff]   ;;  %v4629_v19 = vld [vmem:[%s6087_s3 + $0x1d0] sm:$0xff]  }
  0x96   : > { %v814_v43 = vsel %vm4834_vm7, %v806_v22, %v813_v5  ;;  %v1027_v46 = vsel %vm4773_vm3, %v815_v36, %v1026_v25  ;;  %v1448_v47 = vsel %vm1328_vm9, %v1443_v41, %v1447_v35  ;;  %v5359_v61 = vld [vmem:[#allocation2 + $0xc] sm:$0xff]   ;;  %v4628_v22 = vld [vmem:[%s6087_s3 + $0x198] sm:$0xff]   ;;  %v4634_v36 = vld [vmem:[%s6087_s3 + $0x1c0] sm:$0xff]  }
  0x97   : > { %1025 = vst [vmem:[#allocation2 + $0x88] sm:$0xf] %v814_v43  ;;  %1028 = vst [vmem:[#allocation2 + $0x8c] sm:$0x1] %v1027_v46  ;;  %4392 = vmatmul.mubr.bf16.gmra.mxu1 %v1448_v47  ;;  %1851 = vmatprep.mubr.bf16.mxu0 %v1448_v47  ;;  %v5306_v16 = vld [vmem:[#allocation2 + $0x78] sm:$0xff]   ;;  %v1538_v11 = vrot.slane %v1536_v63, 1 }
  0x98   : > { %v5308_v27 = vld [vmem:[#allocation2 + $0x80] ss:$0 sps:$4 sm:$0x11]   ;;  %1852 = vmatmul.mubr.bf16.gmra.mxu0 %v1436_v26  ;;  %4106 = vmatpush3.bf16.msra.mxu1 %v4615_v37  ;;  %v1450_v48 = vshrl.u32 %v5306_v16, 16  ;;  %v1452_v9 = vshll.u32 %v5306_v16, 16  ;;  %v4626_v31 = vld [vmem:[%s6087_s3 + $0x228] sm:$0xff]  }
  0x99   : > { %4459 = vmatprep.subr.bf16.mxu1 %v5299_v42  ;;  %v1457_v20 = vshll.u32 %v5308_v27, 16  ;;  %v5329_v60 = vld [vmem:[#allocation2 + $0xd4] ss:$0 sps:$4 sm:$0x11]   ;;  %v4631_v37 = vld [vmem:[%s6087_s3 + $0x220] sm:$0xff]   ;;  %v4632_v35 = vld [vmem:[%s6087_s3 + $0x1c8] sm:$0xff]  }
  0x9a   : > { %v1454_v49 = vrot.slane %v1452_v9, 1  ;;  %v4630_v34 = vld [vmem:[%s6087_s3 + $0x190] sm:$0xff]   ;;  %v4633_v5 = vld [vmem:[%s6087_s3 + $0x188] sm:$0xff]   ;;  %v4636_v40 = vld [vmem:[%s6087_s3 + $0x218] sm:$0xff]  }
  0x9b   : > { %v1459_v44 = vrot.slane %v1457_v20, 1  ;;  %v4635_v25 = vld [vmem:[%s6087_s3 + $0x180] sm:$0xff]   ;;  %v4637_v41 = vld [vmem:[%s6087_s3 + $0x210] sm:$0xff]   ;;  %v4638_v43 = vld [vmem:[%s6087_s3 + $0x208] sm:$0xff]  }
  0x9c   : > { %v1455_v50 = vor.u32 %v1454_v49, %v1450_v48  ;;  %v5428_v46 = vld [vmem:[#allocation2 + $0x90] sm:$0xff]   ;;  %v5436_v48 = vld [vmem:[#allocation2 + $0x9c] sm:$0xff]   ;;  %v5439_v9 = vld [vmem:[#allocation2 + $0xa8] sm:$0xff]  }
  0x9d   : > { %v5444_v20 = vld [vmem:[#allocation2 + $0xb4] sm:$0xff]   ;;  %v5447_v49 = vld [vmem:[#allocation2 + $0xc0] sm:$0xff]  }
  0x9e   : > { %v5314_v10 = vld [vmem:[#allocation2 + $0x84] sm:$0xff]   ;;  %v5316_v18 = vld [vmem:[#allocation2 + $0x8c] ss:$0 sps:$4 sm:$0x11]   ;;  %v1460_v51 = vsel %vm1328_vm9, %v1455_v50, %v1459_v44  ;;  %v2547_v44 = vrot.slane %v5359_v61, 1 }
  0x9f   : > { %v1462_v32 = vshrl.u32 %v5314_v10, 16  ;;  %v1464_v52 = vshll.u32 %v5314_v10, 16  ;;  %4395 = vmatprep.mubr.bf16.mxu1 %v1460_v51  ;;  %v1469_v55 = vshll.u32 %v5316_v18, 16  ;;  %1859 = vmatprep.mubr.bf16.mxu0 %v1460_v51  ;;  %v4652_v50 = vld [vmem:[#allocation2 + $0x14] ss:$0 sps:$4 sm:$0x11]  }
  0xa0   : > { %1860 = vmatmul.mubr.bf16.gmra.mxu0 %v1448_v47  ;;  %v4639_v47 = vld [vmem:[%s6087_s3 + $0x200] sm:$0xff]  }
  0xa1   : > { %v1466_v56 = vrot.slane %v1464_v52, 1  ;;  %v1471_v57 = vrot.slane %v1469_v55, 1  ;;  %v2544_v52 = vrot.slane %v5376_v0, 1  ;;  %v4653_v55 = vld [vmem:[#allocation2 + $0x8] ss:$0 sps:$4 sm:$0x11]  }
  0xa3   : > { %v1467_v26 = vor.u32 %v1466_v56, %v1462_v32  ;;  %v2545_v56 = vrot.slane %v4653_v55, 1 }
  0xa5   : > { %v1472_v58 = vsel %vm1328_vm9, %v1467_v26, %v1471_v57  ;;  %v2550_v57 = vrot.slane %v5332_v3, 1  ;;  %v4654_v26 = vld [vmem:[#allocation2 + $0x20] ss:$0 sps:$4 sm:$0x11]  }
  0xa6   : > { %4396 = vmatmul.mubr.bf16.gmra.mxu1 %v1472_v58  ;;  %1867 = vmatprep.mubr.bf16.mxu0 %v1472_v58 }
  0xa7   : > { %4399 = vmatprep.mubr.bf16.mxu1 %v4931_v4 }
  0xa8   : > { %1868 = vmatmul.mubr.bf16.gmra.mxu0 %v1460_v51  ;;  %v2548_v51 = vrot.slane %v4652_v50, 1 }
  0xa9   : > { %1875 = vmatprep.mubr.bf16.mxu0 %v4931_v4  ;;  %v1541_v4 = vshll.u32 %v5329_v60, 16 }
  0xaa   : > { %v2549_v32 = vsel %vm2543_vm10, %v2547_v44, %v2548_v51  ;;  %v2563_v44 = vrot.slane %v5156_v33, 1  ;;  %v2565_v33 = vrot.slane %v5201_v14, 1 }
  0xab   : > { %v1543_v28 = vrot.slane %v1541_v4, 1 }
  0xae   : > { %4400 = vmatmul.mubr.bf16.gmra.mxu1 %v4902_v24  ;;  %v4618_v24 = vld [vmem:[%s6087_s3 + $0x1b8] sm:$0xff]  }
  0xaf   : > { %4403 = vmatprep.mubr.bf16.mxu1 %v4996_v38  ;;  %v1539_v38 = vor.u32 %v1538_v11, %v1534_v6 }
  0xb0   : > { %1876 = vmatmul.mubr.bf16.gmra.mxu0 %v1472_v58  ;;  %v2551_v58 = vrot.slane %v4654_v26, 1  ;;  %v2566_v26 = vrot.slane %v5207_v13, 1 }
  0xb1   : > { %4427 = vmatprep.mubr.bf16.mxu0 %v5332_v3  ;;  %v1544_v21 = vsel %vm1328_vm9, %v1539_v38, %v1543_v28  ;;  %v4655_v38 = vld [vmem:[#allocation2 + $0x2c] ss:$0 sps:$4 sm:$0x11]  }
  0xb2   : > { %v5461_v6 = vsel %vm2543_vm10, %v2550_v57, %v2551_v58  ;;  %v2554_v28 = vrot.slane %v4655_v38, 1 }
  0xb6   : > { %4404 = vmatmul.mubr.bf16.gmra.mxu1 %v5047_v53  ;;  %v4620_v53 = vld [vmem:[%s6087_s3 + $0x1b0] sm:$0xff]  }
  0xb7   : > { %4407 = vmatprep.mubr.bf16.mxu1 %v5121_v45  ;;  %v4622_v45 = vld [vmem:[%s6087_s3 + $0x1e8] sm:$0xff]  }
  0xb8   : > { %4428 = vmatmul.mubr.bf16.vlgmr.msra.gmra.mxu0 %v5345_v17 }
  0xb9   : > { %4228 = vmatpush3.bf16.msra.mxu0 %v4618_v24  ;;  %4431 = vmatprep.mubr.bf16.mxu0 %v5075_v29  ;;  %v4624_v29 = vld [vmem:[%s6087_s3 + $0x1e0] sm:$0xff]  }
  0xba   : > { %4229 = vmatprep.subr.bf16.mxu0 %v4619_v54 }
  0xbd   : > { %4230 = vmatpush3.bf16.msra.mxu0 %v4620_v53 }
  0xbe   : > { %4408 = vmatmul.mubr.bf16.gmra.mxu1 %v1544_v21  ;;  %4231 = vmatprep.subr.bf16.mxu0 %v4622_v45 }
  0xbf   : > { %2253 = vmatprep.mubr.bf16.mxu1 %v5359_v61 }
  0xc0   : > { %4432 = vmatmul.mubr.bf16.gmra.mxu0 %v5111_v39 }
  0xc1   : > { %4435 = vmatprep.mubr.bf16.mxu0 %v5149_v7  ;;  %4232 = vmatpush3.bf16.msra.mxu0 %v4623_v23 }
  0xc2   : > { %4233 = vmatprep.subr.bf16.mxu0 %v4624_v29 }
  0xc5   : > { %4234 = vmatpush3.bf16.msra.mxu0 %v4625_v62 }
  0xc6   : > { %2254 = vmatmul.mubr.bf16.vlgmr.msra.gmra.mxu1 %v5376_v0  ;;  %4235 = vmatprep.subr.bf16.mxu0 %v4627_v30 }
  0xc7   : > { %4460 = vmatpush3.bf16.msra.mxu1 %v5299_v42  ;;  %2261 = vmatprep.mubr.bf16.mxu1 %v5332_v3  ;;  %v5421_v42 = vld [vmem:[#allocation2 + $0x30] sm:$0xff]  }
  0xc8   : > { %4461 = vmatprep.subr.bf16.mxu1 %v4621_v15  ;;  %4436 = vmatmul.mubr.bf16.gmra.mxu0 %v5201_v14 }
  0xc9   : > { %4439 = vmatprep.mubr.bf16.mxu0 %v5230_v2  ;;  %4236 = vmatpush3.bf16.msra.mxu0 %v4628_v22 }
  0xca   : > { %4237 = vmatprep.subr.bf16.mxu0 %v4629_v19 }
  0xcb   : > { %4462 = vmatpush3.bf16.msra.mxu1 %v4621_v15 }
  0xcc   : > { %4463 = vmatprep.subr.bf16.mxu1 %v4626_v31 }
  0xcd   : > { %4238 = vmatpush3.bf16.msra.mxu0 %v4630_v34 }
  0xce   : > { %2262 = vmatmul.mubr.bf16.gmra.mxu1 %v5359_v61  ;;  %4239 = vmatprep.subr.bf16.mxu0 %v4632_v35  ;;  %v2556_v61 = vrot.slane %v5421_v42, 1 }
  0xcf   : > { %2269 = vmatprep.mubr.bf16.mxu1 %v5345_v17  ;;  %4464 = vmatpush3.bf16.msra.mxu1 %v4626_v31  ;;  %v4657_v31 = vld [vmem:[#allocation2 + $0x3c] sm:$0xff]  }
  0xd0   : > { %4465 = vmatprep.subr.bf16.mxu1 %v4631_v37  ;;  %4440 = vmatmul.mubr.bf16.gmra.mxu0 %v5272_v1  ;;  %v2559_v34 = vrot.slane %v4657_v31, 1 }
  0xd1   : > { %4443 = vmatprep.mubr.bf16.mxu0 %v5306_v16  ;;  %4240 = vmatpush3.bf16.msra.mxu0 %v4633_v5 }
  0xd2   : > { %4241 = vmatprep.subr.bf16.mxu0 %v4634_v36 }
  0xd3   : > { %4466 = vmatpush3.bf16.msra.mxu1 %v4631_v37  ;;  %v4658_v37 = vld [vmem:[#allocation2 + $0x44] ss:$0 sps:$4 sm:$0x11]  }
  0xd4   : > { %4467 = vmatprep.subr.bf16.mxu1 %v4636_v40  ;;  %v2560_v35 = vrot.slane %v4658_v37, 1 }
  0xd5   : > { %4242 = vmatpush3.bf16.msra.mxu0 %v4635_v25 }
  0xd6   : > { %2270 = vmatmul.mubr.bf16.gmra.mxu1 %v5332_v3  ;;  %v2553_v3 = vrot.slane %v5345_v17, 1  ;;  %v5492_v25 = vsel %vm2543_vm10, %v2559_v34, %v2560_v35  ;;  %v2575_v35 = vrot.slane %v5308_v27, 1 }
  0xd7   : > { %2277 = vmatprep.mubr.bf16.mxu1 %v5421_v42  ;;  %4468 = vmatpush3.bf16.msra.mxu1 %v4636_v40 }
  0xd8   : > { %4469 = vmatprep.subr.bf16.mxu1 %v4637_v41  ;;  %4444 = vmatmul.mubr.bf16.gmra.mxu0 %v5314_v10  ;;  %v5472_v21 = vsel %vm2543_vm10, %v2553_v3, %v2554_v28  ;;  %v2568_v28 = vrot.slane %v5230_v2, 1 }
  0xd9   : > { %4447 = vmatprep.mubr.bf16.mxu0 %v5428_v46 }
  0xdb   : > { %4470 = vmatpush3.bf16.msra.mxu1 %v4637_v41 }
  0xdc   : > { %4471 = vmatprep.subr.bf16.mxu1 %v4638_v43 }
  0xde   : > { %2278 = vmatmul.mubr.bf16.gmra.mxu1 %v5345_v17  ;;  %v4656_v17 = vld [vmem:[#allocation2 + $0x38] ss:$0 sps:$4 sm:$0x11]  }
  0xdf   : > { %2285 = vmatprep.mubr.bf16.mxu1 %v5111_v39  ;;  %4472 = vmatpush3.bf16.msra.mxu1 %v4638_v43  ;;  %v2557_v29 = vrot.slane %v4656_v17, 1 }
  0xe0   : > { %4473 = vmatprep.subr.bf16.mxu1 %v4639_v47  ;;  %4448 = vmatmul.mubr.bf16.gmra.mxu0 %v5436_v48 }
  0xe1   : > { %4451 = vmatprep.mubr.bf16.mxu0 %v5439_v9  ;;  %v5481_v0 = vsel %vm2543_vm10, %v2556_v61, %v2557_v29  ;;  %v2571_v29 = vrot.slane %v5272_v1, 1 }
  0xe3   : > { %4474 = vmatpush3.bf16.msra.mxu1 %v4639_v47  ;;  %v2562_v47 = vrot.slane %v5149_v7, 1 }
  0xe6   : > { %2286 = vmatmul.mubr.bf16.gmra.mxu1 %v5421_v42 }
  0xe7   : > { %2293 = vmatprep.mubr.bf16.mxu1 %v5149_v7 }
  0xe8   : > { %4452 = vmatmul.mubr.bf16.gmra.mxu0 %v5444_v20 }
  0xe9   : > { %4455 = vmatprep.mubr.bf16.mxu0 %v5447_v49 }
  0xee   : > { %2294 = vmatmul.mubr.bf16.gmra.mxu1 %v5111_v39  ;;  %v2546_v39 = vsel %vm2543_vm10, %v2544_v52, %v2545_v56  ;;  %v5505_v52 = vsel %vm2543_vm10, %v2562_v47, %v2563_v44 }
  0xef   : > { %2301 = vmatprep.mubr.bf16.mxu1 %v5201_v14 }
  0xf0   : > { %4456 = vmatmul.mubr.bf16.gmra.mxu0 %v5325_v59 }
  0xf1   : > { %2840 = vmatprep.mubr.bf16.mxu0 %v2549_v32 }
  0xf4   : > { %v3971_v63 = vpop.f32.mrf.mxu0 }
  0xf6   : > { %2302 = vmatmul.mubr.bf16.gmra.mxu1 %v5149_v7  ;;  %v3972_v11 = vpop.f32.mrf.mxu0 }
  0xf7   : > { %2309 = vmatprep.mubr.bf16.mxu1 %v5230_v2  ;;  %v5463_v4 = vadd.f32 %v3972_v11, %v3971_v63 }
  0xf8   : > { %2841 = vmatmul.mubr.bf16.vlgmr.msra.gmra.mxu0 %v2546_v39  ;;  %v3974_v24 = vpop.f32.mrf.mxu0 }
  0xf9   : > { %2848 = vmatprep.mubr.bf16.mxu0 %v5461_v6 }
  0xfa   : > { %v3975_v54 = vpop.f32.mrf.mxu0 }
  0xfb   : > { %v5467_v53 = vadd.f32 %v3975_v54, %v3974_v24  ;;  %v5518_v24 = vsel %vm2543_vm10, %v2565_v33, %v2566_v26  ;;  %v2569_v54 = vrot.slane %v5239_v12, 1 }
  0xfd   : > { %v5533_v61 = vsel %vm2543_vm10, %v2568_v28, %v2569_v54 }
  0xfe   : > { %2310 = vmatmul.mubr.bf16.gmra.mxu1 %v5201_v14 }
  0xff   : > { %2317 = vmatprep.mubr.bf16.mxu1 %v5272_v1  ;;  %v4043_v45 = vpop.f32.mrf.mxu1 }
 0x100   : > { %2849 = vmatmul.mubr.bf16.gmra.mxu0 %v2549_v32 }
 0x101   : > { %2856 = vmatprep.mubr.bf16.mxu0 %v5472_v21  ;;  %v4044_v23 = vpop.f32.mrf.mxu1 }
 0x102   : > { %v5476_v62 = vadd.f32 %v4044_v23, %v4043_v45 }
 0x103   : > { %v4046_v15 = vpop.f32.mrf.mxu1 }
 0x105   : > { %v4047_v30 = vpop.f32.mrf.mxu1 }
 0x106   : > { %2318 = vmatmul.mubr.bf16.gmra.mxu1 %v5230_v2  ;;  %v5483_v22 = vadd.f32 %v4047_v30, %v4046_v15  ;;  %v2572_v2 = vrot.slane %v5276_v8, 1  ;;  %v2574_v8 = vrot.slane %v5306_v16, 1 }
 0x107   : > { %2325 = vmatprep.mubr.bf16.mxu1 %v5306_v16 }
 0x108   : > { %2857 = vmatmul.mubr.bf16.gmra.mxu0 %v5461_v6 }
 0x109   : > { %v3977_v19 = vpop.f32.mrf.mxu0  ;;  %2864 = vmatprep.mubr.bf16.mxu0 %v5481_v0 }
 0x10b   : > { %v3978_v5 = vpop.f32.mrf.mxu0 }
 0x10c   : > { %v5487_v36 = vadd.f32 %v3978_v5, %v3977_v19  ;;  %v5542_v19 = vsel %vm2543_vm10, %v2571_v29, %v2572_v2 }
 0x10d   : > { %v3980_v40 = vpop.f32.mrf.mxu0 }
 0x10e   : > { %2326 = vmatmul.mubr.bf16.gmra.mxu1 %v5272_v1 }
 0x10f   : > { %2333 = vmatprep.mubr.bf16.mxu1 %v5314_v10  ;;  %v3981_v41 = vpop.f32.mrf.mxu0 }
 0x110   : > { %v5494_v42 = vadd.f32 %v3981_v41, %v3980_v40  ;;  %2865 = vmatmul.mubr.bf16.gmra.mxu0 %v5472_v21 }
 0x111   : > { %v4049_v43 = vpop.f32.mrf.mxu1  ;;  %2872 = vmatprep.mubr.bf16.mxu0 %v5492_v25 }
 0x113   : > { %v4050_v50 = vpop.f32.mrf.mxu1 }
 0x114   : > { %v5500_v51 = vadd.f32 %v4050_v50, %v4049_v43  ;;  %v5553_v43 = vsel %vm2543_vm10, %v2574_v8, %v2575_v35 }
 0x115   : > { %v4052_v32 = vpop.f32.mrf.mxu1 }
 0x116   : > { %2334 = vmatmul.mubr.bf16.gmra.mxu1 %v5306_v16 }
 0x117   : > { %2341 = vmatprep.mubr.bf16.mxu1 %v5428_v46  ;;  %v4053_v55 = vpop.f32.mrf.mxu1  ;;  %v3983_v57 = vpop.f32.mrf.mxu0 }
 0x118   : > { %v5507_v56 = vadd.f32 %v4053_v55, %v4052_v32  ;;  %2873 = vmatmul.mubr.bf16.gmra.mxu0 %v5481_v0 }
 0x119   : > { %2880 = vmatprep.mubr.bf16.mxu0 %v5505_v52  ;;  %v3984_v7 = vpop.f32.mrf.mxu0 }
 0x11a   : > { %v5513_v58 = vadd.f32 %v3984_v7, %v3983_v57  ;;  %v2577_v57 = vrot.slane %v5314_v10, 1  ;;  %v2578_v7 = vrot.slane %v5316_v18, 1 }
 0x11b   : > { %v3986_v63 = vpop.f32.mrf.mxu0 }
 0x11d   : > { %v3987_v11 = vpop.f32.mrf.mxu0 }
 0x11e   : > { %2342 = vmatmul.mubr.bf16.gmra.mxu1 %v5314_v10  ;;  %v4055_v39 = vpop.f32.mrf.mxu1  ;;  %v5520_v3 = vadd.f32 %v3987_v11, %v3986_v63 }
 0x11f   : > { %2349 = vmatprep.mubr.bf16.mxu1 %v5436_v48 }
 0x120   : > { %v4056_v38 = vpop.f32.mrf.mxu1  ;;  %2881 = vmatmul.mubr.bf16.gmra.mxu0 %v5492_v25 }
 0x121   : > { %v5523_v14 = vadd.f32 %v4056_v38, %v4055_v39  ;;  %2888 = vmatprep.mubr.bf16.mxu0 %v5518_v24 }
 0x122   : > { %v4058_v13 = vpop.f32.mrf.mxu1 }
 0x124   : > { %v4059_v45 = vpop.f32.mrf.mxu1 }
 0x125   : > { %v5528_v23 = vadd.f32 %v4059_v45, %v4058_v13  ;;  %v5573_v13 = vsel %vm2543_vm10, %v2577_v57, %v2578_v7 }
 0x126   : > { %2350 = vmatmul.mubr.bf16.gmra.mxu1 %v5428_v46 }
 0x127   : > { %2357 = vmatprep.mubr.bf16.mxu1 %v5439_v9 }
 0x128   : > { %2889 = vmatmul.mubr.bf16.gmra.mxu0 %v5505_v52 }
 0x129   : > { %2896 = vmatprep.mubr.bf16.mxu0 %v5533_v61 }
 0x12a   : > { %v3989_v17 = vpop.f32.mrf.mxu0 }
 0x12c   : > { %v3990_v12 = vpop.f32.mrf.mxu0 }
 0x12d   : > { %v3991_v15 = vadd.f32 %v3990_v12, %v3989_v17  ;;  %v4659_v17 = vld [vmem:[#allocation2 + $0x98] ss:$0 sps:$4 sm:$0x11]  }
 0x12e   : > { %2358 = vmatmul.mubr.bf16.gmra.mxu1 %v5436_v48  ;;  %v3992_v30 = vpop.f32.mrf.mxu0  ;;  %v2581_v29 = vrot.slane %v4659_v17, 1 }
 0x12f   : > { %2365 = vmatprep.mubr.bf16.mxu1 %v5444_v20 }
 0x130   : > { %2897 = vmatmul.mubr.bf16.gmra.mxu0 %v5518_v24  ;;  %v3993_v34 = vpop.f32.mrf.mxu0 }
 0x131   : > { %v4061_v31 = vpop.f32.mrf.mxu1  ;;  %v3994_v37 = vadd.f32 %v3993_v34, %v3992_v30  ;;  %2904 = vmatprep.mubr.bf16.mxu0 %v5542_v19 }
 0x133   : > { %v4062_v1 = vpop.f32.mrf.mxu1 }
 0x134   : > { %v5548_v5 = vadd.f32 %v4062_v1, %v4061_v31 }
 0x135   : > { %v4064_v40 = vpop.f32.mrf.mxu1 }
 0x136   : > { %2366 = vmatmul.mubr.bf16.gmra.mxu1 %v5439_v9 }
 0x137   : > { %2373 = vmatprep.mubr.bf16.mxu1 %v5447_v49  ;;  %v4065_v41 = vpop.f32.mrf.mxu1 }
 0x138   : > { %v5555_v47 = vadd.f32 %v4065_v41, %v4064_v40  ;;  %v3995_v44 = vpop.f32.mrf.mxu0  ;;  %2905 = vmatmul.mubr.bf16.gmra.mxu0 %v5533_v61  ;;  %v4660_v41 = vld [vmem:[#allocation2 + $0xa4] ss:$0 sps:$4 sm:$0x11]  }
 0x139   : > { %v4381_v50 = vpop.f32.mrf.mxu1  ;;  %2912 = vmatprep.mubr.bf16.mxu0 %v5553_v43 }
 0x13a   : > { %v5559_v16 = vadd.f32 %v4381_v50, %v5487_v36  ;;  %v3996_v27 = vpop.f32.mrf.mxu0 }
 0x13b   : > { %v3997_v32 = vadd.f32 %v3996_v27, %v3995_v44  ;;  %v1950_v55 = vpop.f32.mrf.mxu1  ;;  %v2584_v44 = vrot.slane %v4660_v41, 1 }
 0x13c   : > { %v5565_v33 = vadd.f32 %v5463_v4, %v1950_v55  ;;  %v3998_v26 = vpop.f32.mrf.mxu0 }
 0x13d   : > { %v4382_v63 = vpop.f32.mrf.mxu1 }
 0x13e   : > { %2374 = vmatmul.mubr.bf16.gmra.mxu1 %v5444_v20  ;;  %v5569_v39 = vadd.f32 %v4382_v63, %v5494_v42  ;;  %v3999_v36 = vpop.f32.mrf.mxu0 }
 0x13f   : > { %4475 = vmatprep.mubr.bf16.mxu1 %v5461_v6  ;;  %v4000_v11 = vadd.f32 %v3999_v36, %v3998_v26  ;;  %v1953_v38 = vpop.f32.mrf.mxu1  ;;  %v2580_v6 = vrot.slane %v5428_v46, 1 }
 0x140   : > { %v5576_v10 = vadd.f32 %v5467_v53, %v1953_v38  ;;  %v4001_v18 = vpop.f32.mrf.mxu0  ;;  %2913 = vmatmul.mubr.bf16.gmra.mxu0 %v5542_v19 }
 0x141   : > { %v4385_v4 = vpop.f32.mrf.mxu1  ;;  %2920 = vmatprep.mubr.bf16.mxu0 %v5573_v13  ;;  %v5591_v1 = vsel %vm2543_vm10, %v2580_v6, %v2581_v29 }
 0x142   : > { %v5579_v28 = vadd.f32 %v4385_v4, %v3991_v15  ;;  %v4002_v54 = vpop.f32.mrf.mxu0 }
 0x143   : > { %v4003_v42 = vadd.f32 %v4002_v54, %v4001_v18  ;;  %v1966_v45 = vpop.f32.mrf.mxu1  ;;  %v4661_v18 = vld [vmem:[#allocation2 + $0xb0] ss:$0 sps:$4 sm:$0x11]  }
 0x144   : > { %v5584_v2 = vadd.f32 %v5513_v58, %v1966_v45  ;;  %v4004_v53 = vpop.f32.mrf.mxu0  ;;  %v2587_v4 = vrot.slane %v4661_v18, 1 }
 0x145   : > { %v4386_v12 = vpop.f32.mrf.mxu1 }
 0x146   : > { %4476 = vmatmul.mubr.bf16.vlgmr.msra.gmra.mxu1 %v5472_v21  ;;  %v5587_v30 = vadd.f32 %v4386_v12, %v3994_v37  ;;  %v4005_v15 = vpop.f32.mrf.mxu0 }
 0x147   : > { %4479 = vmatprep.mubr.bf16.mxu1 %v5481_v0  ;;  %v4006_v31 = vadd.f32 %v4005_v15, %v4004_v53  ;;  %v1969_v34 = vpop.f32.mrf.mxu1  ;;  %v2583_v0 = vrot.slane %v5436_v48, 1 }
 0x148   : > { %v5594_v46 = vadd.f32 %v5520_v3, %v1969_v34  ;;  %v4007_v8 = vpop.f32.mrf.mxu0  ;;  %2921 = vmatmul.mubr.bf16.gmra.mxu0 %v5553_v43 }
 0x149   : > { %v4389_v58 = vpop.f32.mrf.mxu1  ;;  %2928 = vmatprep.mubr.bf16.mxu0 %v5591_v1  ;;  %v5608_v63 = vsel %vm2543_vm10, %v2583_v0, %v2584_v44  ;;  %v2592_v44 = vrot.slane %v5447_v49, 1 }
 0x14a   : > { %v5597_v35 = vadd.f32 %v4389_v58, %v4003_v42  ;;  %v4008_v21 = vpop.f32.mrf.mxu0 }
 0x14b   : > { %v4009_v37 = vadd.f32 %v4008_v21, %v4007_v8  ;;  %v1982_v40 = vpop.f32.mrf.mxu1 }
 0x14c   : > { %v5601_v50 = vadd.f32 %v3997_v32, %v1982_v40  ;;  %v4010_v27 = vpop.f32.mrf.mxu0 }
 0x14d   : > { %v4390_v3 = vpop.f32.mrf.mxu1 }
 0x14e   : > { %4480 = vmatmul.mubr.bf16.gmra.mxu1 %v5492_v25  ;;  %v5604_v55 = vadd.f32 %v4390_v3, %v4006_v31  ;;  %v4011_v57 = vpop.f32.mrf.mxu0  ;;  %v2586_v25 = vrot.slane %v5439_v9, 1  ;;  %v4662_v31 = vld [vmem:[#allocation2 + $0xbc] ss:$0 sps:$4 sm:$0x11]  }
 0x14f   : > { %4483 = vmatprep.mubr.bf16.mxu1 %v5505_v52  ;;  %v4012_v7 = vadd.f32 %v4011_v57, %v4010_v27  ;;  %v1985_v26 = vpop.f32.mrf.mxu1  ;;  %v4663_v27 = vld [vmem:[#allocation2 + $0xc8] ss:$0 sps:$4 sm:$0x11]  }
 0x150   : > { %v5610_v36 = vadd.f32 %v4000_v11, %v1985_v26  ;;  %v4013_v48 = vpop.f32.mrf.mxu0  ;;  %2929 = vmatmul.mubr.bf16.gmra.mxu0 %v5573_v13  ;;  %v2588_v45 = vsel %vm2543_vm10, %v2586_v25, %v2587_v4  ;;  %v2593_v3 = vrot.slane %v4663_v27, 1 }
 0x151   : > { %2936 = vmatprep.mubr.bf16.mxu0 %v5608_v63 }
 0x152   : > { %v4014_v32 = vpop.f32.mrf.mxu0 }
 0x153   : > { %v4015_v38 = vadd.f32 %v4014_v32, %v4013_v48  ;;  %v2594_v48 = vsel %vm2543_vm10, %v2592_v44, %v2593_v3 }
 0x154   : > { %v4016_v54 = vpop.f32.mrf.mxu0 }
 0x156   : > { %4484 = vmatmul.mubr.bf16.gmra.mxu1 %v5518_v24  ;;  %v4017_v52 = vpop.f32.mrf.mxu0  ;;  %v2589_v24 = vrot.slane %v5444_v20, 1 }
 0x157   : > { %4487 = vmatprep.mubr.bf16.mxu1 %v5533_v61  ;;  %v4393_v42 = vpop.f32.mrf.mxu1  ;;  %v4018_v11 = vadd.f32 %v4017_v52, %v4016_v54  ;;  %v2590_v61 = vrot.slane %v4662_v31, 1 }
 0x158   : > { %v5618_v6 = vadd.f32 %v4393_v42, %v4015_v38  ;;  %v4019_v17 = vpop.f32.mrf.mxu0  ;;  %2937 = vmatmul.mubr.bf16.gmra.mxu0 %v5591_v1 }
 0x159   : > { %v1998_v29 = vpop.f32.mrf.mxu1  ;;  %2944 = vmatprep.mubr.bf16.mxu0 %v2588_v45  ;;  %v2591_v0 = vsel %vm2543_vm10, %v2589_v24, %v2590_v61 }
 0x15a   : > { %v5621_v53 = vadd.f32 %v4009_v37, %v1998_v29  ;;  %v4020_v9 = vpop.f32.mrf.mxu0 }
 0x15b   : > { %v4394_v12 = vpop.f32.mrf.mxu1  ;;  %v4021_v15 = vadd.f32 %v4020_v9, %v4019_v17 }
 0x15c   : > { %v5624_v34 = vadd.f32 %v4394_v12, %v4018_v11  ;;  %v4022_v8 = vpop.f32.mrf.mxu0 }
 0x15d   : > { %v2001_v58 = vpop.f32.mrf.mxu1 }
 0x15e   : > { %4488 = vmatmul.mubr.bf16.gmra.mxu1 %v5542_v19  ;;  %v5627_v21 = vadd.f32 %v4012_v7, %v2001_v58  ;;  %v4023_v40 = vpop.f32.mrf.mxu0 }
 0x15f   : > { %4491 = vmatprep.mubr.bf16.mxu1 %v5553_v43  ;;  %v4024_v37 = vadd.f32 %v4023_v40, %v4022_v8 }
 0x160   : > { %v4025_v41 = vpop.f32.mrf.mxu0  ;;  %2945 = vmatmul.mubr.bf16.gmra.mxu0 %v5608_v63 }
 0x161   : > { %2952 = vmatprep.mubr.bf16.mxu0 %v2591_v0 }
 0x162   : > { %v4026_v20 = vpop.f32.mrf.mxu0 }
 0x163   : > { %v4027_v57 = vadd.f32 %v4026_v20, %v4025_v41  ;;  %v2596_v20 = vrot.slane %v5329_v60, 1 }
 0x164   : > { %v4028_v26 = vpop.f32.mrf.mxu0 }
 0x166   : > { %v4397_v19 = vpop.f32.mrf.mxu1  ;;  %4492 = vmatmul.mubr.bf16.gmra.mxu1 %v5573_v13  ;;  %v4029_v7 = vpop.f32.mrf.mxu0 }
 0x167   : > { %4495 = vmatprep.mubr.bf16.mxu1 %v5591_v1  ;;  %v5635_v43 = vadd.f32 %v4397_v19, %v4027_v57  ;;  %v4030_v38 = vadd.f32 %v4029_v7, %v4028_v26 }
 0x168   : > { %v2014_v32 = vpop.f32.mrf.mxu1  ;;  %v4031_v18 = vpop.f32.mrf.mxu0  ;;  %2953 = vmatmul.mubr.bf16.gmra.mxu0 %v2588_v45 }
 0x169   : > { %v5638_v25 = vadd.f32 %v4021_v15, %v2014_v32  ;;  %2960 = vmatprep.mubr.bf16.mxu0 %v2594_v48 }
 0x16a   : > { %v4398_v49 = vpop.f32.mrf.mxu1  ;;  %v4032_v54 = vpop.f32.mrf.mxu0 }
 0x16b   : > { %v5640_v4 = vadd.f32 %v4398_v49, %v4030_v38  ;;  %v4033_v13 = vadd.f32 %v4032_v54, %v4031_v18 }
 0x16c   : > { %v2017_v52 = vpop.f32.mrf.mxu1  ;;  %v4034_v1 = vpop.f32.mrf.mxu0 }
 0x16d   : > { %v5642_v42 = vadd.f32 %v4024_v37, %v2017_v52 }
 0x16e   : > { %v4401_v11 = vpop.f32.mrf.mxu1  ;;  %4496 = vmatmul.mubr.bf16.gmra.mxu1 %v5608_v63  ;;  %v4035_v17 = vpop.f32.mrf.mxu0 }
 0x16f   : > { %4499 = vmatprep.mubr.bf16.mxu1 %v2588_v45  ;;  %v4036_v9 = vadd.f32 %v4035_v17, %v4034_v1  ;;  %v2595_v45 = vrot.slane %v5325_v59, 1 }
 0x170   : > { %v2030_v29 = vpop.f32.mrf.mxu1  ;;  %v4037_v15 = vpop.f32.mrf.mxu0  ;;  %2961 = vmatmul.mubr.bf16.gmra.mxu0 %v2591_v0 }
 0x171   : > { %v5645_v12 = vadd.f32 %v4033_v13, %v2030_v29 }
 0x172   : > { %v4402_v24 = vpop.f32.mrf.mxu1  ;;  %v4038_v31 = vpop.f32.mrf.mxu0 }
 0x173   : > { %v4039_v8 = vadd.f32 %v4038_v31, %v4037_v15 }
 0x174   : > { %v2033_v61 = vpop.f32.mrf.mxu1  ;;  %v4040_v40 = vpop.f32.mrf.mxu0 }
 0x175   : > { %v5647_v58 = vadd.f32 %v4036_v9, %v2033_v61  ;;  %v5649_v41 = vadd.f32 %v4401_v11, %v4039_v8 }
 0x176   : > { %v4405_v37 = vpop.f32.mrf.mxu1  ;;  %4500 = vmatmul.mubr.bf16.gmra.mxu1 %v2591_v0  ;;  %v4041_v44 = vpop.f32.mrf.mxu0 }
 0x177   : > { %v5652_v63 = vadd.f32 %v4405_v37, %v5500_v51  ;;  %4503 = vmatprep.mubr.bf16.mxu1 %v2594_v48  ;;  %v4042_v3 = vadd.f32 %v4041_v44, %v4040_v40  ;;  %v2597_v51 = vsel %vm2543_vm10, %v2595_v45, %v2596_v20 }
 0x178   : > { %v2046_v27 = vpop.f32.mrf.mxu1  ;;  %v4429_v26 = vpop.f32.mrf.mxu0 }
 0x179   : > { %v5657_v57 = vadd.f32 %v5476_v62, %v2046_v27  ;;  %v5659_v7 = vadd.f32 %v4402_v24, %v4042_v3 }
 0x17a   : > { %v4406_v19 = vpop.f32.mrf.mxu1  ;;  %v2416_v48 = vpop.f32.mrf.mxu0 }
 0x17b   : > { %v5662_v0 = vadd.f32 %v4406_v19, %v5507_v56 }
 0x17c   : > { %v2049_v32 = vpop.f32.mrf.mxu1  ;;  %v4430_v60 = vpop.f32.mrf.mxu0 }
 0x17d   : > { %v5666_v59 = vadd.f32 %v5483_v22, %v2049_v32 }
 0x17e   : > { %v4409_v38 = vpop.f32.mrf.mxu1  ;;  %4504 = vmatmul.mubr.bf16.gmra.mxu1 %v2597_v51  ;;  %v2419_v18 = vpop.f32.mrf.mxu0 }
 0x17f   : > { %v5669_v62 = vadd.f32 %v4409_v38, %v5548_v5 }
 0x180   : > { %v2062_v49 = vpop.f32.mrf.mxu1  ;;  %v4433_v56 = vpop.f32.mrf.mxu0 }
 0x181   : > { %v5672_v54 = vadd.f32 %v5523_v14, %v2062_v49 }
 0x182   : > { %v4410_v52 = vpop.f32.mrf.mxu1  ;;  %v2432_v1 = vpop.f32.mrf.mxu0 }
 0x183   : > { %v5675_v13 = vadd.f32 %v4410_v52, %v5555_v47 }
 0x184   : > { %v2065_v11 = vpop.f32.mrf.mxu1  ;;  %v4434_v17 = vpop.f32.mrf.mxu0 }
 0x185   : > { %6098 = vst [vmem:[#allocation3_spill] sm:$0xff] %v5675_v13  ;;  %v5678_v22 = vadd.f32 %v5528_v23, %v2065_v11 }
 0x186   : > { %v4107_v29 = vpop.f32.mrf.mxu1  ;;  %v2435_v9 = vpop.f32.mrf.mxu0 }
 0x188   : > { %v4108_v5 = vpop.f32.mrf.mxu1  ;;  %v5680_v24 = vpop.f32.mrf.mxu0 }
 0x189   : > { %v4109_v15 = vadd.f32 %v4108_v5, %v4107_v29 }
 0x18a   : > { %v4110_v31 = vpop.f32.mrf.mxu1  ;;  %v2448_v61 = vpop.f32.mrf.mxu0 }
 0x18b   : > { %v2256_v14 = vadd.f32 %v4109_v15, %v5565_v33 }
 0x18c   : > { %v4111_v8 = vpop.f32.mrf.mxu1  ;;  %v5685_v37 = vpop.f32.mrf.mxu0 }
 0x18d   : > { %v5683_v40 = vadd.f32 %v2416_v48, %v2256_v14  ;;  %v4112_v47 = vadd.f32 %v4111_v8, %v4110_v31 }
 0x18e   : > { %v4113_v45 = vpop.f32.mrf.mxu1  ;;  %v2451_v20 = vpop.f32.mrf.mxu0 }
 0x18f   : > { %v2259_v23 = vadd.f32 %v4112_v47, %v5576_v10 }
 0x190   : > { %v4114_v44 = vpop.f32.mrf.mxu1  ;;  %v5690_v19 = vpop.f32.mrf.mxu0 }
 0x191   : > { %v5688_v27 = vadd.f32 %v2419_v18, %v2259_v23  ;;  %v4115_v3 = vadd.f32 %v4114_v44, %v4113_v45 }
 0x192   : > { %v4116_v51 = vpop.f32.mrf.mxu1  ;;  %v5693_v32 = vpop.f32.mrf.mxu0 }
 0x193   : > { %v2264_v33 = vadd.f32 %v4115_v3, %v5559_v16 }
 0x194   : > { %v4117_v48 = vpop.f32.mrf.mxu1  ;;  %v5695_v49 = vpop.f32.mrf.mxu0 }
 0x195   : > { %v4118_v38 = vadd.f32 %v4117_v48, %v4116_v51  ;;  %v5697_v52 = vadd.f32 %v4429_v26, %v2264_v33 }
 0x196   : > { %v4119_v11 = vpop.f32.mrf.mxu1  ;;  %v5700_v29 = vpop.f32.mrf.mxu0 }
 0x197   : > { %v2267_v10 = vadd.f32 %v4118_v38, %v5569_v39 }
 0x198   : > { %v4120_v18 = vpop.f32.mrf.mxu1  ;;  %v5702_v15 = vpop.f32.mrf.mxu0 }
 0x199   : > { %v4121_v5 = vadd.f32 %v4120_v18, %v4119_v11  ;;  %v5704_v31 = vadd.f32 %v4430_v60, %v2267_v10 }
 0x19a   : > { %v4122_v16 = vpop.f32.mrf.mxu1  ;;  %v5707_v8 = vpop.f32.mrf.mxu0 }
 0x19b   : > { %v2272_v14 = vadd.f32 %v4121_v5, %v5584_v2 }
 0x19c   : > { %v4123_v47 = vpop.f32.mrf.mxu1  ;;  %v5709_v26 = vpop.f32.mrf.mxu0 }
 0x19d   : > { %v4124_v45 = vadd.f32 %v4123_v47, %v4122_v16  ;;  %v5711_v23 = vadd.f32 %v2432_v1, %v2272_v14 }
 0x19e   : > { %v4125_v39 = vpop.f32.mrf.mxu1  ;;  %v5714_v3 = vpop.f32.mrf.mxu0 }
 0x19f   : > { %v2275_v44 = vadd.f32 %v4124_v45, %v5594_v46 }
 0x1a0   : > { %v4126_v51 = vpop.f32.mrf.mxu1  ;;  %v5716_v60 = vpop.f32.mrf.mxu0 }
 0x1a1   : > { %v4127_v33 = vadd.f32 %v4126_v51, %v4125_v39  ;;  %6099 = vst [vmem:[#allocation4_spill] sm:$0xff] %v5716_v60  ;;  %v5718_v48 = vadd.f32 %v2435_v9, %v2275_v44 }
 0x1a2   : > { %v4128_v2 = vpop.f32.mrf.mxu1  ;;  %v5721_v11 = vpop.f32.mrf.mxu0 }
 0x1a3   : > { %v2280_v38 = vadd.f32 %v4127_v33, %v5579_v28 }
 0x1a4   : > { %v4129_v10 = vpop.f32.mrf.mxu1  ;;  %v5723_v1 = vpop.f32.mrf.mxu0 }
 0x1a5   : > { %v4130_v18 = vadd.f32 %v4129_v10, %v4128_v2  ;;  %6100 = vst [vmem:[#allocation5_spill] sm:$0xff] %v5723_v1  ;;  %v5725_v5 = vadd.f32 %v4433_v56, %v2280_v38 }
 0x1a6   : > { %v4131_v46 = vpop.f32.mrf.mxu1  ;;  %v5728_v14 = vpop.f32.mrf.mxu0 }
 0x1a7   : > { %v2283_v16 = vadd.f32 %v4130_v18, %v5587_v30 }
 0x1a8   : > { %v4132_v47 = vpop.f32.mrf.mxu1  ;;  %v5730_v9 = vpop.f32.mrf.mxu0 }
 0x1a9   : > { %v4133_v45 = vadd.f32 %v4132_v47, %v4131_v46  ;;  %6101 = vst [vmem:[#allocation6_spill] sm:$0xff] %v5730_v9  ;;  %v5732_v39 = vadd.f32 %v4434_v17, %v2283_v16 }
 0x1aa   : > { %v4134_v28 = vpop.f32.mrf.mxu1  ;;  %v5735_v51 = vpop.f32.mrf.mxu0 }
 0x1ab   : > { %v2288_v44 = vadd.f32 %v4133_v45, %v5601_v50 }
 0x1ac   : > { %v4135_v33 = vpop.f32.mrf.mxu1  ;;  %v5737_v56 = vpop.f32.mrf.mxu0 }
 0x1ad   : > { %v4136_v2 = vadd.f32 %v4135_v33, %v4134_v28  ;;  %6102 = vst [vmem:[#allocation7_spill] sm:$0xff] %v5737_v56  ;;  %v5739_v38 = vadd.f32 %v2448_v61, %v2288_v44 }
 0x1ae   : > { %v4137_v30 = vpop.f32.mrf.mxu1  ;;  %v5742_v18 = vpop.f32.mrf.mxu0 }
 0x1af   : > { %v2291_v10 = vadd.f32 %v4136_v2, %v5610_v36 }
 0x1b0   : > { %v4138_v46 = vpop.f32.mrf.mxu1  ;;  %v5744_v17 = vpop.f32.mrf.mxu0 }
 0x1b1   : > { %v4139_v47 = vadd.f32 %v4138_v46, %v4137_v30  ;;  %6103 = vst [vmem:[#allocation8_spill] sm:$0xff] %v5744_v17  ;;  %v5746_v16 = vadd.f32 %v2451_v20, %v2291_v10 }
 0x1b2   : > { %v4140_v50 = vpop.f32.mrf.mxu1  ;;  %v5749_v13 = vpop.f32.mrf.mxu0 }
 0x1b3   : > { %v2296_v45 = vadd.f32 %v4139_v47, %v5597_v35  ;;  %6104 = vst [vmem:[#allocation9_spill] sm:$0xff] %v5749_v13 }
 0x1b4   : > { %v4141_v28 = vpop.f32.mrf.mxu1  ;;  %v5751_v61 = vpop.f32.mrf.mxu0 }
 0x1b5   : > { %v4142_v33 = vadd.f32 %v4141_v28, %v4140_v50  ;;  %6105 = vst [vmem:[#allocation10_spill] sm:$0xff] %v5751_v61  ;;  %v5754_v44 = vadd.f32 %v5680_v24, %v2296_v45 }
 0x1b6   : > { %v4143_v36 = vpop.f32.mrf.mxu1  ;;  %v5757_v30 = vpop.f32.mrf.mxu0 }
 0x1b7   : > { %v2299_v2 = vadd.f32 %v4142_v33, %v5604_v55  ;;  %6106 = vst [vmem:[#allocation11_spill] sm:$0xff] %v5757_v30 }
 0x1b8   : > { %v4144_v46 = vpop.f32.mrf.mxu1  ;;  %v4243_v10 = vpop.f32.mrf.mxu0 }
 0x1b9   : > { %v4145_v20 = vadd.f32 %v4144_v46, %v4143_v36  ;;  %v5760_v17 = vadd.f32 %v5685_v37, %v2299_v2 }
 0x1ba   : > { %v4146_v35 = vpop.f32.mrf.mxu1  ;;  %v4244_v50 = vpop.f32.mrf.mxu0 }
 0x1bb   : > { %v2304_v47 = vadd.f32 %v4145_v20, %v5621_v53  ;;  %v5763_v61 = vadd.f32 %v4244_v50, %v4243_v10 }
 0x1bc   : > { %v4147_v28 = vpop.f32.mrf.mxu1  ;;  %v4246_v45 = vpop.f32.mrf.mxu0 }
 0x1bd   : > { %v4148_v24 = vadd.f32 %v4147_v28, %v4146_v35  ;;  %v5766_v13 = vadd.f32 %v5693_v32, %v2304_v47 }
 0x1be   : > { %v4149_v55 = vpop.f32.mrf.mxu1  ;;  %v4247_v36 = vpop.f32.mrf.mxu0 }
 0x1bf   : > { %v2307_v33 = vadd.f32 %v4148_v24, %v5627_v21  ;;  %v5769_v30 = vadd.f32 %v4247_v36, %v4246_v45 }
 0x1c0   : > { %v4150_v46 = vpop.f32.mrf.mxu1  ;;  %v5771_v2 = vpop.f32.mrf.mxu0 }
 0x1c1   : > { %v4151_v37 = vadd.f32 %v4150_v46, %v4149_v55  ;;  %v5774_v53 = vadd.f32 %v5700_v29, %v2307_v33 }
 0x1c2   : > { %v4152_v20 = vpop.f32.mrf.mxu1  ;;  %v5777_v35 = vpop.f32.mrf.mxu0 }
 0x1c3   : > { %v2312_v10 = vadd.f32 %v4151_v37, %v5618_v6 }
 0x1c4   : > { %v4153_v32 = vpop.f32.mrf.mxu1  ;;  %v5779_v50 = vpop.f32.mrf.mxu0 }
 0x1c5   : > { %v4154_v47 = vadd.f32 %v4153_v32, %v4152_v20  ;;  %v5782_v21 = vadd.f32 %v5690_v19, %v2312_v10 }
 0x1c6   : > { %v4155_v28 = vpop.f32.mrf.mxu1  ;;  %v5785_v45 = vpop.f32.mrf.mxu0 }
 0x1c7   : > { %v2315_v24 = vadd.f32 %v4154_v47, %v5624_v34 }
 0x1c8   : > { %v4156_v55 = vpop.f32.mrf.mxu1  ;;  %v5787_v33 = vpop.f32.mrf.mxu0 }
 0x1c9   : > { %v4157_v29 = vadd.f32 %v4156_v55, %v4155_v28  ;;  %v5790_v6 = vadd.f32 %v5695_v49, %v2315_v24 }
 0x1ca   : > { %v4158_v36 = vpop.f32.mrf.mxu1  ;;  %v5793_v37 = vpop.f32.mrf.mxu0 }
 0x1cb   : > { %v2320_v46 = vadd.f32 %v4157_v29, %v5638_v25 }
 0x1cc   : > { %v4159_v20 = vpop.f32.mrf.mxu1  ;;  %v5795_v10 = vpop.f32.mrf.mxu0 }
 0x1cd   : > { %v4160_v19 = vadd.f32 %v4159_v20, %v4158_v36  ;;  %v5798_v34 = vadd.f32 %v5707_v8, %v2320_v46 }
 0x1ce   : > { %v4161_v32 = vpop.f32.mrf.mxu1  ;;  %v5801_v28 = vpop.f32.mrf.mxu0 }
 0x1cf   : > { %6107 = vst [vmem:[#allocation12_spill] sm:$0xff] %v5798_v34  ;;  %v2323_v47 = vadd.f32 %v4160_v19, %v5642_v42 }
 0x1d0   : > { %v4162_v55 = vpop.f32.mrf.mxu1  ;;  %v5803_v24 = vpop.f32.mrf.mxu0 }
 0x1d1   : > { %v4163_v49 = vadd.f32 %v4162_v55, %v4161_v32  ;;  %v5806_v25 = vadd.f32 %v5714_v3, %v2323_v47 }
 0x1d2   : > { %v4164_v29 = vpop.f32.mrf.mxu1  ;;  %v5809_v20 = vpop.f32.mrf.mxu0 }
 0x1d3   : > { %6108 = vst [vmem:[#allocation13_spill] sm:$0xff] %v5806_v25  ;;  %v2328_v36 = vadd.f32 %v4163_v49, %v5635_v43 }
 0x1d4   : > { %v4165_v56 = vpop.f32.mrf.mxu1  ;;  %v5811_v46 = vpop.f32.mrf.mxu0 }
 0x1d5   : > { %v4166_v8 = vadd.f32 %v4165_v56, %v4164_v29  ;;  %v5814_v42 = vadd.f32 %v5702_v15, %v2328_v36 }
 0x1d6   : > { %v4167_v19 = vpop.f32.mrf.mxu1  ;;  %v5817_v55 = vpop.f32.mrf.mxu0 }
 0x1d7   : > { %6109 = vst [vmem:[#allocation14_spill] sm:$0xff] %v5814_v42  ;;  %v2331_v32 = vadd.f32 %v4166_v8, %v5640_v4 }
 0x1d8   : > { %v4168_v9 = vpop.f32.mrf.mxu1  ;;  %v5819_v47 = vpop.f32.mrf.mxu0 }
 0x1d9   : > { %v4169_v3 = vadd.f32 %v4168_v9, %v4167_v19  ;;  %v5822_v43 = vadd.f32 %v5709_v26, %v2331_v32 }
 0x1da   : > { %v4170_v49 = vpop.f32.mrf.mxu1  ;;  %v5825_v29 = vpop.f32.mrf.mxu0 }
 0x1db   : > { %6110 = vst [vmem:[#allocation15_spill] sm:$0xff] %v5822_v43  ;;  %v2336_v56 = vadd.f32 %v4169_v3, %v5645_v12 }
 0x1dc   : > { %v4171_v1 = vpop.f32.mrf.mxu1  ;;  %v5827_v36 = vpop.f32.mrf.mxu0 }
 0x1dd   : > { %v4172_v15 = vadd.f32 %v4171_v1, %v4170_v49  ;;  %v5830_v4 = vadd.f32 %v5721_v11, %v2336_v56 }
 0x1de   : > { %v4173_v8 = vpop.f32.mrf.mxu1  ;;  %v5833_v19 = vpop.f32.mrf.mxu0 }
 0x1df   : > { %6111 = vst [vmem:[#allocation16_spill] sm:$0xff] %v5830_v4  ;;  %v2339_v9 = vadd.f32 %v4172_v15, %v5647_v58 }
 0x1e0   : > { %v4174_v60 = vpop.f32.mrf.mxu1  ;;  %v5835_v32 = vpop.f32.mrf.mxu0 }
 0x1e1   : > { %v4175_v26 = vadd.f32 %v4174_v60, %v4173_v8  ;;  %v5838_v12 = vadd.f32 %v5728_v14, %v2339_v9 }
 0x1e2   : > { %v4176_v3 = vpop.f32.mrf.mxu1  ;;  %v5843_v49 = vpop.f32.mrf.mxu0 }
 0x1e3   : > { %6112 = vst [vmem:[#allocation17_spill] sm:$0xff] %v5838_v12  ;;  %v5841_v1 = vadd.f32 %v4175_v26, %v5649_v41 }
 0x1e4   : > { %v4177_v11 = vpop.f32.mrf.mxu1  ;;  %v5845_v4 = vpop.f32.mrf.mxu0 }
 0x1e5   : > { %6113 = vst [vmem:[#allocation18_spill] sm:$0xff] %v5841_v1  ;;  %v4178_v56 = vadd.f32 %v4177_v11, %v4176_v3 }
 0x1e6   : > { %v4179_v58 = vpop.f32.mrf.mxu1  ;;  %v5850_v60 = vpop.f32.mrf.mxu0 }
 0x1e7   : > { %v5848_v15 = vadd.f32 %v4178_v56, %v5659_v7 }
 0x1e8   : > { %v4180_v8 = vpop.f32.mrf.mxu1  ;;  %v5852_v14 = vpop.f32.mrf.mxu0 }
 0x1e9   : > { %6114 = vst [vmem:[#allocation19_spill] sm:$0xff] %v5848_v15  ;;  %v4181_v25 = vadd.f32 %v4180_v8, %v4179_v58 }
 0x1ea   : > { %v4182_v9 = vpop.f32.mrf.mxu1  ;;  %v5855_v26 = vpop.f32.mrf.mxu0 }
 0x1eb   : > { %v2352_v41 = vadd.f32 %v4181_v25, %v5657_v57 }
 0x1ec   : > { %v4183_v12 = vpop.f32.mrf.mxu1  ;;  %v5857_v3 = vpop.f32.mrf.mxu0 }
 0x1ed   : > { %v4184_v1 = vadd.f32 %v4183_v12, %v4182_v9  ;;  %v5860_v11 = vadd.f32 %v5735_v51, %v2352_v41 }
 0x1ee   : > { %v4185_v7 = vpop.f32.mrf.mxu1  ;;  %v5863_v15 = vpop.f32.mrf.mxu0 }
 0x1ef   : > { %6115 = vst [vmem:[#allocation20_spill] sm:$0xff] %v5860_v11  ;;  %v2355_v56 = vadd.f32 %v4184_v1, %v5666_v59 }
 0x1f0   : > { %v4186_v58 = vpop.f32.mrf.mxu1  ;;  %v5865_v43 = vpop.f32.mrf.mxu0 }
 0x1f1   : > { %v4187_v8 = vadd.f32 %v4186_v58, %v4185_v7  ;;  %v5868_v57 = vadd.f32 %v5742_v18, %v2355_v56 }
 0x1f2   : > { %v4188_v25 = vpop.f32.mrf.mxu1  ;;  %v5873_v9 = vpop.f32.mrf.mxu0 }
 0x1f3   : > { %6116 = vst [vmem:[#allocation21_spill] sm:$0xff] %v5868_v57  ;;  %v5871_v12 = vadd.f32 %v4187_v8, %v5652_v63 }
 0x1f4   : > { %v4189_v51 = vpop.f32.mrf.mxu1  ;;  %v5875_v11 = vpop.f32.mrf.mxu0 }
 0x1f5   : > { %6117 = vst [vmem:[#allocation22_spill] sm:$0xff] %v5871_v12  ;;  %v4190_v41 = vadd.f32 %v4189_v51, %v4188_v25 }
 0x1f6   : > { %v4191_v59 = vpop.f32.mrf.mxu1  ;;  %v5880_v7 = vpop.f32.mrf.mxu0 }
 0x1f7   : > { %v5878_v1 = vadd.f32 %v4190_v41, %v5662_v0 }
 0x1f8   : > { %v4192_v58 = vpop.f32.mrf.mxu1  ;;  %v5882_v18 = vpop.f32.mrf.mxu0 }
 0x1f9   : > { %6118 = vst [vmem:[#allocation23_spill] sm:$0xff] %v5878_v1  ;;  %v4193_v42 = vadd.f32 %v4192_v58, %v4191_v59 }
 0x1fa   : > { %v4194_v56 = vpop.f32.mrf.mxu1  ;;  %v5887_v8 = vpop.f32.mrf.mxu0 }
 0x1fb   : > { %v5885_v63 = vadd.f32 %v4193_v42, %v5672_v54 }
 0x1fc   : > { %v4195_v57 = vpop.f32.mrf.mxu1  ;;  %v5889_v51 = vpop.f32.mrf.mxu0 }
 0x1fd   : > { %6119 = vst [vmem:[#allocation24_spill] sm:$0xff] %v5885_v63  ;;  %v4196_v25 = vadd.f32 %v4195_v57, %v4194_v56  ;;  %6120 = vst [vmem:[#allocation25_spill] sm:$0xff] %v5889_v51 }
 0x1fe   : > { %v4197_v12 = vpop.f32.mrf.mxu1  ;;  %v5894_v41 = vpop.f32.mrf.mxu0 }
 0x1ff   : > { %v5892_v0 = vadd.f32 %v4196_v25, %v5678_v22  ;;  %6122 = vst [vmem:[#allocation27_spill] sm:$0xff] %v5894_v41  ;;  %v4251_v22 = vadd.f32 %v5777_v35, %v5771_v2 }
 0x200   : > { %v4198_v1 = vpop.f32.mrf.mxu1  ;;  %v5896_v58 = vpop.f32.mrf.mxu0 }
 0x201   : > { %6121 = vst [vmem:[#allocation26_spill] sm:$0xff] %v5892_v0  ;;  %v4199_v59 = vadd.f32 %v4198_v1, %v4197_v12  ;;  %v4254_v1 = vadd.f32 %v5785_v45, %v5779_v50 }
 0x202   : > { %v5898_v34 = vpop.f32.mrf.mxu1  ;;  %v5903_v42 = vpop.f32.mrf.mxu0 }
 0x203   : > { %6123 = vst [vmem:[#allocation28_spill] sm:$0xff] %v5898_v34  ;;  %v5901_v54 = vadd.f32 %v4199_v59, %v5669_v62 }
 0x204   : > { %v5905_v57 = vpop.f32.mrf.mxu1  ;;  %v5907_v56 = vpop.f32.mrf.mxu0 }
 0x205   : > { %6124 = vst [vmem:[#allocation29_spill] sm:$0xff] %v5901_v54  ;;  %6125 = vst [vmem:[#allocation30_spill] sm:$0xff] %v5905_v57 }
 0x206   : > { %6126 = vst [vmem:[#allocation31_spill] sm:$0xff] %v5907_v56  ;;  %v4477_v63 = vpop.f32.mrf.mxu1  ;;  %v5911_v25 = vpop.f32.mrf.mxu0 }
 0x207   : > { %6127 = vst [vmem:[#allocation32_spill] sm:$0xff] %v5911_v25  ;;  %v3012_v0 = vadd.f32 %v4477_v63, %v4251_v22 }
 0x208   : > { %v3003_v12 = vpop.f32.mrf.mxu1  ;;  %v5916_v59 = vpop.f32.mrf.mxu0 }
 0x209   : > { %v3004_v62 = vadd.f32 %v5763_v61, %v3003_v12  ;;  %v3132_v2 = vadd.f32 %v3012_v0, %v5697_v52  ;;  %v4263_v61 = vadd.f32 %v5809_v20, %v5803_v24 }
 0x20a   : > { %v4478_v54 = vpop.f32.mrf.mxu1  ;;  %v5919_v41 = vpop.f32.mrf.mxu0 }
 0x20b   : > { %v3130_v57 = vadd.f32 %v3004_v62, %v5683_v40  ;;  %v3015_v34 = vadd.f32 %v4478_v54, %v4254_v1  ;;  %v3201_v12 = vmul.f32 %v3132_v2, %v3132_v2 }
 0x20c   : > { %v3006_v51 = vpop.f32.mrf.mxu1  ;;  %v5924_v56 = vpop.f32.mrf.mxu0 }
 0x20d   : > { %v3133_v35 = vadd.f32 %v3015_v34, %v5704_v31  ;;  %v3007_v25 = vadd.f32 %v5769_v30, %v3006_v51  ;;  %v4257_v31 = vadd.f32 %v5793_v37, %v5787_v33  ;;  %v4266_v30 = vadd.f32 %v5817_v55, %v5811_v46 }
 0x20e   : > { %v4481_v40 = vpop.f32.mrf.mxu1  ;;  %v5936_v45 = vpop.f32.mrf.mxu0  ;;  %v3199_v20 = vmul.f32 %v3130_v57, %v3130_v57 }
 0x20f   : > { %v3853_v50 = vpack.c.bf16 %v3133_v35, %v3132_v2  ;;  %v3131_v52 = vadd.f32 %v3007_v25, %v5688_v27  ;;  %v3028_v34 = vadd.f32 %v4481_v40, %v4263_v61  ;;  %v4260_v27 = vadd.f32 %v5801_v28, %v5795_v10 }
 0x210   : > { %v3019_v24 = vpop.f32.mrf.mxu1  ;;  %v5943_v54 = vpop.f32.mrf.mxu0  ;;  %v3202_v55 = vmul.f32 %v3133_v35, %v3133_v35 }
 0x211   : > { %3940 = vst [vmem:[%s5933_s16 + $0x8] sm:$0xff] %v3853_v50   ;;  %v3162_v63 = vadd.f32 %v3131_v52, %v3130_v57  ;;  %v3200_v51 = vmul.f32 %v3131_v52, %v3131_v52  ;;  %v3848_v0 = vpack.c.bf16 %v3131_v52, %v3130_v57  ;;  %v3020_v22 = vadd.f32 %v4257_v31, %v3019_v24 }
 0x212   : > { %v4482_v25 = vpop.f32.mrf.mxu1  ;;  %v5948_v46 = vpop.f32.mrf.mxu0  ;;  %v3136_v62 = vadd.f32 %v3028_v34, %v5725_v5  ;;  %v4275_v31 = vadd.f32 %v5843_v49, %v5835_v32 }
 0x213   : > { %v3163_v33 = vadd.f32 %v3162_v63, %v3132_v2  ;;  %v3231_v37 = vadd.f32 %v3200_v51, %v3199_v20  ;;  %3849 = vst [vmem:[%s5933_s16] sm:$0xff] %v3848_v0   ;;  %v3031_v1 = vadd.f32 %v4482_v25, %v4266_v30  ;;  %v3134_v61 = vadd.f32 %v3020_v22, %v5711_v23 }
 0x214   : > { %v3022_v57 = vpop.f32.mrf.mxu1  ;;  %v5953_v52 = vpop.f32.mrf.mxu0  ;;  %v4269_v2 = vadd.f32 %v5825_v29, %v5819_v47  ;;  %v4272_v25 = vadd.f32 %v5833_v19, %v5827_v36 }
 0x215   : > { %v3232_v40 = vadd.f32 %v3231_v37, %v3201_v12  ;;  %v3164_v50 = vadd.f32 %v3163_v33, %v3133_v35  ;;  %v3137_v10 = vadd.f32 %v3031_v1, %v5732_v39  ;;  %v3023_v28 = vadd.f32 %v4260_v27, %v3022_v57 }
 0x216   : > { %v4485_v30 = vpop.f32.mrf.mxu1  ;;  %v3203_v5 = vmul.f32 %v3134_v61, %v3134_v61  ;;  %v5959_v20 = vpop.f32.mrf.mxu0  ;;  %v4278_v39 = vadd.f32 %v5850_v60, %v5845_v4  ;;  %v3205_v33 = vmul.f32 %v3136_v62, %v3136_v62 }
 0x217   : > { %v3165_v24 = vadd.f32 %v3164_v50, %v3134_v61  ;;  %v3233_v34 = vadd.f32 %v3232_v40, %v3202_v55  ;;  %v3863_v23 = vpack.c.bf16 %v3137_v10, %v3136_v62  ;;  %v3135_v35 = vadd.f32 %v3023_v28, %v5718_v48 }
 0x218   : > { %v3035_v63 = vpop.f32.mrf.mxu1  ;;  %v3044_v47 = vadd.f32 %v4485_v30, %v4275_v31  ;;  %v5965_v0 = vpop.f32.mrf.mxu0  ;;  %v3206_v50 = vmul.f32 %v3137_v10, %v3137_v10 }
 0x219   : > { %v3234_v51 = vadd.f32 %v3233_v34, %v3203_v5  ;;  %3942 = vst [vmem:[%s5933_s16 + $0x18] sm:$0xff] %v3863_v23   ;;  %v3036_v29 = vadd.f32 %v4269_v2, %v3035_v63  ;;  %v3166_v32 = vadd.f32 %v3165_v24, %v3135_v35  ;;  %v3204_v49 = vmul.f32 %v3135_v35, %v3135_v35 }
 0x21a   : > { %v3858_v27 = vpack.c.bf16 %v3135_v35, %v3134_v61  ;;  %v4486_v22 = vpop.f32.mrf.mxu1  ;;  %v5969_v48 = vpop.f32.mrf.mxu0  ;;  %v3140_v55 = vadd.f32 %v3044_v47, %v5754_v44  ;;  %v4287_v2 = vadd.f32 %v5873_v9, %v5865_v43  ;;  %v4284_v63 = vadd.f32 %v5863_v15, %v5857_v3 }
 0x21b   : > { %v3047_v12 = vadd.f32 %v4486_v22, %v4278_v39  ;;  %v3167_v37 = vadd.f32 %v3166_v32, %v3136_v62  ;;  %v3235_v4 = vadd.f32 %v3234_v51, %v3204_v49  ;;  %v3138_v60 = vadd.f32 %v3036_v29, %v5739_v38 }
 0x21c   : > { %3941 = vst [vmem:[%s5933_s16 + $0x10] sm:$0xff] %v3858_v27   ;;  %v3038_v1 = vpop.f32.mrf.mxu1  ;;  %v5975_v61 = vpop.f32.mrf.mxu0  ;;  %v4281_v62 = vadd.f32 %v5855_v26, %v5852_v14 }
 0x21d   : > { %v3141_v57 = vadd.f32 %v3047_v12, %v5760_v17  ;;  %v3039_v40 = vadd.f32 %v4272_v25, %v3038_v1  ;;  %v3236_v36 = vadd.f32 %v3235_v4, %v3205_v33  ;;  %v3168_v19 = vadd.f32 %v3167_v37, %v3137_v10  ;;  %v6129_v1 = vld [vmem:[#allocation32_spill] sm:$0xff] }
 0x21e   : > { %v4489_v28 = vpop.f32.mrf.mxu1  ;;  %v5982_v44 = vpop.f32.mrf.mxu0  ;;  %v4290_v17 = vadd.f32 %v5880_v7, %v5875_v11  ;;  %v3207_v24 = vmul.f32 %v3138_v60, %v3138_v60  ;;  %v3209_v7 = vmul.f32 %v3140_v55, %v3140_v55  ;;  %v4293_v37 = vadd.f32 %v5887_v8, %v5882_v18 }
 0x21f   : > { %v3873_v38 = vpack.c.bf16 %v3141_v57, %v3140_v55  ;;  %v3139_v31 = vadd.f32 %v3039_v40, %v5746_v16  ;;  %v3169_v30 = vadd.f32 %v3168_v19, %v3138_v60  ;;  %v3237_v5 = vadd.f32 %v3236_v36, %v3206_v50 }
 0x220   : > { %v3051_v10 = vpop.f32.mrf.mxu1  ;;  %v3060_v14 = vadd.f32 %v4489_v28, %v4287_v2  ;;  %v5987_v35 = vpop.f32.mrf.mxu0  ;;  %v3210_v12 = vmul.f32 %v3141_v57, %v3141_v57  ;;  %v4299_v4 = vadd.f32 %v5903_v42, %v5896_v58  ;;  %v6130_v2 = vld [vmem:[#allocation25_spill] sm:$0xff] }
 0x221   : > { %3944 = vst [vmem:[%s5933_s16 + $0x28] sm:$0xff] %v3873_v38   ;;  %v3208_v34 = vmul.f32 %v3139_v31, %v3139_v31  ;;  %v3868_v23 = vpack.c.bf16 %v3139_v31, %v3138_v60  ;;  %v3052_v26 = vadd.f32 %v4281_v62, %v3051_v10  ;;  %v3238_v43 = vadd.f32 %v3237_v5, %v3207_v24  ;;  %v6131_v38 = vld [vmem:[#allocation27_spill] sm:$0xff] }
 0x222   : > { %v3170_v9 = vadd.f32 %v3169_v30, %v3139_v31  ;;  %v4490_v16 = vpop.f32.mrf.mxu1  ;;  %v5992_v11 = vpop.f32.mrf.mxu0  ;;  %v3144_v49 = vadd.f32 %v3060_v14, %v5782_v21  ;;  %v4296_v31 = vadd.f32 %v6131_v38, %v6130_v2 }
 0x223   : > { %3943 = vst [vmem:[%s5933_s16 + $0x20] sm:$0xff] %v3868_v23   ;;  %v3063_v39 = vadd.f32 %v4490_v16, %v4290_v17  ;;  %v3239_v47 = vadd.f32 %v3238_v43, %v3208_v34  ;;  %v3142_v29 = vadd.f32 %v3052_v26, %v5766_v13  ;;  %v6132_v34 = vld [vmem:[#allocation12_spill] sm:$0xff]  ;;  %v6133_v26 = vld [vmem:[#allocation14_spill] sm:$0xff] }
 0x224   : > { %v3171_v51 = vadd.f32 %v3170_v9, %v3140_v55  ;;  %v3054_v32 = vpop.f32.mrf.mxu1  ;;  %v5997_v25 = vpop.f32.mrf.mxu0  ;;  %v3213_v24 = vmul.f32 %v3144_v49, %v3144_v49  ;;  %v6134_v9 = vld [vmem:[#allocation15_spill] sm:$0xff] }
 0x225   : > { %v3145_v27 = vadd.f32 %v3063_v39, %v5790_v6  ;;  %v3055_v22 = vadd.f32 %v4284_v63, %v3054_v32  ;;  %v3240_v15 = vadd.f32 %v3239_v47, %v3209_v7  ;;  %v6128_v6 = vld [vmem:[#allocation31_spill] sm:$0xff]  ;;  %v3211_v50 = vmul.f32 %v3142_v29, %v3142_v29 }
 0x226   : > { %v3172_v3 = vadd.f32 %v3171_v51, %v3141_v57  ;;  %v4493_v33 = vpop.f32.mrf.mxu1  ;;  %v6004_v21 = vpop.f32.mrf.mxu0  ;;  %v4302_v55 = vadd.f32 %v6129_v1, %v6128_v6  ;;  %v4305_v32 = vadd.f32 %v5919_v41, %v5916_v59 }
 0x227   : > { %v3883_v13 = vpack.c.bf16 %v3145_v27, %v3144_v49  ;;  %v3143_v60 = vadd.f32 %v3055_v22, %v5774_v53  ;;  %v3241_v36 = vadd.f32 %v3240_v15, %v3210_v12  ;;  %v3076_v18 = vadd.f32 %v4493_v33, %v4299_v4  ;;  %v6135_v12 = vld [vmem:[#allocation13_spill] sm:$0xff] }
 0x228   : > { %v3173_v40 = vadd.f32 %v3172_v3, %v3142_v29  ;;  %v3067_v57 = vpop.f32.mrf.mxu1  ;;  %v6009_v62 = vpop.f32.mrf.mxu0  ;;  %v3214_v7 = vmul.f32 %v3145_v27, %v3145_v27  ;;  %v4314_v33 = vadd.f32 %v5959_v20, %v5953_v52  ;;  %v6138_v20 = vld [vmem:[#allocation19_spill] sm:$0xff] }
 0x229   : > { %3946 = vst [vmem:[%s5933_s16 + $0x38] sm:$0xff] %v3883_v13   ;;  %v3212_v19 = vmul.f32 %v3143_v60, %v3143_v60  ;;  %v3878_v28 = vpack.c.bf16 %v3143_v60, %v3142_v29  ;;  %v3068_v8 = vadd.f32 %v4293_v37, %v3067_v57  ;;  %v3242_v58 = vadd.f32 %v3241_v36, %v3211_v50  ;;  %v6136_v50 = vld [vmem:[#allocation18_spill] sm:$0xff]  ;;  %v6137_v36 = vld [vmem:[#allocation4_spill] sm:$0xff]  ;;  %v6139_v57 = vld [vmem:[#allocation5_spill] sm:$0xff] }
 0x22a   : > { %v3174_v42 = vadd.f32 %v3173_v40, %v3143_v60  ;;  %v4494_v53 = vpop.f32.mrf.mxu1  ;;  %v6014_v30 = vpop.f32.mrf.mxu0  ;;  %v3148_v43 = vadd.f32 %v3076_v18, %v6133_v26  ;;  %v4308_v40 = vadd.f32 %v5936_v45, %v5924_v56  ;;  %v2505_v52 = vadd.f32 %v6137_v36, %v6136_v50  ;;  %v6141_v26 = vld [vmem:[#allocation17_spill] sm:$0xff] }
 0x22b   : > { %3945 = vst [vmem:[%s5933_s16 + $0x30] sm:$0xff] %v3878_v28   ;;  %v3079_v17 = vadd.f32 %v4494_v53, %v4302_v55  ;;  %v3243_v10 = vadd.f32 %v3242_v58, %v3212_v19  ;;  %v3146_v23 = vadd.f32 %v3068_v8, %v6132_v34  ;;  %v2508_v19 = vadd.f32 %v6139_v57, %v6138_v20 }
 0x22c   : > { %v3175_v5 = vadd.f32 %v3174_v42, %v3144_v49  ;;  %v3070_v14 = vpop.f32.mrf.mxu1  ;;  %v6019_v39 = vpop.f32.mrf.mxu0  ;;  %v4311_v49 = vadd.f32 %v5948_v46, %v5943_v54  ;;  %v3217_v18 = vmul.f32 %v3148_v43, %v3148_v43  ;;  %v6140_v42 = vld [vmem:[#allocation16_spill] sm:$0xff]  ;;  %v4317_v34 = vadd.f32 %v5969_v48, %v5965_v0 }
 0x22d   : > { %v3149_v16 = vadd.f32 %v3079_v17, %v6134_v9  ;;  %v3071_v63 = vadd.f32 %v4296_v31, %v3070_v14  ;;  %v3244_v51 = vadd.f32 %v3243_v10, %v3213_v24  ;;  %v3215_v4 = vmul.f32 %v3146_v23, %v3146_v23  ;;  %v6142_v48 = vld [vmem:[#allocation28_spill] sm:$0xff] }
 0x22e   : > { %v3176_v47 = vadd.f32 %v3175_v5, %v3145_v27  ;;  %v4497_v29 = vpop.f32.mrf.mxu1  ;;  %v6026_v3 = vpop.f32.mrf.mxu0 }
 0x22f   : > { %v3893_v22 = vpack.c.bf16 %v3149_v16, %v3148_v43  ;;  %v3147_v15 = vadd.f32 %v3071_v63, %v6135_v12  ;;  %v3245_v13 = vadd.f32 %v3244_v51, %v3214_v7  ;;  %v3092_v41 = vadd.f32 %v4497_v29, %v4311_v49 }
 0x230   : > { %v3177_v37 = vadd.f32 %v3176_v47, %v3146_v23  ;;  %v3083_v27 = vpop.f32.mrf.mxu1  ;;  %v4333_v1 = vpop.f32.mrf.mxu0  ;;  %v3218_v56 = vmul.f32 %v3149_v16, %v3149_v16  ;;  %v4326_v51 = vadd.f32 %v6004_v21, %v5997_v25  ;;  %v6146_v21 = vld [vmem:[#allocation23_spill] sm:$0xff] }
 0x231   : > { %3948 = vst [vmem:[%s5933_s16 + $0x48] sm:$0xff] %v3893_v22   ;;  %v3216_v60 = vmul.f32 %v3147_v15, %v3147_v15  ;;  %v3888_v6 = vpack.c.bf16 %v3147_v15, %v3146_v23  ;;  %v3084_v59 = vadd.f32 %v4305_v32, %v3083_v27  ;;  %v3246_v54 = vadd.f32 %v3245_v13, %v3215_v4  ;;  %v6143_v22 = vld [vmem:[#allocation30_spill] sm:$0xff]  ;;  %v6147_v13 = vld [vmem:[#allocation7_spill] sm:$0xff] }
 0x232   : > { %v3178_v46 = vadd.f32 %v3177_v37, %v3147_v15  ;;  %v4498_v55 = vpop.f32.mrf.mxu1  ;;  %v4334_v38 = vpop.f32.mrf.mxu0  ;;  %v3152_v31 = vadd.f32 %v3092_v41, %v2505_v52  ;;  %v4323_v23 = vadd.f32 %v5992_v11, %v5987_v35  ;;  %v4202_v35 = vadd.f32 %v6143_v22, %v6142_v48  ;;  %v6144_v37 = vld [vmem:[#allocation22_spill] sm:$0xff] }
 0x233   : > { %3947 = vst [vmem:[%s5933_s16 + $0x40] sm:$0xff] %v3888_v6   ;;  %v3095_v28 = vadd.f32 %v4498_v55, %v4314_v33  ;;  %v3247_v58 = vadd.f32 %v3246_v54, %v3216_v60  ;;  %v3150_v53 = vadd.f32 %v3084_v59, %v6140_v42  ;;  %v4320_v33 = vadd.f32 %v5982_v44, %v5975_v61  ;;  %v6145_v4 = vld [vmem:[#allocation6_spill] sm:$0xff]  ;;  %v6148_v54 = vld [vmem:[#allocation20_spill] sm:$0xff]  ;;  %v6149_v44 = vld [vmem:[#allocation3_spill] sm:$0xff] }
 0x234   : > { %v3179_v8 = vadd.f32 %v3178_v46, %v3148_v43  ;;  %v3086_v2 = vpop.f32.mrf.mxu1  ;;  %v4336_v29 = vpop.f32.mrf.mxu0  ;;  %v2521_v25 = vadd.f32 %v6145_v4, %v6144_v37  ;;  %v2524_v27 = vadd.f32 %v6147_v13, %v6146_v21  ;;  %v3221_v6 = vmul.f32 %v3152_v31, %v3152_v31  ;;  %v6150_v42 = vld [vmem:[#allocation21_spill] sm:$0xff] }
 0x235   : > { %v3153_v17 = vadd.f32 %v3095_v28, %v2508_v19  ;;  %v3087_v24 = vadd.f32 %v4308_v40, %v3086_v2  ;;  %v3248_v45 = vadd.f32 %v3247_v58, %v3217_v18  ;;  %v3219_v63 = vmul.f32 %v3150_v53, %v3150_v53 }
 0x236   : > { %v3180_v5 = vadd.f32 %v3179_v8, %v3149_v16  ;;  %v4501_v10 = vpop.f32.mrf.mxu1  ;;  %v4337_v40 = vpop.f32.mrf.mxu0  ;;  %v4335_v61 = vadd.f32 %v4334_v38, %v4333_v1  ;;  %v2379_v20 = vadd.f32 %v4202_v35, %v6149_v44  ;;  %v4329_v8 = vadd.f32 %v6014_v30, %v6009_v62  ;;  %v6153_v30 = vld [vmem:[#allocation29_spill] sm:$0xff]  ;;  %v6156_v35 = vld [vmem:[#allocation26_spill] sm:$0xff] }
 0x237   : > { %v3903_v14 = vpack.c.bf16 %v3153_v17, %v3152_v31  ;;  %v3151_v43 = vadd.f32 %v3087_v24, %v6141_v26  ;;  %v3249_v7 = vadd.f32 %v3248_v45, %v3218_v56  ;;  %v3108_v49 = vadd.f32 %v4501_v10, %v4323_v23  ;;  %v6151_v23 = vld [vmem:[#allocation24_spill] sm:$0xff] }
 0x238   : > { %v3181_v9 = vadd.f32 %v3180_v5, %v3150_v53  ;;  %v3099_v47 = vpop.f32.mrf.mxu1  ;;  %v3222_v57 = vmul.f32 %v3153_v17, %v3153_v17  ;;  %v4338_v2 = vadd.f32 %v4337_v40, %v4336_v29 }
 0x239   : > { %3950 = vst [vmem:[%s5933_s16 + $0x58] sm:$0xff] %v3903_v14   ;;  %v3220_v16 = vmul.f32 %v3151_v43, %v3151_v43  ;;  %v3898_v32 = vpack.c.bf16 %v3151_v43, %v3150_v53  ;;  %v3100_v0 = vadd.f32 %v4317_v34, %v3099_v47  ;;  %v3250_v11 = vadd.f32 %v3249_v7, %v3219_v63  ;;  %v6152_v14 = vld [vmem:[#allocation9_spill] sm:$0xff]  ;;  %v6155_v63 = vld [vmem:[#allocation10_spill] sm:$0xff] }
 0x23a   : > { %v3182_v12 = vadd.f32 %v3181_v9, %v3151_v43  ;;  %v4502_v15 = vpop.f32.mrf.mxu1  ;;  %v3156_v50 = vadd.f32 %v3108_v49, %v2521_v25  ;;  %v2529_v26 = vadd.f32 %v6152_v14, %v6151_v23  ;;  %v6154_v43 = vld [vmem:[#allocation8_spill] sm:$0xff]  ;;  %v2540_v7 = vadd.f32 %v6155_v63, %v2379_v20 }
 0x23b   : > { %3949 = vst [vmem:[%s5933_s16 + $0x50] sm:$0xff] %v3898_v32   ;;  %v3111_v60 = vadd.f32 %v4502_v15, %v4326_v51  ;;  %v3251_v59 = vadd.f32 %v3250_v11, %v3220_v16  ;;  %v3154_v46 = vadd.f32 %v3100_v0, %v6148_v54  ;;  %v2537_v9 = vadd.f32 %v6154_v43, %v6153_v30  ;;  %v6157_v11 = vld [vmem:[#allocation11_spill] sm:$0xff] }
 0x23c   : > { %v3183_v41 = vadd.f32 %v3182_v12, %v3152_v31  ;;  %v3102_v55 = vpop.f32.mrf.mxu1  ;;  %v4332_v51 = vadd.f32 %v6026_v3, %v6019_v39  ;;  %v3225_v29 = vmul.f32 %v3156_v50, %v3156_v50  ;;  %v2532_v12 = vadd.f32 %v6157_v11, %v6156_v35 }
 0x23d   : > { %v3157_v36 = vadd.f32 %v3111_v60, %v2524_v27  ;;  %v3103_v52 = vadd.f32 %v4320_v33, %v3102_v55  ;;  %v3252_v19 = vadd.f32 %v3251_v59, %v3221_v6  ;;  %v3223_v24 = vmul.f32 %v3154_v46, %v3154_v46 }
 0x23e   : > { %v3184_v28 = vadd.f32 %v3183_v41, %v3153_v17  ;;  %v4505_v18 = vpop.f32.mrf.mxu1 }
 0x23f   : > { %v3913_v58 = vpack.c.bf16 %v3157_v36, %v3156_v50  ;;  %v3155_v53 = vadd.f32 %v3103_v52, %v6150_v42  ;;  %v3253_v56 = vadd.f32 %v3252_v19, %v3222_v57  ;;  %v3124_v5 = vadd.f32 %v4505_v18, %v4335_v61 }
 0x240   : > { %v3185_v31 = vadd.f32 %v3184_v28, %v3154_v46  ;;  %v3115_v45 = vpop.f32.mrf.mxu1  ;;  %v3226_v33 = vmul.f32 %v3157_v36, %v3157_v36 }
 0x241   : > { %3952 = vst [vmem:[%s5933_s16 + $0x68] sm:$0xff] %v3913_v58   ;;  %v3224_v1 = vmul.f32 %v3155_v53, %v3155_v53  ;;  %v3908_v38 = vpack.c.bf16 %v3155_v53, %v3154_v46  ;;  %v3116_v10 = vadd.f32 %v4329_v8, %v3115_v45  ;;  %v3254_v34 = vadd.f32 %v3253_v56, %v3223_v24 }
 0x242   : > { %v3186_v17 = vadd.f32 %v3185_v31, %v3155_v53  ;;  %v4506_v62 = vpop.f32.mrf.mxu1  ;;  %v3160_v48 = vadd.f32 %v3124_v5, %v2537_v9 }
 0x243   : > { %3951 = vst [vmem:[%s5933_s16 + $0x60] sm:$0xff] %v3908_v38   ;;  %v3127_v47 = vadd.f32 %v4506_v62, %v4338_v2  ;;  %v3255_v32 = vadd.f32 %v3254_v34, %v3224_v1  ;;  %v3158_v49 = vadd.f32 %v3116_v10, %v2529_v26 }
 0x244   : > { %v3187_v16 = vadd.f32 %v3186_v17, %v3156_v50  ;;  %v3118_v0 = vpop.f32.mrf.mxu1  ;;  %v3229_v59 = vmul.f32 %v3160_v48, %v3160_v48 }
 0x245   : > { %v3161_v22 = vadd.f32 %v3127_v47, %v2540_v7  ;;  %v3119_v15 = vadd.f32 %v4332_v51, %v3118_v0  ;;  %v3256_v37 = vadd.f32 %v3255_v32, %v3225_v29  ;;  %v3227_v21 = vmul.f32 %v3158_v49, %v3158_v49 }
 0x246   : > { %v3188_v4 = vadd.f32 %v3187_v16, %v3157_v36 }
 0x247   : > { %v3923_v25 = vpack.c.bf16 %v3161_v22, %v3160_v48  ;;  %v3159_v39 = vadd.f32 %v3119_v15, %v2532_v12  ;;  %v3257_v13 = vadd.f32 %v3256_v37, %v3226_v33  ;;  %v3230_v55 = vmul.f32 %v3161_v22, %v3161_v22 }
 0x248   : > { %v3189_v3 = vadd.f32 %v3188_v4, %v3158_v49 }
 0x249   : > { %3954 = vst [vmem:[%s5933_s16 + $0x78] sm:$0xff] %v3923_v25   ;;  %v3228_v27 = vmul.f32 %v3159_v39, %v3159_v39  ;;  %v3918_v60 = vpack.c.bf16 %v3159_v39, %v3158_v49  ;;  %v3258_v6 = vadd.f32 %v3257_v13, %v3227_v21 }
 0x24a   : > { %v3190_v41 = vadd.f32 %v3189_v3, %v3159_v39 }
 0x24b   : > { %3953 = vst [vmem:[%s5933_s16 + $0x70] sm:$0xff] %v3918_v60   ;;  %v3259_v46 = vadd.f32 %v3258_v6, %v3228_v27 }
 0x24c   : > { %v3191_v54 = vadd.f32 %v3190_v41, %v3160_v48 }
 0x24d   : > { %v3260_v50 = vadd.f32 %v3259_v46, %v3229_v59 }
 0x24e   : > { %v3192_v40 = vadd.f32 %v3191_v54, %v3161_v22 }
 0x24f   : > { %v3261_v36 = vadd.f32 %v3260_v50, %v3230_v55 }
 0x250   : > { %v3193_v52 = vrot.slane %v3192_v40, 4 }
 0x251   : > { %v3262_v44 = vrot.slane %v3261_v36, 4 }
 0x252   : > { %v3194_v61 = vadd.f32 %v3193_v52, %v3192_v40 }
 0x253   : > { %v3263_v57 = vadd.f32 %v3262_v44, %v3261_v36 }
 0x254   : > { %v3195_v20 = vrot.slane %v3194_v61, 2 }
 0x255   : > { %v3264_v28 = vrot.slane %v3263_v57, 2 }
 0x256   : > { %v3196_v19 = vadd.f32 %v3195_v20, %v3194_v61 }
 0x257   : > { %v3265_v8 = vadd.f32 %v3264_v28, %v3263_v57 }
 0x258   : > { %v3197_v18 = vrot.slane %v3196_v19, 1 }
 0x259   : > { %v3266_v58 = vrot.slane %v3265_v8, 1 }
 0x25a   : > { %v3198_v42 = vadd.f32 %v3197_v18, %v3196_v19 }
 0x25b   : > { %v3267_v53 = vadd.f32 %v3266_v58, %v3265_v8 }
 0x25d   : > { %v3269_v2 = vsel %vm434_vm0, %v3198_v42, %v3267_v53 }
 0x25e   : > { %v3271_v31 = vsel %vm3270_vm11, %v3269_v2, 0.0 }
 0x25f   : > { %v3273_v24 = vsel %vm3272_vm12, %v3271_v31, 0.0 }
 0x260   : > { %v3275_v56 = vsel %vm950_vm5, %v3273_v24, 0.0 }
 0x261   : > { %v3277_v45 = vsel %vm3276_vm13, %v3275_v56, 0.0 }
 0x262   : > { %v3279_v1 = vsel %vm3278_vm14, %v3277_v45, 0.0 }
 0x263   : > { %v3281_v38 = vsel %vm2543_vm10, %v3279_v1, 0.0 }
 0x264   : > { %3282 = vst [vmem:[%s235_s28] sm:$0xff] %v3281_v38 }
 0x265 PF: > { %s16_s18 = sadd.s32 1, %s4670_s18  }
 0x266   : > { %p13_p4 = scmp.ge.s32.totalorder %s16_s18, 4  }
 0x268   :  { %15 = sbr.rel (!%p13_p4) target bundleno = 1 (0x1), region = 80 }

</bundles_post_ra>
